<compile_context>
chip_gen: v7x
topology: tpu7x:2x2x1
jax: 0.10.0
libtpu: 0.0.40
codegen_flags: <defaults>
</compile_context>

<pallas_src>
import functools

import jax
import jax.numpy as jnp
from jax.experimental import pallas as pl
from jax.experimental.pallas import tpu as pltpu

EPS = 1e-6
NUM_GROUPS = 32
VMEM_LIMIT_BYTES = 64 * 1024 * 1024


def _pick_tile_h(h):
    """Row-tile height (must divide H). Multiples of 8 keep sublane alignment."""
    for th in (8, 16, 32):
        if h % th == 0:
            return th
    return h


# ----------------------------------------------------------------------------
# Kernel 1: tiled GroupNorm statistics (single pass: sum & sum of squares)
#   outputs per-sample, per-CHANNEL mean and rstd (group stats broadcast back to
#   channels via a one-hot matmul), shape (N, 1, C) f32.
# ----------------------------------------------------------------------------
def gn_stats_kernel(x_ref, m_ref, mean_ref, rstd_ref, sum_sc, sq_sc):
    t = pl.program_id(1)
    nt = pl.num_programs(1)
    _, TH, W, C = x_ref.shape
    G = m_ref.shape[1]
    cg = C // G

    @pl.when(t == 0)
    def _():
        sum_sc[...] = jnp.zeros_like(sum_sc)
        sq_sc[...] = jnp.zeros_like(sq_sc)

    x = x_ref[0].astype(jnp.float32).reshape(TH * W, C)
    sum_sc[...] += jnp.sum(x, axis=0, keepdims=True)
    sq_sc[...] += jnp.sum(x * x, axis=0, keepdims=True)

    @pl.when(t == nt - 1)
    def _():
        M = m_ref[...]                                  # (C, G) one-hot, f32
        cnt = TH * W * cg * nt
        inv_cnt = 1.0 / cnt
        sum_g = jnp.dot(sum_sc[...], M, preferred_element_type=jnp.float32)   # (1, G)
        sq_g = jnp.dot(sq_sc[...], M, preferred_element_type=jnp.float32)     # (1, G)
        mean_g = sum_g * inv_cnt
        var_g = sq_g * inv_cnt - mean_g * mean_g        # biased var (matches torch GN)
        rstd_g = jax.lax.rsqrt(var_g + EPS)
        mean_ref[0] = jnp.dot(mean_g, M.T, preferred_element_type=jnp.float32)  # (1, C)
        rstd_ref[0] = jnp.dot(rstd_g, M.T, preferred_element_type=jnp.float32)  # (1, C)


def _gn_stats(x, num_groups=NUM_GROUPS):
    N, H, W, C = x.shape
    G = num_groups
    cg = C // G
    TH = _pick_tile_h(H)
    T = H // TH
    M = (jnp.arange(C)[:, None] // cg == jnp.arange(G)[None, :]).astype(jnp.float32)
    mean, rstd = pl.pallas_call(
        gn_stats_kernel,
        out_shape=(jax.ShapeDtypeStruct((N, 1, C), jnp.float32),
                   jax.ShapeDtypeStruct((N, 1, C), jnp.float32)),
        grid=(N, T),
        in_specs=[pl.BlockSpec((1, TH, W, C), lambda n, t: (n, t, 0, 0)),
                  pl.BlockSpec((C, G), lambda n, t: (0, 0))],
        out_specs=(pl.BlockSpec((1, 1, C), lambda n, t: (n, 0, 0)),
                   pl.BlockSpec((1, 1, C), lambda n, t: (n, 0, 0))),
        scratch_shapes=[pltpu.VMEM((1, C), jnp.float32),
                        pltpu.VMEM((1, C), jnp.float32)],
        compiler_params=pltpu.CompilerParams(
            dimension_semantics=("parallel", "arbitrary"),
            vmem_limit_bytes=VMEM_LIMIT_BYTES),
    )(x, M)
    return mean, rstd


# ----------------------------------------------------------------------------
# Kernel 2: fused GroupNorm-apply + swish + 3x3 conv (+ optional fused residual)
# ----------------------------------------------------------------------------
def _gn_apply_conv_core(xt_ref, xc_ref, xb_ref, mean_ref, rstd_ref,
                        gamma_ref, beta_ref, w_ref, ypad_ref, acc_ref):
    """Fills acc_ref (TH*W, Cout) f32 with conv3x3(swish(GN(x))) for this row tile."""
    _, TH, W, Cin = xc_ref.shape
    t = pl.program_id(1)
    nt = pl.num_programs(1)

    mean = mean_ref[...]                                   # (1, 1, Cin) f32
    rstd = rstd_ref[...]
    gamma = gamma_ref[...].astype(jnp.float32)             # (1, 1, Cin)
    beta = beta_ref[...].astype(jnp.float32)

    # zero scratch once: provides the zero padding rows / columns of the halo.
    ypad_ref[...] = jnp.zeros_like(ypad_ref)

    def norm_swish(x_raw):                                 # (rows, W, Cin)
        y = (x_raw.astype(jnp.float32) - mean) * rstd * gamma + beta
        y = y * jax.nn.sigmoid(y)
        return y.astype(ypad_ref.dtype)

    def pack_store(r0, r1, y):
        # dx-packed layout: ypad[r, x, dx*Cin + c] = width-padded y[r, x + dx, c]
        ypad_ref[r0:r1, 1:W, 0:Cin] = y[:, 0:W - 1, :]
        ypad_ref[r0:r1, 0:W, Cin:2 * Cin] = y
        ypad_ref[r0:r1, 0:W - 1, 2 * Cin:3 * Cin] = y[:, 1:W, :]

    # main TH rows of this tile
    pack_store(1, TH + 1, norm_swish(xc_ref[0]))

    # top / bottom halo rows (come from neighbouring tiles; zero at image border)
    @pl.when(t > 0)
    def _():
        pack_store(0, 1, norm_swish(xt_ref[0]))

    @pl.when(t < nt - 1)
    def _():
        pack_store(TH + 1, TH + 2, norm_swish(xb_ref[0]))

    # 3 MXU matmuls, K = 3*Cin each; dy slabs are free leading-axis slices.
    acc_ref[...] = jnp.zeros_like(acc_ref)
    for dy in range(3):
        slab = ypad_ref[dy:dy + TH].reshape(TH * W, 3 * Cin)
        acc_ref[...] += jnp.dot(slab, w_ref[dy],
                                preferred_element_type=jnp.float32)


def gn_swish_conv_kernel(xt_ref, xc_ref, xb_ref, mean_ref, rstd_ref,
                         gamma_ref, beta_ref, w_ref, bias_ref,
                         o_ref, ypad_ref, acc_ref):
    _gn_apply_conv_core(xt_ref, xc_ref, xb_ref, mean_ref, rstd_ref,
                        gamma_ref, beta_ref, w_ref, ypad_ref, acc_ref)
    _, TH, W, Cout = o_ref.shape
    out = acc_ref[...] + bias_ref[...].astype(jnp.float32)
    o_ref[0] = out.reshape(TH, W, Cout).astype(o_ref.dtype)


def gn_swish_conv_add_kernel(xt_ref, xc_ref, xb_ref, mean_ref, rstd_ref,
                             gamma_ref, beta_ref, w_ref, bias_ref, res_ref,
                             o_ref, ypad_ref, acc_ref):
    _gn_apply_conv_core(xt_ref, xc_ref, xb_ref, mean_ref, rstd_ref,
                        gamma_ref, beta_ref, w_ref, ypad_ref, acc_ref)
    _, TH, W, Cout = o_ref.shape
    out = acc_ref[...] + bias_ref[...].astype(jnp.float32)
    out = out + res_ref[0].astype(jnp.float32).reshape(TH * W, Cout)
    o_ref[0] = out.reshape(TH, W, Cout).astype(o_ref.dtype)


def gn_swish_conv_nin_kernel(xt_ref, xc_ref, xb_ref, mean_ref, rstd_ref,
                             gamma_ref, beta_ref, w_ref, bias_ref,
                             res_ref, ws_ref, bs_ref,
                             o_ref, ypad_ref, acc_ref):
    _gn_apply_conv_core(xt_ref, xc_ref, xb_ref, mean_ref, rstd_ref,
                        gamma_ref, beta_ref, w_ref, ypad_ref, acc_ref)
    _, TH, W, Cout = o_ref.shape
    Cres = res_ref.shape[-1]
    r = res_ref[0].reshape(TH * W, Cres)
    s = jnp.dot(r, ws_ref[...], preferred_element_type=jnp.float32)
    out = (acc_ref[...] + bias_ref[...].astype(jnp.float32)
           + s + bs_ref[...].astype(jnp.float32))
    o_ref[0] = out.reshape(TH, W, Cout).astype(o_ref.dtype)


def _fused_gn_swish_conv(x, mean, rstd, gamma, beta, w, bias,
                         residual=None, shortcut_w=None, shortcut_b=None):
    """conv3x3(swish(GroupNorm(x))) [+ residual | + conv1x1(residual)], NHWC."""
    N, H, W, Cin = x.shape
    Cout = w.shape[-1]
    TH = _pick_tile_h(H)
    T = H // TH

    w_packed = w.reshape(3, 3 * Cin, Cout)        # K-packed taps (per dy row)
    gamma3 = gamma.reshape(1, 1, Cin)
    beta3 = beta.reshape(1, 1, Cin)
    bias2 = bias.reshape(1, Cout)

    x_top_spec = pl.BlockSpec(
        (1, 1, W, Cin), lambda n, t: (n, jnp.maximum(t * TH - 1, 0), 0, 0))
    x_cur_spec = pl.BlockSpec((1, TH, W, Cin), lambda n, t: (n, t, 0, 0))
    x_bot_spec = pl.BlockSpec(
        (1, 1, W, Cin), lambda n, t: (n, jnp.minimum(t * TH + TH, H - 1), 0, 0))
    per_nc3 = lambda n, t: (n, 0, 0)
    const3 = lambda n, t: (0, 0, 0)
    const2 = lambda n, t: (0, 0)

    in_specs = [
        x_top_spec, x_cur_spec, x_bot_spec,
        pl.BlockSpec((1, 1, Cin), per_nc3),               # mean  (N,1,Cin)
        pl.BlockSpec((1, 1, Cin), per_nc3),               # rstd  (N,1,Cin)
        pl.BlockSpec((1, 1, Cin), const3),                # gamma
        pl.BlockSpec((1, 1, Cin), const3),                # beta
        pl.BlockSpec((3, 3 * Cin, Cout), const3),         # packed conv weights
        pl.BlockSpec((1, Cout), const2),                  # conv bias
    ]
    args = [x, x, x, mean, rstd, gamma3, beta3, w_packed, bias2]

    if residual is None:
        kernel = gn_swish_conv_kernel
    else:
        Cres = residual.shape[-1]
        in_specs.append(pl.BlockSpec((1, TH, W, Cres), lambda n, t: (n, t, 0, 0)))
        args.append(residual)
        if shortcut_w is None:
            kernel = gn_swish_conv_add_kernel
        else:
            in_specs.append(pl.BlockSpec((Cres, Cout), const2))
            in_specs.append(pl.BlockSpec((1, Cout), const2))
            args.extend([shortcut_w, shortcut_b.reshape(1, Cout)])
            kernel = gn_swish_conv_nin_kernel

    return pl.pallas_call(
        kernel,
        out_shape=jax.ShapeDtypeStruct((N, H, W, Cout), x.dtype),
        grid=(N, T),
        in_specs=in_specs,
        out_specs=pl.BlockSpec((1, TH, W, Cout), lambda n, t: (n, t, 0, 0)),
        scratch_shapes=[pltpu.VMEM((TH + 2, W, 3 * Cin), x.dtype),   # dx-packed halo tile
                        pltpu.VMEM((TH * W, Cout), jnp.float32)],    # f32 accumulator
        compiler_params=pltpu.CompilerParams(
            dimension_semantics=("parallel", "parallel"),
            vmem_limit_bytes=VMEM_LIMIT_BYTES),
    )(*args)


# ----------------------------------------------------------------------------
# ResnetBlock forward (NHWC; keep NHWC through the surrounding model)
# ----------------------------------------------------------------------------
@functools.partial(jax.jit, static_argnames=("in_channels", "out_channels"))
def resnet_block_forward(x, params, *, in_channels, out_channels):
    """x: (N, H, W, C) NHWC."""
    mean1, rstd1 = _gn_stats(x)
    h = _fused_gn_swish_conv(x, mean1, rstd1, params["g1"], params["b1"],
                             params["w1"], params["bc1"])
    mean2, rstd2 = _gn_stats(h)
    if in_channels != out_channels:
        out = _fused_gn_swish_conv(h, mean2, rstd2, params["g2"], params["b2"],
                                   params["w2"], params["bc2"],
                                   residual=x, shortcut_w=params["ws"],
                                   shortcut_b=params["bs"])
    else:
        out = _fused_gn_swish_conv(h, mean2, rstd2, params["g2"], params["b2"],
                                   params["w2"], params["bc2"], residual=x)
    return out


def resnet_block_forward_nchw(x_nchw, params, *, in_channels, out_channels):
    """Drop-in adapter matching the PyTorch NCHW interface (single transpose pair)."""
    x = jnp.transpose(x_nchw, (0, 2, 3, 1))
    y = resnet_block_forward(x, params, in_channels=in_channels,
                             out_channels=out_channels)
    return jnp.transpose(y, (0, 3, 1, 2))


# ----------------------------------------------------------------------------
# Pure-JAX reference (for correctness check), NHWC
# ----------------------------------------------------------------------------
def ref_forward(x, params, in_channels, out_channels):
    def gn(v, g, b):
        N, H, W, C = v.shape
        G = NUM_GROUPS
        vg = v.reshape(N, H, W, G, C // G)
        mean = vg.mean(axis=(1, 2, 4), keepdims=True)
        var = ((vg - mean) ** 2).mean(axis=(1, 2, 4), keepdims=True)
        vn = ((vg - mean) / jnp.sqrt(var + EPS)).reshape(N, H, W, C)
        return vn * g[None, None, None, :] + b[None, None, None, :]

    def sw(v):
        return v * jax.nn.sigmoid(v)

    def conv(v, w_hwio, b, pad):
        y = jax.lax.conv_general_dilated(
            v, w_hwio, (1, 1), [(pad, pad), (pad, pad)],
            dimension_numbers=("NHWC", "HWIO", "NHWC"))
        return y + b[None, None, None, :]

    h = conv(sw(gn(x, params["g1"], params["b1"])), params["w1"], params["bc1"], 1)
    h = conv(sw(gn(h, params["g2"], params["b2"])), params["w2"], params["bc2"], 1)
    if in_channels != out_channels:
        ws = params["ws"].reshape(1, 1, in_channels, out_channels)
        x = conv(x, ws, params["bs"], 0)
    return x + h


# ----------------------------------------------------------------------------
# Main
# ----------------------------------------------------------------------------
def make_params(key, cin, cout):
    ks = jax.random.split(key, 10)
    p = {
        "g1": 1.0 + 0.1 * jax.random.normal(ks[0], (cin,), jnp.float32),
        "b1": 0.1 * jax.random.normal(ks[1], (cin,), jnp.float32),
        "w1": 0.1 * jax.random.normal(ks[2], (3, 3, cin, cout), jnp.float32),
        "bc1": 0.1 * jax.random.normal(ks[3], (cout,), jnp.float32),
        "g2": 1.0 + 0.1 * jax.random.normal(ks[4], (cout,), jnp.float32),
        "b2": 0.1 * jax.random.normal(ks[5], (cout,), jnp.float32),
        "w2": 0.1 * jax.random.normal(ks[6], (3, 3, cout, cout), jnp.float32),
        "bc2": 0.1 * jax.random.normal(ks[7], (cout,), jnp.float32),
    }
    if cin != cout:
        p["ws"] = 0.1 * jax.random.normal(ks[8], (cin, cout), jnp.float32)
        p["bs"] = 0.1 * jax.random.normal(ks[9], (cout,), jnp.float32)
    return p


if __name__ == "__main__":
    key = jax.random.PRNGKey(0)
    kx, kp, kp2 = jax.random.split(key, 3)

    N, H, W = 2, 16, 16                      # TH=8 -> 2 row tiles (exercises halos)

    # Case 1: in_channels != out_channels (fused 1x1 nin_shortcut path)
    Cin, Cout = 32, 64
    x = jax.random.normal(kx, (N, H, W, Cin), jnp.float32)       # NHWC
    params = make_params(kp, Cin, Cout)
    out = jax.block_until_ready(
        resnet_block_forward(x, params, in_channels=Cin, out_channels=Cout))
    ref = ref_forward(x, params, Cin, Cout)
    assert out.shape == (N, H, W, Cout)
    assert jnp.allclose(out, ref, rtol=1e-4, atol=1e-4), \
        float(jnp.max(jnp.abs(out - ref)))

    # Case 2: in_channels == out_channels (fused identity-residual path)
    C = 64
    x2 = jax.random.normal(kx, (N, H, W, C), jnp.float32)
    params2 = make_params(kp2, C, C)
    out2 = jax.block_until_ready(
        resnet_block_forward(x2, params2, in_channels=C, out_channels=C))
    ref2 = ref_forward(x2, params2, C, C)
    assert jnp.allclose(out2, ref2, rtol=1e-4, atol=1e-4), \
        float(jnp.max(jnp.abs(out2 - ref2)))

    print("KERNEL_OK")
</pallas_src>

<mosaic_0001>
module attributes {stable_mosaic.version = 11 : i64} {
  func.func @gn_stats_kernel(%arg0: i32, %arg1: i32, %arg2: memref<1x8x16x32xf32, #tpu.memory_space<vmem>>, %arg3: memref<32x32xf32, #tpu.memory_space<vmem>>, %arg4: memref<1x1x32xf32, #tpu.memory_space<vmem>>, %arg5: memref<1x1x32xf32, #tpu.memory_space<vmem>>, %arg6: memref<1x32xf32, #tpu.memory_space<vmem>>, %arg7: memref<1x32xf32, #tpu.memory_space<vmem>>) attributes {dimension_semantics = [#tpu.dimension_semantics<parallel>, #tpu.dimension_semantics<arbitrary>], iteration_bounds = array<i64: 2, 2>, scalar_prefetch = 0 : i64, scratch_operands = 2 : i64, tpu.core_type = #tpu.core_type<tc>, window_params = [{transform_indices = @transform_0, window_bounds = array<i64: 1, 8, 16, 32>}, {pipeline_mode = #tpu.pipeline_mode<synchronous>, transform_indices = @transform_1, window_bounds = array<i64: 32, 32>}, {transform_indices = @transform_2, window_bounds = array<i64: 1, 1, 32>}, {transform_indices = @transform_3, window_bounds = array<i64: 1, 1, 32>}]} {
    %c0_i32 = arith.constant 0 : i32
    %0 = arith.cmpi eq, %arg1, %c0_i32 : i32
    %1 = arith.extui %0 : i1 to i32
    %c0_i32_0 = arith.constant 0 : i32
    %2 = arith.cmpi ne, %1, %c0_i32_0 : i32
    scf.if %2 {
      %cst_14 = arith.constant 0.000000e+00 : f32
      %20 = vector.broadcast %cst_14 : f32 to vector<1x32xf32>
      %c0_15 = arith.constant 0 : index
      %c0_16 = arith.constant 0 : index
      %21 = vector.load %arg6[%c0_15, %c0_16] : memref<1x32xf32, #tpu.memory_space<vmem>>, vector<1x32xf32>
      tpu.vector_store %arg6[%c0_15, %c0_16], %20 {strides = array<i32>} : memref<1x32xf32, #tpu.memory_space<vmem>>, vector<1x32xf32>,
      %cst_17 = arith.constant 0.000000e+00 : f32
      %22 = vector.broadcast %cst_17 : f32 to vector<1x32xf32>
      %c0_18 = arith.constant 0 : index
      %c0_19 = arith.constant 0 : index
      %23 = vector.load %arg7[%c0_18, %c0_19] : memref<1x32xf32, #tpu.memory_space<vmem>>, vector<1x32xf32>
      tpu.vector_store %arg7[%c0_18, %c0_19], %22 {strides = array<i32>} : memref<1x32xf32, #tpu.memory_space<vmem>>, vector<1x32xf32>,
    } else {
    }
    %c0 = arith.constant 0 : index
    %c0_1 = arith.constant 0 : index
    %c0_2 = arith.constant 0 : index
    %c0_3 = arith.constant 0 : index
    %3 = vector.load %arg2[%c0, %c0_1, %c0_2, %c0_3] : memref<1x8x16x32xf32, #tpu.memory_space<vmem>>, vector<1x8x16x32xf32>
    %4 = vector.shape_cast %3 : vector<1x8x16x32xf32> to vector<8x16x32xf32>
    %5 = vector.shape_cast %4 : vector<8x16x32xf32> to vector<128x32xf32>
    %c0_4 = arith.constant 0 : index
    %c0_5 = arith.constant 0 : index
    %6 = vector.load %arg6[%c0_4, %c0_5] : memref<1x32xf32, #tpu.memory_space<vmem>>, vector<1x32xf32>
    %cst = arith.constant dense<0.000000e+00> : vector<32xf32>
    %7 = vector.multi_reduction <add>, %5, %cst [0] : vector<128x32xf32> to vector<32xf32>
    %8 = vector.shape_cast %7 : vector<32xf32> to vector<1x32xf32>
    %9 = arith.addf %6, %8 : vector<1x32xf32>
    %c0_6 = arith.constant 0 : index
    %c0_7 = arith.constant 0 : index
    %10 = vector.load %arg6[%c0_6, %c0_7] : memref<1x32xf32, #tpu.memory_space<vmem>>, vector<1x32xf32>
    tpu.vector_store %arg6[%c0_6, %c0_7], %9 {strides = array<i32>} : memref<1x32xf32, #tpu.memory_space<vmem>>, vector<1x32xf32>,
    %c0_8 = arith.constant 0 : index
    %c0_9 = arith.constant 0 : index
    %11 = vector.load %arg7[%c0_8, %c0_9] : memref<1x32xf32, #tpu.memory_space<vmem>>, vector<1x32xf32>
    %12 = arith.mulf %5, %5 : vector<128x32xf32>
    %cst_10 = arith.constant dense<0.000000e+00> : vector<32xf32>
    %13 = vector.multi_reduction <add>, %12, %cst_10 [0] : vector<128x32xf32> to vector<32xf32>
    %14 = vector.shape_cast %13 : vector<32xf32> to vector<1x32xf32>
    %15 = arith.addf %11, %14 : vector<1x32xf32>
    %c0_11 = arith.constant 0 : index
    %c0_12 = arith.constant 0 : index
    %16 = vector.load %arg7[%c0_11, %c0_12] : memref<1x32xf32, #tpu.memory_space<vmem>>, vector<1x32xf32>
    tpu.vector_store %arg7[%c0_11, %c0_12], %15 {strides = array<i32>} : memref<1x32xf32, #tpu.memory_space<vmem>>, vector<1x32xf32>,
    %c1_i32 = arith.constant 1 : i32
    %17 = arith.cmpi eq, %arg1, %c1_i32 : i32
    %18 = arith.extui %17 : i1 to i32
    %c0_i32_13 = arith.constant 0 : i32
    %19 = arith.cmpi ne, %18, %c0_i32_13 : i32
    scf.if %19 {
      %c0_14 = arith.constant 0 : index
      %c0_15 = arith.constant 0 : index
      %20 = vector.load %arg3[%c0_14, %c0_15] : memref<32x32xf32, #tpu.memory_space<vmem>>, vector<32x32xf32>
      %c0_16 = arith.constant 0 : index
      %c0_17 = arith.constant 0 : index
      %21 = vector.load %arg6[%c0_16, %c0_17] : memref<1x32xf32, #tpu.memory_space<vmem>>, vector<1x32xf32>
      %cst_18 = arith.constant dense<0.000000e+00> : vector<1x32xf32>
      %22 = tpu.matmul %21, %20, %cst_18 {dimension_numbers = #tpu.dot_dimension_numbers<[1], [0], [0], [1], [0, 0, 1, 1], [], []>} : vector<1x32xf32>, vector<32x32xf32>, vector<1x32xf32> -> vector<1x32xf32>
      %c0_19 = arith.constant 0 : index
      %c0_20 = arith.constant 0 : index
      %23 = vector.load %arg7[%c0_19, %c0_20] : memref<1x32xf32, #tpu.memory_space<vmem>>, vector<1x32xf32>
      %cst_21 = arith.constant dense<0.000000e+00> : vector<1x32xf32>
      %24 = tpu.matmul %23, %20, %cst_21 {dimension_numbers = #tpu.dot_dimension_numbers<[1], [0], [0], [1], [0, 0, 1, 1], [], []>} : vector<1x32xf32>, vector<32x32xf32>, vector<1x32xf32> -> vector<1x32xf32>
      %cst_22 = arith.constant 3.906250e-03 : f32
      %25 = vector.broadcast %cst_22 : f32 to vector<1x32xf32>
      %26 = arith.mulf %22, %25 : vector<1x32xf32>
      %cst_23 = arith.constant 3.906250e-03 : f32
      %27 = vector.broadcast %cst_23 : f32 to vector<1x32xf32>
      %28 = arith.mulf %24, %27 : vector<1x32xf32>
      %29 = arith.mulf %26, %26 : vector<1x32xf32>
      %30 = arith.subf %28, %29 : vector<1x32xf32>
      %cst_24 = arith.constant 9.99999997E-7 : f32
      %31 = vector.broadcast %cst_24 : f32 to vector<1x32xf32>
      %32 = arith.addf %30, %31 : vector<1x32xf32>
      %33 = math.rsqrt %32 : vector<1x32xf32>
      %34 = tpu.transpose %20, [1, 0] : vector<32x32xf32> -> vector<32x32xf32>
      %cst_25 = arith.constant dense<0.000000e+00> : vector<1x32xf32>
      %35 = tpu.matmul %26, %34, %cst_25 {dimension_numbers = #tpu.dot_dimension_numbers<[1], [0], [0], [1], [0, 0, 1, 1], [], []>} : vector<1x32xf32>, vector<32x32xf32>, vector<1x32xf32> -> vector<1x32xf32>
      %c0_26 = arith.constant 0 : index
      %c0_27 = arith.constant 0 : index
      %c0_28 = arith.constant 0 : index
      %36 = vector.load %arg4[%c0_26, %c0_27, %c0_28] : memref<1x1x32xf32, #tpu.memory_space<vmem>>, vector<1x1x32xf32>
      %37 = vector.shape_cast %36 : vector<1x1x32xf32> to vector<1x32xf32>
      %38 = vector.shape_cast %35 : vector<1x32xf32> to vector<1x1x32xf32>
      tpu.vector_store %arg4[%c0_26, %c0_27, %c0_28], %38 {strides = array<i32>} : memref<1x1x32xf32, #tpu.memory_space<vmem>>, vector<1x1x32xf32>,
      %39 = tpu.transpose %20, [1, 0] : vector<32x32xf32> -> vector<32x32xf32>
      %cst_29 = arith.constant dense<0.000000e+00> : vector<1x32xf32>
      %40 = tpu.matmul %33, %39, %cst_29 {dimension_numbers = #tpu.dot_dimension_numbers<[1], [0], [0], [1], [0, 0, 1, 1], [], []>} : vector<1x32xf32>, vector<32x32xf32>, vector<1x32xf32> -> vector<1x32xf32>
      %c0_30 = arith.constant 0 : index
      %c0_31 = arith.constant 0 : index
      %c0_32 = arith.constant 0 : index
      %41 = vector.load %arg5[%c0_30, %c0_31, %c0_32] : memref<1x1x32xf32, #tpu.memory_space<vmem>>, vector<1x1x32xf32>
      %42 = vector.shape_cast %41 : vector<1x1x32xf32> to vector<1x32xf32>
      %43 = vector.shape_cast %40 : vector<1x32xf32> to vector<1x1x32xf32>
      tpu.vector_store %arg5[%c0_30, %c0_31, %c0_32], %43 {strides = array<i32>} : memref<1x1x32xf32, #tpu.memory_space<vmem>>, vector<1x1x32xf32>,
    } else {
    }
    return
  }
  func.func @transform_0(%arg0: i32, %arg1: i32) -> (i32, i32, i32, i32) {
    %c0_i32 = arith.constant 0 : i32
    %c0_i32_0 = arith.constant 0 : i32
    %c0_i32_1 = arith.constant 0 : i32
    return %arg0, %arg1, %c0_i32, %c0_i32_0 : i32, i32, i32, i32
  }
  func.func @transform_1(%arg0: i32, %arg1: i32) -> (i32, i32) {
    %c0_i32 = arith.constant 0 : i32
    %c0_i32_0 = arith.constant 0 : i32
    %c0_i32_1 = arith.constant 0 : i32
    return %c0_i32, %c0_i32_0 : i32, i32
  }
  func.func @transform_2(%arg0: i32, %arg1: i32) -> (i32, i32, i32) {
    %c0_i32 = arith.constant 0 : i32
    %c0_i32_0 = arith.constant 0 : i32
    %c0_i32_1 = arith.constant 0 : i32
    return %arg0, %c0_i32, %c0_i32_0 : i32, i32, i32
  }
  func.func @transform_3(%arg0: i32, %arg1: i32) -> (i32, i32, i32) {
    %c0_i32 = arith.constant 0 : i32
    %c0_i32_0 = arith.constant 0 : i32
    %c0_i32_1 = arith.constant 0 : i32
    return %arg0, %c0_i32, %c0_i32_0 : i32, i32, i32
  }
}

module attributes {stable_mosaic.version = 11 : i64} {
  func.func @gn_swish_conv_kernel(%arg0: i32, %arg1: i32, %arg2: memref<1x1x16x32xf32, #tpu.memory_space<vmem>>, %arg3: memref<1x8x16x32xf32, #tpu.memory_space<vmem>>, %arg4: memref<1x1x16x32xf32, #tpu.memory_space<vmem>>, %arg5: memref<1x1x32xf32, #tpu.memory_space<vmem>>, %arg6: memref<1x1x32xf32, #tpu.memory_space<vmem>>, %arg7: memref<1x1x32xf32, #tpu.memory_space<vmem>>, %arg8: memref<1x1x32xf32, #tpu.memory_space<vmem>>, %arg9: memref<3x96x64xf32, #tpu.memory_space<vmem>>, %arg10: memref<1x64xf32, #tpu.memory_space<vmem>>, %arg11: memref<1x8x16x64xf32, #tpu.memory_space<vmem>>, %arg12: memref<10x16x96xf32, #tpu.memory_space<vmem>>, %arg13: memref<128x64xf32, #tpu.memory_space<vmem>>) attributes {dimension_semantics = [#tpu.dimension_semantics<parallel>, #tpu.dimension_semantics<parallel>], iteration_bounds = array<i64: 2, 2>, scalar_prefetch = 0 : i64, scratch_operands = 2 : i64, tpu.core_type = #tpu.core_type<tc>, window_params = [{transform_indices = @transform_0, window_bounds = array<i64: 1, 1, 16, 32>}, {transform_indices = @transform_1, window_bounds = array<i64: 1, 8, 16, 32>}, {transform_indices = @transform_2, window_bounds = array<i64: 1, 1, 16, 32>}, {transform_indices = @transform_3, window_bounds = array<i64: 1, 1, 32>}, {transform_indices = @transform_4, window_bounds = array<i64: 1, 1, 32>}, {pipeline_mode = #tpu.pipeline_mode<synchronous>, transform_indices = @transform_5, window_bounds = array<i64: 1, 1, 32>}, {pipeline_mode = #tpu.pipeline_mode<synchronous>, transform_indices = @transform_6, window_bounds = array<i64: 1, 1, 32>}, {pipeline_mode = #tpu.pipeline_mode<synchronous>, transform_indices = @transform_7, window_bounds = array<i64: 3, 96, 64>}, {pipeline_mode = #tpu.pipeline_mode<synchronous>, transform_indices = @transform_8, window_bounds = array<i64: 1, 64>}, {transform_indices = @transform_9, window_bounds = array<i64: 1, 8, 16, 64>}]} {
    %c0 = arith.constant 0 : index
    %c0_0 = arith.constant 0 : index
    %c0_1 = arith.constant 0 : index
    %0 = vector.load %arg5[%c0, %c0_0, %c0_1] : memref<1x1x32xf32, #tpu.memory_space<vmem>>, vector<1x1x32xf32>
    %c0_2 = arith.constant 0 : index
    %c0_3 = arith.constant 0 : index
    %c0_4 = arith.constant 0 : index
    %1 = vector.load %arg6[%c0_2, %c0_3, %c0_4] : memref<1x1x32xf32, #tpu.memory_space<vmem>>, vector<1x1x32xf32>
    %c0_5 = arith.constant 0 : index
    %c0_6 = arith.constant 0 : index
    %c0_7 = arith.constant 0 : index
    %2 = vector.load %arg7[%c0_5, %c0_6, %c0_7] : memref<1x1x32xf32, #tpu.memory_space<vmem>>, vector<1x1x32xf32>
    %c0_8 = arith.constant 0 : index
    %c0_9 = arith.constant 0 : index
    %c0_10 = arith.constant 0 : index
    %3 = vector.load %arg8[%c0_8, %c0_9, %c0_10] : memref<1x1x32xf32, #tpu.memory_space<vmem>>, vector<1x1x32xf32>
    %cst = arith.constant 0.000000e+00 : f32
    %4 = vector.broadcast %cst : f32 to vector<10x16x96xf32>
    %c0_11 = arith.constant 0 : index
    %c0_12 = arith.constant 0 : index
    %c0_13 = arith.constant 0 : index
    %5 = vector.load %arg12[%c0_11, %c0_12, %c0_13] : memref<10x16x96xf32, #tpu.memory_space<vmem>>, vector<10x16x96xf32>
    tpu.vector_store %arg12[%c0_11, %c0_12, %c0_13], %4 {strides = array<i32>} : memref<10x16x96xf32, #tpu.memory_space<vmem>>, vector<10x16x96xf32>,
    %c0_14 = arith.constant 0 : index
    %c0_15 = arith.constant 0 : index
    %c0_16 = arith.constant 0 : index
    %c0_17 = arith.constant 0 : index
    %6 = vector.load %arg3[%c0_14, %c0_15, %c0_16, %c0_17] : memref<1x8x16x32xf32, #tpu.memory_space<vmem>>, vector<1x8x16x32xf32>
    %7 = vector.shape_cast %6 : vector<1x8x16x32xf32> to vector<8x16x32xf32>
    %8 = vector.broadcast %0 : vector<1x1x32xf32> to vector<8x16x32xf32>
    %9 = arith.subf %7, %8 : vector<8x16x32xf32>
    %10 = vector.broadcast %1 : vector<1x1x32xf32> to vector<8x16x32xf32>
    %11 = arith.mulf %9, %10 : vector<8x16x32xf32>
    %12 = vector.broadcast %2 : vector<1x1x32xf32> to vector<8x16x32xf32>
    %13 = arith.mulf %11, %12 : vector<8x16x32xf32>
    %14 = vector.broadcast %3 : vector<1x1x32xf32> to vector<8x16x32xf32>
    %15 = arith.addf %13, %14 : vector<8x16x32xf32>
    %16 = arith.negf %15 : vector<8x16x32xf32>
    %17 = math.exp %16 : vector<8x16x32xf32>
    %cst_18 = arith.constant 1.000000e+00 : f32
    %18 = vector.broadcast %cst_18 : f32 to vector<8x16x32xf32>
    %19 = arith.addf %18, %17 : vector<8x16x32xf32>
    %20 = arith.divf %18, %19 : vector<8x16x32xf32>
    %21 = arith.mulf %15, %20 : vector<8x16x32xf32>
    %22 = vector.extract_strided_slice %21 {offsets = [0, 0, 0], sizes = [8, 15, 32], strides = [1, 1, 1]} : vector<8x16x32xf32> to vector<8x15x32xf32>
    %c1 = arith.constant 1 : index
    %c1_19 = arith.constant 1 : index
    %c0_20 = arith.constant 0 : index
    %23 = vector.load %arg12[%c1, %c1_19, %c0_20] : memref<10x16x96xf32, #tpu.memory_space<vmem>>, vector<8x15x32xf32>
    tpu.vector_store %arg12[%c1, %c1_19, %c0_20], %22 {strides = array<i32>} : memref<10x16x96xf32, #tpu.memory_space<vmem>>, vector<8x15x32xf32>,
    %c1_21 = arith.constant 1 : index
    %c0_22 = arith.constant 0 : index
    %c32 = arith.constant 32 : index
    %24 = vector.load %arg12[%c1_21, %c0_22, %c32] : memref<10x16x96xf32, #tpu.memory_space<vmem>>, vector<8x16x32xf32>
    tpu.vector_store %arg12[%c1_21, %c0_22, %c32], %21 {strides = array<i32>} : memref<10x16x96xf32, #tpu.memory_space<vmem>>, vector<8x16x32xf32>,
    %25 = vector.extract_strided_slice %21 {offsets = [0, 1, 0], sizes = [8, 15, 32], strides = [1, 1, 1]} : vector<8x16x32xf32> to vector<8x15x32xf32>
    %c1_23 = arith.constant 1 : index
    %c0_24 = arith.constant 0 : index
    %c64 = arith.constant 64 : index
    %26 = vector.load %arg12[%c1_23, %c0_24, %c64] : memref<10x16x96xf32, #tpu.memory_space<vmem>>, vector<8x15x32xf32>
    tpu.vector_store %arg12[%c1_23, %c0_24, %c64], %25 {strides = array<i32>} : memref<10x16x96xf32, #tpu.memory_space<vmem>>, vector<8x15x32xf32>,
    %c0_i32 = arith.constant 0 : i32
    %27 = arith.cmpi sgt, %arg1, %c0_i32 : i32
    %28 = arith.extui %27 : i1 to i32
    %c0_i32_25 = arith.constant 0 : i32
    %29 = arith.cmpi ne, %28, %c0_i32_25 : i32
    scf.if %29 {
      %c0_70 = arith.constant 0 : index
      %c0_71 = arith.constant 0 : index
      %c0_72 = arith.constant 0 : index
      %c0_73 = arith.constant 0 : index
      %67 = vector.load %arg2[%c0_70, %c0_71, %c0_72, %c0_73] : memref<1x1x16x32xf32, #tpu.memory_space<vmem>>, vector<1x1x16x32xf32>
      %68 = vector.shape_cast %67 : vector<1x1x16x32xf32> to vector<1x16x32xf32>
      %69 = vector.broadcast %0 : vector<1x1x32xf32> to vector<1x16x32xf32>
      %70 = arith.subf %68, %69 : vector<1x16x32xf32>
      %71 = vector.broadcast %1 : vector<1x1x32xf32> to vector<1x16x32xf32>
      %72 = arith.mulf %70, %71 : vector<1x16x32xf32>
      %73 = vector.broadcast %2 : vector<1x1x32xf32> to vector<1x16x32xf32>
      %74 = arith.mulf %72, %73 : vector<1x16x32xf32>
      %75 = vector.broadcast %3 : vector<1x1x32xf32> to vector<1x16x32xf32>
      %76 = arith.addf %74, %75 : vector<1x16x32xf32>
      %77 = arith.negf %76 : vector<1x16x32xf32>
      %78 = math.exp %77 : vector<1x16x32xf32>
      %cst_74 = arith.constant 1.000000e+00 : f32
      %79 = vector.broadcast %cst_74 : f32 to vector<1x16x32xf32>
      %80 = arith.addf %79, %78 : vector<1x16x32xf32>
      %81 = arith.divf %79, %80 : vector<1x16x32xf32>
      %82 = arith.mulf %76, %81 : vector<1x16x32xf32>
      %83 = vector.extract_strided_slice %82 {offsets = [0, 0, 0], sizes = [1, 15, 32], strides = [1, 1, 1]} : vector<1x16x32xf32> to vector<1x15x32xf32>
      %c0_75 = arith.constant 0 : index
      %c1_76 = arith.constant 1 : index
      %c0_77 = arith.constant 0 : index
      %84 = vector.load %arg12[%c0_75, %c1_76, %c0_77] : memref<10x16x96xf32, #tpu.memory_space<vmem>>, vector<1x15x32xf32>
      tpu.vector_store %arg12[%c0_75, %c1_76, %c0_77], %83 {strides = array<i32>} : memref<10x16x96xf32, #tpu.memory_space<vmem>>, vector<1x15x32xf32>,
      %c0_78 = arith.constant 0 : index
      %c0_79 = arith.constant 0 : index
      %c32_80 = arith.constant 32 : index
      %85 = vector.load %arg12[%c0_78, %c0_79, %c32_80] : memref<10x16x96xf32, #tpu.memory_space<vmem>>, vector<1x16x32xf32>
      tpu.vector_store %arg12[%c0_78, %c0_79, %c32_80], %82 {strides = array<i32>} : memref<10x16x96xf32, #tpu.memory_space<vmem>>, vector<1x16x32xf32>,
      %86 = vector.extract_strided_slice %82 {offsets = [0, 1, 0], sizes = [1, 15, 32], strides = [1, 1, 1]} : vector<1x16x32xf32> to vector<1x15x32xf32>
      %c0_81 = arith.constant 0 : index
      %c0_82 = arith.constant 0 : index
      %c64_83 = arith.constant 64 : index
      %87 = vector.load %arg12[%c0_81, %c0_82, %c64_83] : memref<10x16x96xf32, #tpu.memory_space<vmem>>, vector<1x15x32xf32>
      tpu.vector_store %arg12[%c0_81, %c0_82, %c64_83], %86 {strides = array<i32>} : memref<10x16x96xf32, #tpu.memory_space<vmem>>, vector<1x15x32xf32>,
    } else {
    }
    %c1_i32 = arith.constant 1 : i32
    %30 = arith.cmpi slt, %arg1, %c1_i32 : i32
    %31 = arith.extui %30 : i1 to i32
    %c0_i32_26 = arith.constant 0 : i32
    %32 = arith.cmpi ne, %31, %c0_i32_26 : i32
    scf.if %32 {
      %c0_70 = arith.constant 0 : index
      %c0_71 = arith.constant 0 : index
      %c0_72 = arith.constant 0 : index
      %c0_73 = arith.constant 0 : index
      %67 = vector.load %arg4[%c0_70, %c0_71, %c0_72, %c0_73] : memref<1x1x16x32xf32, #tpu.memory_space<vmem>>, vector<1x1x16x32xf32>
      %68 = vector.shape_cast %67 : vector<1x1x16x32xf32> to vector<1x16x32xf32>
      %69 = vector.broadcast %0 : vector<1x1x32xf32> to vector<1x16x32xf32>
      %70 = arith.subf %68, %69 : vector<1x16x32xf32>
      %71 = vector.broadcast %1 : vector<1x1x32xf32> to vector<1x16x32xf32>
      %72 = arith.mulf %70, %71 : vector<1x16x32xf32>
      %73 = vector.broadcast %2 : vector<1x1x32xf32> to vector<1x16x32xf32>
      %74 = arith.mulf %72, %73 : vector<1x16x32xf32>
      %75 = vector.broadcast %3 : vector<1x1x32xf32> to vector<1x16x32xf32>
      %76 = arith.addf %74, %75 : vector<1x16x32xf32>
      %77 = arith.negf %76 : vector<1x16x32xf32>
      %78 = math.exp %77 : vector<1x16x32xf32>
      %cst_74 = arith.constant 1.000000e+00 : f32
      %79 = vector.broadcast %cst_74 : f32 to vector<1x16x32xf32>
      %80 = arith.addf %79, %78 : vector<1x16x32xf32>
      %81 = arith.divf %79, %80 : vector<1x16x32xf32>
      %82 = arith.mulf %76, %81 : vector<1x16x32xf32>
      %83 = vector.extract_strided_slice %82 {offsets = [0, 0, 0], sizes = [1, 15, 32], strides = [1, 1, 1]} : vector<1x16x32xf32> to vector<1x15x32xf32>
      %c9 = arith.constant 9 : index
      %c1_75 = arith.constant 1 : index
      %c0_76 = arith.constant 0 : index
      %84 = vector.load %arg12[%c9, %c1_75, %c0_76] : memref<10x16x96xf32, #tpu.memory_space<vmem>>, vector<1x15x32xf32>
      tpu.vector_store %arg12[%c9, %c1_75, %c0_76], %83 {strides = array<i32>} : memref<10x16x96xf32, #tpu.memory_space<vmem>>, vector<1x15x32xf32>,
      %c9_77 = arith.constant 9 : index
      %c0_78 = arith.constant 0 : index
      %c32_79 = arith.constant 32 : index
      %85 = vector.load %arg12[%c9_77, %c0_78, %c32_79] : memref<10x16x96xf32, #tpu.memory_space<vmem>>, vector<1x16x32xf32>
      tpu.vector_store %arg12[%c9_77, %c0_78, %c32_79], %82 {strides = array<i32>} : memref<10x16x96xf32, #tpu.memory_space<vmem>>, vector<1x16x32xf32>,
      %86 = vector.extract_strided_slice %82 {offsets = [0, 1, 0], sizes = [1, 15, 32], strides = [1, 1, 1]} : vector<1x16x32xf32> to vector<1x15x32xf32>
      %c9_80 = arith.constant 9 : index
      %c0_81 = arith.constant 0 : index
      %c64_82 = arith.constant 64 : index
      %87 = vector.load %arg12[%c9_80, %c0_81, %c64_82] : memref<10x16x96xf32, #tpu.memory_space<vmem>>, vector<1x15x32xf32>
      tpu.vector_store %arg12[%c9_80, %c0_81, %c64_82], %86 {strides = array<i32>} : memref<10x16x96xf32, #tpu.memory_space<vmem>>, vector<1x15x32xf32>,
    } else {
    }
    %cst_27 = arith.constant 0.000000e+00 : f32
    %33 = vector.broadcast %cst_27 : f32 to vector<128x64xf32>
    %c0_28 = arith.constant 0 : index
    %c0_29 = arith.constant 0 : index
    %34 = vector.load %arg13[%c0_28, %c0_29] : memref<128x64xf32, #tpu.memory_space<vmem>>, vector<128x64xf32>
    tpu.vector_store %arg13[%c0_28, %c0_29], %33 {strides = array<i32>} : memref<128x64xf32, #tpu.memory_space<vmem>>, vector<128x64xf32>,
    %c0_30 = arith.constant 0 : index
    %c0_31 = arith.constant 0 : index
    %c0_32 = arith.constant 0 : index
    %35 = vector.load %arg12[%c0_30, %c0_31, %c0_32] : memref<10x16x96xf32, #tpu.memory_space<vmem>>, vector<8x16x96xf32>
    %36 = vector.shape_cast %35 : vector<8x16x96xf32> to vector<128x96xf32>
    %c0_33 = arith.constant 0 : index
    %c0_34 = arith.constant 0 : index
    %37 = vector.load %arg13[%c0_33, %c0_34] : memref<128x64xf32, #tpu.memory_space<vmem>>, vector<128x64xf32>
    %c0_35 = arith.constant 0 : index
    %c0_36 = arith.constant 0 : index
    %c0_37 = arith.constant 0 : index
    %38 = vector.load %arg9[%c0_35, %c0_36, %c0_37] : memref<3x96x64xf32, #tpu.memory_space<vmem>>, vector<1x96x64xf32>
    %39 = vector.shape_cast %38 : vector<1x96x64xf32> to vector<96x64xf32>
    %cst_38 = arith.constant dense<0.000000e+00> : vector<128x64xf32>
    %40 = tpu.matmul %36, %39, %cst_38 {dimension_numbers = #tpu.dot_dimension_numbers<[1], [0], [0], [1], [0, 0, 1, 1], [], []>} : vector<128x96xf32>, vector<96x64xf32>, vector<128x64xf32> -> vector<128x64xf32>
    %41 = arith.addf %37, %40 : vector<128x64xf32>
    %c0_39 = arith.constant 0 : index
    %c0_40 = arith.constant 0 : index
    %42 = vector.load %arg13[%c0_39, %c0_40] : memref<128x64xf32, #tpu.memory_space<vmem>>, vector<128x64xf32>
    tpu.vector_store %arg13[%c0_39, %c0_40], %41 {strides = array<i32>} : memref<128x64xf32, #tpu.memory_space<vmem>>, vector<128x64xf32>,
    %c1_41 = arith.constant 1 : index
    %c0_42 = arith.constant 0 : index
    %c0_43 = arith.constant 0 : index
    %43 = vector.load %arg12[%c1_41, %c0_42, %c0_43] : memref<10x16x96xf32, #tpu.memory_space<vmem>>, vector<8x16x96xf32>
    %44 = vector.shape_cast %43 : vector<8x16x96xf32> to vector<128x96xf32>
    %c0_44 = arith.constant 0 : index
    %c0_45 = arith.constant 0 : index
    %45 = vector.load %arg13[%c0_44, %c0_45] : memref<128x64xf32, #tpu.memory_space<vmem>>, vector<128x64xf32>
    %c1_46 = arith.constant 1 : index
    %c0_47 = arith.constant 0 : index
    %c0_48 = arith.constant 0 : index
    %46 = vector.load %arg9[%c1_46, %c0_47, %c0_48] : memref<3x96x64xf32, #tpu.memory_space<vmem>>, vector<1x96x64xf32>
    %47 = vector.shape_cast %46 : vector<1x96x64xf32> to vector<96x64xf32>
    %cst_49 = arith.constant dense<0.000000e+00> : vector<128x64xf32>
    %48 = tpu.matmul %44, %47, %cst_49 {dimension_numbers = #tpu.dot_dimension_numbers<[1], [0], [0], [1], [0, 0, 1, 1], [], []>} : vector<128x96xf32>, vector<96x64xf32>, vector<128x64xf32> -> vector<128x64xf32>
    %49 = arith.addf %45, %48 : vector<128x64xf32>
    %c0_50 = arith.constant 0 : index
    %c0_51 = arith.constant 0 : index
    %50 = vector.load %arg13[%c0_50, %c0_51] : memref<128x64xf32, #tpu.memory_space<vmem>>, vector<128x64xf32>
    tpu.vector_store %arg13[%c0_50, %c0_51], %49 {strides = array<i32>} : memref<128x64xf32, #tpu.memory_space<vmem>>, vector<128x64xf32>,
    %c2 = arith.constant 2 : index
    %c0_52 = arith.constant 0 : index
    %c0_53 = arith.constant 0 : index
    %51 = vector.load %arg12[%c2, %c0_52, %c0_53] : memref<10x16x96xf32, #tpu.memory_space<vmem>>, vector<8x16x96xf32>
    %52 = vector.shape_cast %51 : vector<8x16x96xf32> to vector<128x96xf32>
    %c0_54 = arith.constant 0 : index
    %c0_55 = arith.constant 0 : index
    %53 = vector.load %arg13[%c0_54, %c0_55] : memref<128x64xf32, #tpu.memory_space<vmem>>, vector<128x64xf32>
    %c2_56 = arith.constant 2 : index
    %c0_57 = arith.constant 0 : index
    %c0_58 = arith.constant 0 : index
    %54 = vector.load %arg9[%c2_56, %c0_57, %c0_58] : memref<3x96x64xf32, #tpu.memory_space<vmem>>, vector<1x96x64xf32>
    %55 = vector.shape_cast %54 : vector<1x96x64xf32> to vector<96x64xf32>
    %cst_59 = arith.constant dense<0.000000e+00> : vector<128x64xf32>
    %56 = tpu.matmul %52, %55, %cst_59 {dimension_numbers = #tpu.dot_dimension_numbers<[1], [0], [0], [1], [0, 0, 1, 1], [], []>} : vector<128x96xf32>, vector<96x64xf32>, vector<128x64xf32> -> vector<128x64xf32>
    %57 = arith.addf %53, %56 : vector<128x64xf32>
    %c0_60 = arith.constant 0 : index
    %c0_61 = arith.constant 0 : index
    %58 = vector.load %arg13[%c0_60, %c0_61] : memref<128x64xf32, #tpu.memory_space<vmem>>, vector<128x64xf32>
    tpu.vector_store %arg13[%c0_60, %c0_61], %57 {strides = array<i32>} : memref<128x64xf32, #tpu.memory_space<vmem>>, vector<128x64xf32>,
    %c0_62 = arith.constant 0 : index
    %c0_63 = arith.constant 0 : index
    %59 = vector.load %arg13[%c0_62, %c0_63] : memref<128x64xf32, #tpu.memory_space<vmem>>, vector<128x64xf32>
    %c0_64 = arith.constant 0 : index
    %c0_65 = arith.constant 0 : index
    %60 = vector.load %arg10[%c0_64, %c0_65] : memref<1x64xf32, #tpu.memory_space<vmem>>, vector<1x64xf32>
    %61 = vector.broadcast %60 : vector<1x64xf32> to vector<128x64xf32>
    %62 = arith.addf %59, %61 : vector<128x64xf32>
    %63 = vector.shape_cast %62 : vector<128x64xf32> to vector<8x16x64xf32>
    %c0_66 = arith.constant 0 : index
    %c0_67 = arith.constant 0 : index
    %c0_68 = arith.constant 0 : index
    %c0_69 = arith.constant 0 : index
    %64 = vector.load %arg11[%c0_66, %c0_67, %c0_68, %c0_69] : memref<1x8x16x64xf32, #tpu.memory_space<vmem>>, vector<1x8x16x64xf32>
    %65 = vector.shape_cast %64 : vector<1x8x16x64xf32> to vector<8x16x64xf32>
    %66 = vector.shape_cast %63 : vector<8x16x64xf32> to vector<1x8x16x64xf32>
    tpu.vector_store %arg11[%c0_66, %c0_67, %c0_68, %c0_69], %66 {strides = array<i32>} : memref<1x8x16x64xf32, #tpu.memory_space<vmem>>, vector<1x8x16x64xf32>,
    return
  }
  func.func @transform_0(%arg0: i32, %arg1: i32) -> (i32, i32, i32, i32) {
    %c8_i32 = arith.constant 8 : i32
    %0 = arith.muli %arg1, %c8_i32 : i32
    %c1_i32 = arith.constant 1 : i32
    %1 = arith.subi %0, %c1_i32 : i32
    %c0_i32 = arith.constant 0 : i32
    %2 = arith.maxsi %1, %c0_i32 : i32
    %c0_i32_0 = arith.constant 0 : i32
    %c0_i32_1 = arith.constant 0 : i32
    %c0_i32_2 = arith.constant 0 : i32
    return %arg0, %2, %c0_i32_0, %c0_i32_1 : i32, i32, i32, i32
  }
  func.func @transform_1(%arg0: i32, %arg1: i32) -> (i32, i32, i32, i32) {
    %c0_i32 = arith.constant 0 : i32
    %c0_i32_0 = arith.constant 0 : i32
    %c0_i32_1 = arith.constant 0 : i32
    return %arg0, %arg1, %c0_i32, %c0_i32_0 : i32, i32, i32, i32
  }
  func.func @transform_2(%arg0: i32, %arg1: i32) -> (i32, i32, i32, i32) {
    %c8_i32 = arith.constant 8 : i32
    %0 = arith.muli %arg1, %c8_i32 : i32
    %c8_i32_0 = arith.constant 8 : i32
    %1 = arith.addi %0, %c8_i32_0 : i32
    %c15_i32 = arith.constant 15 : i32
    %2 = arith.minsi %1, %c15_i32 : i32
    %c0_i32 = arith.constant 0 : i32
    %c0_i32_1 = arith.constant 0 : i32
    %c0_i32_2 = arith.constant 0 : i32
    return %arg0, %2, %c0_i32, %c0_i32_1 : i32, i32, i32, i32
  }
  func.func @transform_3(%arg0: i32, %arg1: i32) -> (i32, i32, i32) {
    %c0_i32 = arith.constant 0 : i32
    %c0_i32_0 = arith.constant 0 : i32
    %c0_i32_1 = arith.constant 0 : i32
    return %arg0, %c0_i32, %c0_i32_0 : i32, i32, i32
  }
  func.func @transform_4(%arg0: i32, %arg1: i32) -> (i32, i32, i32) {
    %c0_i32 = arith.constant 0 : i32
    %c0_i32_0 = arith.constant 0 : i32
    %c0_i32_1 = arith.constant 0 : i32
    return %arg0, %c0_i32, %c0_i32_0 : i32, i32, i32
  }
  func.func @transform_5(%arg0: i32, %arg1: i32) -> (i32, i32, i32) {
    %c0_i32 = arith.constant 0 : i32
    %c0_i32_0 = arith.constant 0 : i32
    %c0_i32_1 = arith.constant 0 : i32
    %c0_i32_2 = arith.constant 0 : i32
    return %c0_i32, %c0_i32_0, %c0_i32_1 : i32, i32, i32
  }
  func.func @transform_6(%arg0: i32, %arg1: i32) -> (i32, i32, i32) {
    %c0_i32 = arith.constant 0 : i32
    %c0_i32_0 = arith.constant 0 : i32
    %c0_i32_1 = arith.constant 0 : i32
    %c0_i32_2 = arith.constant 0 : i32
    return %c0_i32, %c0_i32_0, %c0_i32_1 : i32, i32, i32
  }
  func.func @transform_7(%arg0: i32, %arg1: i32) -> (i32, i32, i32) {
    %c0_i32 = arith.constant 0 : i32
    %c0_i32_0 = arith.constant 0 : i32
    %c0_i32_1 = arith.constant 0 : i32
    %c0_i32_2 = arith.constant 0 : i32
    return %c0_i32, %c0_i32_0, %c0_i32_1 : i32, i32, i32
  }
  func.func @transform_8(%arg0: i32, %arg1: i32) -> (i32, i32) {
    %c0_i32 = arith.constant 0 : i32
    %c0_i32_0 = arith.constant 0 : i32
    %c0_i32_1 = arith.constant 0 : i32
    return %c0_i32, %c0_i32_0 : i32, i32
  }
  func.func @transform_9(%arg0: i32, %arg1: i32) -> (i32, i32, i32, i32) {
    %c0_i32 = arith.constant 0 : i32
    %c0_i32_0 = arith.constant 0 : i32
    %c0_i32_1 = arith.constant 0 : i32
    return %arg0, %arg1, %c0_i32, %c0_i32_0 : i32, i32, i32, i32
  }
}

module attributes {stable_mosaic.version = 11 : i64} {
  func.func @gn_stats_kernel(%arg0: i32, %arg1: i32, %arg2: memref<1x8x16x64xf32, #tpu.memory_space<vmem>>, %arg3: memref<64x32xf32, #tpu.memory_space<vmem>>, %arg4: memref<1x1x64xf32, #tpu.memory_space<vmem>>, %arg5: memref<1x1x64xf32, #tpu.memory_space<vmem>>, %arg6: memref<1x64xf32, #tpu.memory_space<vmem>>, %arg7: memref<1x64xf32, #tpu.memory_space<vmem>>) attributes {dimension_semantics = [#tpu.dimension_semantics<parallel>, #tpu.dimension_semantics<arbitrary>], iteration_bounds = array<i64: 2, 2>, scalar_prefetch = 0 : i64, scratch_operands = 2 : i64, tpu.core_type = #tpu.core_type<tc>, window_params = [{transform_indices = @transform_0, window_bounds = array<i64: 1, 8, 16, 64>}, {pipeline_mode = #tpu.pipeline_mode<synchronous>, transform_indices = @transform_1, window_bounds = array<i64: 64, 32>}, {transform_indices = @transform_2, window_bounds = array<i64: 1, 1, 64>}, {transform_indices = @transform_3, window_bounds = array<i64: 1, 1, 64>}]} {
    %c0_i32 = arith.constant 0 : i32
    %0 = arith.cmpi eq, %arg1, %c0_i32 : i32
    %1 = arith.extui %0 : i1 to i32
    %c0_i32_0 = arith.constant 0 : i32
    %2 = arith.cmpi ne, %1, %c0_i32_0 : i32
    scf.if %2 {
      %cst_14 = arith.constant 0.000000e+00 : f32
      %20 = vector.broadcast %cst_14 : f32 to vector<1x64xf32>
      %c0_15 = arith.constant 0 : index
      %c0_16 = arith.constant 0 : index
      %21 = vector.load %arg6[%c0_15, %c0_16] : memref<1x64xf32, #tpu.memory_space<vmem>>, vector<1x64xf32>
      tpu.vector_store %arg6[%c0_15, %c0_16], %20 {strides = array<i32>} : memref<1x64xf32, #tpu.memory_space<vmem>>, vector<1x64xf32>,
      %cst_17 = arith.constant 0.000000e+00 : f32
      %22 = vector.broadcast %cst_17 : f32 to vector<1x64xf32>
      %c0_18 = arith.constant 0 : index
      %c0_19 = arith.constant 0 : index
      %23 = vector.load %arg7[%c0_18, %c0_19] : memref<1x64xf32, #tpu.memory_space<vmem>>, vector<1x64xf32>
      tpu.vector_store %arg7[%c0_18, %c0_19], %22 {strides = array<i32>} : memref<1x64xf32, #tpu.memory_space<vmem>>, vector<1x64xf32>,
    } else {
    }
    %c0 = arith.constant 0 : index
    %c0_1 = arith.constant 0 : index
    %c0_2 = arith.constant 0 : index
    %c0_3 = arith.constant 0 : index
    %3 = vector.load %arg2[%c0, %c0_1, %c0_2, %c0_3] : memref<1x8x16x64xf32, #tpu.memory_space<vmem>>, vector<1x8x16x64xf32>
    %4 = vector.shape_cast %3 : vector<1x8x16x64xf32> to vector<8x16x64xf32>
    %5 = vector.shape_cast %4 : vector<8x16x64xf32> to vector<128x64xf32>
    %c0_4 = arith.constant 0 : index
    %c0_5 = arith.constant 0 : index
    %6 = vector.load %arg6[%c0_4, %c0_5] : memref<1x64xf32, #tpu.memory_space<vmem>>, vector<1x64xf32>
    %cst = arith.constant dense<0.000000e+00> : vector<64xf32>
    %7 = vector.multi_reduction <add>, %5, %cst [0] : vector<128x64xf32> to vector<64xf32>
    %8 = vector.shape_cast %7 : vector<64xf32> to vector<1x64xf32>
    %9 = arith.addf %6, %8 : vector<1x64xf32>
    %c0_6 = arith.constant 0 : index
    %c0_7 = arith.constant 0 : index
    %10 = vector.load %arg6[%c0_6, %c0_7] : memref<1x64xf32, #tpu.memory_space<vmem>>, vector<1x64xf32>
    tpu.vector_store %arg6[%c0_6, %c0_7], %9 {strides = array<i32>} : memref<1x64xf32, #tpu.memory_space<vmem>>, vector<1x64xf32>,
    %c0_8 = arith.constant 0 : index
    %c0_9 = arith.constant 0 : index
    %11 = vector.load %arg7[%c0_8, %c0_9] : memref<1x64xf32, #tpu.memory_space<vmem>>, vector<1x64xf32>
    %12 = arith.mulf %5, %5 : vector<128x64xf32>
    %cst_10 = arith.constant dense<0.000000e+00> : vector<64xf32>
    %13 = vector.multi_reduction <add>, %12, %cst_10 [0] : vector<128x64xf32> to vector<64xf32>
    %14 = vector.shape_cast %13 : vector<64xf32> to vector<1x64xf32>
    %15 = arith.addf %11, %14 : vector<1x64xf32>
    %c0_11 = arith.constant 0 : index
    %c0_12 = arith.constant 0 : index
    %16 = vector.load %arg7[%c0_11, %c0_12] : memref<1x64xf32, #tpu.memory_space<vmem>>, vector<1x64xf32>
    tpu.vector_store %arg7[%c0_11, %c0_12], %15 {strides = array<i32>} : memref<1x64xf32, #tpu.memory_space<vmem>>, vector<1x64xf32>,
    %c1_i32 = arith.constant 1 : i32
    %17 = arith.cmpi eq, %arg1, %c1_i32 : i32
    %18 = arith.extui %17 : i1 to i32
    %c0_i32_13 = arith.constant 0 : i32
    %19 = arith.cmpi ne, %18, %c0_i32_13 : i32
    scf.if %19 {
      %c0_14 = arith.constant 0 : index
      %c0_15 = arith.constant 0 : index
      %20 = vector.load %arg3[%c0_14, %c0_15] : memref<64x32xf32, #tpu.memory_space<vmem>>, vector<64x32xf32>
      %c0_16 = arith.constant 0 : index
      %c0_17 = arith.constant 0 : index
      %21 = vector.load %arg6[%c0_16, %c0_17] : memref<1x64xf32, #tpu.memory_space<vmem>>, vector<1x64xf32>
      %cst_18 = arith.constant dense<0.000000e+00> : vector<1x32xf32>
      %22 = tpu.matmul %21, %20, %cst_18 {dimension_numbers = #tpu.dot_dimension_numbers<[1], [0], [0], [1], [0, 0, 1, 1], [], []>} : vector<1x64xf32>, vector<64x32xf32>, vector<1x32xf32> -> vector<1x32xf32>
      %c0_19 = arith.constant 0 : index
      %c0_20 = arith.constant 0 : index
      %23 = vector.load %arg7[%c0_19, %c0_20] : memref<1x64xf32, #tpu.memory_space<vmem>>, vector<1x64xf32>
      %cst_21 = arith.constant dense<0.000000e+00> : vector<1x32xf32>
      %24 = tpu.matmul %23, %20, %cst_21 {dimension_numbers = #tpu.dot_dimension_numbers<[1], [0], [0], [1], [0, 0, 1, 1], [], []>} : vector<1x64xf32>, vector<64x32xf32>, vector<1x32xf32> -> vector<1x32xf32>
      %cst_22 = arith.constant 0.001953125 : f32
      %25 = vector.broadcast %cst_22 : f32 to vector<1x32xf32>
      %26 = arith.mulf %22, %25 : vector<1x32xf32>
      %cst_23 = arith.constant 0.001953125 : f32
      %27 = vector.broadcast %cst_23 : f32 to vector<1x32xf32>
      %28 = arith.mulf %24, %27 : vector<1x32xf32>
      %29 = arith.mulf %26, %26 : vector<1x32xf32>
      %30 = arith.subf %28, %29 : vector<1x32xf32>
      %cst_24 = arith.constant 9.99999997E-7 : f32
      %31 = vector.broadcast %cst_24 : f32 to vector<1x32xf32>
      %32 = arith.addf %30, %31 : vector<1x32xf32>
      %33 = math.rsqrt %32 : vector<1x32xf32>
      %34 = tpu.transpose %20, [1, 0] : vector<64x32xf32> -> vector<32x64xf32>
      %cst_25 = arith.constant dense<0.000000e+00> : vector<1x64xf32>
      %35 = tpu.matmul %26, %34, %cst_25 {dimension_numbers = #tpu.dot_dimension_numbers<[1], [0], [0], [1], [0, 0, 1, 1], [], []>} : vector<1x32xf32>, vector<32x64xf32>, vector<1x64xf32> -> vector<1x64xf32>
      %c0_26 = arith.constant 0 : index
      %c0_27 = arith.constant 0 : index
      %c0_28 = arith.constant 0 : index
      %36 = vector.load %arg4[%c0_26, %c0_27, %c0_28] : memref<1x1x64xf32, #tpu.memory_space<vmem>>, vector<1x1x64xf32>
      %37 = vector.shape_cast %36 : vector<1x1x64xf32> to vector<1x64xf32>
      %38 = vector.shape_cast %35 : vector<1x64xf32> to vector<1x1x64xf32>
      tpu.vector_store %arg4[%c0_26, %c0_27, %c0_28], %38 {strides = array<i32>} : memref<1x1x64xf32, #tpu.memory_space<vmem>>, vector<1x1x64xf32>,
      %39 = tpu.transpose %20, [1, 0] : vector<64x32xf32> -> vector<32x64xf32>
      %cst_29 = arith.constant dense<0.000000e+00> : vector<1x64xf32>
      %40 = tpu.matmul %33, %39, %cst_29 {dimension_numbers = #tpu.dot_dimension_numbers<[1], [0], [0], [1], [0, 0, 1, 1], [], []>} : vector<1x32xf32>, vector<32x64xf32>, vector<1x64xf32> -> vector<1x64xf32>
      %c0_30 = arith.constant 0 : index
      %c0_31 = arith.constant 0 : index
      %c0_32 = arith.constant 0 : index
      %41 = vector.load %arg5[%c0_30, %c0_31, %c0_32] : memref<1x1x64xf32, #tpu.memory_space<vmem>>, vector<1x1x64xf32>
      %42 = vector.shape_cast %41 : vector<1x1x64xf32> to vector<1x64xf32>
      %43 = vector.shape_cast %40 : vector<1x64xf32> to vector<1x1x64xf32>
      tpu.vector_store %arg5[%c0_30, %c0_31, %c0_32], %43 {strides = array<i32>} : memref<1x1x64xf32, #tpu.memory_space<vmem>>, vector<1x1x64xf32>,
    } else {
    }
    return
  }
  func.func @transform_0(%arg0: i32, %arg1: i32) -> (i32, i32, i32, i32) {
    %c0_i32 = arith.constant 0 : i32
    %c0_i32_0 = arith.constant 0 : i32
    %c0_i32_1 = arith.constant 0 : i32
    return %arg0, %arg1, %c0_i32, %c0_i32_0 : i32, i32, i32, i32
  }
  func.func @transform_1(%arg0: i32, %arg1: i32) -> (i32, i32) {
    %c0_i32 = arith.constant 0 : i32
    %c0_i32_0 = arith.constant 0 : i32
    %c0_i32_1 = arith.constant 0 : i32
    return %c0_i32, %c0_i32_0 : i32, i32
  }
  func.func @transform_2(%arg0: i32, %arg1: i32) -> (i32, i32, i32) {
    %c0_i32 = arith.constant 0 : i32
    %c0_i32_0 = arith.constant 0 : i32
    %c0_i32_1 = arith.constant 0 : i32
    return %arg0, %c0_i32, %c0_i32_0 : i32, i32, i32
  }
  func.func @transform_3(%arg0: i32, %arg1: i32) -> (i32, i32, i32) {
    %c0_i32 = arith.constant 0 : i32
    %c0_i32_0 = arith.constant 0 : i32
    %c0_i32_1 = arith.constant 0 : i32
    return %arg0, %c0_i32, %c0_i32_0 : i32, i32, i32
  }
}

module attributes {stable_mosaic.version = 11 : i64} {
  func.func @gn_swish_conv_nin_kernel(%arg0: i32, %arg1: i32, %arg2: memref<1x1x16x64xf32, #tpu.memory_space<vmem>>, %arg3: memref<1x8x16x64xf32, #tpu.memory_space<vmem>>, %arg4: memref<1x1x16x64xf32, #tpu.memory_space<vmem>>, %arg5: memref<1x1x64xf32, #tpu.memory_space<vmem>>, %arg6: memref<1x1x64xf32, #tpu.memory_space<vmem>>, %arg7: memref<1x1x64xf32, #tpu.memory_space<vmem>>, %arg8: memref<1x1x64xf32, #tpu.memory_space<vmem>>, %arg9: memref<3x192x64xf32, #tpu.memory_space<vmem>>, %arg10: memref<1x64xf32, #tpu.memory_space<vmem>>, %arg11: memref<1x8x16x32xf32, #tpu.memory_space<vmem>>, %arg12: memref<32x64xf32, #tpu.memory_space<vmem>>, %arg13: memref<1x64xf32, #tpu.memory_space<vmem>>, %arg14: memref<1x8x16x64xf32, #tpu.memory_space<vmem>>, %arg15: memref<10x16x192xf32, #tpu.memory_space<vmem>>, %arg16: memref<128x64xf32, #tpu.memory_space<vmem>>) attributes {dimension_semantics = [#tpu.dimension_semantics<parallel>, #tpu.dimension_semantics<parallel>], iteration_bounds = array<i64: 2, 2>, scalar_prefetch = 0 : i64, scratch_operands = 2 : i64, tpu.core_type = #tpu.core_type<tc>, window_params = [{transform_indices = @transform_0, window_bounds = array<i64: 1, 1, 16, 64>}, {transform_indices = @transform_1, window_bounds = array<i64: 1, 8, 16, 64>}, {transform_indices = @transform_2, window_bounds = array<i64: 1, 1, 16, 64>}, {transform_indices = @transform_3, window_bounds = array<i64: 1, 1, 64>}, {transform_indices = @transform_4, window_bounds = array<i64: 1, 1, 64>}, {pipeline_mode = #tpu.pipeline_mode<synchronous>, transform_indices = @transform_5, window_bounds = array<i64: 1, 1, 64>}, {pipeline_mode = #tpu.pipeline_mode<synchronous>, transform_indices = @transform_6, window_bounds = array<i64: 1, 1, 64>}, {pipeline_mode = #tpu.pipeline_mode<synchronous>, transform_indices = @transform_7, window_bounds = array<i64: 3, 192, 64>}, {pipeline_mode = #tpu.pipeline_mode<synchronous>, transform_indices = @transform_8, window_bounds = array<i64: 1, 64>}, {transform_indices = @transform_9, window_bounds = array<i64: 1, 8, 16, 32>}, {pipeline_mode = #tpu.pipeline_mode<synchronous>, transform_indices = @transform_10, window_bounds = array<i64: 32, 64>}, {pipeline_mode = #tpu.pipeline_mode<synchronous>, transform_indices = @transform_11, window_bounds = array<i64: 1, 64>}, {transform_indices = @transform_12, window_bounds = array<i64: 1, 8, 16, 64>}]} {
    %c0 = arith.constant 0 : index
    %c0_0 = arith.constant 0 : index
    %c0_1 = arith.constant 0 : index
    %0 = vector.load %arg5[%c0, %c0_0, %c0_1] : memref<1x1x64xf32, #tpu.memory_space<vmem>>, vector<1x1x64xf32>
    %c0_2 = arith.constant 0 : index
    %c0_3 = arith.constant 0 : index
    %c0_4 = arith.constant 0 : index
    %1 = vector.load %arg6[%c0_2, %c0_3, %c0_4] : memref<1x1x64xf32, #tpu.memory_space<vmem>>, vector<1x1x64xf32>
    %c0_5 = arith.constant 0 : index
    %c0_6 = arith.constant 0 : index
    %c0_7 = arith.constant 0 : index
    %2 = vector.load %arg7[%c0_5, %c0_6, %c0_7] : memref<1x1x64xf32, #tpu.memory_space<vmem>>, vector<1x1x64xf32>
    %c0_8 = arith.constant 0 : index
    %c0_9 = arith.constant 0 : index
    %c0_10 = arith.constant 0 : index
    %3 = vector.load %arg8[%c0_8, %c0_9, %c0_10] : memref<1x1x64xf32, #tpu.memory_space<vmem>>, vector<1x1x64xf32>
    %cst = arith.constant 0.000000e+00 : f32
    %4 = vector.broadcast %cst : f32 to vector<10x16x192xf32>
    %c0_11 = arith.constant 0 : index
    %c0_12 = arith.constant 0 : index
    %c0_13 = arith.constant 0 : index
    %5 = vector.load %arg15[%c0_11, %c0_12, %c0_13] : memref<10x16x192xf32, #tpu.memory_space<vmem>>, vector<10x16x192xf32>
    tpu.vector_store %arg15[%c0_11, %c0_12, %c0_13], %4 {strides = array<i32>} : memref<10x16x192xf32, #tpu.memory_space<vmem>>, vector<10x16x192xf32>,
    %c0_14 = arith.constant 0 : index
    %c0_15 = arith.constant 0 : index
    %c0_16 = arith.constant 0 : index
    %c0_17 = arith.constant 0 : index
    %6 = vector.load %arg3[%c0_14, %c0_15, %c0_16, %c0_17] : memref<1x8x16x64xf32, #tpu.memory_space<vmem>>, vector<1x8x16x64xf32>
    %7 = vector.shape_cast %6 : vector<1x8x16x64xf32> to vector<8x16x64xf32>
    %8 = vector.broadcast %0 : vector<1x1x64xf32> to vector<8x16x64xf32>
    %9 = arith.subf %7, %8 : vector<8x16x64xf32>
    %10 = vector.broadcast %1 : vector<1x1x64xf32> to vector<8x16x64xf32>
    %11 = arith.mulf %9, %10 : vector<8x16x64xf32>
    %12 = vector.broadcast %2 : vector<1x1x64xf32> to vector<8x16x64xf32>
    %13 = arith.mulf %11, %12 : vector<8x16x64xf32>
    %14 = vector.broadcast %3 : vector<1x1x64xf32> to vector<8x16x64xf32>
    %15 = arith.addf %13, %14 : vector<8x16x64xf32>
    %16 = arith.negf %15 : vector<8x16x64xf32>
    %17 = math.exp %16 : vector<8x16x64xf32>
    %cst_18 = arith.constant 1.000000e+00 : f32
    %18 = vector.broadcast %cst_18 : f32 to vector<8x16x64xf32>
    %19 = arith.addf %18, %17 : vector<8x16x64xf32>
    %20 = arith.divf %18, %19 : vector<8x16x64xf32>
    %21 = arith.mulf %15, %20 : vector<8x16x64xf32>
    %22 = vector.extract_strided_slice %21 {offsets = [0, 0, 0], sizes = [8, 15, 64], strides = [1, 1, 1]} : vector<8x16x64xf32> to vector<8x15x64xf32>
    %c1 = arith.constant 1 : index
    %c1_19 = arith.constant 1 : index
    %c0_20 = arith.constant 0 : index
    %23 = vector.load %arg15[%c1, %c1_19, %c0_20] : memref<10x16x192xf32, #tpu.memory_space<vmem>>, vector<8x15x64xf32>
    tpu.vector_store %arg15[%c1, %c1_19, %c0_20], %22 {strides = array<i32>} : memref<10x16x192xf32, #tpu.memory_space<vmem>>, vector<8x15x64xf32>,
    %c1_21 = arith.constant 1 : index
    %c0_22 = arith.constant 0 : index
    %c64 = arith.constant 64 : index
    %24 = vector.load %arg15[%c1_21, %c0_22, %c64] : memref<10x16x192xf32, #tpu.memory_space<vmem>>, vector<8x16x64xf32>
    tpu.vector_store %arg15[%c1_21, %c0_22, %c64], %21 {strides = array<i32>} : memref<10x16x192xf32, #tpu.memory_space<vmem>>, vector<8x16x64xf32>,
    %25 = vector.extract_strided_slice %21 {offsets = [0, 1, 0], sizes = [8, 15, 64], strides = [1, 1, 1]} : vector<8x16x64xf32> to vector<8x15x64xf32>
    %c1_23 = arith.constant 1 : index
    %c0_24 = arith.constant 0 : index
    %c128 = arith.constant 128 : index
    %26 = vector.load %arg15[%c1_23, %c0_24, %c128] : memref<10x16x192xf32, #tpu.memory_space<vmem>>, vector<8x15x64xf32>
    tpu.vector_store %arg15[%c1_23, %c0_24, %c128], %25 {strides = array<i32>} : memref<10x16x192xf32, #tpu.memory_space<vmem>>, vector<8x15x64xf32>,
    %c0_i32 = arith.constant 0 : i32
    %27 = arith.cmpi sgt, %arg1, %c0_i32 : i32
    %28 = arith.extui %27 : i1 to i32
    %c0_i32_25 = arith.constant 0 : i32
    %29 = arith.cmpi ne, %28, %c0_i32_25 : i32
    scf.if %29 {
      %c0_79 = arith.constant 0 : index
      %c0_80 = arith.constant 0 : index
      %c0_81 = arith.constant 0 : index
      %c0_82 = arith.constant 0 : index
      %76 = vector.load %arg2[%c0_79, %c0_80, %c0_81, %c0_82] : memref<1x1x16x64xf32, #tpu.memory_space<vmem>>, vector<1x1x16x64xf32>
      %77 = vector.shape_cast %76 : vector<1x1x16x64xf32> to vector<1x16x64xf32>
      %78 = vector.broadcast %0 : vector<1x1x64xf32> to vector<1x16x64xf32>
      %79 = arith.subf %77, %78 : vector<1x16x64xf32>
      %80 = vector.broadcast %1 : vector<1x1x64xf32> to vector<1x16x64xf32>
      %81 = arith.mulf %79, %80 : vector<1x16x64xf32>
      %82 = vector.broadcast %2 : vector<1x1x64xf32> to vector<1x16x64xf32>
      %83 = arith.mulf %81, %82 : vector<1x16x64xf32>
      %84 = vector.broadcast %3 : vector<1x1x64xf32> to vector<1x16x64xf32>
      %85 = arith.addf %83, %84 : vector<1x16x64xf32>
      %86 = arith.negf %85 : vector<1x16x64xf32>
      %87 = math.exp %86 : vector<1x16x64xf32>
      %cst_83 = arith.constant 1.000000e+00 : f32
      %88 = vector.broadcast %cst_83 : f32 to vector<1x16x64xf32>
      %89 = arith.addf %88, %87 : vector<1x16x64xf32>
      %90 = arith.divf %88, %89 : vector<1x16x64xf32>
      %91 = arith.mulf %85, %90 : vector<1x16x64xf32>
      %92 = vector.extract_strided_slice %91 {offsets = [0, 0, 0], sizes = [1, 15, 64], strides = [1, 1, 1]} : vector<1x16x64xf32> to vector<1x15x64xf32>
      %c0_84 = arith.constant 0 : index
      %c1_85 = arith.constant 1 : index
      %c0_86 = arith.constant 0 : index
      %93 = vector.load %arg15[%c0_84, %c1_85, %c0_86] : memref<10x16x192xf32, #tpu.memory_space<vmem>>, vector<1x15x64xf32>
      tpu.vector_store %arg15[%c0_84, %c1_85, %c0_86], %92 {strides = array<i32>} : memref<10x16x192xf32, #tpu.memory_space<vmem>>, vector<1x15x64xf32>,
      %c0_87 = arith.constant 0 : index
      %c0_88 = arith.constant 0 : index
      %c64_89 = arith.constant 64 : index
      %94 = vector.load %arg15[%c0_87, %c0_88, %c64_89] : memref<10x16x192xf32, #tpu.memory_space<vmem>>, vector<1x16x64xf32>
      tpu.vector_store %arg15[%c0_87, %c0_88, %c64_89], %91 {strides = array<i32>} : memref<10x16x192xf32, #tpu.memory_space<vmem>>, vector<1x16x64xf32>,
      %95 = vector.extract_strided_slice %91 {offsets = [0, 1, 0], sizes = [1, 15, 64], strides = [1, 1, 1]} : vector<1x16x64xf32> to vector<1x15x64xf32>
      %c0_90 = arith.constant 0 : index
      %c0_91 = arith.constant 0 : index
      %c128_92 = arith.constant 128 : index
      %96 = vector.load %arg15[%c0_90, %c0_91, %c128_92] : memref<10x16x192xf32, #tpu.memory_space<vmem>>, vector<1x15x64xf32>
      tpu.vector_store %arg15[%c0_90, %c0_91, %c128_92], %95 {strides = array<i32>} : memref<10x16x192xf32, #tpu.memory_space<vmem>>, vector<1x15x64xf32>,
    } else {
    }
    %c1_i32 = arith.constant 1 : i32
    %30 = arith.cmpi slt, %arg1, %c1_i32 : i32
    %31 = arith.extui %30 : i1 to i32
    %c0_i32_26 = arith.constant 0 : i32
    %32 = arith.cmpi ne, %31, %c0_i32_26 : i32
    scf.if %32 {
      %c0_79 = arith.constant 0 : index
      %c0_80 = arith.constant 0 : index
      %c0_81 = arith.constant 0 : index
      %c0_82 = arith.constant 0 : index
      %76 = vector.load %arg4[%c0_79, %c0_80, %c0_81, %c0_82] : memref<1x1x16x64xf32, #tpu.memory_space<vmem>>, vector<1x1x16x64xf32>
      %77 = vector.shape_cast %76 : vector<1x1x16x64xf32> to vector<1x16x64xf32>
      %78 = vector.broadcast %0 : vector<1x1x64xf32> to vector<1x16x64xf32>
      %79 = arith.subf %77, %78 : vector<1x16x64xf32>
      %80 = vector.broadcast %1 : vector<1x1x64xf32> to vector<1x16x64xf32>
      %81 = arith.mulf %79, %80 : vector<1x16x64xf32>
      %82 = vector.broadcast %2 : vector<1x1x64xf32> to vector<1x16x64xf32>
      %83 = arith.mulf %81, %82 : vector<1x16x64xf32>
      %84 = vector.broadcast %3 : vector<1x1x64xf32> to vector<1x16x64xf32>
      %85 = arith.addf %83, %84 : vector<1x16x64xf32>
      %86 = arith.negf %85 : vector<1x16x64xf32>
      %87 = math.exp %86 : vector<1x16x64xf32>
      %cst_83 = arith.constant 1.000000e+00 : f32
      %88 = vector.broadcast %cst_83 : f32 to vector<1x16x64xf32>
      %89 = arith.addf %88, %87 : vector<1x16x64xf32>
      %90 = arith.divf %88, %89 : vector<1x16x64xf32>
      %91 = arith.mulf %85, %90 : vector<1x16x64xf32>
      %92 = vector.extract_strided_slice %91 {offsets = [0, 0, 0], sizes = [1, 15, 64], strides = [1, 1, 1]} : vector<1x16x64xf32> to vector<1x15x64xf32>
      %c9 = arith.constant 9 : index
      %c1_84 = arith.constant 1 : index
      %c0_85 = arith.constant 0 : index
      %93 = vector.load %arg15[%c9, %c1_84, %c0_85] : memref<10x16x192xf32, #tpu.memory_space<vmem>>, vector<1x15x64xf32>
      tpu.vector_store %arg15[%c9, %c1_84, %c0_85], %92 {strides = array<i32>} : memref<10x16x192xf32, #tpu.memory_space<vmem>>, vector<1x15x64xf32>,
      %c9_86 = arith.constant 9 : index
      %c0_87 = arith.constant 0 : index
      %c64_88 = arith.constant 64 : index
      %94 = vector.load %arg15[%c9_86, %c0_87, %c64_88] : memref<10x16x192xf32, #tpu.memory_space<vmem>>, vector<1x16x64xf32>
      tpu.vector_store %arg15[%c9_86, %c0_87, %c64_88], %91 {strides = array<i32>} : memref<10x16x192xf32, #tpu.memory_space<vmem>>, vector<1x16x64xf32>,
      %95 = vector.extract_strided_slice %91 {offsets = [0, 1, 0], sizes = [1, 15, 64], strides = [1, 1, 1]} : vector<1x16x64xf32> to vector<1x15x64xf32>
      %c9_89 = arith.constant 9 : index
      %c0_90 = arith.constant 0 : index
      %c128_91 = arith.constant 128 : index
      %96 = vector.load %arg15[%c9_89, %c0_90, %c128_91] : memref<10x16x192xf32, #tpu.memory_space<vmem>>, vector<1x15x64xf32>
      tpu.vector_store %arg15[%c9_89, %c0_90, %c128_91], %95 {strides = array<i32>} : memref<10x16x192xf32, #tpu.memory_space<vmem>>, vector<1x15x64xf32>,
    } else {
    }
    %cst_27 = arith.constant 0.000000e+00 : f32
    %33 = vector.broadcast %cst_27 : f32 to vector<128x64xf32>
    %c0_28 = arith.constant 0 : index
    %c0_29 = arith.constant 0 : index
    %34 = vector.load %arg16[%c0_28, %c0_29] : memref<128x64xf32, #tpu.memory_space<vmem>>, vector<128x64xf32>
    tpu.vector_store %arg16[%c0_28, %c0_29], %33 {strides = array<i32>} : memref<128x64xf32, #tpu.memory_space<vmem>>, vector<128x64xf32>,
    %c0_30 = arith.constant 0 : index
    %c0_31 = arith.constant 0 : index
    %c0_32 = arith.constant 0 : index
    %35 = vector.load %arg15[%c0_30, %c0_31, %c0_32] : memref<10x16x192xf32, #tpu.memory_space<vmem>>, vector<8x16x192xf32>
    %36 = vector.shape_cast %35 : vector<8x16x192xf32> to vector<128x192xf32>
    %c0_33 = arith.constant 0 : index
    %c0_34 = arith.constant 0 : index
    %37 = vector.load %arg16[%c0_33, %c0_34] : memref<128x64xf32, #tpu.memory_space<vmem>>, vector<128x64xf32>
    %c0_35 = arith.constant 0 : index
    %c0_36 = arith.constant 0 : index
    %c0_37 = arith.constant 0 : index
    %38 = vector.load %arg9[%c0_35, %c0_36, %c0_37] : memref<3x192x64xf32, #tpu.memory_space<vmem>>, vector<1x192x64xf32>
    %39 = vector.shape_cast %38 : vector<1x192x64xf32> to vector<192x64xf32>
    %cst_38 = arith.constant dense<0.000000e+00> : vector<128x64xf32>
    %40 = tpu.matmul %36, %39, %cst_38 {dimension_numbers = #tpu.dot_dimension_numbers<[1], [0], [0], [1], [0, 0, 1, 1], [], []>} : vector<128x192xf32>, vector<192x64xf32>, vector<128x64xf32> -> vector<128x64xf32>
    %41 = arith.addf %37, %40 : vector<128x64xf32>
    %c0_39 = arith.constant 0 : index
    %c0_40 = arith.constant 0 : index
    %42 = vector.load %arg16[%c0_39, %c0_40] : memref<128x64xf32, #tpu.memory_space<vmem>>, vector<128x64xf32>
    tpu.vector_store %arg16[%c0_39, %c0_40], %41 {strides = array<i32>} : memref<128x64xf32, #tpu.memory_space<vmem>>, vector<128x64xf32>,
    %c1_41 = arith.constant 1 : index
    %c0_42 = arith.constant 0 : index
    %c0_43 = arith.constant 0 : index
    %43 = vector.load %arg15[%c1_41, %c0_42, %c0_43] : memref<10x16x192xf32, #tpu.memory_space<vmem>>, vector<8x16x192xf32>
    %44 = vector.shape_cast %43 : vector<8x16x192xf32> to vector<128x192xf32>
    %c0_44 = arith.constant 0 : index
    %c0_45 = arith.constant 0 : index
    %45 = vector.load %arg16[%c0_44, %c0_45] : memref<128x64xf32, #tpu.memory_space<vmem>>, vector<128x64xf32>
    %c1_46 = arith.constant 1 : index
    %c0_47 = arith.constant 0 : index
    %c0_48 = arith.constant 0 : index
    %46 = vector.load %arg9[%c1_46, %c0_47, %c0_48] : memref<3x192x64xf32, #tpu.memory_space<vmem>>, vector<1x192x64xf32>
    %47 = vector.shape_cast %46 : vector<1x192x64xf32> to vector<192x64xf32>
    %cst_49 = arith.constant dense<0.000000e+00> : vector<128x64xf32>
    %48 = tpu.matmul %44, %47, %cst_49 {dimension_numbers = #tpu.dot_dimension_numbers<[1], [0], [0], [1], [0, 0, 1, 1], [], []>} : vector<128x192xf32>, vector<192x64xf32>, vector<128x64xf32> -> vector<128x64xf32>
    %49 = arith.addf %45, %48 : vector<128x64xf32>
    %c0_50 = arith.constant 0 : index
    %c0_51 = arith.constant 0 : index
    %50 = vector.load %arg16[%c0_50, %c0_51] : memref<128x64xf32, #tpu.memory_space<vmem>>, vector<128x64xf32>
    tpu.vector_store %arg16[%c0_50, %c0_51], %49 {strides = array<i32>} : memref<128x64xf32, #tpu.memory_space<vmem>>, vector<128x64xf32>,
    %c2 = arith.constant 2 : index
    %c0_52 = arith.constant 0 : index
    %c0_53 = arith.constant 0 : index
    %51 = vector.load %arg15[%c2, %c0_52, %c0_53] : memref<10x16x192xf32, #tpu.memory_space<vmem>>, vector<8x16x192xf32>
    %52 = vector.shape_cast %51 : vector<8x16x192xf32> to vector<128x192xf32>
    %c0_54 = arith.constant 0 : index
    %c0_55 = arith.constant 0 : index
    %53 = vector.load %arg16[%c0_54, %c0_55] : memref<128x64xf32, #tpu.memory_space<vmem>>, vector<128x64xf32>
    %c2_56 = arith.constant 2 : index
    %c0_57 = arith.constant 0 : index
    %c0_58 = arith.constant 0 : index
    %54 = vector.load %arg9[%c2_56, %c0_57, %c0_58] : memref<3x192x64xf32, #tpu.memory_space<vmem>>, vector<1x192x64xf32>
    %55 = vector.shape_cast %54 : vector<1x192x64xf32> to vector<192x64xf32>
    %cst_59 = arith.constant dense<0.000000e+00> : vector<128x64xf32>
    %56 = tpu.matmul %52, %55, %cst_59 {dimension_numbers = #tpu.dot_dimension_numbers<[1], [0], [0], [1], [0, 0, 1, 1], [], []>} : vector<128x192xf32>, vector<192x64xf32>, vector<128x64xf32> -> vector<128x64xf32>
    %57 = arith.addf %53, %56 : vector<128x64xf32>
    %c0_60 = arith.constant 0 : index
    %c0_61 = arith.constant 0 : index
    %58 = vector.load %arg16[%c0_60, %c0_61] : memref<128x64xf32, #tpu.memory_space<vmem>>, vector<128x64xf32>
    tpu.vector_store %arg16[%c0_60, %c0_61], %57 {strides = array<i32>} : memref<128x64xf32, #tpu.memory_space<vmem>>, vector<128x64xf32>,
    %c0_62 = arith.constant 0 : index
    %c0_63 = arith.constant 0 : index
    %c0_64 = arith.constant 0 : index
    %c0_65 = arith.constant 0 : index
    %59 = vector.load %arg11[%c0_62, %c0_63, %c0_64, %c0_65] : memref<1x8x16x32xf32, #tpu.memory_space<vmem>>, vector<1x8x16x32xf32>
    %60 = vector.shape_cast %59 : vector<1x8x16x32xf32> to vector<8x16x32xf32>
    %61 = vector.shape_cast %60 : vector<8x16x32xf32> to vector<128x32xf32>
    %c0_66 = arith.constant 0 : index
    %c0_67 = arith.constant 0 : index
    %62 = vector.load %arg12[%c0_66, %c0_67] : memref<32x64xf32, #tpu.memory_space<vmem>>, vector<32x64xf32>
    %cst_68 = arith.constant dense<0.000000e+00> : vector<128x64xf32>
    %63 = tpu.matmul %61, %62, %cst_68 {dimension_numbers = #tpu.dot_dimension_numbers<[1], [0], [0], [1], [0, 0, 1, 1], [], []>} : vector<128x32xf32>, vector<32x64xf32>, vector<128x64xf32> -> vector<128x64xf32>
    %c0_69 = arith.constant 0 : index
    %c0_70 = arith.constant 0 : index
    %64 = vector.load %arg16[%c0_69, %c0_70] : memref<128x64xf32, #tpu.memory_space<vmem>>, vector<128x64xf32>
    %c0_71 = arith.constant 0 : index
    %c0_72 = arith.constant 0 : index
    %65 = vector.load %arg10[%c0_71, %c0_72] : memref<1x64xf32, #tpu.memory_space<vmem>>, vector<1x64xf32>
    %66 = vector.broadcast %65 : vector<1x64xf32> to vector<128x64xf32>
    %67 = arith.addf %64, %66 : vector<128x64xf32>
    %68 = arith.addf %67, %63 : vector<128x64xf32>
    %c0_73 = arith.constant 0 : index
    %c0_74 = arith.constant 0 : index
    %69 = vector.load %arg13[%c0_73, %c0_74] : memref<1x64xf32, #tpu.memory_space<vmem>>, vector<1x64xf32>
    %70 = vector.broadcast %69 : vector<1x64xf32> to vector<128x64xf32>
    %71 = arith.addf %68, %70 : vector<128x64xf32>
    %72 = vector.shape_cast %71 : vector<128x64xf32> to vector<8x16x64xf32>
    %c0_75 = arith.constant 0 : index
    %c0_76 = arith.constant 0 : index
    %c0_77 = arith.constant 0 : index
    %c0_78 = arith.constant 0 : index
    %73 = vector.load %arg14[%c0_75, %c0_76, %c0_77, %c0_78] : memref<1x8x16x64xf32, #tpu.memory_space<vmem>>, vector<1x8x16x64xf32>
    %74 = vector.shape_cast %73 : vector<1x8x16x64xf32> to vector<8x16x64xf32>
    %75 = vector.shape_cast %72 : vector<8x16x64xf32> to vector<1x8x16x64xf32>
    tpu.vector_store %arg14[%c0_75, %c0_76, %c0_77, %c0_78], %75 {strides = array<i32>} : memref<1x8x16x64xf32, #tpu.memory_space<vmem>>, vector<1x8x16x64xf32>,
    return
  }
  func.func @transform_0(%arg0: i32, %arg1: i32) -> (i32, i32, i32, i32) {
    %c8_i32 = arith.constant 8 : i32
    %0 = arith.muli %arg1, %c8_i32 : i32
    %c1_i32 = arith.constant 1 : i32
    %1 = arith.subi %0, %c1_i32 : i32
    %c0_i32 = arith.constant 0 : i32
    %2 = arith.maxsi %1, %c0_i32 : i32
    %c0_i32_0 = arith.constant 0 : i32
    %c0_i32_1 = arith.constant 0 : i32
    %c0_i32_2 = arith.constant 0 : i32
    return %arg0, %2, %c0_i32_0, %c0_i32_1 : i32, i32, i32, i32
  }
  func.func @transform_1(%arg0: i32, %arg1: i32) -> (i32, i32, i32, i32) {
    %c0_i32 = arith.constant 0 : i32
    %c0_i32_0 = arith.constant 0 : i32
    %c0_i32_1 = arith.constant 0 : i32
    return %arg0, %arg1, %c0_i32, %c0_i32_0 : i32, i32, i32, i32
  }
  func.func @transform_2(%arg0: i32, %arg1: i32) -> (i32, i32, i32, i32) {
    %c8_i32 = arith.constant 8 : i32
    %0 = arith.muli %arg1, %c8_i32 : i32
    %c8_i32_0 = arith.constant 8 : i32
    %1 = arith.addi %0, %c8_i32_0 : i32
    %c15_i32 = arith.constant 15 : i32
    %2 = arith.minsi %1, %c15_i32 : i32
    %c0_i32 = arith.constant 0 : i32
    %c0_i32_1 = arith.constant 0 : i32
    %c0_i32_2 = arith.constant 0 : i32
    return %arg0, %2, %c0_i32, %c0_i32_1 : i32, i32, i32, i32
  }
  func.func @transform_3(%arg0: i32, %arg1: i32) -> (i32, i32, i32) {
    %c0_i32 = arith.constant 0 : i32
    %c0_i32_0 = arith.constant 0 : i32
    %c0_i32_1 = arith.constant 0 : i32
    return %arg0, %c0_i32, %c0_i32_0 : i32, i32, i32
  }
  func.func @transform_4(%arg0: i32, %arg1: i32) -> (i32, i32, i32) {
    %c0_i32 = arith.constant 0 : i32
    %c0_i32_0 = arith.constant 0 : i32
    %c0_i32_1 = arith.constant 0 : i32
    return %arg0, %c0_i32, %c0_i32_0 : i32, i32, i32
  }
  func.func @transform_5(%arg0: i32, %arg1: i32) -> (i32, i32, i32) {
    %c0_i32 = arith.constant 0 : i32
    %c0_i32_0 = arith.constant 0 : i32
    %c0_i32_1 = arith.constant 0 : i32
    %c0_i32_2 = arith.constant 0 : i32
    return %c0_i32, %c0_i32_0, %c0_i32_1 : i32, i32, i32
  }
  func.func @transform_6(%arg0: i32, %arg1: i32) -> (i32, i32, i32) {
    %c0_i32 = arith.constant 0 : i32
    %c0_i32_0 = arith.constant 0 : i32
    %c0_i32_1 = arith.constant 0 : i32
    %c0_i32_2 = arith.constant 0 : i32
    return %c0_i32, %c0_i32_0, %c0_i32_1 : i32, i32, i32
  }
  func.func @transform_7(%arg0: i32, %arg1: i32) -> (i32, i32, i32) {
    %c0_i32 = arith.constant 0 : i32
    %c0_i32_0 = arith.constant 0 : i32
    %c0_i32_1 = arith.constant 0 : i32
    %c0_i32_2 = arith.constant 0 : i32
    return %c0_i32, %c0_i32_0, %c0_i32_1 : i32, i32, i32
  }
  func.func @transform_8(%arg0: i32, %arg1: i32) -> (i32, i32) {
    %c0_i32 = arith.constant 0 : i32
    %c0_i32_0 = arith.constant 0 : i32
    %c0_i32_1 = arith.constant 0 : i32
    return %c0_i32, %c0_i32_0 : i32, i32
  }
  func.func @transform_9(%arg0: i32, %arg1: i32) -> (i32, i32, i32, i32) {
    %c0_i32 = arith.constant 0 : i32
    %c0_i32_0 = arith.constant 0 : i32
    %c0_i32_1 = arith.constant 0 : i32
    return %arg0, %arg1, %c0_i32, %c0_i32_0 : i32, i32, i32, i32
  }
  func.func @transform_10(%arg0: i32, %arg1: i32) -> (i32, i32) {
    %c0_i32 = arith.constant 0 : i32
    %c0_i32_0 = arith.constant 0 : i32
    %c0_i32_1 = arith.constant 0 : i32
    return %c0_i32, %c0_i32_0 : i32, i32
  }
  func.func @transform_11(%arg0: i32, %arg1: i32) -> (i32, i32) {
    %c0_i32 = arith.constant 0 : i32
    %c0_i32_0 = arith.constant 0 : i32
    %c0_i32_1 = arith.constant 0 : i32
    return %c0_i32, %c0_i32_0 : i32, i32
  }
  func.func @transform_12(%arg0: i32, %arg1: i32) -> (i32, i32, i32, i32) {
    %c0_i32 = arith.constant 0 : i32
    %c0_i32_0 = arith.constant 0 : i32
    %c0_i32_1 = arith.constant 0 : i32
    return %arg0, %arg1, %c0_i32, %c0_i32_0 : i32, i32, i32, i32
  }
}

</mosaic_0001>

<bundles_post_ra>
// kernel: resnet_block_forward.4
= control target key start
LH: loop header
LB: loop body
LE: loop exit
PB: predicated region body
PF: predicated region fallthrough
CT: control target
= control target key end

     0   :  { %s1687_s0 = inlined_call_operand.hbm [shape: f32[2,16,16,32], index: 0, kind: input, shape index: {}]   ;;  %s1688_s1 = inlined_call_operand.hbm [shape: f32[32,32], index: 1, kind: input, shape index: {}]   ;;  %s1689_s2 = inlined_call_operand.hbm [shape: f32[2,1,32], index: 2, kind: output, shape index: {0}]   ;;  %s1690_s3 = inlined_call_operand.hbm [shape: f32[2,1,32], index: 3, kind: output, shape index: {1}]  }
   0x1   :  { %1704 = sst [smem:[#allocation20_spill]] %s1688_s1 }
   0x2   :  { %1705 = sst [smem:[#allocation21_spill]] %s1689_s2 }
   0x3   :  { %1706 = sst [smem:[#allocation22_spill]] %s1690_s3 }
   0x4   :  { %9 = vsyncpa [#allocation5], 0 }
   0x5   :  { %11 = vsyncpa [#allocation5 + $0x1], 0 }
   0x6   :  { %12 = vsyncpa [#allocation8], 0 }
   0x7   :  { %13 = vsyncpa [#allocation6], 0 }
   0x8   :  { %15 = vsyncpa [#allocation6 + $0x1], 0 }
   0x9   :  { %16 = vsyncpa [#allocation11], 0 }
   0xa   :  { %18 = vsyncpa [#allocation11 + $0x1], 0  ;;  %s1320_s12 = smov 0   ;;  %s1322_s13 = smov 0  }
   0xb   :  { %s1324_s14 = smov 0   ;;  %s1326_s15 = smov 0  }
   0xc   :  { %s1328_s16 = smov 0   ;;  %s1330_s17 = smov 0  }
   0xd   :  { %s1332_s18 = smov 0   ;;  %s1334_s19 = smov 0  }
   0xe   :  { %s1336_s20 = smov 0   ;;  %s1338_s21 = smov 0  }
   0xf   :  { %s1340_s22 = smov 0  }
  0x10 LB: > { %1707 = sst [smem:[#allocation16_spill]] %s1248_s12  ;;  %s822_s23 = sadd.s32 4294967295, %s1288_s22   ;;  %s1288_s22 = sphi %s1340_s22, %s24_s22   ;;  %s1284_s21 = sphi %s1338_s21, %s1742_s21   ;;  %s1280_s20 = sphi %s1336_s20, %s1741_s20   ;;  %s1276_s19 = sphi %s1334_s19, %s1740_s19   ;;  %s1272_s18 = sphi %s1332_s18, %s1739_s18   ;;  %s1268_s17 = sphi %s1330_s17, %s1738_s17   ;;  %s1264_s16 = sphi %s1328_s16, %s1737_s16   ;;  %s1260_s15 = sphi %s1326_s15, %s1736_s15   ;;  %s1256_s14 = sphi %s1324_s14, %s1735_s14   ;;  %s1252_s13 = sphi %s1322_s13, %s1734_s13   ;;  %s1248_s12 = sphi %s1320_s12, %s1733_s12  }
  0x11   : > { %s823_s24 = sadd.s32 4294967294, %s1288_s22   ;;  %p58_p0 = scmp.ne.s32.totalorder %s1264_s16, %s1260_s15 }
  0x12   : > { %p1376_p1 = scmp.eq.s32.totalorder %s822_s23, 0  ;;  %s92_s26 = sadd.s32 1, %s1256_s14 }
  0x13   : > { %p102_p2 = scmp.ne.s32.totalorder %s1256_s14, %s1252_s13  ;;  %p103_p4 = scmp.eq.s32.totalorder %s822_s23, 3 }
  0x14   : > { %s1708_s25 = scalar_select %p1376_p1, 1, 0 }
  0x15   : > { %p1385_p3 = por %p1376_p1, %p58_p0  ;;  %p108_p5 = scmp.ne.s32.totalorder %s1252_s13, %s1248_s12 }
  0x16   : > { %p109_p6 = scmp.eq.s32.totalorder %s823_s24, 3  ;;  %p1391_p7 = por %p103_p4, %p102_p2 }
  0x17   : > { %s1709_s27 = scalar_select %p1385_p3, 1, 0 }
  0x18   : > { %s1710_s28 = scalar_select %p1391_p7, 1, 0 }
  0x19   : > { %p824_p8 = scmp.ge.s32.totalorder %s1288_s22, 1  ;;  %p1396_p9 = por %p109_p6, %p108_p5 }
  0x1a   : > { %p142_p10 = scmp.lt.s32.totalorder %s1288_s22, 5  ;;  %s1290_s4 = smov [#allocation7]  }
  0x1b   : > { %s1711_s29 = scalar_select %p1396_p9, 1, 0 }
  0x1c   : > { %p1401_p11 = pnand %p824_p8, %p142_p10  ;;  %s154_s5 = sshll.u32 %s1290_s4, 4  ;;  %s155_s5 = int_to_ptr.vmem [resolvable:$true] %s154_s5 }
  0x1d   : > { %1712 = sst [smem:[#allocation17_spill]] %s1711_s29  ;;  %s1715_s1 = sld [smem:[#allocation20_spill]] }
  0x1e   : > { %s1713_s30 = scalar_select %p1401_p11, 1, 0 }
  0x1f   : > { %p956_p12 = pneg %p1401_p11 }
  0x21   : > { %p1409_p13 = pnand %p956_p12, %p1376_p1 }
  0x23   : > { %s1072_s9 = scalar_lea.hbm %s1715_s1, 512  ;;  %p1074_p2 = pneg %p1409_p13 }
  0x24   : > { %p1073_p0 = scmp.ne.s32.totalorder %s1715_s1, %s1072_s9  ;;  %p1079_p6 = scmp.lt.u32.totalorder %s1072_s9, %s1715_s1 }
  0x26   : > { %p1075_p4 = pnand %p1074_p2, %p1073_p0 }
  0x28   : > { %p1076_p5 = pneg %p1075_p4 }
  0x2a   : > { %p1081_p8 = pnand %p1079_p6, %p1076_p5 }
  0x2c   : > { %1084 = shalt.err (!%p1081_p8)
}
  0x2d   : > { %s1085_s24 = scalar_lea.vmem %s155_s5, 512  ;;  %p1093_p7 = scmp.lt.s32.totalorder %s155_s5, %s155_s5 }
  0x2e   : > { %p1086_p10 = scmp.ne.s32.totalorder %s155_s5, %s1085_s24  ;;  %p1094_p1 = scmp.lt.s32.totalorder %s1085_s24, %s1085_s24 }
  0x30   : > { %p1088_p12 = pnand %p1086_p10, %p1074_p2  ;;  %p1095_p3 = por %p1094_p1, %p1093_p7 }
  0x32   : > { %p1089_p9 = pneg %p1088_p12 }
  0x34   : > { %p1096_p11 = pnand %p1095_p3, %p1089_p9 }
  0x36   : > { %1099 = shalt.err (!%p1096_p11)
}
  0x37   : > { %s1696_s4 = smov 128   ;;  %s1697_s7 = smov 8  }
  0x38   : > { %959 = dma.hbm_to_vmem [thread:$0]  (!%p1409_p13), %s1715_s1, 512, %s155_s5, [#allocation8], %s1696_s4, %s1696_s4, %s1697_s7  }
  0x39   : > { %s33_s10 = sadd.s32 1, %s1280_s20  ;;  %s36_s11 = sadd.s32 1, %s1284_s21 }
  0x3a   : > { %p34_p1 = scmp.ge.s32.totalorder %s33_s10, 2  ;;  %s45_s15 = sadd.s32 1, %s1268_s17 }
  0x3b   : > { %p52_p3 = scmp.ne.s32.totalorder %s1268_s17, %s1264_s16  ;;  %p53_p7 = scmp.eq.s32.totalorder %s1288_s22, 0 }
  0x3c   : > { %s1744_s10 = smov (%p34_p1, %s33_s10), 0  ;;  %s1746_s11 = smov (!%p34_p1, %s36_s11), %s1284_s21 }
  0x3d   : > { %1716 = sst [smem:[#allocation18_spill]] %s1744_s10  ;;  %s41_s6 = ssub.s32 %s1280_s20, %s1744_s10 }
  0x3e   : > { %p38_p9 = scmp.ge.s32.totalorder %s1746_s11, 2  ;;  %p972_p11 = scmp.lt.s32.totalorder %s1288_s22, 4 }
  0x3f   : > { %p1444_p13 = por %p53_p7, %p52_p3  ;;  %s168_s23 = sand.u32 1, %s1268_s17  }
  0x40   : > { %s1748_s11 = smov (%p38_p9, %s1746_s11), 0  ;;  %s827_s24 = sshll.u32 %s168_s23, 7 }
  0x41   : > { %1718 = sst [smem:[#allocation19_spill]] %s1748_s11  ;;  %s40_s8 = ssub.s32 %s1284_s21, %s1748_s11 }
  0x42   : > { %s42_s9 = sor.u32 %s41_s6, %s40_s8  ;;  %p90_p0 = scmp.eq.s32.totalorder %s40_s8, 0 }
  0x43   : > { %p43_p2 = scmp.eq.s32.totalorder %s42_s9, 0  ;;  %s853_s4 = sshll.u32 %s1280_s20, 4 }
  0x44   : > { %s1457_s7 = scalar_select %p90_p0, %s1256_s14, %s92_s26  }
  0x45   : > { %s1460_s1 = scalar_select %p43_p2, %s1268_s17, %s45_s15  }
  0x46   : > { %s830_s10 = sshll.u32 %s1284_s21, 5  ;;  %s172_s29 = scalar_lea.vmem [#allocation4], %s827_s24 }
  0x47   : > { %s182_s12 = sshll.u32 %s172_s29, 4  ;;  %s179_s3 = sadd.s32 %s853_s4, %s830_s10  ;;  %s1463_s12 = int_to_ptr.vmem [resolvable:$true] %s182_s12 }
  0x48   : > { %s831_s2 = sshll.u32 %s179_s3, 7  ;;  %p1469_p4 = pnand %p972_p11, %p1444_p13 }
  0x49   : > { %s1476_s26 = scalar_lea.hbm %s1687_s0, %s831_s2  ;;  %s1478_s29 = scalar_lea.sflag [#allocation5], %s168_s23 }
  0x4a   : > { %s1100_s3 = scalar_lea.hbm %s1476_s26, 2048  ;;  %p1102_p6 = pneg %p1469_p4 }
  0x4b   : > { %p1101_p5 = scmp.ne.s32.totalorder %s1476_s26, %s1100_s3  ;;  %s1105_s15 = scalar_lea.hbm %s1687_s0, 8192 }
  0x4c   : > { %p1106_p12 = scmp.lt.u32.totalorder %s1476_s26, %s1687_s0  ;;  %p1107_p1 = scmp.lt.u32.totalorder %s1105_s15, %s1100_s3 }
  0x4d   : > { %p1103_p8 = pnand %p1102_p6, %p1101_p5  ;;  %p1109_p7 = scmp.lt.u32.totalorder %s1100_s3, %s1476_s26 }
  0x4e   : > { %p1108_p3 = por %p1107_p1, %p1106_p12 }
  0x4f   : > { %p1104_p10 = pneg %p1103_p8 }
  0x50   : > { %p1110_p9 = por %p1109_p7, %p1108_p3 }
  0x52   : > { %p1111_p11 = pnand %p1110_p9, %p1104_p10 }
  0x54   : > { %1114 = shalt.err (!%p1111_p11)
}
  0x55   : > { %s1115_s23 = scalar_lea.vmem %s1463_s12, 2048  ;;  %s1293_s24 = smov [#allocation4]  }
  0x56   : > { %p1116_p13 = scmp.ne.s32.totalorder %s1463_s12, %s1115_s23  ;;  %s1120_s9 = sshll.u32 %s1293_s24, 4  ;;  %s1121_s9 = int_to_ptr.vmem [resolvable:$false] %s1120_s9 }
  0x57   : > { %s1122_s6 = scalar_lea.vmem %s1121_s9, 4096  ;;  %p1123_p5 = scmp.lt.s32.totalorder %s1463_s12, %s1121_s9 }
  0x58   : > { %p1118_p0 = pnand %p1116_p13, %p1102_p6  ;;  %p1124_p8 = scmp.lt.s32.totalorder %s1122_s6, %s1115_s23 }
  0x5a   : > { %p1119_p2 = pneg %p1118_p0  ;;  %p1125_p12 = por %p1124_p8, %p1123_p5 }
  0x5c   : > { %p1126_p1 = pnand %p1125_p12, %p1119_p2 }
  0x5e   : > { %1129 = shalt.err (!%p1126_p1)
}
  0x5f   : > { %s1720_s8 = smov 8   ;;  %s1721_s3 = smov 128  }
  0x60   : > { %963 = dma.hbm_to_vmem [thread:$0]  (!%p1469_p4), %s1476_s26, 2048, %s1463_s12, %s1478_s29, %s1721_s3, %s1721_s3, %s1720_s8  }
  0x61   : > { %p1722_p6 = scmp.ne.s32.totalorder %s1713_s30, 0 }
  0x62   : > { %s196_s4 = sand.u32 (!%p1722_p6), 1, %s1264_s16   ;;  %p1723_p10 = scmp.ne.s32.totalorder (!%p1722_p6), %s1709_s27, 0 }
  0x63   : > { %194 = sbr.rel (%p1722_p6) target bundleno = 668 (0x29c), region = 28  ;;  %s833_s10 = sshll.u32 (!%p1722_p6), %s196_s4, 7 }
  0x64   : > { %s197_s15 = scalar_lea.sflag (!%p1722_p6), [#allocation5], %s196_s4  ;;  %s1512_s2 = scalar_lea.vmem (!%p1722_p6), [#allocation4], %s833_s10 }
  0x6a   : > { %1231 = dma.done.wait (%p1723_p10), %s197_s15, 2048  }
  0x6b   : > { %1233 = vsyncadd (%p1723_p10), %s197_s15, 4294965248  ;;  %p1724_p3 = scmp.ne.s32.totalorder %s1708_s25, 0 }
  0x6d   : > { %1235 = dma.done.wait (%p1724_p3), [#allocation8], 512  }
  0x6e   : > { %1237 = vsyncadd (%p1724_p3), [#allocation8], 4294966784  ;;  %s1523_s12 = sand.u32 1, %s1252_s13   ;;  %p835_p4 = scmp.ne.s32.totalorder %s1272_s18, 0 }
  0x6f   : > { %s223_s30 = scalar_lea.vmem [#allocation9], %s1523_s12  ;;  %s229_s11 = scalar_lea.vmem [#allocation10], %s1523_s12  ;;  %vm235_vm0 = vcmask (!%p835_p4), 253952   ;;  %v1294_v0 = vmov (!%p835_p4), 0.0  }
  0x70   : > { %234 = sbr.rel (%p835_p4) target bundleno = 119 (0x77), region = 40  ;;  %236 = vst.msk [vmem:[#allocation2] sm:$0x1] (!%p835_p4), %vm235_vm0, %v1294_v0  ;;  %237 = vst.msk [vmem:[#allocation3] sm:$0x1] (!%p835_p4), %vm235_vm0, %v1294_v0 }
  0x77 PF: > { %v238_v1 = vld [vmem:[%s1512_s2] sm:$0xff]  ;;  %v239_v2 = vld [vmem:[%s1512_s2 + $0x8] sm:$0xff]  ;;  %v240_v3 = vld [vmem:[%s1512_s2 + $0x10] sm:$0xff]  ;;  %vm255_vm1 = vcmask 261120   ;;  %vm294_vm2 = vcmask 253952   ;;  %p836_p7 = scmp.ne.s32.totalorder %s1272_s18, 1 }
  0x78   : > { %v256_v4 = vsel %vm255_vm1, %v238_v1, 0.0  ;;  %v257_v5 = vsel %vm255_vm1, %v239_v2, 0.0  ;;  %v259_v6 = vsel %vm255_vm1, %v240_v3, 0.0  ;;  %v241_v7 = vld [vmem:[%s1512_s2 + $0x18] sm:$0xff]  ;;  %v242_v10 = vld [vmem:[%s1512_s2 + $0x20] sm:$0xff]  ;;  %v243_v13 = vld [vmem:[%s1512_s2 + $0x28] sm:$0xff]  ;;  %v297_v15 = vmul.f32 %v238_v1, %v238_v1 }
  0x79   : > { %v258_v8 = vadd.f32 %v257_v5, %v256_v4  ;;  %v261_v9 = vsel %vm255_vm1, %v241_v7, 0.0  ;;  %v263_v12 = vsel %vm255_vm1, %v242_v10, 0.0  ;;  %v298_v16 = vmul.f32 %v239_v2, %v239_v2  ;;  %v244_v19 = vld [vmem:[%s1512_s2 + $0x30] sm:$0xff]  ;;  %v245_v24 = vld [vmem:[%s1512_s2 + $0x38] sm:$0xff]  ;;  %v246_v31 = vld [vmem:[%s1512_s2 + $0x40] sm:$0xff] }
  0x7a   : > { %v299_v17 = vmul.f32 %v240_v3, %v240_v3  ;;  %v265_v18 = vsel %vm255_vm1, %v243_v13, 0.0  ;;  %v300_v21 = vmul.f32 %v241_v7, %v241_v7  ;;  %v267_v22 = vsel %vm255_vm1, %v244_v19, 0.0  ;;  %v247_v37 = vld [vmem:[%s1512_s2 + $0x48] sm:$0xff]  ;;  %v248_v43 = vld [vmem:[%s1512_s2 + $0x50] sm:$0xff]  ;;  %v249_v49 = vld [vmem:[%s1512_s2 + $0x58] sm:$0xff] }
  0x7b   : > { %v260_v11 = vadd.f32 %v259_v6, %v258_v8  ;;  %v301_v23 = vmul.f32 %v242_v10, %v242_v10  ;;  %v313_v26 = vsel %vm255_vm1, %v297_v15, 0.0  ;;  %v314_v27 = vsel %vm255_vm1, %v298_v16, 0.0  ;;  %v250_v55 = vld [vmem:[%s1512_s2 + $0x60] sm:$0xff]  ;;  %v251_v61 = vld [vmem:[%s1512_s2 + $0x68] sm:$0xff]  ;;  %v252_v3 = vld [vmem:[%s1512_s2 + $0x70] sm:$0xff] }
  0x7c   : > { %v316_v28 = vsel %vm255_vm1, %v299_v17, 0.0  ;;  %v269_v29 = vsel %vm255_vm1, %v245_v24, 0.0  ;;  %v315_v30 = vadd.f32 %v314_v27, %v313_v26  ;;  %v302_v33 = vmul.f32 %v243_v13, %v243_v13  ;;  %vm932_vm4 = vmpackc.low (!%p836_p7), %vm255_vm1, %vm255_vm1 }
  0x7d   : > { %v262_v14 = vadd.f32 %v261_v9, %v260_v11  ;;  %v318_v34 = vsel %vm255_vm1, %v300_v21, 0.0  ;;  %v271_v35 = vsel %vm255_vm1, %v246_v31, 0.0  ;;  %v303_v39 = vmul.f32 %v244_v19, %v244_v19  ;;  %v253_v9 = vld [vmem:[%s1512_s2 + $0x78] sm:$0xff] }
  0x7e   : > { %v317_v36 = vadd.f32 %v316_v28, %v315_v30  ;;  %v320_v40 = vsel %vm255_vm1, %v301_v23, 0.0  ;;  %v273_v41 = vsel %vm255_vm1, %v247_v37, 0.0  ;;  %v304_v45 = vmul.f32 %v245_v24, %v245_v24 }
  0x7f   : > { %v264_v20 = vadd.f32 %v263_v12, %v262_v14  ;;  %v322_v46 = vsel %vm255_vm1, %v302_v33, 0.0  ;;  %v275_v47 = vsel %vm255_vm1, %v248_v43, 0.0  ;;  %v305_v51 = vmul.f32 %v246_v31, %v246_v31 }
  0x80   : > { %v319_v42 = vadd.f32 %v318_v34, %v317_v36  ;;  %v324_v52 = vsel %vm255_vm1, %v303_v39, 0.0  ;;  %v277_v53 = vsel %vm255_vm1, %v249_v49, 0.0  ;;  %v306_v57 = vmul.f32 %v247_v37, %v247_v37  ;;  %v254_v36 = vld [vmem:[#allocation2] sm:$0x1] }
  0x81   : > { %v266_v25 = vadd.f32 %v265_v18, %v264_v20  ;;  %v326_v58 = vsel %vm255_vm1, %v304_v45, 0.0  ;;  %v279_v59 = vsel %vm255_vm1, %v250_v55, 0.0  ;;  %v307_v63 = vmul.f32 %v248_v43, %v248_v43 }
  0x82   : > { %v321_v48 = vadd.f32 %v320_v40, %v319_v42  ;;  %v328_v0 = vsel %vm255_vm1, %v305_v51, 0.0  ;;  %v281_v1 = vsel %vm255_vm1, %v251_v61, 0.0  ;;  %v308_v5 = vmul.f32 %v249_v49, %v249_v49  ;;  %v358_v49 = vld [vmem:[#allocation7 + $0x10] sm:$0xff] (!%p836_p7) }
  0x83   : > { %v268_v32 = vadd.f32 %v267_v22, %v266_v25  ;;  %v330_v6 = vsel %vm255_vm1, %v306_v57, 0.0  ;;  %v283_v7 = vsel %vm255_vm1, %v252_v3, 0.0  ;;  %v309_v11 = vmul.f32 %v250_v55, %v250_v55 }
  0x84   : > { %v323_v54 = vadd.f32 %v322_v46, %v321_v48  ;;  %v332_v12 = vsel %vm255_vm1, %v307_v63, 0.0  ;;  %v285_v13 = vsel %vm255_vm1, %v253_v9, 0.0  ;;  %v310_v16 = vmul.f32 %v251_v61, %v251_v61  ;;  %v357_v48 = vld [vmem:[#allocation7 + $0x8] sm:$0xff] (!%p836_p7) }
  0x85   : > { %v270_v38 = vadd.f32 %v269_v29, %v268_v32  ;;  %v334_v17 = vsel %vm255_vm1, %v308_v5, 0.0  ;;  %v311_v20 = vmul.f32 %v252_v3, %v252_v3  ;;  %v336_v21 = vsel %vm255_vm1, %v309_v11, 0.0 }
  0x86   : > { %v325_v60 = vadd.f32 %v324_v52, %v323_v54  ;;  %v312_v24 = vmul.f32 %v253_v9, %v253_v9  ;;  %v338_v25 = vsel %vm255_vm1, %v310_v16, 0.0  ;;  %v359_v52 = vld [vmem:[#allocation7 + $0x18] sm:$0xff] (!%p836_p7)  ;;  %vm1296_vm3 = vmmov (!%p836_p7), 0  }
  0x87   : > { %v272_v44 = vadd.f32 %v271_v35, %v270_v38  ;;  %v340_v28 = vsel %vm255_vm1, %v311_v20, 0.0  ;;  %v922_v54 = vpack.c.bf16 (!%p836_p7), %v359_v52, %v358_v49 }
  0x88   : > { %v327_v2 = vadd.f32 %v326_v58, %v325_v60  ;;  %v342_v31 = vsel %vm255_vm1, %v312_v24, 0.0 }
  0x89   : > { %v274_v50 = vadd.f32 %v273_v41, %v272_v44  ;;  %v296_v44 = vld [vmem:[#allocation3] sm:$0x1] }
  0x8a   : > { %v329_v8 = vadd.f32 %v328_v0, %v327_v2 }
  0x8b   : > { %v276_v56 = vadd.f32 %v275_v47, %v274_v50  ;;  %v356_v47 = vld [vmem:[#allocation7] sm:$0xff] (!%p836_p7)  ;;  %v1295_v50 = vmov (!%p836_p7), 0.0|0.0  }
  0x8c   : > { %v331_v14 = vadd.f32 %v330_v6, %v329_v8  ;;  %918 = vmatprep.subr.bf16.mxu0 (!%p836_p7), %v1295_v50  ;;  %v919_v51 = vpack.c.bf16 (!%p836_p7), %v357_v48, %v356_v47  ;;  %924 = vmatprep.subr.bf16.mxu1 (!%p836_p7), %v1295_v50 }
  0x8d   : > { %v278_v62 = vadd.f32 %v277_v53, %v276_v56  ;;  %v1297_v53 = vmov (!%p836_p7), 0.0  }
  0x8e   : > { %v333_v18 = vadd.f32 %v332_v12, %v331_v14  ;;  %882 = vmatprep.mubr.msk.f32.mxu0 (!%p836_p7), %vm1296_vm3, %v1297_v53  ;;  %893 = vmatprep.mubr.msk.f32.mxu1 (!%p836_p7), %vm1296_vm3, %v1297_v53 }
  0x8f   : > { %v280_v4 = vadd.f32 %v279_v59, %v278_v62  ;;  %920 = vmatpush3.bf16.msra.mxu0 (!%p836_p7), %v919_v51  ;;  %926 = vmatpush3.bf16.msra.mxu1 (!%p836_p7), %v919_v51 }
  0x90   : > { %v335_v22 = vadd.f32 %v334_v17, %v333_v18  ;;  %921 = vmatprep.subr.bf16.mxu0 (!%p836_p7), %v1295_v50  ;;  %927 = vmatprep.subr.bf16.mxu1 (!%p836_p7), %v1295_v50 }
  0x91   : > { %v282_v10 = vadd.f32 %v281_v1, %v280_v4 }
  0x92   : > { %v337_v26 = vadd.f32 %v336_v21, %v335_v22 }
  0x93   : > { %v284_v15 = vadd.f32 %v283_v7, %v282_v10  ;;  %923 = vmatpush3.bf16.msra.mxu0 (!%p836_p7), %v922_v54  ;;  %929 = vmatpush3.bf16.msra.mxu1 (!%p836_p7), %v922_v54 }
  0x94   : > { %v339_v29 = vadd.f32 %v338_v25, %v337_v26  ;;  %930 = vmatprep.subr.bf16.mxu0 (!%p836_p7), %v1295_v50  ;;  %938 = vmatprep.subr.bf16.mxu1 (!%p836_p7), %v1295_v50 }
  0x95   : > { %v286_v19 = vadd.f32 %v285_v13, %v284_v15 }
  0x96   : > { %v341_v32 = vadd.f32 %v340_v28, %v339_v29 }
  0x97   : > { %v287_v23 = vrot.slane %v286_v19, 4 }
  0x98   : > { %v343_v34 = vadd.f32 %v342_v31, %v341_v32 }
  0x99   : > { %v288_v27 = vadd.f32 %v287_v23, %v286_v19 }
  0x9a   : > { %v344_v37 = vrot.slane %v343_v34, 4 }
  0x9b   : > { %v289_v30 = vrot.slane %v288_v27, 2 }
  0x9c   : > { %v345_v39 = vadd.f32 %v344_v37, %v343_v34 }
  0x9d   : > { %v290_v33 = vadd.f32 %v289_v30, %v288_v27 }
  0x9e   : > { %v346_v41 = vrot.slane %v345_v39, 2 }
  0x9f   : > { %v291_v35 = vrot.slane %v290_v33, 1 }
  0xa0   : > { %v347_v42 = vadd.f32 %v346_v41, %v345_v39 }
  0xa1   : > { %v292_v38 = vadd.f32 %v291_v35, %v290_v33 }
  0xa2   : > { %v348_v43 = vrot.slane %v347_v42, 1  ;;  %355 = sbr.rel (%p836_p7) target bundleno = 618 (0x26a), region = 44 }
  0xa3   : > { %v293_v40 = vadd.f32 %v292_v38, %v254_v36 }
  0xa4   : > { %v349_v45 = vadd.f32 %v348_v43, %v347_v42 }
  0xa5   : > { %295 = vst.msk [vmem:[#allocation2] sm:$0x1] %vm294_vm2, %v293_v40 }
  0xa6   : > { %v350_v46 = vadd.f32 %v349_v45, %v296_v44 }
  0xa8   : > { %351 = vst.msk [vmem:[#allocation3] sm:$0x1] %vm294_vm2, %v350_v46 }
  0xac   : > { %v360_v55 = vld [vmem:[#allocation2] sm:$0x1] }
  0xad   : > { %883 = vmatmul.mubr.msk.f32.vlgmr.msra.gmra.mrb[0].mxu0 %vm255_vm1, %v360_v55 }
  0xae   : > { %904 = vmatprep.mubr.msk.f32.mxu0 %vm1296_vm3, %v1297_v53  ;;  %933 = vmatpush3.bf16.xpose.msk.msra.mxu0 %vm932_vm4, %v919_v51 }
  0xaf   : > { %v434_v56 = vld [vmem:[#allocation3] sm:$0x1]  ;;  %934 = vmatprep.subr.bf16.mxu0 %v1295_v50 }
  0xb0   : > { %894 = vmatmul.mubr.msk.f32.vlgmr.msra.gmra.mrb[0].mxu1 %vm255_vm1, %v434_v56 }
  0xb1   : > { %915 = vmatprep.mubr.msk.f32.mxu1 %vm1296_vm3, %v1297_v53  ;;  %941 = vmatpush3.bf16.xpose.msk.msra.mxu1 %vm932_vm4, %v919_v51 }
  0xb2   : > { %942 = vmatprep.subr.bf16.mxu1 %v1295_v50 }
  0xb6   : > { %937 = vmatpush3.bf16.xpose.msk.msra.mxu0 %vm932_vm4, %v922_v54 }
  0xb9   : > { %945 = vmatpush3.bf16.xpose.msk.msra.mxu1 %vm932_vm4, %v922_v54 }
 0x180   : > { %v430_v57 = vpop.f32.mrb[0].mxu0 }
 0x181   : > { %v508_v59 = vmul.f32 0.00390625, %v430_v57  ;;  %v884_v60 = vpop.f32.mrb[1].mxu0 }
 0x183   : > { %v504_v58 = vpop.f32.mrb[0].mxu1  ;;  %v510_v63 = vmul.f32 %v508_v59, %v508_v59  ;;  %905 = vmatmul.mubr.msk.f32.vlgmr.msra.gmra.mrb[2].mxu0 %vm255_vm1, %v508_v59 }
 0x184   : > { %v509_v61 = vmul.f32 0.00390625, %v504_v58  ;;  %v895_v62 = vpop.f32.mrb[1].mxu1 }
 0x186   : > { %v511_v0 = vsub.f32 %v509_v61, %v510_v63 }
 0x188   : > { %v512_v1 = vadd.f32 1e-06, %v511_v0 }
 0x18a   : > { %1070 = vrsqrt.f32 %v512_v1 }
 0x194   : > { %v1071_v2 = vpop.eup %1070 }
 0x195   : > { %916 = vmatmul.mubr.msk.f32.vlgmr.msra.gmra.mrb[2].mxu1 %vm255_vm1, %v1071_v2 }
 0x256   : > { %v595_v3 = vpop.f32.mrb[2].mxu0 }
 0x257   : > { %599 = vst.msk [vmem:[%s223_s30] sm:$0x1] %vm294_vm2, %v595_v3  ;;  %v906_v4 = vpop.f32.mrb[3].mxu0 }
 0x268   : > { %v669_v5 = vpop.f32.mrb[2].mxu1 }
 0x269   : > { %673 = vst.msk [vmem:[%s229_s11] sm:$0x1] %vm294_vm2, %v669_v5  ;;  %v917_v6 = vpop.f32.mrb[3].mxu1 }
 0x26a PF: > { %s849_s18 = sshll.u32 %s1276_s19, 4  ;;  %s1725_s26 = sld [smem:[#allocation21_spill]] }
 0x26b   : > { %s691_s5 = sshll.u32 %s223_s30, 4  ;;  %s675_s23 = scalar_lea.sflag [#allocation6], %s1523_s12  ;;  %s692_s5 = int_to_ptr.vmem [resolvable:$true] %s691_s5 }
 0x26c   : > { %s1130_s24 = scalar_lea.vmem %s692_s5, 16  ;;  %p1726_p11 = scmp.ne.s32.totalorder %s1710_s28, 0 }
 0x26d   : > { %p1131_p9 = scmp.ne.s32.totalorder %s692_s5, %s1130_s24  ;;  %s1298_s9 = smov [#allocation9]  }
 0x26e   : > { %s1134_s6 = sshll.u32 %s1298_s9, 4  ;;  %s1135_s6 = int_to_ptr.vmem [resolvable:$false] %s1134_s6 }
 0x26f   : > { %p1132_p13 = pnand %p1131_p9, %p1726_p11  ;;  %s1136_s8 = scalar_lea.vmem %s1135_s6, 32 }
 0x270   : > { %s1601_s29 = scalar_lea.hbm %s1725_s26, %s849_s18  ;;  %p1137_p2 = scmp.lt.s32.totalorder %s692_s5, %s1135_s6 }
 0x271   : > { %p1133_p0 = pneg %p1132_p13  ;;  %p1138_p5 = scmp.lt.s32.totalorder %s1136_s8, %s1130_s24 }
 0x273   : > { %p1139_p8 = por %p1138_p5, %p1137_p2 }
 0x275   : > { %p1140_p12 = pnand %p1139_p8, %p1133_p0 }
 0x277   : > { %1143 = shalt.err (!%p1140_p12)
}
 0x278   : > { %s1144_s3 = scalar_lea.hbm %s1601_s29, 16  ;;  %s1148_s15 = scalar_lea.hbm %s1725_s26, 32 }
 0x279   : > { %p1145_p1 = scmp.ne.s32.totalorder %s1601_s29, %s1144_s3  ;;  %p1149_p3 = scmp.lt.u32.totalorder %s1601_s29, %s1725_s26 }
 0x27a   : > { %p1150_p4 = scmp.lt.u32.totalorder %s1148_s15, %s1144_s3  ;;  %p1152_p9 = scmp.lt.u32.totalorder %s1144_s3, %s1601_s29 }
 0x27b   : > { %p1146_p6 = pnand %p1145_p1, %p1726_p11 }
 0x27c   : > { %p1151_p7 = por %p1150_p4, %p1149_p3 }
 0x27d   : > { %p1147_p10 = pneg %p1146_p6 }
 0x27e   : > { %p1153_p13 = por %p1152_p9, %p1151_p7 }
 0x280   : > { %p1154_p0 = pnand %p1153_p13, %p1147_p10 }
 0x282   : > { %1157 = shalt.err (!%p1154_p0)
}
 0x283   : > { %952 = dma.vmem_to_hbm [thread:$0]  (%p1726_p11), %s692_s5, 16, %s1601_s29, %s675_s23  }
 0x284   : > { %s1727_s24 = sld [smem:[#allocation22_spill]]  ;;  %s704_s6 = sshll.u32 %s229_s11, 4  ;;  %s705_s6 = int_to_ptr.vmem [resolvable:$true] %s704_s6 }
 0x285   : > { %s679_s8 = scalar_lea.sflag [#allocation11], %s1523_s12  ;;  %s1158_s3 = scalar_lea.vmem %s705_s6, 16 }
 0x286   : > { %p1159_p2 = scmp.ne.s32.totalorder %s705_s6, %s1158_s3  ;;  %s1299_s4 = smov [#allocation10]  }
 0x287   : > { %s1162_s10 = sshll.u32 %s1299_s4, 4  ;;  %s1163_s10 = int_to_ptr.vmem [resolvable:$false] %s1162_s10 }
 0x288   : > { %p1160_p5 = pnand %p1159_p2, %p1726_p11  ;;  %s1164_s15 = scalar_lea.vmem %s1163_s10, 32 }
 0x289   : > { %p1165_p12 = scmp.lt.s32.totalorder %s705_s6, %s1163_s10  ;;  %p1166_p1 = scmp.lt.s32.totalorder %s1164_s15, %s1158_s3 }
 0x28a   : > { %s1628_s9 = scalar_lea.hbm %s1727_s24, %s849_s18  ;;  %p1161_p8 = pneg %p1160_p5 }
 0x28b   : > { %p1167_p6 = por %p1166_p1, %p1165_p12 }
 0x28d   : > { %p1168_p10 = pnand %p1167_p6, %p1161_p8 }
 0x28f   : > { %1171 = shalt.err (!%p1168_p10)
}
 0x290   : > { %s1172_s19 = scalar_lea.hbm %s1628_s9, 16  ;;  %s1176_s18 = scalar_lea.hbm %s1727_s24, 32 }
 0x291   : > { %p1173_p3 = scmp.ne.s32.totalorder %s1628_s9, %s1172_s19  ;;  %p1177_p9 = scmp.lt.u32.totalorder %s1628_s9, %s1727_s24 }
 0x292   : > { %p1178_p13 = scmp.lt.u32.totalorder %s1176_s18, %s1172_s19  ;;  %p1180_p2 = scmp.lt.u32.totalorder %s1172_s19, %s1628_s9 }
 0x293   : > { %p1174_p4 = pnand %p1173_p3, %p1726_p11 }
 0x294   : > { %p1179_p0 = por %p1178_p13, %p1177_p9 }
 0x295   : > { %p1175_p7 = pneg %p1174_p4 }
 0x296   : > { %p1181_p5 = por %p1180_p2, %p1179_p0 }
 0x298   : > { %p1182_p8 = pnand %p1181_p5, %p1175_p7 }
 0x29a   : > { %1185 = shalt.err (!%p1182_p8)
}
 0x29b   : > { %953 = dma.vmem_to_hbm [thread:$0]  (%p1726_p11), %s705_s6, 16, %s1628_s9, %s679_s8  }
 0x29c PF: > { %s1728_s23 = sld [smem:[#allocation16_spill]]  ;;  %s1729_s2 = sld [smem:[#allocation17_spill]] }
 0x29d   : > { %p974_p12 = scmp.ge.s32.totalorder %s1288_s22, 2 }
 0x2a2   : > { %s716_s30 = sand.u32 1, %s1728_s23   ;;  %p1730_p1 = scmp.ne.s32.totalorder %s1729_s2, 0 }
 0x2a3   : > { %s717_s25 = scalar_lea.sflag [#allocation6], %s716_s30 }
 0x2a4   : > { %p965_p6 = pnand %p974_p12, %p1730_p1 }
 0x2a6   : > { %1239 = dma.done.wait (!%p965_p6), %s717_s25, 16  }
 0x2a7   : > { %1241 = vsyncadd (!%p965_p6), %s717_s25, 4294967280  ;;  %s725_s27 = scalar_lea.sflag [#allocation11], %s716_s30 }
 0x2a8   : > { %1243 = dma.done.wait (!%p965_p6), %s725_s27, 16  }
 0x2a9   : > { %1245 = vsyncadd (!%p965_p6), %s725_s27, 4294967280  ;;  %s24_s22 = sadd.s32 1, %s1288_s22   ;;  %s1731_s28 = sld [smem:[#allocation18_spill]] }
 0x2aa   : > { %p21_p10 = scmp.ge.s32.totalorder %s24_s22, 6   ;;  %s1732_s9 = sld [smem:[#allocation19_spill]] }
 0x2ab   : > { %s1733_s12 = smov %s1252_s13  ;;  %s1734_s13 = smov %s1256_s14 }
 0x2ac   : > { %s1735_s14 = smov %s1457_s7  ;;  %s1736_s15 = smov %s1264_s16 }
 0x2ad   : > { %s1737_s16 = smov %s1268_s17  ;;  %s1738_s17 = smov %s1460_s1 }
 0x2ae   : > { %s1739_s18 = smov %s1280_s20  ;;  %s1740_s19 = smov %s1284_s21 }
 0x2af   : > { %s1741_s20 = smov %s1731_s28  ;;  %23 = sbr.rel (!%p21_p10) target bundleno = 16 (0x10), region = 102 }
 0x2b0   : > { %s1742_s21 = smov %s1732_s9 }
 0x2b6   :  { %729 = vsyncpa [#allocation5], 1 }
 0x2b7   :  { %731 = vsyncpa [#allocation5 + $0x1], 1 }
 0x2b8   :  { %732 = vsyncpa [#allocation8], 1 }
 0x2b9   :  { %733 = vsyncpa [#allocation6], 1 }
 0x2ba   :  { %735 = vsyncpa [#allocation6 + $0x1], 1 }
 0x2bb   :  { %736 = vsyncpa [#allocation11], 1 }
 0x2bc   :  { %738 = vsyncpa [#allocation11 + $0x1], 1 }

// kernel: resnet_block_forward.6
= control target key start
LH: loop header
LB: loop body
LE: loop exit
PB: predicated region body
PF: predicated region fallthrough
CT: control target
= control target key end

     0   :  { %s1788_s0 = inlined_call_operand.hbm [shape: f32[2,16,16,64], index: 0, kind: input, shape index: {}]   ;;  %s1789_s1 = inlined_call_operand.hbm [shape: f32[64,32], index: 1, kind: input, shape index: {}]   ;;  %s1790_s2 = inlined_call_operand.hbm [shape: f32[2,1,64], index: 2, kind: output, shape index: {0}]   ;;  %s1791_s3 = inlined_call_operand.hbm [shape: f32[2,1,64], index: 3, kind: output, shape index: {1}]  }
   0x1   :  { %1805 = sst [smem:[#allocation20_spill]] %s1789_s1 }
   0x2   :  { %1806 = sst [smem:[#allocation21_spill]] %s1790_s2 }
   0x3   :  { %1807 = sst [smem:[#allocation22_spill]] %s1791_s3 }
   0x4   :  { %9 = vsyncpa [#allocation5], 0 }
   0x5   :  { %11 = vsyncpa [#allocation5 + $0x1], 0 }
   0x6   :  { %12 = vsyncpa [#allocation8], 0 }
   0x7   :  { %13 = vsyncpa [#allocation6], 0 }
   0x8   :  { %15 = vsyncpa [#allocation6 + $0x1], 0 }
   0x9   :  { %16 = vsyncpa [#allocation11], 0 }
   0xa   :  { %18 = vsyncpa [#allocation11 + $0x1], 0  ;;  %s1421_s12 = smov 0   ;;  %s1423_s13 = smov 0  }
   0xb   :  { %s1425_s14 = smov 0   ;;  %s1427_s15 = smov 0  }
   0xc   :  { %s1429_s16 = smov 0   ;;  %s1431_s17 = smov 0  }
   0xd   :  { %s1433_s18 = smov 0   ;;  %s1435_s19 = smov 0  }
   0xe   :  { %s1437_s20 = smov 0   ;;  %s1439_s21 = smov 0  }
   0xf   :  { %s1441_s22 = smov 0  }
  0x10 LB: > { %1808 = sst [smem:[#allocation16_spill]] %s1349_s12  ;;  %s839_s23 = sadd.s32 4294967295, %s1389_s22   ;;  %s1389_s22 = sphi %s1441_s22, %s24_s22   ;;  %s1385_s21 = sphi %s1439_s21, %s1843_s21   ;;  %s1381_s20 = sphi %s1437_s20, %s1842_s20   ;;  %s1377_s19 = sphi %s1435_s19, %s1841_s19   ;;  %s1373_s18 = sphi %s1433_s18, %s1840_s18   ;;  %s1369_s17 = sphi %s1431_s17, %s1839_s17   ;;  %s1365_s16 = sphi %s1429_s16, %s1838_s16   ;;  %s1361_s15 = sphi %s1427_s15, %s1837_s15   ;;  %s1357_s14 = sphi %s1425_s14, %s1836_s14   ;;  %s1353_s13 = sphi %s1423_s13, %s1835_s13   ;;  %s1349_s12 = sphi %s1421_s12, %s1834_s12  }
  0x11   : > { %s840_s24 = sadd.s32 4294967294, %s1389_s22   ;;  %p58_p0 = scmp.ne.s32.totalorder %s1365_s16, %s1361_s15 }
  0x12   : > { %p1477_p1 = scmp.eq.s32.totalorder %s839_s23, 0  ;;  %s92_s26 = sadd.s32 1, %s1357_s14 }
  0x13   : > { %p102_p2 = scmp.ne.s32.totalorder %s1357_s14, %s1353_s13  ;;  %p103_p4 = scmp.eq.s32.totalorder %s839_s23, 3 }
  0x14   : > { %s1809_s25 = scalar_select %p1477_p1, 1, 0 }
  0x15   : > { %p1486_p3 = por %p1477_p1, %p58_p0  ;;  %p108_p5 = scmp.ne.s32.totalorder %s1353_s13, %s1349_s12 }
  0x16   : > { %p109_p6 = scmp.eq.s32.totalorder %s840_s24, 3  ;;  %p1492_p7 = por %p103_p4, %p102_p2 }
  0x17   : > { %s1810_s27 = scalar_select %p1486_p3, 1, 0 }
  0x18   : > { %s1811_s28 = scalar_select %p1492_p7, 1, 0 }
  0x19   : > { %p841_p8 = scmp.ge.s32.totalorder %s1389_s22, 1  ;;  %p1497_p9 = por %p109_p6, %p108_p5 }
  0x1a   : > { %p142_p10 = scmp.lt.s32.totalorder %s1389_s22, 5  ;;  %s1391_s4 = smov [#allocation7]  }
  0x1b   : > { %s1812_s29 = scalar_select %p1497_p9, 1, 0 }
  0x1c   : > { %p1502_p11 = pnand %p841_p8, %p142_p10  ;;  %s154_s5 = sshll.u32 %s1391_s4, 4  ;;  %s155_s5 = int_to_ptr.vmem [resolvable:$true] %s154_s5 }
  0x1d   : > { %1813 = sst [smem:[#allocation17_spill]] %s1812_s29  ;;  %s1816_s1 = sld [smem:[#allocation20_spill]] }
  0x1e   : > { %s1814_s30 = scalar_select %p1502_p11, 1, 0 }
  0x1f   : > { %p1057_p12 = pneg %p1502_p11 }
  0x21   : > { %p1510_p13 = pnand %p1057_p12, %p1477_p1 }
  0x23   : > { %s1173_s9 = scalar_lea.hbm %s1816_s1, 1024  ;;  %p1175_p2 = pneg %p1510_p13 }
  0x24   : > { %p1174_p0 = scmp.ne.s32.totalorder %s1816_s1, %s1173_s9  ;;  %p1180_p6 = scmp.lt.u32.totalorder %s1173_s9, %s1816_s1 }
  0x26   : > { %p1176_p4 = pnand %p1175_p2, %p1174_p0 }
  0x28   : > { %p1177_p5 = pneg %p1176_p4 }
  0x2a   : > { %p1182_p8 = pnand %p1180_p6, %p1177_p5 }
  0x2c   : > { %1185 = shalt.err (!%p1182_p8)
}
  0x2d   : > { %s1186_s24 = scalar_lea.vmem %s155_s5, 1024  ;;  %p1194_p7 = scmp.lt.s32.totalorder %s155_s5, %s155_s5 }
  0x2e   : > { %p1187_p10 = scmp.ne.s32.totalorder %s155_s5, %s1186_s24  ;;  %p1195_p1 = scmp.lt.s32.totalorder %s1186_s24, %s1186_s24 }
  0x30   : > { %p1189_p12 = pnand %p1187_p10, %p1175_p2  ;;  %p1196_p3 = por %p1195_p1, %p1194_p7 }
  0x32   : > { %p1190_p9 = pneg %p1189_p12 }
  0x34   : > { %p1197_p11 = pnand %p1196_p3, %p1190_p9 }
  0x36   : > { %1200 = shalt.err (!%p1197_p11)
}
  0x37   : > { %s1797_s4 = smov 128   ;;  %s1798_s7 = smov 8  }
  0x38   : > { %1060 = dma.hbm_to_vmem [thread:$0]  (!%p1510_p13), %s1816_s1, 1024, %s155_s5, [#allocation8], %s1797_s4, %s1797_s4, %s1798_s7  }
  0x39   : > { %s33_s10 = sadd.s32 1, %s1381_s20  ;;  %s36_s11 = sadd.s32 1, %s1385_s21 }
  0x3a   : > { %p34_p1 = scmp.ge.s32.totalorder %s33_s10, 2  ;;  %s45_s15 = sadd.s32 1, %s1369_s17 }
  0x3b   : > { %p52_p3 = scmp.ne.s32.totalorder %s1369_s17, %s1365_s16  ;;  %p53_p7 = scmp.eq.s32.totalorder %s1389_s22, 0 }
  0x3c   : > { %s1845_s10 = smov (%p34_p1, %s33_s10), 0  ;;  %s1847_s11 = smov (!%p34_p1, %s36_s11), %s1385_s21 }
  0x3d   : > { %1817 = sst [smem:[#allocation18_spill]] %s1845_s10  ;;  %s41_s6 = ssub.s32 %s1381_s20, %s1845_s10 }
  0x3e   : > { %p38_p9 = scmp.ge.s32.totalorder %s1847_s11, 2  ;;  %p1073_p11 = scmp.lt.s32.totalorder %s1389_s22, 4 }
  0x3f   : > { %p1545_p13 = por %p53_p7, %p52_p3  ;;  %s168_s23 = sand.u32 1, %s1369_s17  }
  0x40   : > { %s1849_s11 = smov (%p38_p9, %s1847_s11), 0  ;;  %s844_s24 = sshll.u32 %s168_s23, 7 }
  0x41   : > { %1819 = sst [smem:[#allocation19_spill]] %s1849_s11  ;;  %s40_s8 = ssub.s32 %s1385_s21, %s1849_s11 }
  0x42   : > { %s42_s9 = sor.u32 %s41_s6, %s40_s8  ;;  %p90_p0 = scmp.eq.s32.totalorder %s40_s8, 0 }
  0x43   : > { %p43_p2 = scmp.eq.s32.totalorder %s42_s9, 0  ;;  %s878_s4 = sshll.u32 %s1381_s20, 4 }
  0x44   : > { %s1558_s7 = scalar_select %p90_p0, %s1357_s14, %s92_s26  }
  0x45   : > { %s1561_s1 = scalar_select %p43_p2, %s1369_s17, %s45_s15  }
  0x46   : > { %s847_s10 = sshll.u32 %s1385_s21, 5  ;;  %s172_s29 = scalar_lea.vmem [#allocation4], %s844_s24 }
  0x47   : > { %s182_s12 = sshll.u32 %s172_s29, 4  ;;  %s179_s3 = sadd.s32 %s878_s4, %s847_s10  ;;  %s1564_s12 = int_to_ptr.vmem [resolvable:$true] %s182_s12 }
  0x48   : > { %s848_s2 = sshll.u32 %s179_s3, 7  ;;  %p1570_p4 = pnand %p1073_p11, %p1545_p13 }
  0x49   : > { %s1577_s26 = scalar_lea.hbm %s1788_s0, %s848_s2  ;;  %s1579_s29 = scalar_lea.sflag [#allocation5], %s168_s23 }
  0x4a   : > { %s1201_s3 = scalar_lea.hbm %s1577_s26, 2048  ;;  %p1203_p6 = pneg %p1570_p4 }
  0x4b   : > { %p1202_p5 = scmp.ne.s32.totalorder %s1577_s26, %s1201_s3  ;;  %s1206_s15 = scalar_lea.hbm %s1788_s0, 8192 }
  0x4c   : > { %p1207_p12 = scmp.lt.u32.totalorder %s1577_s26, %s1788_s0  ;;  %p1208_p1 = scmp.lt.u32.totalorder %s1206_s15, %s1201_s3 }
  0x4d   : > { %p1204_p8 = pnand %p1203_p6, %p1202_p5  ;;  %p1210_p7 = scmp.lt.u32.totalorder %s1201_s3, %s1577_s26 }
  0x4e   : > { %p1209_p3 = por %p1208_p1, %p1207_p12 }
  0x4f   : > { %p1205_p10 = pneg %p1204_p8 }
  0x50   : > { %p1211_p9 = por %p1210_p7, %p1209_p3 }
  0x52   : > { %p1212_p11 = pnand %p1211_p9, %p1205_p10 }
  0x54   : > { %1215 = shalt.err (!%p1212_p11)
}
  0x55   : > { %s1216_s23 = scalar_lea.vmem %s1564_s12, 2048  ;;  %s1394_s24 = smov [#allocation4]  }
  0x56   : > { %p1217_p13 = scmp.ne.s32.totalorder %s1564_s12, %s1216_s23  ;;  %s1221_s9 = sshll.u32 %s1394_s24, 4  ;;  %s1222_s9 = int_to_ptr.vmem [resolvable:$false] %s1221_s9 }
  0x57   : > { %s1223_s6 = scalar_lea.vmem %s1222_s9, 4096  ;;  %p1224_p5 = scmp.lt.s32.totalorder %s1564_s12, %s1222_s9 }
  0x58   : > { %p1219_p0 = pnand %p1217_p13, %p1203_p6  ;;  %p1225_p8 = scmp.lt.s32.totalorder %s1223_s6, %s1216_s23 }
  0x5a   : > { %p1220_p2 = pneg %p1219_p0  ;;  %p1226_p12 = por %p1225_p8, %p1224_p5 }
  0x5c   : > { %p1227_p1 = pnand %p1226_p12, %p1220_p2 }
  0x5e   : > { %1230 = shalt.err (!%p1227_p1)
}
  0x5f   : > { %s1821_s8 = smov 8   ;;  %s1822_s3 = smov 128  }
  0x60   : > { %1064 = dma.hbm_to_vmem [thread:$0]  (!%p1570_p4), %s1577_s26, 2048, %s1564_s12, %s1579_s29, %s1822_s3, %s1822_s3, %s1821_s8  }
  0x61   : > { %p1823_p6 = scmp.ne.s32.totalorder %s1814_s30, 0 }
  0x62   : > { %s196_s4 = sand.u32 (!%p1823_p6), 1, %s1365_s16   ;;  %p1824_p10 = scmp.ne.s32.totalorder (!%p1823_p6), %s1810_s27, 0 }
  0x63   : > { %194 = sbr.rel (%p1823_p6) target bundleno = 668 (0x29c), region = 28  ;;  %s850_s10 = sshll.u32 (!%p1823_p6), %s196_s4, 7 }
  0x64   : > { %s197_s15 = scalar_lea.sflag (!%p1823_p6), [#allocation5], %s196_s4  ;;  %s1613_s2 = scalar_lea.vmem (!%p1823_p6), [#allocation4], %s850_s10 }
  0x6a   : > { %1332 = dma.done.wait (%p1824_p10), %s197_s15, 2048  }
  0x6b   : > { %1334 = vsyncadd (%p1824_p10), %s197_s15, 4294965248  ;;  %p1825_p3 = scmp.ne.s32.totalorder %s1809_s25, 0 }
  0x6d   : > { %1336 = dma.done.wait (%p1825_p3), [#allocation8], 1024  }
  0x6e   : > { %1338 = vsyncadd (%p1825_p3), [#allocation8], 4294966272  ;;  %s1624_s12 = sand.u32 1, %s1353_s13   ;;  %p852_p4 = scmp.ne.s32.totalorder %s1373_s18, 0 }
  0x6f   : > { %s223_s30 = scalar_lea.vmem [#allocation9], %s1624_s12  ;;  %s229_s11 = scalar_lea.vmem [#allocation10], %s1624_s12  ;;  %vm235_vm0 = vcmask (!%p852_p4), 516096   ;;  %v1395_v0 = vmov (!%p852_p4), 0.0  }
  0x70   : > { %234 = sbr.rel (%p852_p4) target bundleno = 119 (0x77), region = 40  ;;  %236 = vst.msk [vmem:[#allocation2] sm:$0x1] (!%p852_p4), %vm235_vm0, %v1395_v0  ;;  %237 = vst.msk [vmem:[#allocation3] sm:$0x1] (!%p852_p4), %vm235_vm0, %v1395_v0 }
  0x77 PF: > { %v238_v1 = vld [vmem:[%s1613_s2] sm:$0xff]  ;;  %v239_v2 = vld [vmem:[%s1613_s2 + $0x8] sm:$0xff]  ;;  %v240_v3 = vld [vmem:[%s1613_s2 + $0x10] sm:$0xff]  ;;  %vm255_vm1 = vcmask 523264   ;;  %vm294_vm2 = vcmask 516096   ;;  %p853_p7 = scmp.ne.s32.totalorder %s1373_s18, 1 }
  0x78   : > { %v256_v4 = vsel %vm255_vm1, %v238_v1, 0.0  ;;  %v257_v5 = vsel %vm255_vm1, %v239_v2, 0.0  ;;  %v259_v6 = vsel %vm255_vm1, %v240_v3, 0.0  ;;  %v241_v7 = vld [vmem:[%s1613_s2 + $0x18] sm:$0xff]  ;;  %v242_v10 = vld [vmem:[%s1613_s2 + $0x20] sm:$0xff]  ;;  %v243_v13 = vld [vmem:[%s1613_s2 + $0x28] sm:$0xff]  ;;  %v297_v15 = vmul.f32 %v238_v1, %v238_v1 }
  0x79   : > { %v258_v8 = vadd.f32 %v257_v5, %v256_v4  ;;  %v261_v9 = vsel %vm255_vm1, %v241_v7, 0.0  ;;  %v263_v12 = vsel %vm255_vm1, %v242_v10, 0.0  ;;  %v298_v16 = vmul.f32 %v239_v2, %v239_v2  ;;  %v244_v19 = vld [vmem:[%s1613_s2 + $0x30] sm:$0xff]  ;;  %v245_v24 = vld [vmem:[%s1613_s2 + $0x38] sm:$0xff]  ;;  %v246_v31 = vld [vmem:[%s1613_s2 + $0x40] sm:$0xff] }
  0x7a   : > { %v299_v17 = vmul.f32 %v240_v3, %v240_v3  ;;  %v265_v18 = vsel %vm255_vm1, %v243_v13, 0.0  ;;  %v300_v21 = vmul.f32 %v241_v7, %v241_v7  ;;  %v267_v22 = vsel %vm255_vm1, %v244_v19, 0.0  ;;  %v247_v37 = vld [vmem:[%s1613_s2 + $0x48] sm:$0xff]  ;;  %v248_v43 = vld [vmem:[%s1613_s2 + $0x50] sm:$0xff]  ;;  %v249_v49 = vld [vmem:[%s1613_s2 + $0x58] sm:$0xff] }
  0x7b   : > { %v260_v11 = vadd.f32 %v259_v6, %v258_v8  ;;  %v301_v23 = vmul.f32 %v242_v10, %v242_v10  ;;  %v313_v26 = vsel %vm255_vm1, %v297_v15, 0.0  ;;  %v314_v27 = vsel %vm255_vm1, %v298_v16, 0.0  ;;  %v250_v55 = vld [vmem:[%s1613_s2 + $0x60] sm:$0xff]  ;;  %v251_v61 = vld [vmem:[%s1613_s2 + $0x68] sm:$0xff]  ;;  %v252_v3 = vld [vmem:[%s1613_s2 + $0x70] sm:$0xff] }
  0x7c   : > { %v316_v28 = vsel %vm255_vm1, %v299_v17, 0.0  ;;  %v269_v29 = vsel %vm255_vm1, %v245_v24, 0.0  ;;  %v315_v30 = vadd.f32 %v314_v27, %v313_v26  ;;  %v302_v33 = vmul.f32 %v243_v13, %v243_v13 }
  0x7d   : > { %v262_v14 = vadd.f32 %v261_v9, %v260_v11  ;;  %v318_v34 = vsel %vm255_vm1, %v300_v21, 0.0  ;;  %v271_v35 = vsel %vm255_vm1, %v246_v31, 0.0  ;;  %v303_v39 = vmul.f32 %v244_v19, %v244_v19  ;;  %v253_v9 = vld [vmem:[%s1613_s2 + $0x78] sm:$0xff] }
  0x7e   : > { %v317_v36 = vadd.f32 %v316_v28, %v315_v30  ;;  %v320_v40 = vsel %vm255_vm1, %v301_v23, 0.0  ;;  %v273_v41 = vsel %vm255_vm1, %v247_v37, 0.0  ;;  %v304_v45 = vmul.f32 %v245_v24, %v245_v24 }
  0x7f   : > { %v264_v20 = vadd.f32 %v263_v12, %v262_v14  ;;  %v322_v46 = vsel %vm255_vm1, %v302_v33, 0.0  ;;  %v275_v47 = vsel %vm255_vm1, %v248_v43, 0.0  ;;  %v305_v51 = vmul.f32 %v246_v31, %v246_v31 }
  0x80   : > { %v319_v42 = vadd.f32 %v318_v34, %v317_v36  ;;  %v324_v52 = vsel %vm255_vm1, %v303_v39, 0.0  ;;  %v277_v53 = vsel %vm255_vm1, %v249_v49, 0.0  ;;  %v306_v57 = vmul.f32 %v247_v37, %v247_v37  ;;  %v254_v36 = vld [vmem:[#allocation2] sm:$0x1] }
  0x81   : > { %v266_v25 = vadd.f32 %v265_v18, %v264_v20  ;;  %v326_v58 = vsel %vm255_vm1, %v304_v45, 0.0  ;;  %v279_v59 = vsel %vm255_vm1, %v250_v55, 0.0  ;;  %v307_v63 = vmul.f32 %v248_v43, %v248_v43 }
  0x82   : > { %v321_v48 = vadd.f32 %v320_v40, %v319_v42  ;;  %v328_v0 = vsel %vm255_vm1, %v305_v51, 0.0  ;;  %v281_v1 = vsel %vm255_vm1, %v251_v61, 0.0  ;;  %v308_v5 = vmul.f32 %v249_v49, %v249_v49  ;;  %v358_v49 = vld [vmem:[#allocation7 + $0x10] sm:$0xff] (!%p853_p7) }
  0x83   : > { %v268_v32 = vadd.f32 %v267_v22, %v266_v25  ;;  %v330_v6 = vsel %vm255_vm1, %v306_v57, 0.0  ;;  %v283_v7 = vsel %vm255_vm1, %v252_v3, 0.0  ;;  %v309_v11 = vmul.f32 %v250_v55, %v250_v55  ;;  %v360_v55 = vld [vmem:[#allocation7 + $0x20] sm:$0xff] (!%p853_p7) }
  0x84   : > { %v323_v54 = vadd.f32 %v322_v46, %v321_v48  ;;  %v332_v12 = vsel %vm255_vm1, %v307_v63, 0.0  ;;  %v285_v13 = vsel %vm255_vm1, %v253_v9, 0.0  ;;  %v310_v16 = vmul.f32 %v251_v61, %v251_v61  ;;  %v357_v48 = vld [vmem:[#allocation7 + $0x8] sm:$0xff] (!%p853_p7) }
  0x85   : > { %v270_v38 = vadd.f32 %v269_v29, %v268_v32  ;;  %v334_v17 = vsel %vm255_vm1, %v308_v5, 0.0  ;;  %v311_v20 = vmul.f32 %v252_v3, %v252_v3  ;;  %v336_v21 = vsel %vm255_vm1, %v309_v11, 0.0 }
  0x86   : > { %v325_v60 = vadd.f32 %v324_v52, %v323_v54  ;;  %v312_v24 = vmul.f32 %v253_v9, %v253_v9  ;;  %v338_v25 = vsel %vm255_vm1, %v310_v16, 0.0  ;;  %v359_v52 = vld [vmem:[#allocation7 + $0x18] sm:$0xff] (!%p853_p7)  ;;  %vm1397_vm3 = vmmov (!%p853_p7), 0  }
  0x87   : > { %v272_v44 = vadd.f32 %v271_v35, %v270_v38  ;;  %v340_v28 = vsel %vm255_vm1, %v311_v20, 0.0  ;;  %v995_v54 = vpack.c.bf16 (!%p853_p7), %v359_v52, %v358_v49  ;;  %vm518_vm4 = vcmask (!%p853_p7), 261120  }
  0x88   : > { %v327_v2 = vadd.f32 %v326_v58, %v325_v60  ;;  %v342_v31 = vsel %vm255_vm1, %v312_v24, 0.0  ;;  %v362_v58 = vld [vmem:[#allocation7 + $0x30] sm:$0xff] (!%p853_p7)  ;;  %vm1017_vm5 = vmpackc.low (!%p853_p7), %vm518_vm4, %vm518_vm4 }
  0x89   : > { %v274_v50 = vadd.f32 %v273_v41, %v272_v44  ;;  %v296_v44 = vld [vmem:[#allocation3] sm:$0x1] }
  0x8a   : > { %v329_v8 = vadd.f32 %v328_v0, %v327_v2 }
  0x8b   : > { %v276_v56 = vadd.f32 %v275_v47, %v274_v50  ;;  %v356_v47 = vld [vmem:[#allocation7] sm:$0xff] (!%p853_p7)  ;;  %v1396_v50 = vmov (!%p853_p7), 0.0|0.0  }
  0x8c   : > { %v331_v14 = vadd.f32 %v330_v6, %v329_v8  ;;  %991 = vmatprep.subr.bf16.mxu0 (!%p853_p7), %v1396_v50  ;;  %v992_v51 = vpack.c.bf16 (!%p853_p7), %v357_v48, %v356_v47  ;;  %1003 = vmatprep.subr.bf16.mxu1 (!%p853_p7), %v1396_v50 }
  0x8d   : > { %v278_v62 = vadd.f32 %v277_v53, %v276_v56  ;;  %v1398_v53 = vmov (!%p853_p7), 0.0   ;;  %v361_v56 = vld [vmem:[#allocation7 + $0x28] sm:$0xff] (!%p853_p7) }
  0x8e   : > { %v333_v18 = vadd.f32 %v332_v12, %v331_v14  ;;  %931 = vmatprep.mubr.msk.f32.mxu0 (!%p853_p7), %vm1397_vm3, %v1398_v53  ;;  %950 = vmatprep.mubr.msk.f32.mxu1 (!%p853_p7), %vm1397_vm3, %v1398_v53  ;;  %v998_v57 = vpack.c.bf16 (!%p853_p7), %v361_v56, %v360_v55 }
  0x8f   : > { %v280_v4 = vadd.f32 %v279_v59, %v278_v62  ;;  %993 = vmatpush3.bf16.msra.mxu0 (!%p853_p7), %v992_v51  ;;  %1005 = vmatpush3.bf16.msra.mxu1 (!%p853_p7), %v992_v51  ;;  %v363_v59 = vld [vmem:[#allocation7 + $0x38] sm:$0xff] (!%p853_p7) }
  0x90   : > { %v335_v22 = vadd.f32 %v334_v17, %v333_v18  ;;  %994 = vmatprep.subr.bf16.mxu0 (!%p853_p7), %v1396_v50  ;;  %1006 = vmatprep.subr.bf16.mxu1 (!%p853_p7), %v1396_v50  ;;  %v1001_v60 = vpack.c.bf16 (!%p853_p7), %v363_v59, %v362_v58 }
  0x91   : > { %v282_v10 = vadd.f32 %v281_v1, %v280_v4 }
  0x92   : > { %v337_v26 = vadd.f32 %v336_v21, %v335_v22 }
  0x93   : > { %v284_v15 = vadd.f32 %v283_v7, %v282_v10  ;;  %996 = vmatpush3.bf16.msra.mxu0 (!%p853_p7), %v995_v54  ;;  %1008 = vmatpush3.bf16.msra.mxu1 (!%p853_p7), %v995_v54 }
  0x94   : > { %v339_v29 = vadd.f32 %v338_v25, %v337_v26  ;;  %997 = vmatprep.subr.bf16.mxu0 (!%p853_p7), %v1396_v50  ;;  %1009 = vmatprep.subr.bf16.mxu1 (!%p853_p7), %v1396_v50 }
  0x95   : > { %v286_v19 = vadd.f32 %v285_v13, %v284_v15 }
  0x96   : > { %v341_v32 = vadd.f32 %v340_v28, %v339_v29 }
  0x97   : > { %v287_v23 = vrot.slane %v286_v19, 4  ;;  %999 = vmatpush3.bf16.msra.mxu0 (!%p853_p7), %v998_v57  ;;  %1011 = vmatpush3.bf16.msra.mxu1 (!%p853_p7), %v998_v57 }
  0x98   : > { %v343_v34 = vadd.f32 %v342_v31, %v341_v32  ;;  %1000 = vmatprep.subr.bf16.mxu0 (!%p853_p7), %v1396_v50  ;;  %1012 = vmatprep.subr.bf16.mxu1 (!%p853_p7), %v1396_v50 }
  0x99   : > { %v288_v27 = vadd.f32 %v287_v23, %v286_v19 }
  0x9a   : > { %v344_v37 = vrot.slane %v343_v34, 4 }
  0x9b   : > { %v289_v30 = vrot.slane %v288_v27, 2  ;;  %1002 = vmatpush3.bf16.msra.mxu0 (!%p853_p7), %v1001_v60  ;;  %1014 = vmatpush3.bf16.msra.mxu1 (!%p853_p7), %v1001_v60 }
  0x9c   : > { %v345_v39 = vadd.f32 %v344_v37, %v343_v34  ;;  %1015 = vmatprep.subr.bf16.mxu0 (!%p853_p7), %v1396_v50  ;;  %1031 = vmatprep.subr.bf16.mxu1 (!%p853_p7), %v1396_v50 }
  0x9d   : > { %v290_v33 = vadd.f32 %v289_v30, %v288_v27 }
  0x9e   : > { %v346_v41 = vrot.slane %v345_v39, 2 }
  0x9f   : > { %v291_v35 = vrot.slane %v290_v33, 1 }
  0xa0   : > { %v347_v42 = vadd.f32 %v346_v41, %v345_v39 }
  0xa1   : > { %v292_v38 = vadd.f32 %v291_v35, %v290_v33 }
  0xa2   : > { %v348_v43 = vrot.slane %v347_v42, 1  ;;  %355 = sbr.rel (%p853_p7) target bundleno = 618 (0x26a), region = 44 }
  0xa3   : > { %v293_v40 = vadd.f32 %v292_v38, %v254_v36 }
  0xa4   : > { %v349_v45 = vadd.f32 %v348_v43, %v347_v42 }
  0xa5   : > { %295 = vst.msk [vmem:[#allocation2] sm:$0x1] %vm294_vm2, %v293_v40 }
  0xa6   : > { %v350_v46 = vadd.f32 %v349_v45, %v296_v44 }
  0xa8   : > { %351 = vst.msk [vmem:[#allocation3] sm:$0x1] %vm294_vm2, %v350_v46 }
  0xac   : > { %v364_v61 = vld [vmem:[#allocation2] sm:$0x1] }
  0xad   : > { %932 = vmatmul.mubr.msk.f32.vlgmr.msra.gmra.mrb[0].mxu0 %vm255_vm1, %v364_v61 }
  0xae   : > { %969 = vmatprep.mubr.msk.f32.mxu0 %vm1397_vm3, %v1398_v53  ;;  %1018 = vmatpush3.bf16.xpose.msk.msra.mxu0 %vm1017_vm5, %v992_v51 }
  0xaf   : > { %v438_v62 = vld [vmem:[#allocation3] sm:$0x1]  ;;  %1019 = vmatprep.subr.bf16.mxu0 %v1396_v50 }
  0xb0   : > { %951 = vmatmul.mubr.msk.f32.vlgmr.msra.gmra.mrb[0].mxu1 %vm255_vm1, %v438_v62 }
  0xb1   : > { %988 = vmatprep.mubr.msk.f32.mxu1 %vm1397_vm3, %v1398_v53  ;;  %1034 = vmatpush3.bf16.xpose.msk.msra.mxu1 %vm1017_vm5, %v992_v51 }
  0xb2   : > { %1035 = vmatprep.subr.bf16.mxu1 %v1396_v50 }
  0xb6   : > { %1022 = vmatpush3.bf16.xpose.msk.msra.mxu0 %vm1017_vm5, %v995_v54 }
  0xb7   : > { %1023 = vmatprep.subr.bf16.mxu0 %v1396_v50 }
  0xb9   : > { %1038 = vmatpush3.bf16.xpose.msk.msra.mxu1 %vm1017_vm5, %v995_v54 }
  0xba   : > { %1039 = vmatprep.subr.bf16.mxu1 %v1396_v50 }
  0xbe   : > { %1026 = vmatpush3.bf16.xpose.msk.msra.mxu0 %vm1017_vm5, %v998_v57 }
  0xbf   : > { %1027 = vmatprep.subr.bf16.mxu0 %v1396_v50 }
  0xc1   : > { %1042 = vmatpush3.bf16.xpose.msk.msra.mxu1 %vm1017_vm5, %v998_v57 }
  0xc2   : > { %1043 = vmatprep.subr.bf16.mxu1 %v1396_v50 }
  0xc6   : > { %1030 = vmatpush3.bf16.xpose.msk.msra.mxu0 %vm1017_vm5, %v1001_v60 }
  0xc9   : > { %1046 = vmatpush3.bf16.xpose.msk.msra.mxu1 %vm1017_vm5, %v1001_v60 }
 0x180   : > { %v434_v63 = vpop.f32.mrb[0].mxu0 }
 0x181   : > { %v512_v1 = vmul.f32 0.001953125, %v434_v63  ;;  %v933_v2 = vpop.f32.mrb[1].mxu0 }
 0x183   : > { %v508_v0 = vpop.f32.mrb[0].mxu1  ;;  %v514_v5 = vmul.f32 %v512_v1, %v512_v1  ;;  %970 = vmatmul.mubr.msk.f32.vlgmr.msra.gmra.mrb[2].mxu0 %vm518_vm4, %v512_v1 }
 0x184   : > { %v513_v3 = vmul.f32 0.001953125, %v508_v0  ;;  %v952_v4 = vpop.f32.mrb[1].mxu1 }
 0x186   : > { %v515_v6 = vsub.f32 %v513_v3, %v514_v5 }
 0x188   : > { %v516_v7 = vadd.f32 1e-06, %v515_v6 }
 0x18a   : > { %1171 = vrsqrt.f32 %v516_v7 }
 0x194   : > { %v1172_v8 = vpop.eup %1171 }
 0x195   : > { %989 = vmatmul.mubr.msk.f32.vlgmr.msra.gmra.mrb[2].mxu1 %vm518_vm4, %v1172_v8 }
 0x256   : > { %v612_v9 = vpop.f32.mrb[2].mxu0 }
 0x257   : > { %616 = vst.msk [vmem:[%s223_s30] sm:$0x1] %vm294_vm2, %v612_v9  ;;  %v971_v10 = vpop.f32.mrb[3].mxu0 }
 0x268   : > { %v686_v11 = vpop.f32.mrb[2].mxu1 }
 0x269   : > { %690 = vst.msk [vmem:[%s229_s11] sm:$0x1] %vm294_vm2, %v686_v11  ;;  %v990_v12 = vpop.f32.mrb[3].mxu1 }
 0x26a PF: > { %s874_s18 = sshll.u32 %s1377_s19, 4  ;;  %s1826_s26 = sld [smem:[#allocation21_spill]] }
 0x26b   : > { %s708_s5 = sshll.u32 %s223_s30, 4  ;;  %s692_s23 = scalar_lea.sflag [#allocation6], %s1624_s12  ;;  %s709_s5 = int_to_ptr.vmem [resolvable:$true] %s708_s5 }
 0x26c   : > { %s1231_s24 = scalar_lea.vmem %s709_s5, 16  ;;  %p1827_p11 = scmp.ne.s32.totalorder %s1811_s28, 0 }
 0x26d   : > { %p1232_p9 = scmp.ne.s32.totalorder %s709_s5, %s1231_s24  ;;  %s1399_s9 = smov [#allocation9]  }
 0x26e   : > { %s1235_s6 = sshll.u32 %s1399_s9, 4  ;;  %s1236_s6 = int_to_ptr.vmem [resolvable:$false] %s1235_s6 }
 0x26f   : > { %p1233_p13 = pnand %p1232_p9, %p1827_p11  ;;  %s1237_s8 = scalar_lea.vmem %s1236_s6, 32 }
 0x270   : > { %s1702_s29 = scalar_lea.hbm %s1826_s26, %s874_s18  ;;  %p1238_p2 = scmp.lt.s32.totalorder %s709_s5, %s1236_s6 }
 0x271   : > { %p1234_p0 = pneg %p1233_p13  ;;  %p1239_p5 = scmp.lt.s32.totalorder %s1237_s8, %s1231_s24 }
 0x273   : > { %p1240_p8 = por %p1239_p5, %p1238_p2 }
 0x275   : > { %p1241_p12 = pnand %p1240_p8, %p1234_p0 }
 0x277   : > { %1244 = shalt.err (!%p1241_p12)
}
 0x278   : > { %s1245_s3 = scalar_lea.hbm %s1702_s29, 16  ;;  %s1249_s15 = scalar_lea.hbm %s1826_s26, 32 }
 0x279   : > { %p1246_p1 = scmp.ne.s32.totalorder %s1702_s29, %s1245_s3  ;;  %p1250_p3 = scmp.lt.u32.totalorder %s1702_s29, %s1826_s26 }
 0x27a   : > { %p1251_p4 = scmp.lt.u32.totalorder %s1249_s15, %s1245_s3  ;;  %p1253_p9 = scmp.lt.u32.totalorder %s1245_s3, %s1702_s29 }
 0x27b   : > { %p1247_p6 = pnand %p1246_p1, %p1827_p11 }
 0x27c   : > { %p1252_p7 = por %p1251_p4, %p1250_p3 }
 0x27d   : > { %p1248_p10 = pneg %p1247_p6 }
 0x27e   : > { %p1254_p13 = por %p1253_p9, %p1252_p7 }
 0x280   : > { %p1255_p0 = pnand %p1254_p13, %p1248_p10 }
 0x282   : > { %1258 = shalt.err (!%p1255_p0)
}
 0x283   : > { %1053 = dma.vmem_to_hbm [thread:$0]  (%p1827_p11), %s709_s5, 16, %s1702_s29, %s692_s23  }
 0x284   : > { %s1828_s24 = sld [smem:[#allocation22_spill]]  ;;  %s721_s6 = sshll.u32 %s229_s11, 4  ;;  %s722_s6 = int_to_ptr.vmem [resolvable:$true] %s721_s6 }
 0x285   : > { %s696_s8 = scalar_lea.sflag [#allocation11], %s1624_s12  ;;  %s1259_s3 = scalar_lea.vmem %s722_s6, 16 }
 0x286   : > { %p1260_p2 = scmp.ne.s32.totalorder %s722_s6, %s1259_s3  ;;  %s1400_s4 = smov [#allocation10]  }
 0x287   : > { %s1263_s10 = sshll.u32 %s1400_s4, 4  ;;  %s1264_s10 = int_to_ptr.vmem [resolvable:$false] %s1263_s10 }
 0x288   : > { %p1261_p5 = pnand %p1260_p2, %p1827_p11  ;;  %s1265_s15 = scalar_lea.vmem %s1264_s10, 32 }
 0x289   : > { %p1266_p12 = scmp.lt.s32.totalorder %s722_s6, %s1264_s10  ;;  %p1267_p1 = scmp.lt.s32.totalorder %s1265_s15, %s1259_s3 }
 0x28a   : > { %s1729_s9 = scalar_lea.hbm %s1828_s24, %s874_s18  ;;  %p1262_p8 = pneg %p1261_p5 }
 0x28b   : > { %p1268_p6 = por %p1267_p1, %p1266_p12 }
 0x28d   : > { %p1269_p10 = pnand %p1268_p6, %p1262_p8 }
 0x28f   : > { %1272 = shalt.err (!%p1269_p10)
}
 0x290   : > { %s1273_s19 = scalar_lea.hbm %s1729_s9, 16  ;;  %s1277_s18 = scalar_lea.hbm %s1828_s24, 32 }
 0x291   : > { %p1274_p3 = scmp.ne.s32.totalorder %s1729_s9, %s1273_s19  ;;  %p1278_p9 = scmp.lt.u32.totalorder %s1729_s9, %s1828_s24 }
 0x292   : > { %p1279_p13 = scmp.lt.u32.totalorder %s1277_s18, %s1273_s19  ;;  %p1281_p2 = scmp.lt.u32.totalorder %s1273_s19, %s1729_s9 }
 0x293   : > { %p1275_p4 = pnand %p1274_p3, %p1827_p11 }
 0x294   : > { %p1280_p0 = por %p1279_p13, %p1278_p9 }
 0x295   : > { %p1276_p7 = pneg %p1275_p4 }
 0x296   : > { %p1282_p5 = por %p1281_p2, %p1280_p0 }
 0x298   : > { %p1283_p8 = pnand %p1282_p5, %p1276_p7 }
 0x29a   : > { %1286 = shalt.err (!%p1283_p8)
}
 0x29b   : > { %1054 = dma.vmem_to_hbm [thread:$0]  (%p1827_p11), %s722_s6, 16, %s1729_s9, %s696_s8  }
 0x29c PF: > { %s1829_s23 = sld [smem:[#allocation16_spill]]  ;;  %s1830_s2 = sld [smem:[#allocation17_spill]] }
 0x29d   : > { %p1075_p12 = scmp.ge.s32.totalorder %s1389_s22, 2 }
 0x2a2   : > { %s733_s30 = sand.u32 1, %s1829_s23   ;;  %p1831_p1 = scmp.ne.s32.totalorder %s1830_s2, 0 }
 0x2a3   : > { %s734_s25 = scalar_lea.sflag [#allocation6], %s733_s30 }
 0x2a4   : > { %p1066_p6 = pnand %p1075_p12, %p1831_p1 }
 0x2a6   : > { %1340 = dma.done.wait (!%p1066_p6), %s734_s25, 16  }
 0x2a7   : > { %1342 = vsyncadd (!%p1066_p6), %s734_s25, 4294967280  ;;  %s742_s27 = scalar_lea.sflag [#allocation11], %s733_s30 }
 0x2a8   : > { %1344 = dma.done.wait (!%p1066_p6), %s742_s27, 16  }
 0x2a9   : > { %1346 = vsyncadd (!%p1066_p6), %s742_s27, 4294967280  ;;  %s24_s22 = sadd.s32 1, %s1389_s22   ;;  %s1832_s28 = sld [smem:[#allocation18_spill]] }
 0x2aa   : > { %p21_p10 = scmp.ge.s32.totalorder %s24_s22, 6   ;;  %s1833_s9 = sld [smem:[#allocation19_spill]] }
 0x2ab   : > { %s1834_s12 = smov %s1353_s13  ;;  %s1835_s13 = smov %s1357_s14 }
 0x2ac   : > { %s1836_s14 = smov %s1558_s7  ;;  %s1837_s15 = smov %s1365_s16 }
 0x2ad   : > { %s1838_s16 = smov %s1369_s17  ;;  %s1839_s17 = smov %s1561_s1 }
 0x2ae   : > { %s1840_s18 = smov %s1381_s20  ;;  %s1841_s19 = smov %s1385_s21 }
 0x2af   : > { %s1842_s20 = smov %s1832_s28  ;;  %23 = sbr.rel (!%p21_p10) target bundleno = 16 (0x10), region = 102 }
 0x2b0   : > { %s1843_s21 = smov %s1833_s9 }
 0x2b6   :  { %746 = vsyncpa [#allocation5], 1 }
 0x2b7   :  { %748 = vsyncpa [#allocation5 + $0x1], 1 }
 0x2b8   :  { %749 = vsyncpa [#allocation8], 1 }
 0x2b9   :  { %750 = vsyncpa [#allocation6], 1 }
 0x2ba   :  { %752 = vsyncpa [#allocation6 + $0x1], 1 }
 0x2bb   :  { %753 = vsyncpa [#allocation11], 1 }
 0x2bc   :  { %755 = vsyncpa [#allocation11 + $0x1], 1 }

// kernel: resnet_block_forward.5
= control target key start
LH: loop header
LB: loop body
LE: loop exit
PB: predicated region body
PF: predicated region fallthrough
CT: control target
= control target key end

     0   :  { %s4695_s0 = inlined_call_operand.hbm [shape: f32[2,16,16,32], index: 0, kind: input, shape index: {}, may-alias: {0,1,2}]   ;;  %s4696_s1 = inlined_call_operand.hbm [shape: f32[2,16,16,32], index: 1, kind: input, shape index: {}, may-alias: {0,1,2}]   ;;  %s4697_s2 = inlined_call_operand.hbm [shape: f32[2,16,16,32], index: 2, kind: input, shape index: {}, may-alias: {0,1,2}]   ;;  %s4698_s3 = inlined_call_operand.hbm [shape: f32[2,1,32], index: 3, kind: input, shape index: {}]   ;;  %s4699_s4 = inlined_call_operand.hbm [shape: f32[2,1,32], index: 4, kind: input, shape index: {}]   ;;  %s4700_s5 = inlined_call_operand.hbm [shape: f32[1,1,32], index: 5, kind: input, shape index: {}]   ;;  %s4701_s6 = inlined_call_operand.hbm [shape: f32[1,1,32], index: 6, kind: input, shape index: {}]   ;;  %s4702_s7 = inlined_call_operand.hbm [shape: f32[3,96,64], index: 7, kind: input, shape index: {}]   ;;  %s4703_s8 = inlined_call_operand.hbm [shape: f32[1,64], index: 8, kind: input, shape index: {}]   ;;  %s4704_s9 = inlined_call_operand.hbm [shape: f32[2,16,16,64], index: 9, kind: output, shape index: {}]  }
   0x1   :  { %4749 = sst [smem:[#allocation50_spill]] %s4695_s0 }
   0x2   :  { %4750 = sst [smem:[#allocation51_spill]] %s4696_s1 }
   0x3   :  { %4751 = sst [smem:[#allocation52_spill]] %s4697_s2 }
   0x4   :  { %4752 = sst [smem:[#allocation53_spill]] %s4698_s3 }
   0x5   :  { %4753 = sst [smem:[#allocation54_spill]] %s4699_s4 }
   0x6   :  { %4754 = sst [smem:[#allocation55_spill]] %s4700_s5 }
   0x7   :  { %4755 = sst [smem:[#allocation56_spill]] %s4701_s6 }
   0x8   :  { %4756 = sst [smem:[#allocation57_spill]] %s4702_s7 }
   0x9   :  { %4757 = sst [smem:[#allocation58_spill]] %s4703_s8 }
   0xa   :  { %4758 = sst [smem:[#allocation59_spill]] %s4704_s9 }
   0xb   :  { %14 = vsyncpa [#allocation5], 0 }
   0xc   :  { %16 = vsyncpa [#allocation5 + $0x1], 0 }
   0xd   :  { %17 = vsyncpa [#allocation8], 0 }
   0xe   :  { %19 = vsyncpa [#allocation8 + $0x1], 0 }
   0xf   :  { %20 = vsyncpa [#allocation11], 0 }
  0x10   :  { %22 = vsyncpa [#allocation11 + $0x1], 0 }
  0x11   :  { %23 = vsyncpa [#allocation14], 0 }
  0x12   :  { %24 = vsyncpa [#allocation17], 0 }
  0x13   :  { %25 = vsyncpa [#allocation6], 0 }
  0x14   :  { %27 = vsyncpa [#allocation6 + $0x1], 0  ;;  %s3487_s30 = smov 0   ;;  %s3489_s10 = smov 0  }
  0x15   :  { %s3491_s11 = smov 0   ;;  %s3493_s12 = smov 0  }
  0x16   :  { %s3495_s13 = smov 0   ;;  %s3497_s14 = smov 0  }
  0x17   :  { %s3499_s15 = smov 0   ;;  %s3501_s16 = smov 0  }
  0x18   :  { %s3503_s17 = smov 0   ;;  %s3505_s18 = smov 0  }
  0x19   :  { %s3507_s19 = smov 0   ;;  %s3509_s20 = smov 0  }
  0x1a   :  { %s3511_s21 = smov 0   ;;  %s3513_s22 = smov 0  }
  0x1b   :  { %s3515_s23 = smov 0   ;;  %s3517_s24 = smov 0  }
  0x1c   :  { %s3519_s25 = smov 0  }
  0x1d LB: > { %4759 = sst [smem:[#allocation27_spill]] %s3354_s10  ;;  %s3573_s26 = sadd.s32 4294967295, %s3414_s25   ;;  %s3414_s25 = sphi %s3519_s25, %s33_s25   ;;  %s3410_s24 = sphi %s3517_s24, %s4883_s24   ;;  %s3406_s23 = sphi %s3515_s23, %s4874_s23   ;;  %s3402_s22 = sphi %s3513_s22, %s4882_s22   ;;  %s3398_s21 = sphi %s3511_s21, %s4881_s21   ;;  %s3394_s20 = sphi %s3509_s20, %s4880_s20   ;;  %s3390_s19 = sphi %s3507_s19, %s4871_s19   ;;  %s3386_s18 = sphi %s3505_s18, %s4870_s18   ;;  %s3382_s17 = sphi %s3503_s17, %s4869_s17   ;;  %s3378_s16 = sphi %s3501_s16, %s4868_s16   ;;  %s3374_s15 = sphi %s3499_s15, %s4879_s15   ;;  %s3370_s14 = sphi %s3497_s14, %s4878_s14   ;;  %s3366_s13 = sphi %s3495_s13, %s4866_s13   ;;  %s3362_s12 = sphi %s3493_s12, %s4865_s12   ;;  %s3358_s11 = sphi %s3491_s11, %s4877_s11   ;;  %s3354_s10 = sphi %s3489_s10, %s4876_s10   ;;  %s3350_s30 = sphi %s3487_s30, %s4863_s30  }
  0x1e   : > { %4760 = sst [smem:[#allocation28_spill]] %s3362_s12  ;;  %p2231_p0 = scmp.ge.s32.totalorder %s3414_s25, 1 }
  0x1f   : > { %4761 = sst [smem:[#allocation29_spill]] %s3366_s13  ;;  %p4711_p1 = scmp.eq.s32.totalorder %s3573_s26, 0 }
  0x20   : > { %4762 = sst [smem:[#allocation30_spill]] %s3370_s14  ;;  %p314_p2 = scmp.lt.s32.totalorder %s3414_s25, 5 }
  0x21   : > { %4763 = sst [smem:[#allocation31_spill]] %s3374_s15  ;;  %s3416_s28 = smov [#allocation13]  }
  0x22   : > { %4764 = sst [smem:[#allocation32_spill]] %s3378_s16  ;;  %p3578_p3 = pnand %p2231_p0, %p314_p2 }
  0x23   : > { %4765 = sst [smem:[#allocation33_spill]] %s3382_s17  ;;  %s327_s29 = sshll.u32 %s3416_s28, 4  ;;  %s328_s29 = int_to_ptr.vmem [resolvable:$true] %s327_s29 }
  0x24   : > { %4766 = sst [smem:[#allocation34_spill]] %s3386_s18  ;;  %p2688_p4 = pneg %p3578_p3 }
  0x25   : > { %4767 = sst [smem:[#allocation35_spill]] %s3390_s19  ;;  %s3417_s9 = smov [#allocation16]  }
  0x26   : > { %4768 = sst [smem:[#allocation36_spill]] %s3394_s20  ;;  %p3586_p5 = pnand %p2688_p4, %p4711_p1 }
  0x27   : > { %4769 = sst [smem:[#allocation37_spill]] %s3398_s21  ;;  %s4775_s5 = sld [smem:[#allocation55_spill]] }
  0x28   : > { %4770 = sst [smem:[#allocation38_spill]] %s3402_s22  ;;  %s348_s22 = sshll.u32 %s3417_s9, 4  ;;  %s3590_s22 = int_to_ptr.vmem [resolvable:$true] %s348_s22 }
  0x29   : > { %4771 = sst [smem:[#allocation39_spill]] %s3406_s23  ;;  %p3600_p7 = pneg %p3586_p5 }
  0x2a   : > { %s4772_s27 = scalar_select %p3578_p3, 1, 0 }
  0x2b   : > { %s4774_s21 = scalar_select %p3586_p5, 1, 0 }
  0x2c   : > { %4773 = sst [smem:[#allocation40_spill]] %s4772_s27 }
  0x2d   : > { %s2962_s12 = scalar_lea.hbm %s4775_s5, 16 }
  0x2e   : > { %p2963_p6 = scmp.ne.s32.totalorder %s4775_s5, %s2962_s12  ;;  %p2969_p10 = scmp.lt.u32.totalorder %s2962_s12, %s4775_s5 }
  0x30   : > { %p2965_p8 = pnand %p3600_p7, %p2963_p6 }
  0x32   : > { %p2966_p9 = pneg %p2965_p8 }
  0x34   : > { %p2971_p11 = pnand %p2969_p10, %p2966_p9 }
  0x36   : > { %2974 = shalt.err (!%p2971_p11)
}
  0x37   : > { %s2975_s2 = scalar_lea.vmem %s328_s29, 16  ;;  %s2982_s4 = scalar_lea.vmem %s328_s29, 32 }
  0x38   : > { %p2976_p12 = scmp.ne.s32.totalorder %s328_s29, %s2975_s2  ;;  %p2983_p2 = scmp.lt.s32.totalorder %s328_s29, %s328_s29 }
  0x39   : > { %p2984_p4 = scmp.lt.s32.totalorder %s2982_s4, %s2975_s2 }
  0x3a   : > { %p2978_p13 = pnand %p2976_p12, %p3600_p7 }
  0x3b   : > { %p2985_p1 = por %p2984_p4, %p2983_p2 }
  0x3c   : > { %p2979_p0 = pneg %p2978_p13 }
  0x3e   : > { %p2986_p3 = pnand %p2985_p1, %p2979_p0 }
  0x40   : > { %2989 = shalt.err (!%p2986_p3)
}
  0x41   : > { %2691 = dma.hbm_to_vmem [thread:$0]  (!%p3586_p5), %s4775_s5, 16, %s328_s29, [#allocation14]  }
  0x42   : > { %s4777_s7 = sld [smem:[#allocation57_spill]] }
  0x48   : > { %s2990_s9 = scalar_lea.hbm %s4777_s7, 4608 }
  0x49   : > { %p2991_p6 = scmp.ne.s32.totalorder %s4777_s7, %s2990_s9  ;;  %p2997_p1 = scmp.lt.u32.totalorder %s2990_s9, %s4777_s7 }
  0x4b   : > { %p2993_p8 = pnand %p2991_p6, %p3600_p7 }
  0x4d   : > { %p2994_p9 = pneg %p2993_p8 }
  0x4f   : > { %p2999_p3 = pnand %p2997_p1, %p2994_p9 }
  0x51   : > { %3002 = shalt.err (!%p2999_p3)
}
  0x52   : > { %s3003_s29 = scalar_lea.vmem %s3590_s22, 4608  ;;  %p3011_p13 = scmp.lt.s32.totalorder %s3590_s22, %s3590_s22 }
  0x53   : > { %p3004_p10 = scmp.ne.s32.totalorder %s3590_s22, %s3003_s29  ;;  %p3012_p0 = scmp.lt.s32.totalorder %s3003_s29, %s3003_s29 }
  0x55   : > { %p3006_p11 = pnand %p3004_p10, %p3600_p7  ;;  %p3013_p2 = por %p3012_p0, %p3011_p13 }
  0x57   : > { %p3007_p12 = pneg %p3006_p11 }
  0x59   : > { %p3014_p4 = pnand %p3013_p2, %p3007_p12 }
  0x5b   : > { %3017 = shalt.err (!%p3014_p4)
}
  0x5c   : > { %s4714_s0 = smov 128   ;;  %s4716_s18 = smov 8  }
  0x5d   : > { %2697 = dma.hbm_to_vmem [thread:$0]  (!%p3586_p5), %s4777_s7, 4608, %s3590_s22, [#allocation17], %s4714_s0, %s4714_s0, %s4716_s18  }
  0x5e   : > { %s2224_s12 = sadd.s32 4294967294, %s3414_s25   ;;  %s42_s27 = sadd.s32 1, %s3406_s23 }
  0x5f   : > { %p43_p6 = scmp.ge.s32.totalorder %s42_s27, 2  ;;  %s45_s9 = sadd.s32 1, %s3410_s24 }
  0x60   : > { %p4730_p8 = scmp.eq.s32.totalorder %s3414_s25, 0  ;;  %s90_s2 = sadd.s32 1, %s3382_s17 }
  0x61   : > { %s4885_s27 = smov (%p43_p6, %s42_s27), 0  ;;  %s4887_s9 = smov (!%p43_p6, %s45_s9), %s3410_s24 }
  0x62   : > { %4778 = sst [smem:[#allocation41_spill]] %s4885_s27  ;;  %s86_s4 = ssub.s32 %s3406_s23, %s4885_s27 }
  0x63   : > { %p97_p9 = scmp.ne.s32.totalorder %s3382_s17, %s3378_s16  ;;  %p47_p1 = scmp.ge.s32.totalorder %s4887_s9, 2 }
  0x64   : > { %p103_p3 = scmp.ne.s32.totalorder %s3378_s16, %s3374_s15  ;;  %p301_p11 = scmp.eq.s32.totalorder %s3573_s26, 3 }
  0x65   : > { %p3658_p10 = por %p97_p9, %p4730_p8  ;;  %s4889_s9 = smov (%p47_p1, %s4887_s9), 0 }
  0x66   : > { %4780 = sst [smem:[#allocation42_spill]] %s4889_s9  ;;  %p4781_p12 = scmp.eq.s32.totalorder %s3573_s26, 0 }
  0x67   : > { %p3671_p0 = por %p301_p11, %p97_p9  ;;  %s3677_s14 = ssub.s32 %s3410_s24, %s4889_s9 }
  0x68   : > { %p3667_p13 = por %p103_p3, %p4781_p12  ;;  %p307_p2 = scmp.eq.s32.totalorder %s2224_s12, 3 }
  0x69   : > { %s4784_s13 = scalar_select %p3671_p0, 1, 0 }
  0x6a   : > { %s4782_s29 = scalar_select %p3667_p13, 1, 0 }
  0x6b   : > { %4785 = sst [smem:[#allocation44_spill]] %s4784_s13  ;;  %s87_s0 = sor.u32 %s86_s4, %s3677_s14 }
  0x6c   : > { %4783 = sst [smem:[#allocation43_spill]] %s4782_s29  ;;  %p4729_p4 = scmp.lt.s32.totalorder %s3414_s25, 4 }
  0x6d   : > { %p88_p6 = scmp.eq.s32.totalorder %s87_s0, 0  ;;  %p3681_p1 = por %p307_p2, %p103_p3 }
  0x6e   : > { %s3686_s5 = sshll.u32 %s3410_s24, 5  ;;  %s400_s7 = sand.u32 1, %s3414_s25  }
  0x6f   : > { %s4786_s18 = scalar_select %p3681_p1, 1, 0 }
  0x70   : > { %s3690_s15 = scalar_select %p88_p6, %s3382_s17, %s90_s2  }
  0x71   : > { %4787 = sst [smem:[#allocation45_spill]] %s4786_s18  ;;  %s402_s9 = sand.u32 1, %s3382_s17  }
  0x72   : > { %4788 = sst [smem:[#allocation46_spill]] %s3690_s15  ;;  %s2243_s13 = sshll.u32 %s402_s9, 7 }
  0x73   : > { %s2346_s29 = sshll.u32 %s3406_s23, 4  ;;  %s404_s16 = scalar_lea.vmem [#allocation7], %s2243_s13 }
  0x74   : > { %s411_s12 = sadd.s32 %s2346_s29, %s3686_s5  ;;  %s414_s19 = sshll.u32 %s404_s16, 4  ;;  %s3700_s19 = int_to_ptr.vmem [resolvable:$true] %s414_s19 }
  0x75   : > { %s2247_s4 = sshll.u32 %s411_s12, 7  ;;  %s4789_s1 = sld [smem:[#allocation51_spill]] }
  0x76   : > { %p3706_p9 = pnand %p4729_p4, %p3658_p10  ;;  %s3712_s16 = scalar_lea.sflag [#allocation8], %s400_s7 }
  0x78   : > { %p3020_p11 = pneg %p3706_p9 }
  0x7b   : > { %s3698_s0 = scalar_lea.hbm %s4789_s1, %s2247_s4  ;;  %s3023_s22 = scalar_lea.hbm %s4789_s1, 8192 }
  0x7c   : > { %s3018_s20 = scalar_lea.hbm %s3698_s0, 2048  ;;  %p3024_p10 = scmp.lt.u32.totalorder %s3698_s0, %s4789_s1 }
  0x7d   : > { %p3019_p3 = scmp.ne.s32.totalorder %s3698_s0, %s3018_s20  ;;  %p3025_p6 = scmp.lt.u32.totalorder %s3023_s22, %s3018_s20 }
  0x7e   : > { %p3027_p8 = scmp.lt.u32.totalorder %s3018_s20, %s3698_s0 }
  0x7f   : > { %p3021_p12 = pnand %p3020_p11, %p3019_p3  ;;  %p3026_p4 = por %p3025_p6, %p3024_p10 }
  0x81   : > { %p3022_p2 = pneg %p3021_p12  ;;  %p3028_p1 = por %p3027_p8, %p3026_p4 }
  0x83   : > { %p3029_p0 = pnand %p3028_p1, %p3022_p2 }
  0x85   : > { %3032 = shalt.err (!%p3029_p0)
}
  0x86   : > { %s3033_s12 = scalar_lea.vmem %s3700_s19, 2048  ;;  %s3420_s4 = smov [#allocation7]  }
  0x87   : > { %p3034_p3 = scmp.ne.s32.totalorder %s3700_s19, %s3033_s12  ;;  %s3038_s27 = sshll.u32 %s3420_s4, 4  ;;  %s3039_s27 = int_to_ptr.vmem [resolvable:$false] %s3038_s27 }
  0x88   : > { %s3040_s2 = scalar_lea.vmem %s3039_s27, 4096  ;;  %p3041_p5 = scmp.lt.s32.totalorder %s3700_s19, %s3039_s27 }
  0x89   : > { %p3036_p12 = pnand %p3034_p3, %p3020_p11  ;;  %p3042_p10 = scmp.lt.s32.totalorder %s3040_s2, %s3033_s12 }
  0x8b   : > { %p3037_p13 = pneg %p3036_p12  ;;  %p3043_p6 = por %p3042_p10, %p3041_p5 }
  0x8d   : > { %p3044_p8 = pnand %p3043_p6, %p3037_p13 }
  0x8f   : > { %3047 = shalt.err (!%p3044_p8)
}
  0x90   : > { %s4791_s20 = smov 8   ;;  %s4792_s22 = smov 128  }
  0x91   : > { %2707 = dma.hbm_to_vmem [thread:$0]  (!%p3706_p9), %s3698_s0, 2048, %s3700_s19, %s3712_s16, %s4792_s22, %s4792_s22, %s4791_s20  }
  0x92   : > { %p150_p5 = scmp.eq.s32.totalorder %s3677_s14, 0  ;;  %s152_s9 = sadd.s32 1, %s3358_s11 }
  0x93   : > { %p159_p13 = scmp.ne.s32.totalorder %s3358_s11, %s3354_s10  ;;  %p165_p0 = scmp.ne.s32.totalorder %s3354_s10, %s3350_s30 }
  0x94   : > { %s3750_s29 = scalar_select %p150_p5, %s3358_s11, %s152_s9  }
  0x95   : > { %p4794_p4 = scmp.eq.s32.totalorder %s3414_s25, 0  ;;  %p4795_p11 = scmp.eq.s32.totalorder %s3573_s26, 0 }
  0x96   : > { %4793 = sst [smem:[#allocation47_spill]] %s3750_s29  ;;  %s4736_s12 = sand.u32 1, %s3358_s11  }
  0x97   : > { %p161_p1 = por %p159_p13, %p4794_p4  ;;  %p3756_p2 = por %p165_p0, %p4795_p11 }
  0x98   : > { %s4735_s4 = sshll.u32 %s3410_s24, 4  ;;  %s4798_s3 = sld [smem:[#allocation53_spill]] }
  0x99   : > { %s4796_s13 = scalar_select %p3756_p2, 1, 0 }
  0x9a   : > { %s454_s30 = scalar_lea.vmem [#allocation10], %s4736_s12  ;;  %p4799_p9 = scmp.lt.s32.totalorder %s3414_s25, 4 }
  0x9b   : > { %4797 = sst [smem:[#allocation48_spill]] %s4796_s13  ;;  %s461_s0 = sshll.u32 %s454_s30, 4  ;;  %s3771_s0 = int_to_ptr.vmem [resolvable:$true] %s461_s0 }
  0x9c   : > { %p3775_p3 = pnand %p4799_p9, %p161_p1  ;;  %s3781_s27 = scalar_lea.sflag [#allocation11], %s400_s7 }
  0x9d   : > { %4801 = sst [smem:[#allocation49_spill]] %s3781_s27 }
  0x9e   : > { %s3767_s19 = scalar_lea.hbm %s4798_s3, %s4735_s4  ;;  %p4740_p10 = pneg %p3775_p3 }
  0x9f   : > { %s4800_s9 = scalar_select %p3775_p3, 1, 0 }
  0xa0   : > { %s3048_s2 = scalar_lea.hbm %s3767_s19, 16  ;;  %s3053_s12 = scalar_lea.hbm %s4798_s3, 32 }
  0xa1   : > { %p3049_p12 = scmp.ne.s32.totalorder %s3767_s19, %s3048_s2  ;;  %p3054_p5 = scmp.lt.u32.totalorder %s3767_s19, %s4798_s3 }
  0xa2   : > { %p3055_p13 = scmp.lt.u32.totalorder %s3053_s12, %s3048_s2  ;;  %p3057_p4 = scmp.lt.u32.totalorder %s3048_s2, %s3767_s19 }
  0xa3   : > { %p3051_p6 = pnand %p4740_p10, %p3049_p12 }
  0xa4   : > { %p3056_p0 = por %p3055_p13, %p3054_p5 }
  0xa5   : > { %p3052_p8 = pneg %p3051_p6 }
  0xa6   : > { %p3058_p1 = por %p3057_p4, %p3056_p0 }
  0xa8   : > { %p3059_p11 = pnand %p3058_p1, %p3052_p8 }
  0xaa   : > { %3062 = shalt.err (!%p3059_p11)
}
  0xab   : > { %s3063_s7 = scalar_lea.vmem %s3771_s0, 16  ;;  %s3421_s4 = smov [#allocation10]  }
  0xac   : > { %p3064_p9 = scmp.ne.s32.totalorder %s3771_s0, %s3063_s7  ;;  %s3068_s30 = sshll.u32 %s3421_s4, 4  ;;  %s3069_s30 = int_to_ptr.vmem [resolvable:$false] %s3068_s30 }
  0xad   : > { %s3070_s1 = scalar_lea.vmem %s3069_s30, 32  ;;  %p3071_p2 = scmp.lt.s32.totalorder %s3771_s0, %s3069_s30 }
  0xae   : > { %p3066_p12 = pnand %p3064_p9, %p4740_p10  ;;  %p3072_p5 = scmp.lt.s32.totalorder %s3070_s1, %s3063_s7 }
  0xb0   : > { %p3067_p6 = pneg %p3066_p12  ;;  %p3073_p13 = por %p3072_p5, %p3071_p2 }
  0xb2   : > { %p3074_p0 = pnand %p3073_p13, %p3067_p6 }
  0xb4   : > { %3077 = shalt.err (!%p3074_p0)
}
  0xb5   : > { %2713 = dma.hbm_to_vmem [thread:$0]  (!%p3775_p3), %s3767_s19, 16, %s3771_s0, %s3781_s27  }
  0xb6   : > { %s3422_s15 = smov [#allocation15]   ;;  %s3423_s2 = smov [#allocation18]  }
  0xb7   : > { %s338_s12 = sshll.u32 %s3422_s15, 4  ;;  %s362_s3 = sshll.u32 %s3423_s2, 4  ;;  %s339_s12 = int_to_ptr.vmem [resolvable:$true] %s338_s12  ;;  %s363_s3 = int_to_ptr.vmem [resolvable:$true] %s362_s3 }
  0xb8   : > { %s4802_s6 = sld [smem:[#allocation56_spill]] }
  0xbe   : > { %s3078_s30 = scalar_lea.hbm %s4802_s6, 16 }
  0xbf   : > { %p3079_p2 = scmp.ne.s32.totalorder %s4802_s6, %s3078_s30  ;;  %p3085_p1 = scmp.lt.u32.totalorder %s3078_s30, %s4802_s6 }
  0xc1   : > { %p3081_p8 = pnand %p3079_p2, %p3600_p7 }
  0xc3   : > { %p3082_p4 = pneg %p3081_p8 }
  0xc5   : > { %p3087_p11 = pnand %p3085_p1, %p3082_p4 }
  0xc7   : > { %3090 = shalt.err (!%p3087_p11)
}
  0xc8   : > { %s3091_s19 = scalar_lea.vmem %s339_s12, 16  ;;  %s3098_s17 = scalar_lea.vmem %s339_s12, 32 }
  0xc9   : > { %p3092_p9 = scmp.ne.s32.totalorder %s339_s12, %s3091_s19  ;;  %p3099_p5 = scmp.lt.s32.totalorder %s339_s12, %s339_s12 }
  0xca   : > { %p3100_p13 = scmp.lt.s32.totalorder %s3098_s17, %s3091_s19 }
  0xcb   : > { %p3094_p12 = pnand %p3092_p9, %p3600_p7 }
  0xcc   : > { %p3101_p0 = por %p3100_p13, %p3099_p5 }
  0xcd   : > { %p3095_p6 = pneg %p3094_p12 }
  0xcf   : > { %p3102_p10 = pnand %p3101_p0, %p3095_p6 }
  0xd1   : > { %3105 = shalt.err (!%p3102_p10)
}
  0xd2   : > { %p4803_p2 = scmp.ne.s32.totalorder %s4774_s21, 0  ;;  %s4804_s8 = sld [smem:[#allocation58_spill]] }
  0xd4   : > { %2694 = dma.hbm_to_vmem [thread:$0]  (!%p4803_p2), %s4802_s6, 16, %s339_s12, [#allocation14]  }
  0xd8   : > { %s3106_s2 = scalar_lea.hbm %s4804_s8, 16 }
  0xd9   : > { %p3107_p8 = scmp.ne.s32.totalorder %s4804_s8, %s3106_s2  ;;  %p3113_p10 = scmp.lt.u32.totalorder %s3106_s2, %s4804_s8 }
  0xdb   : > { %p3109_p4 = pnand %p3107_p8, %p3600_p7 }
  0xdd   : > { %p3110_p1 = pneg %p3109_p4 }
  0xdf   : > { %p3115_p11 = pnand %p3113_p10, %p3110_p1 }
  0xe1   : > { %3118 = shalt.err (!%p3115_p11)
}
  0xe2   : > { %s3119_s19 = scalar_lea.vmem %s363_s3, 16  ;;  %s3126_s12 = scalar_lea.vmem %s363_s3, 32 }
  0xe3   : > { %p3120_p9 = scmp.ne.s32.totalorder %s363_s3, %s3119_s19  ;;  %p3127_p5 = scmp.lt.s32.totalorder %s363_s3, %s363_s3 }
  0xe4   : > { %p3128_p13 = scmp.lt.s32.totalorder %s3126_s12, %s3119_s19 }
  0xe5   : > { %p3122_p12 = pnand %p3120_p9, %p3600_p7 }
  0xe6   : > { %p3129_p0 = por %p3128_p13, %p3127_p5 }
  0xe7   : > { %p3123_p6 = pneg %p3122_p12 }
  0xe9   : > { %p3130_p3 = pnand %p3129_p0, %p3123_p6 }
  0xeb   : > { %3133 = shalt.err (!%p3130_p3)
}
  0xec   : > { %s4805_s15 = sld [smem:[#allocation41_spill]]  ;;  %s4806_s18 = sld [smem:[#allocation36_spill]] }
  0xed   : > { %s4807_s29 = sld [smem:[#allocation35_spill]]  ;;  %s4808_s2 = sld [smem:[#allocation34_spill]] }
  0xee   : > { %2700 = dma.hbm_to_vmem [thread:$0]  (!%p4803_p2), %s4804_s8, 16, %s363_s3, [#allocation17]  }
  0xef   : > { %s2225_s28 = sshll.u32 %s3406_s23, 3  ;;  %p4809_p2 = scmp.eq.s32.totalorder %s3414_s25, 0 }
  0xf0   : > { %s2226_s4 = sadd.s32 4294967295, %s2225_s28  ;;  %s3852_s19 = sadd.s32 8, %s2225_s28 }
  0xf1   : > { %p51_p7 = scmp.gt.s32.totalorder %s2226_s4, 0  ;;  %p4811_p11 = scmp.eq.s32.totalorder %s3573_s26, 0 }
  0xf2   : > { %s2227_s30 = sshll.u32 %s4805_s15, 3  ;;  %s62_s7 = sadd.s32 1, %s4806_s18 }
  0xf3   : > { %s2228_s21 = sadd.s32 4294967295, %s2227_s30  ;;  %s4891_s4 = smov (!%p51_p7, %s2226_s4), 0 }
  0xf4   : > { %p55_p3 = scmp.gt.s32.totalorder %s2228_s21, 0  ;;  %p69_p8 = scmp.ne.s32.totalorder %s4806_s18, %s4807_s29 }
  0xf5   : > { %p75_p4 = scmp.ne.s32.totalorder %s4807_s29, %s4808_s2  ;;  %s3868_s0 = sadd.s32 8, %s2227_s30 }
  0xf6   : > { %s4893_s21 = smov (!%p55_p3, %s2228_s21), 0  ;;  %p3857_p1 = por %p4809_p2, %p69_p8 }
  0xf7   : > { %s58_s1 = ssub.s32 %s4891_s4, %s4893_s21  ;;  %p3863_p9 = por %p4811_p11, %p75_p4 }
  0xf8   : > { %s59_s3 = sor.u32 %s58_s1, %s3677_s14  ;;  %s373_s29 = sand.u32 1, %s4806_s18  }
  0xf9   : > { %p60_p10 = scmp.eq.s32.totalorder %s59_s3, 0  ;;  %s2237_s2 = sshll.u32 %s373_s29, 4 }
  0xfa   : > { %s2240_s28 = sshll.u32 %s4891_s4, 1  ;;  %s377_s1 = scalar_lea.vmem [#allocation4], %s2237_s2 }
  0xfb   : > { %s3871_s15 = scalar_select %p60_p10, %s4806_s18, %s62_s7  }
  0xfc   : > { %s387_s21 = sadd.s32 %s3686_s5, %s2240_s28  ;;  %s390_s6 = sshll.u32 %s377_s1, 4  ;;  %s3876_s6 = int_to_ptr.vmem [resolvable:$true] %s390_s6 }
  0xfd   : > { %s2242_s8 = sshll.u32 %s387_s21, 7  ;;  %s4813_s13 = sld [smem:[#allocation50_spill]] }
  0xfe   : > { %p4815_p5 = scmp.lt.s32.totalorder %s3414_s25, 4  ;;  %s3891_s4 = scalar_lea.sflag [#allocation5], %s373_s29 }
 0x100   : > { %p3887_p13 = pnand %p4815_p5, %p3857_p1 }
 0x102   : > { %p3136_p7 = pneg %p3887_p13 }
 0x103   : > { %s4814_s27 = smov %s4813_s13  ;;  %s3881_s10 = scalar_lea.hbm %s4813_s13, %s2242_s8 }
 0x104   : > { %s3134_s30 = scalar_lea.hbm %s3881_s10, 256  ;;  %s3139_s13 = scalar_lea.hbm %s4814_s27, 8192 }
 0x105   : > { %p3135_p0 = scmp.ne.s32.totalorder %s3881_s10, %s3134_s30  ;;  %p3140_p4 = scmp.lt.u32.totalorder %s3881_s10, %s4814_s27 }
 0x106   : > { %p3141_p2 = scmp.lt.u32.totalorder %s3139_s13, %s3134_s30  ;;  %p3143_p10 = scmp.lt.u32.totalorder %s3134_s30, %s3881_s10 }
 0x107   : > { %p3137_p3 = pnand %p3136_p7, %p3135_p0 }
 0x108   : > { %p3142_p1 = por %p3141_p2, %p3140_p4 }
 0x109   : > { %p3138_p8 = pneg %p3137_p3 }
 0x10a   : > { %p3144_p11 = por %p3143_p10, %p3142_p1 }
 0x10c   : > { %p3145_p5 = pnand %p3144_p11, %p3138_p8 }
 0x10e   : > { %3148 = shalt.err (!%p3145_p5)
}
 0x10f   : > { %s3149_s29 = scalar_lea.vmem %s3876_s6, 256  ;;  %s3424_s2 = smov [#allocation4]  }
 0x110   : > { %p3150_p0 = scmp.ne.s32.totalorder %s3876_s6, %s3149_s29  ;;  %s3154_s28 = sshll.u32 %s3424_s2, 4  ;;  %s3155_s28 = int_to_ptr.vmem [resolvable:$false] %s3154_s28 }
 0x111   : > { %s3156_s21 = scalar_lea.vmem %s3155_s28, 512  ;;  %p3157_p12 = scmp.lt.s32.totalorder %s3876_s6, %s3155_s28 }
 0x112   : > { %p3152_p3 = pnand %p3150_p0, %p3136_p7  ;;  %p3158_p4 = scmp.lt.s32.totalorder %s3156_s21, %s3149_s29 }
 0x114   : > { %p3153_p6 = pneg %p3152_p3  ;;  %p3159_p2 = por %p3158_p4, %p3157_p12 }
 0x116   : > { %p3160_p1 = pnand %p3159_p2, %p3153_p6 }
 0x118   : > { %3163 = shalt.err (!%p3160_p1)
}
 0x119   : > { %s4817_s1 = sld [smem:[#allocation30_spill]]  ;;  %s4818_s3 = sld [smem:[#allocation29_spill]] }
 0x11a   : > { %s4819_s30 = sld [smem:[#allocation28_spill]]  ;;  %p4820_p12 = scmp.lt.s32.totalorder %s3852_s19, 15 }
 0x11b   : > { %2704 = dma.hbm_to_vmem [thread:$0]  (!%p3887_p13), %s3881_s10, 256, %s3876_s6, %s3891_s4, %s4792_s22, %s4792_s22, %s4791_s20  }
 0x11c   : > { %s4895_s19 = smov (!%p4820_p12, %s3852_s19), 15  ;;  %p4821_p6 = scmp.lt.s32.totalorder %s3868_s0, 15 }
 0x11d   : > { %p4822_p10 = scmp.eq.s32.totalorder %s3414_s25, 0  ;;  %p4823_p0 = scmp.eq.s32.totalorder %s3573_s26, 0 }
 0x11e   : > { %s4897_s0 = smov (!%p4821_p6, %s3868_s0), 15  ;;  %s2250_s10 = sshll.u32 %s4895_s19, 1 }
 0x11f   : > { %s126_s18 = sadd.s32 1, %s4817_s1  ;;  %p133_p7 = scmp.ne.s32.totalorder %s4817_s1, %s4818_s3 }
 0x120   : > { %p139_p8 = scmp.ne.s32.totalorder %s4818_s3, %s4819_s30  ;;  %s122_s8 = ssub.s32 %s4895_s19, %s4897_s0 }
 0x121   : > { %s426_s23 = sand.u32 1, %s4817_s1   ;;  %s123_s13 = sor.u32 %s122_s8, %s3677_s14 }
 0x122   : > { %p135_p11 = por %p133_p7, %p4822_p10  ;;  %p124_p5 = scmp.eq.s32.totalorder %s123_s13, 0 }
 0x123   : > { %p3939_p3 = por %p139_p8, %p4823_p0  ;;  %s2248_s6 = sshll.u32 %s426_s23, 4 }
 0x124   : > { %s4899_s1 = smov (!%p124_p5, %s4817_s1), %s126_s18  ;;  %s438_s4 = sadd.s32 %s2250_s10, %s3686_s5 }
 0x125   : > { %s4824_s7 = scalar_select %p3939_p3, 1, 0 }
 0x126   : > { %s2252_s12 = sshll.u32 %s438_s4, 7  ;;  %s428_s29 = scalar_lea.vmem [#allocation9], %s2248_s6 }
 0x127   : > { %s441_s0 = sshll.u32 %s428_s29, 4  ;;  %s4825_s14 = sld [smem:[#allocation52_spill]]  ;;  %s3952_s0 = int_to_ptr.vmem [resolvable:$true] %s441_s0 }
 0x128   : > { %p4827_p13 = scmp.lt.s32.totalorder %s3414_s25, 4  ;;  %s4829_s5 = sand.u32 1, %s3358_s11  }
 0x129   : > { %s471_s30 = scalar_lea.vmem [#allocation12], %s4829_s5  ;;  %s4830_s8 = sshll.u32 %s3410_s24, 4 }
 0x12a   : > { %p3956_p4 = pnand %p4827_p13, %p135_p11  ;;  %s478_s18 = sshll.u32 %s471_s30, 4  ;;  %s3969_s18 = int_to_ptr.vmem [resolvable:$true] %s478_s18 }
 0x12b   : > { %s4831_s6 = sld [smem:[#allocation54_spill]] }
 0x12c   : > { %p3166_p1 = pneg %p3956_p4 }
 0x12d   : > { %s4826_s3 = smov %s4825_s14  ;;  %s3950_s21 = scalar_lea.hbm %s4825_s14, %s2252_s12 }
 0x12e   : > { %s3164_s4 = scalar_lea.hbm %s3950_s21, 256  ;;  %s3169_s2 = scalar_lea.hbm %s4826_s3, 8192 }
 0x12f   : > { %p3165_p2 = scmp.ne.s32.totalorder %s3950_s21, %s3164_s4  ;;  %p3170_p7 = scmp.lt.u32.totalorder %s3950_s21, %s4826_s3 }
 0x130   : > { %p3171_p8 = scmp.lt.u32.totalorder %s3169_s2, %s3164_s4  ;;  %p3173_p11 = scmp.lt.u32.totalorder %s3164_s4, %s3950_s21 }
 0x131   : > { %s3967_s10 = scalar_lea.hbm %s4831_s6, %s4830_s8  ;;  %p3167_p12 = pnand %p3166_p1, %p3165_p2 }
 0x132   : > { %p3172_p10 = por %p3171_p8, %p3170_p7 }
 0x133   : > { %p3168_p6 = pneg %p3167_p12 }
 0x134   : > { %p3174_p5 = por %p3173_p11, %p3172_p10 }
 0x136   : > { %p3175_p0 = pnand %p3174_p5, %p3168_p6 }
 0x138   : > { %3178 = shalt.err (!%p3175_p0)
}
 0x139   : > { %s3179_s5 = scalar_lea.vmem %s3952_s0, 256  ;;  %s3425_s30 = smov [#allocation9]  }
 0x13a   : > { %p3180_p13 = scmp.ne.s32.totalorder %s3952_s0, %s3179_s5  ;;  %s3184_s8 = sshll.u32 %s3425_s30, 4  ;;  %s3185_s8 = int_to_ptr.vmem [resolvable:$false] %s3184_s8 }
 0x13b   : > { %s3186_s23 = scalar_lea.vmem %s3185_s8, 512  ;;  %p3187_p3 = scmp.lt.s32.totalorder %s3952_s0, %s3185_s8 }
 0x13c   : > { %p3182_p2 = pnand %p3180_p13, %p3166_p1  ;;  %p3188_p7 = scmp.lt.s32.totalorder %s3186_s23, %s3179_s5 }
 0x13e   : > { %p3183_p12 = pneg %p3182_p2  ;;  %p3189_p8 = por %p3188_p7, %p3187_p3 }
 0x140   : > { %p3190_p10 = pnand %p3189_p8, %p3183_p12 }
 0x142   : > { %3193 = shalt.err (!%p3190_p10)
}
 0x143   : > { %2710 = dma.hbm_to_vmem [thread:$0]  (!%p3956_p4), %s3950_s21, 256, %s3952_s0, %s3712_s16, %s4792_s22, %s4792_s22, %s4791_s20  }
 0x144   : > { %s3194_s13 = scalar_lea.hbm %s3967_s10, 16  ;;  %p4832_p6 = scmp.ne.s32.totalorder %s4800_s9, 0 }
 0x145   : > { %p3195_p1 = scmp.ne.s32.totalorder %s3967_s10, %s3194_s13  ;;  %s3199_s12 = scalar_lea.hbm %s4831_s6, 32 }
 0x146   : > { %p4833_p3 = pneg %p4832_p6  ;;  %p3200_p0 = scmp.lt.u32.totalorder %s3967_s10, %s4831_s6 }
 0x147   : > { %p3201_p13 = scmp.lt.u32.totalorder %s3199_s12, %s3194_s13  ;;  %p3203_p12 = scmp.lt.u32.totalorder %s3194_s13, %s3967_s10 }
 0x148   : > { %p3197_p11 = pnand %p3195_p1, %p4833_p3 }
 0x149   : > { %p3202_p2 = por %p3201_p13, %p3200_p0 }
 0x14a   : > { %p3198_p5 = pneg %p3197_p11 }
 0x14b   : > { %p3204_p7 = por %p3203_p12, %p3202_p2 }
 0x14d   : > { %p3205_p8 = pnand %p3204_p7, %p3198_p5 }
 0x14f   : > { %3208 = shalt.err (!%p3205_p8)
}
 0x150   : > { %s3209_s16 = scalar_lea.vmem %s3969_s18, 16  ;;  %p4834_p10 = pmov %p4833_p3 }
 0x151   : > { %p3210_p4 = scmp.ne.s32.totalorder %s3969_s18, %s3209_s16  ;;  %s3426_s20 = smov [#allocation12]  }
 0x152   : > { %s3214_s22 = sshll.u32 %s3426_s20, 4  ;;  %s3215_s22 = int_to_ptr.vmem [resolvable:$false] %s3214_s22 }
 0x153   : > { %p3212_p1 = pnand %p3210_p4, %p4834_p10  ;;  %s3216_s0 = scalar_lea.vmem %s3215_s22, 32 }
 0x154   : > { %p3217_p11 = scmp.lt.s32.totalorder %s3969_s18, %s3215_s22  ;;  %p3218_p0 = scmp.lt.s32.totalorder %s3216_s0, %s3209_s16 }
 0x155   : > { %p3213_p3 = pneg %p3212_p1 }
 0x156   : > { %p3219_p13 = por %p3218_p0, %p3217_p11 }
 0x158   : > { %p3220_p2 = pnand %p3219_p13, %p3213_p3 }
 0x15a   : > { %3223 = shalt.err (!%p3220_p2)
}
 0x15b   : > { %s4835_s21 = sld [smem:[#allocation49_spill]]  ;;  %s4836_s28 = sld [smem:[#allocation40_spill]] }
 0x161   : > { %2716 = dma.hbm_to_vmem [thread:$0]  (!%p4832_p6), %s3967_s10, 16, %s3969_s18, %s4835_s21  }
 0x162   : > { %p4837_p5 = scmp.ne.s32.totalorder %s4836_s28, 0 }
 0x163   : > { %s4838_s14 = sld [smem:[#allocation35_spill]] (!%p4837_p5) }
 0x164   : > { %487 = sbr.rel (%p4837_p5) target bundleno = 1120 (0x460), region = 56 }
 0x169   : > { %s489_s5 = sand.u32 (!%p4837_p5), 1, %s4838_s14  }
 0x16a   : > { %s4027_s30 = sshll.u32 (!%p4837_p5), %s489_s5, 4  ;;  %s490_s8 = scalar_lea.sflag (!%p4837_p5), [#allocation5], %s489_s5 }
 0x16b   : > { %s493_s23 = scalar_lea.vmem [#allocation4], %s4027_s30 }
 0x16c   : > { %3321 = dma.done.wait (%p3863_p9), %s490_s8, 256  }
 0x16d   : > { %3323 = vsyncadd (%p3863_p9), %s490_s8, 4294967040  ;;  %s4839_s9 = sld [smem:[#allocation32_spill]]  ;;  %s4840_s18 = sld [smem:[#allocation43_spill]] }
 0x16e   : > { %s498_s10 = sand.u32 1, %s3573_s26  }
 0x16f   : > { %s499_s19 = scalar_lea.sflag [#allocation8], %s498_s10 }
 0x173   : > { %s500_s13 = sand.u32 1, %s4839_s9   ;;  %p4841_p6 = scmp.ne.s32.totalorder %s4840_s18, 0 }
 0x174   : > { %s4038_s4 = sshll.u32 %s500_s13, 7 }
 0x175   : > { %s4041_s12 = scalar_lea.vmem [#allocation7], %s4038_s4 }
 0x176   : > { %3325 = dma.done.wait (%p4841_p6), %s499_s19, 2048  }
 0x177   : > { %3327 = vsyncadd (%p4841_p6), %s499_s19, 4294965248  ;;  %s4842_s17 = sld [smem:[#allocation29_spill]]  ;;  %p4843_p9 = scmp.ne.s32.totalorder %s4824_s7, 0 }
 0x17d   : > { %s509_s29 = sand.u32 1, %s4842_s17  }
 0x17e   : > { %s4048_s2 = sshll.u32 %s509_s29, 4 }
 0x17f   : > { %s511_s16 = scalar_lea.vmem [#allocation9], %s4048_s2 }
 0x180   : > { %3329 = dma.done.wait (%p4843_p9), %s499_s19, 256  }
 0x181   : > { %3331 = vsyncadd (%p4843_p9), %s499_s19, 4294967040  ;;  %s4844_s20 = sld [smem:[#allocation27_spill]]  ;;  %s4845_s22 = sld [smem:[#allocation48_spill]] }
 0x182   : > { %s517_s21 = scalar_lea.sflag [#allocation11], %s498_s10 }
 0x187   : > { %s518_s0 = sand.u32 1, %s4844_s20   ;;  %p4846_p12 = scmp.ne.s32.totalorder %s4845_s22, 0 }
 0x188   : > { %s519_s28 = scalar_lea.vmem [#allocation10], %s518_s0 }
 0x189   : > { %3333 = dma.done.wait (%p4846_p12), %s517_s21, 32  }
 0x18a   : > { %3335 = vsyncadd (%p4846_p12), %s517_s21, 4294967264  ;;  %s527_s14 = scalar_lea.vmem [#allocation12], %s518_s0  ;;  %p4847_p7 = scmp.eq.s32.totalorder %s3573_s26, 0 }
 0x18c   : > { %3337 = dma.done.wait (%p4847_p7), [#allocation14], 32   ;;  %p4848_p8 = pmov %p4847_p7 }
 0x18d   : > { %p4849_p4 = pmov %p4847_p7 }
 0x18e   : > { %3339 = vsyncadd (%p4848_p8), [#allocation14], 4294967264 }
 0x18f   : > { %3341 = dma.done.wait (%p4849_p4), [#allocation17], 4624   ;;  %p4850_p10 = pmov %p4849_p4 }
 0x190   : > { %vm610_vm0 = vcmask 785408   ;;  %v3427_v0 = vmov 0.0   ;;  %v4108_v1 = vld [vmem:[%s519_s28] ss:$0 sm:$0xff]  ;;  %v4112_v3 = vld [vmem:[#allocation13] ss:$0 sm:$0xff] }
 0x191   : > { %3343 = vsyncadd (%p4850_p10), [#allocation17], 4294962672  ;;  %611 = vst.msk [vmem:[#allocation2] sm:$0xff] %vm610_vm0, %v3427_v0  ;;  %v4110_v2 = vld [vmem:[%s527_s14] ss:$0 sm:$0xff]  ;;  %v633_v4 = vld [vmem:[%s4041_s12 + $0x10] sm:$0xff] }
 0x192   : > { %612 = vst.msk [vmem:[#allocation2 + $0x8] sm:$0xff] %vm610_vm0, %v3427_v0  ;;  %629 = vst.msk [vmem:[#allocation2 + $0x90] sm:$0xff] %vm610_vm0, %v3427_v0  ;;  %v631_v5 = vld [vmem:[%s4041_s12] sm:$0xff]  ;;  %v655_v6 = vsub.f32 %v633_v4, %v4108_v1  ;;  %v634_v8 = vld [vmem:[%s4041_s12 + $0x18] sm:$0xff]  ;;  %vm848_vm1 = vcmask 261120   ;;  %vm850_vm2 = vcmask 260096  }
 0x193   : > { %630 = vst.msk [vmem:[#allocation2 + $0x98] sm:$0xff] %vm610_vm0, %v3427_v0  ;;  %613 = vst.msk [vmem:[#allocation2 + $0x10] sm:$0xff] %vm610_vm0, %v3427_v0  ;;  %v653_v7 = vsub.f32 %v631_v5, %v4108_v1  ;;  %v632_v9 = vld [vmem:[%s4041_s12 + $0x8] sm:$0xff]  ;;  %v656_v11 = vsub.f32 %v634_v8, %v4108_v1  ;;  %v635_v14 = vld [vmem:[%s4041_s12 + $0x20] sm:$0xff]  ;;  %s3428_s26 = smov 32   ;;  %s3429_s7 = smov 64  }
 0x194   : > { %614 = vst.msk [vmem:[#allocation2 + $0x18] sm:$0xff] %vm610_vm0, %v3427_v0  ;;  %615 = vst.msk [vmem:[#allocation2 + $0x20] sm:$0xff] %vm610_vm0, %v3427_v0  ;;  %v636_v10 = vld [vmem:[%s4041_s12 + $0x28] sm:$0xff]  ;;  %v654_v12 = vsub.f32 %v632_v9, %v4108_v1  ;;  %v638_v15 = vld [vmem:[%s4041_s12 + $0x38] sm:$0xff]  ;;  %v677_v17 = vmul.f32 %v4110_v2, %v655_v6  ;;  %v657_v19 = vsub.f32 %v635_v14, %v4108_v1  ;;  %vm930_vm3 = vcmask 523520   ;;  %s4360_s5 = scalar_lea.vmem [#allocation19], %s4038_s4 }
 0x195   : > { %616 = vst.msk [vmem:[#allocation2 + $0x28] sm:$0xff] %vm610_vm0, %v3427_v0  ;;  %617 = vst.msk [vmem:[#allocation2 + $0x30] sm:$0xff] %vm610_vm0, %v3427_v0  ;;  %v658_v13 = vsub.f32 %v636_v10, %v4108_v1  ;;  %v637_v16 = vld [vmem:[%s4041_s12 + $0x30] sm:$0xff]  ;;  %v675_v18 = vmul.f32 %v4110_v2, %v653_v7  ;;  %v660_v20 = vsub.f32 %v638_v15, %v4108_v1  ;;  %v4131_v21 = vld [vmem:[#allocation15] ss:$0 sm:$0xff]  ;;  %vm997_vm4 = vcmask 785920  }
 0x196   : > { %618 = vst.msk [vmem:[#allocation2 + $0x38] sm:$0xff] %vm610_vm0, %v3427_v0  ;;  %619 = vst.msk [vmem:[#allocation2 + $0x40] sm:$0xff] %vm610_vm0, %v3427_v0  ;;  %v678_v22 = vmul.f32 %v4110_v2, %v656_v11  ;;  %v676_v23 = vmul.f32 %v4110_v2, %v654_v12  ;;  %v659_v25 = vsub.f32 %v637_v16, %v4108_v1  ;;  %v640_v42 = vld [vmem:[%s4041_s12 + $0x48] sm:$0xff]  ;;  %v639_v47 = vld [vmem:[%s4041_s12 + $0x40] sm:$0xff]  ;;  %vm995_vm5 = vcmask 785921   ;;  %s4851_s8 = sld [smem:[#allocation37_spill]] }
 0x197   : > { %620 = vst.msk [vmem:[#allocation2 + $0x48] sm:$0xff] %vm610_vm0, %v3427_v0  ;;  %621 = vst.msk [vmem:[#allocation2 + $0x50] sm:$0xff] %vm610_vm0, %v3427_v0  ;;  %v680_v24 = vmul.f32 %v4110_v2, %v658_v13  ;;  %v699_v26 = vmul.f32 %v4112_v3, %v677_v17  ;;  %v697_v27 = vmul.f32 %v4112_v3, %v675_v18  ;;  %v642_v48 = vld [vmem:[%s4041_s12 + $0x58] sm:$0xff]  ;;  %v641_v52 = vld [vmem:[%s4041_s12 + $0x50] sm:$0xff] }
 0x198   : > { %622 = vst.msk [vmem:[#allocation2 + $0x58] sm:$0xff] %vm610_vm0, %v3427_v0  ;;  %623 = vst.msk [vmem:[#allocation2 + $0x60] sm:$0xff] %vm610_vm0, %v3427_v0  ;;  %v679_v28 = vmul.f32 %v4110_v2, %v657_v19  ;;  %v682_v29 = vmul.f32 %v4110_v2, %v660_v20  ;;  %v700_v30 = vmul.f32 %v4112_v3, %v678_v22  ;;  %v644_v53 = vld [vmem:[%s4041_s12 + $0x68] sm:$0xff]  ;;  %v643_v6 = vld [vmem:[%s4041_s12 + $0x60] sm:$0xff] }
 0x199   : > { %624 = vst.msk [vmem:[#allocation2 + $0x68] sm:$0xff] %vm610_vm0, %v3427_v0  ;;  %625 = vst.msk [vmem:[#allocation2 + $0x70] sm:$0xff] %vm610_vm0, %v3427_v0  ;;  %v698_v31 = vmul.f32 %v4112_v3, %v676_v23  ;;  %v702_v32 = vmul.f32 %v4112_v3, %v680_v24  ;;  %v681_v33 = vmul.f32 %v4110_v2, %v659_v25  ;;  %v646_v11 = vld [vmem:[%s4041_s12 + $0x78] sm:$0xff]  ;;  %v645_v15 = vld [vmem:[%s4041_s12 + $0x70] sm:$0xff] }
 0x19a   : > { %626 = vst.msk [vmem:[#allocation2 + $0x78] sm:$0xff] %vm610_vm0, %v3427_v0  ;;  %627 = vst.msk [vmem:[#allocation2 + $0x80] sm:$0xff] %vm610_vm0, %v3427_v0  ;;  %v4146_v34 = vadd.f32 %v4131_v21, %v699_v26  ;;  %v4149_v35 = vadd.f32 %v4131_v21, %v697_v27  ;;  %v701_v36 = vmul.f32 %v4112_v3, %v679_v28 }
 0x19b   : > { %628 = vst.msk [vmem:[#allocation2 + $0x88] sm:$0xff] %vm610_vm0, %v3427_v0  ;;  %v704_v37 = vmul.f32 %v4112_v3, %v682_v29  ;;  %v4154_v38 = vadd.f32 %v4131_v21, %v700_v30  ;;  %v4157_v39 = vadd.f32 %v4131_v21, %v698_v31  ;;  %v4160_v40 = vadd.f32 %v4131_v21, %v702_v32 }
 0x19c   : > { %v703_v41 = vmul.f32 %v4112_v3, %v681_v33  ;;  %v2270_v43 = vmul.f32 -1.442695, %v4146_v34  ;;  %v2268_v44 = vmul.f32 -1.442695, %v4149_v35  ;;  %v4167_v45 = vadd.f32 %v4131_v21, %v701_v36  ;;  %p2284_p1 = scmp.le.s32.totalorder %s4851_s8, 0 }
 0x19d   : > { %v4170_v46 = vadd.f32 %v4131_v21, %v704_v37  ;;  %v2271_v49 = vmul.f32 -1.442695, %v4154_v38  ;;  %v2269_v50 = vmul.f32 -1.442695, %v4157_v39  ;;  %v2273_v54 = vmul.f32 -1.442695, %v4160_v40 }
 0x19e   : > { %v4177_v51 = vadd.f32 %v4131_v21, %v703_v41  ;;  %2882 = vpow2.f32 %v2270_v43  ;;  %v2272_v55 = vmul.f32 -1.442695, %v4167_v45  ;;  %v662_v56 = vsub.f32 %v640_v42, %v4108_v1  ;;  %s3430_s30 = smov (!%p2284_p1), 32  }
 0x19f   : > { %2884 = vpow2.f32 %v2268_v44  ;;  %v2275_v57 = vmul.f32 -1.442695, %v4170_v46  ;;  %v661_v58 = vsub.f32 %v639_v47, %v4108_v1  ;;  %v664_v59 = vsub.f32 %v642_v48, %v4108_v1 }
 0x1a0   : > { %2886 = vpow2.f32 %v2271_v49  ;;  %v684_v60 = vmul.f32 %v4110_v2, %v662_v56  ;;  %v663_v61 = vsub.f32 %v641_v52, %v4108_v1  ;;  %v666_v62 = vsub.f32 %v644_v53, %v4108_v1 }
 0x1a1   : > { %2888 = vpow2.f32 %v2269_v50  ;;  %v2274_v63 = vmul.f32 -1.442695, %v4177_v51  ;;  %v683_v4 = vmul.f32 %v4110_v2, %v661_v58  ;;  %v686_v5 = vmul.f32 %v4110_v2, %v664_v59 }
 0x1a2   : > { %2890 = vpow2.f32 %v2273_v54  ;;  %v706_v7 = vmul.f32 %v4112_v3, %v684_v60  ;;  %v685_v10 = vmul.f32 %v4110_v2, %v663_v61  ;;  %v688_v13 = vmul.f32 %v4110_v2, %v666_v62 }
 0x1a3   : > { %2892 = vpow2.f32 %v2272_v55  ;;  %v705_v8 = vmul.f32 %v4112_v3, %v683_v4  ;;  %v708_v9 = vmul.f32 %v4112_v3, %v686_v5  ;;  %v665_v14 = vsub.f32 %v643_v6, %v4108_v1 }
 0x1a4   : > { %2894 = vpow2.f32 %v2275_v57  ;;  %v4200_v12 = vadd.f32 %v4131_v21, %v706_v7  ;;  %v668_v19 = vsub.f32 %v646_v11, %v4108_v1  ;;  %v707_v23 = vmul.f32 %v4112_v3, %v685_v10 }
 0x1a5   : > { %2896 = vpow2.f32 %v2274_v63  ;;  %v4206_v16 = vadd.f32 %v4131_v21, %v705_v8  ;;  %v4209_v17 = vadd.f32 %v4131_v21, %v708_v9  ;;  %v667_v24 = vsub.f32 %v645_v15, %v4108_v1 }
 0x1a6   : > { %v2277_v18 = vmul.f32 -1.442695, %v4200_v12  ;;  %v710_v26 = vmul.f32 %v4112_v3, %v688_v13  ;;  %v687_v27 = vmul.f32 %v4110_v2, %v665_v14  ;;  %v690_v30 = vmul.f32 %v4110_v2, %v668_v19 }
 0x1a7   : > { %v2276_v20 = vmul.f32 -1.442695, %v4206_v16  ;;  %v2279_v22 = vmul.f32 -1.442695, %v4209_v17  ;;  %v689_v33 = vmul.f32 %v4110_v2, %v667_v24  ;;  %v4222_v41 = vadd.f32 %v4131_v21, %v707_v23 }
 0x1a8   : > { %v2883_v25 = vpop.eup %2882  ;;  %2898 = vpow2.f32 %v2277_v18  ;;  %v4225_v44 = vadd.f32 %v4131_v21, %v710_v26  ;;  %v709_v47 = vmul.f32 %v4112_v3, %v687_v27  ;;  %v712_v50 = vmul.f32 %v4112_v3, %v690_v30 }
 0x1a9   : > { %v2885_v28 = vpop.eup %2884  ;;  %v785_v29 = vadd.f32 1.0, %v2883_v25  ;;  %2900 = vpow2.f32 %v2276_v20  ;;  %v711_v54 = vmul.f32 %v4112_v3, %v689_v33  ;;  %v2278_v57 = vmul.f32 -1.442695, %v4222_v41 }
 0x1aa   : > { %v2887_v31 = vpop.eup %2886  ;;  %v783_v32 = vadd.f32 1.0, %v2885_v28  ;;  %2902 = vpow2.f32 %v2279_v22  ;;  %v2281_v59 = vmul.f32 -1.442695, %v4225_v44  ;;  %v4233_v60 = vadd.f32 %v4131_v21, %v709_v47 }
 0x1ab   : > { %v2889_v36 = vpop.eup %2888  ;;  %2904 = vrcp.f32 %v785_v29  ;;  %v786_v37 = vadd.f32 1.0, %v2887_v31  ;;  %v4236_v61 = vadd.f32 %v4131_v21, %v712_v50  ;;  %v4239_v63 = vadd.f32 %v4131_v21, %v711_v54 }
 0x1ac   : > { %v2891_v42 = vpop.eup %2890  ;;  %2906 = vrcp.f32 %v783_v32  ;;  %v784_v43 = vadd.f32 1.0, %v2889_v36  ;;  %v2280_v8 = vmul.f32 -1.442695, %v4233_v60 }
 0x1ad   : > { %v2893_v48 = vpop.eup %2892  ;;  %2908 = vrcp.f32 %v786_v37  ;;  %v788_v49 = vadd.f32 1.0, %v2891_v42  ;;  %v2283_v11 = vmul.f32 -1.442695, %v4236_v61  ;;  %v2282_v15 = vmul.f32 -1.442695, %v4239_v63 }
 0x1ae   : > { %v2895_v52 = vpop.eup %2894  ;;  %2910 = vrcp.f32 %v784_v43  ;;  %v787_v53 = vadd.f32 1.0, %v2893_v48 }
 0x1af   : > { %v2897_v55 = vpop.eup %2896  ;;  %2912 = vrcp.f32 %v788_v49  ;;  %v790_v56 = vadd.f32 1.0, %v2895_v52 }
 0x1b0   : > { %2914 = vrcp.f32 %v787_v53  ;;  %v789_v58 = vadd.f32 1.0, %v2897_v55 }
 0x1b1   : > { %2916 = vrcp.f32 %v790_v56 }
 0x1b2   : > { %v2899_v62 = vpop.eup %2898  ;;  %2918 = vrcp.f32 %v789_v58 }
 0x1b3   : > { %v2901_v4 = vpop.eup %2900  ;;  %v792_v5 = vadd.f32 1.0, %v2899_v62  ;;  %2920 = vpow2.f32 %v2278_v57 }
 0x1b4   : > { %v2903_v6 = vpop.eup %2902  ;;  %v791_v7 = vadd.f32 1.0, %v2901_v4  ;;  %2922 = vpow2.f32 %v2281_v59 }
 0x1b5   : > { %v2905_v9 = vpop.eup %2904  ;;  %2924 = vrcp.f32 %v792_v5  ;;  %v794_v10 = vadd.f32 1.0, %v2903_v6 }
 0x1b6   : > { %v2907_v13 = vpop.eup %2906  ;;  %v4244_v14 = vmul.f32 %v2905_v9, %v4146_v34  ;;  %2926 = vrcp.f32 %v791_v7 }
 0x1b7   : > { %v2909_v18 = vpop.eup %2908  ;;  %v4248_v19 = vmul.f32 %v2907_v13, %v4149_v35  ;;  %2928 = vrcp.f32 %v794_v10 }
 0x1b8   : > { %v2911_v20 = vpop.eup %2910  ;;  %886 = vrot.lane.b32.xlu1 %v4244_v14, %s3428_s26  ;;  %v4253_v22 = vmul.f32 %v2909_v18, %v4154_v38  ;;  %2930 = vpow2.f32 %v2280_v8  ;;  %852 = vst.msk [vmem:[#allocation2 + $0x21] sm:$0xff] %vm848_vm1, %v4244_v14 }
 0x1b9   : > { %v2913_v34 = vpop.eup %2912  ;;  %882 = vrot.lane.b32.xlu0 %v4248_v19, %s3428_s26  ;;  %v4260_v35 = vmul.f32 %v2911_v20, %v4157_v39  ;;  %2932 = vpow2.f32 %v2283_v11  ;;  %849 = vst.msk [vmem:[#allocation2 + $0x11] sm:$0xff] %vm848_vm1, %v4248_v19 }
 0x1ba   : > { %v2915_v23 = vpop.eup %2914  ;;  %v4265_v24 = vmul.f32 %v2913_v34, %v4160_v40  ;;  %2934 = vpow2.f32 %v2282_v15  ;;  %853 = vst.msk [vmem:[#allocation2 + $0x29] sm:$0x7f] %vm850_vm2, %v4253_v22 }
 0x1bb   : > { %v2917_v38 = vpop.eup %2916  ;;  %v4270_v25 = vmul.f32 %v2915_v23, %v4167_v45  ;;  %851 = vst.msk [vmem:[#allocation2 + $0x19] sm:$0x7f] %vm850_vm2, %v4260_v35 }
 0x1bc   : > { %v2919_v39 = vpop.eup %2918  ;;  %888 = vrot.lane.b32.xlu1 %v4253_v22, %s3428_s26  ;;  %v4277_v26 = vmul.f32 %v2917_v38, %v4170_v46  ;;  %855 = vst.msk [vmem:[#allocation2 + $0x39] sm:$0x7f] %vm850_vm2, %v4265_v24 }
 0x1bd   : > { %v2921_v40 = vpop.eup %2920  ;;  %884 = vrot.lane.b32.xlu0 %v4260_v35, %s3428_s26  ;;  %v837_v45 = vmul.f32 %v2919_v39, %v4177_v51  ;;  %854 = vst.msk [vmem:[#allocation2 + $0x31] sm:$0xff] %vm848_vm1, %v4270_v25 }
 0x1be   : > { %v2923_v27 = vpop.eup %2922  ;;  %v793_v28 = vadd.f32 1.0, %v2921_v40  ;;  %857 = vst.msk [vmem:[#allocation2 + $0x49] sm:$0x7f] %vm850_vm2, %v4277_v26  ;;  %v1017_v40 = vld [vmem:[%s493_s23] sm:$0xff] (!%p2284_p1) }
 0x1bf   : > { %v2925_v29 = vpop.eup %2924  ;;  %v796_v46 = vadd.f32 1.0, %v2923_v27  ;;  %856 = vst.msk [vmem:[#allocation2 + $0x41] sm:$0xff] %vm848_vm1, %v837_v45  ;;  %v1019_v27 = vsub.f32 (!%p2284_p1), %v1017_v40, %v4108_v1 }
 0x1c0   : > { %v2927_v30 = vpop.eup %2926  ;;  %892 = vrot.lane.b32.xlu1 %v4265_v24, %s3428_s26  ;;  %v840_v31 = vmul.f32 %v2925_v29, %v4200_v12  ;;  %2936 = vrcp.f32 %v793_v28 }
 0x1c1   : > { %v2929_v51 = vpop.eup %2928  ;;  %890 = vrot.lane.b32.xlu0 %v4270_v25, %s3428_s26  ;;  %v839_v32 = vmul.f32 %v2927_v30, %v4206_v16  ;;  %2938 = vrcp.f32 %v796_v46  ;;  %v1021_v29 = vmul.f32 (!%p2284_p1), %v4110_v2, %v1019_v27 }
 0x1c2   : > { %v2931_v33 = vpop.eup %2930  ;;  %v842_v36 = vmul.f32 %v2929_v51, %v4209_v17  ;;  %859 = vst.msk [vmem:[#allocation2 + $0x59] sm:$0x7f] %vm850_vm2, %v840_v31 }
 0x1c3   : > { %v2933_v37 = vpop.eup %2932  ;;  %v795_v42 = vadd.f32 1.0, %v2931_v33  ;;  %858 = vst.msk [vmem:[#allocation2 + $0x51] sm:$0xff] %vm848_vm1, %v839_v32  ;;  %v1023_v30 = vmul.f32 (!%p2284_p1), %v4112_v3, %v1021_v29 }
 0x1c4   : > { %v2935_v43 = vpop.eup %2934  ;;  %896 = vrot.lane.b32.xlu1 %v4277_v26, %s3428_s26  ;;  %v798_v12 = vadd.f32 1.0, %v2933_v37  ;;  %861 = vst.msk [vmem:[#allocation2 + $0x69] sm:$0x7f] %vm850_vm2, %v842_v36 }
 0x1c5   : > { %894 = vrot.lane.b32.xlu0 %v837_v45, %s3428_s26  ;;  %2940 = vrcp.f32 %v795_v42  ;;  %v797_v16 = vadd.f32 1.0, %v2935_v43  ;;  %v1025_v51 = vadd.f32 (!%p2284_p1), %v4131_v21, %v1023_v30 }
 0x1c6   : > { %2942 = vrcp.f32 %v798_v12 }
 0x1c7   : > { %2944 = vrcp.f32 %v797_v16  ;;  %v2285_v33 = vmul.f32 (!%p2284_p1), -1.442695, %v1025_v51 }
 0x1c8   : > { %900 = vrot.lane.b32.xlu1 %v840_v31, %s3428_s26 }
 0x1c9   : > { %898 = vrot.lane.b32.xlu0 %v839_v32, %s3428_s26  ;;  %2946 = vpow2.f32 (!%p2284_p1), %v2285_v33 }
 0x1ca   : > { %v2937_v17 = vpop.eup %2936 }
 0x1cb   : > { %v2939_v47 = vpop.eup %2938  ;;  %v841_v48 = vmul.f32 %v2937_v17, %v4222_v41 }
 0x1cc   : > { %904 = vrot.lane.b32.xlu1 %v842_v36, %s3428_s26  ;;  %v844_v49 = vmul.f32 %v2939_v47, %v4225_v44 }
 0x1cd   : > { %902 = vrot.lane.b32.xlu0 %v841_v48, %s3428_s26  ;;  %860 = vst.msk [vmem:[#allocation2 + $0x61] sm:$0xff] %vm848_vm1, %v841_v48 }
 0x1ce   : > { %863 = vst.msk [vmem:[#allocation2 + $0x79] sm:$0x7f] %vm850_vm2, %v844_v49 }
 0x1cf   : > { %v2941_v50 = vpop.eup %2940 }
 0x1d0   : > { %v2943_v52 = vpop.eup %2942  ;;  %908 = vrot.lane.b32.xlu1 %v844_v49, %s3428_s26  ;;  %v843_v53 = vmul.f32 %v2941_v50, %v4233_v60 }
 0x1d1   : > { %v2945_v54 = vpop.eup %2944  ;;  %v846_v55 = vmul.f32 %v2943_v52, %v4236_v61 }
 0x1d2   : > { %906 = vrot.lane.b32.xlu0 %v843_v53, %s3428_s26  ;;  %v845_v41 = vmul.f32 %v2945_v54, %v4239_v63  ;;  %862 = vst.msk [vmem:[#allocation2 + $0x71] sm:$0xff] %vm848_vm1, %v843_v53 }
 0x1d3   : > { %865 = vst.msk [vmem:[#allocation2 + $0x89] sm:$0x7f] %vm850_vm2, %v846_v55  ;;  %v2947_v37 = vpop.eup (!%p2284_p1), %2946 }
 0x1d4   : > { %912 = vrot.lane.b32.xlu1 %v846_v55, %s3428_s26  ;;  %864 = vst.msk [vmem:[#allocation2 + $0x81] sm:$0xff] %vm848_vm1, %v845_v41  ;;  %v1033_v43 = vadd.f32 (!%p2284_p1), 1.0, %v2947_v37 }
 0x1d6   : > { %910 = vrot.lane.b32.xlu0 %v845_v41, %s3428_s26 }
 0x1d8   : > { %949 = vrot.lane.b32.xlu1 %v4260_v35, %s3429_s7 }
 0x1da   : > { %947 = vrot.lane.b32.xlu0 %v4248_v19, %s3429_s7 }
 0x1dc   : > { %953 = vrot.lane.b32.xlu1 %v4253_v22, %s3429_s7 }
 0x1de   : > { %951 = vrot.lane.b32.xlu0 %v4244_v14, %s3429_s7 }
 0x1e0   : > { %957 = vrot.lane.b32.xlu1 %v4265_v24, %s3429_s7 }
 0x1e2   : > { %955 = vrot.lane.b32.xlu0 %v4270_v25, %s3429_s7 }
 0x1e4   : > { %961 = vrot.lane.b32.xlu1 %v4277_v26, %s3429_s7 }
 0x1e6   : > { %959 = vrot.lane.b32.xlu0 %v837_v45, %s3429_s7  ;;  %v1018_v45 = vld [vmem:[%s493_s23 + $0x8] sm:$0xff] (!%p2284_p1)  ;;  %s3431_s23 = smov (!%p2284_p1), 64  }
 0x1e7   : > { %v1020_v28 = vsub.f32 (!%p2284_p1), %v1018_v45, %v4108_v1 }
 0x1e8   : > { %965 = vrot.lane.b32.xlu1 %v840_v31, %s3429_s7 }
 0x1e9   : > { %v1022_v46 = vmul.f32 (!%p2284_p1), %v4110_v2, %v1020_v28 }
 0x1ea   : > { %963 = vrot.lane.b32.xlu0 %v839_v32, %s3429_s7 }
 0x1eb   : > { %v1024_v31 = vmul.f32 (!%p2284_p1), %v4112_v3, %v1022_v46 }
 0x1ec   : > { %969 = vrot.lane.b32.xlu1 %v842_v36, %s3429_s7 }
 0x1ed   : > { %v1026_v32 = vadd.f32 (!%p2284_p1), %v4131_v21, %v1024_v31 }
 0x1ee   : > { %967 = vrot.lane.b32.xlu0 %v841_v48, %s3429_s7 }
 0x1ef   : > { %v2286_v36 = vmul.f32 (!%p2284_p1), -1.442695, %v1026_v32 }
 0x1f0   : > { %973 = vrot.lane.b32.xlu1 %v844_v49, %s3429_s7 }
 0x1f1   : > { %2948 = vpow2.f32 (!%p2284_p1), %v2286_v36 }
 0x1f2   : > { %971 = vrot.lane.b32.xlu0 %v843_v53, %s3429_s7  ;;  %2950 = vrcp.f32 (!%p2284_p1), %v1033_v43 }
 0x1f4   : > { %977 = vrot.lane.b32.xlu1 %v846_v55, %s3429_s7 }
 0x1f6   : > { %975 = vrot.lane.b32.xlu0 %v845_v41, %s3429_s7 }
 0x1fb   : > { %v2949_v42 = vpop.eup (!%p2284_p1), %2948 }
 0x1fc   : > { %v1034_v12 = vadd.f32 (!%p2284_p1), 1.0, %v2949_v42  ;;  %v2951_v16 = vpop.eup (!%p2284_p1), %2950 }
 0x1fd   : > { %v1039_v47 = vmul.f32 (!%p2284_p1), %v2951_v16, %v1025_v51 }
 0x1fe   : > { %2952 = vrcp.f32 (!%p2284_p1), %v1034_v12 }
 0x1ff   : > { %1045 = vrot.lane.b32.xlu0 (!%p2284_p1), %v1039_v47, %s3430_s30  ;;  %1041 = vst.msk [vmem:[#allocation2 + $0x1] sm:$0xff] (!%p2284_p1), %vm848_vm1, %v1039_v47  ;;  %1053 = vrot.lane.b32.xlu1 (!%p2284_p1), %v1039_v47, %s3431_s23 }
 0x208   : > { %v2953_v17 = vpop.eup (!%p2284_p1), %2952 }
 0x209   : > { %v1040_v48 = vmul.f32 (!%p2284_p1), %v2953_v17, %v1026_v32 }
 0x20b   : > { %1042 = vst.msk [vmem:[#allocation2 + $0x9] sm:$0x7f] (!%p2284_p1), %vm850_vm2, %v1040_v48  ;;  %1047 = vrot.lane.b32.xlu0 (!%p2284_p1), %v1040_v48, %s3430_s30  ;;  %1055 = vrot.lane.b32.xlu1 (!%p2284_p1), %v1040_v48, %s3431_s23 }
 0x22a   : > { %v887_v44 = vpop.permute.xlu1 %886 }
 0x22b   : > { %933 = vst.msk [vmem:[#allocation2 + $0x20] sm:$0xff] %vm930_vm3, %v887_v44  ;;  %v883_v56 = vpop.permute.xlu0 %882 }
 0x22c   : > { %931 = vst.msk [vmem:[#allocation2 + $0x10] sm:$0xff] %vm930_vm3, %v883_v56 }
 0x22e   : > { %v889_v57 = vpop.permute.xlu1 %888 }
 0x22f   : > { %934 = vst.msk [vmem:[#allocation2 + $0x28] sm:$0xff] %vm930_vm3, %v889_v57  ;;  %v885_v58 = vpop.permute.xlu0 %884 }
 0x230   : > { %932 = vst.msk [vmem:[#allocation2 + $0x18] sm:$0xff] %vm930_vm3, %v885_v58 }
 0x232   : > { %v893_v59 = vpop.permute.xlu1 %892 }
 0x233   : > { %936 = vst.msk [vmem:[#allocation2 + $0x38] sm:$0xff] %vm930_vm3, %v893_v59  ;;  %v891_v60 = vpop.permute.xlu0 %890 }
 0x234   : > { %935 = vst.msk [vmem:[#allocation2 + $0x30] sm:$0xff] %vm930_vm3, %v891_v60 }
 0x236   : > { %v897_v61 = vpop.permute.xlu1 %896 }
 0x237   : > { %938 = vst.msk [vmem:[#allocation2 + $0x48] sm:$0xff] %vm930_vm3, %v897_v61  ;;  %v895_v62 = vpop.permute.xlu0 %894 }
 0x238   : > { %937 = vst.msk [vmem:[#allocation2 + $0x40] sm:$0xff] %vm930_vm3, %v895_v62 }
 0x23a   : > { %v901_v63 = vpop.permute.xlu1 %900 }
 0x23b   : > { %940 = vst.msk [vmem:[#allocation2 + $0x58] sm:$0xff] %vm930_vm3, %v901_v63  ;;  %v899_v4 = vpop.permute.xlu0 %898 }
 0x23c   : > { %939 = vst.msk [vmem:[#allocation2 + $0x50] sm:$0xff] %vm930_vm3, %v899_v4 }
 0x23e   : > { %v905_v5 = vpop.permute.xlu1 %904 }
 0x23f   : > { %942 = vst.msk [vmem:[#allocation2 + $0x68] sm:$0xff] %vm930_vm3, %v905_v5  ;;  %v903_v6 = vpop.permute.xlu0 %902 }
 0x240   : > { %941 = vst.msk [vmem:[#allocation2 + $0x60] sm:$0xff] %vm930_vm3, %v903_v6 }
 0x242   : > { %v909_v7 = vpop.permute.xlu1 %908 }
 0x243   : > { %944 = vst.msk [vmem:[#allocation2 + $0x78] sm:$0xff] %vm930_vm3, %v909_v7 }
 0x244   : > { %v907_v8 = vpop.permute.xlu0 %906 }
 0x245   : > { %943 = vst.msk [vmem:[#allocation2 + $0x70] sm:$0xff] %vm930_vm3, %v907_v8 }
 0x246   : > { %v913_v9 = vpop.permute.xlu1 %912 }
 0x247   : > { %946 = vst.msk [vmem:[#allocation2 + $0x88] sm:$0xff] %vm930_vm3, %v913_v9 }
 0x248   : > { %v911_v10 = vpop.permute.xlu0 %910 }
 0x249   : > { %945 = vst.msk [vmem:[#allocation2 + $0x80] sm:$0xff] %vm930_vm3, %v911_v10 }
 0x24a   : > { %v950_v11 = vpop.permute.xlu1 %949 }
 0x24b   : > { %998 = vst.msk [vmem:[#allocation2 + $0x17] sm:$0xff] %vm997_vm4, %v950_v11 }
 0x24c   : > { %v948_v13 = vpop.permute.xlu0 %947 }
 0x24d   : > { %996 = vst.msk [vmem:[#allocation2 + $0xf] sm:$0xfe] %vm995_vm5, %v948_v13 }
 0x24e   : > { %v954_v14 = vpop.permute.xlu1 %953 }
 0x24f   : > { %1000 = vst.msk [vmem:[#allocation2 + $0x27] sm:$0xff] %vm997_vm4, %v954_v14 }
 0x250   : > { %v952_v15 = vpop.permute.xlu0 %951 }
 0x251   : > { %999 = vst.msk [vmem:[#allocation2 + $0x1f] sm:$0xfe] %vm995_vm5, %v952_v15 }
 0x252   : > { %v958_v18 = vpop.permute.xlu1 %957 }
 0x253   : > { %1002 = vst.msk [vmem:[#allocation2 + $0x37] sm:$0xff] %vm997_vm4, %v958_v18 }
 0x254   : > { %v956_v19 = vpop.permute.xlu0 %955 }
 0x255   : > { %1001 = vst.msk [vmem:[#allocation2 + $0x2f] sm:$0xfe] %vm995_vm5, %v956_v19 }
 0x256   : > { %v962_v20 = vpop.permute.xlu1 %961 }
 0x257   : > { %1004 = vst.msk [vmem:[#allocation2 + $0x47] sm:$0xff] %vm997_vm4, %v962_v20 }
 0x258   : > { %v960_v22 = vpop.permute.xlu0 %959 }
 0x259   : > { %1003 = vst.msk [vmem:[#allocation2 + $0x3f] sm:$0xfe] %vm995_vm5, %v960_v22 }
 0x25a   : > { %v966_v34 = vpop.permute.xlu1 %965 }
 0x25b   : > { %1006 = vst.msk [vmem:[#allocation2 + $0x57] sm:$0xff] %vm997_vm4, %v966_v34 }
 0x25c   : > { %v964_v35 = vpop.permute.xlu0 %963 }
 0x25d   : > { %1005 = vst.msk [vmem:[#allocation2 + $0x4f] sm:$0xfe] %vm995_vm5, %v964_v35 }
 0x25e   : > { %v970_v23 = vpop.permute.xlu1 %969 }
 0x25f   : > { %1008 = vst.msk [vmem:[#allocation2 + $0x67] sm:$0xff] %vm997_vm4, %v970_v23 }
 0x260   : > { %v968_v24 = vpop.permute.xlu0 %967 }
 0x261   : > { %1007 = vst.msk [vmem:[#allocation2 + $0x5f] sm:$0xfe] %vm995_vm5, %v968_v24 }
 0x262   : > { %v974_v38 = vpop.permute.xlu1 %973 }
 0x263   : > { %1010 = vst.msk [vmem:[#allocation2 + $0x77] sm:$0xff] %vm997_vm4, %v974_v38  ;;  %1016 = sbr.rel (%p2284_p1) target bundleno = 640 (0x280), region = 96 }
 0x264   : > { %v972_v25 = vpop.permute.xlu0 %971 }
 0x265   : > { %1009 = vst.msk [vmem:[#allocation2 + $0x6f] sm:$0xfe] %vm995_vm5, %v972_v25 }
 0x266   : > { %v978_v39 = vpop.permute.xlu1 %977 }
 0x267   : > { %1012 = vst.msk [vmem:[#allocation2 + $0x87] sm:$0xff] %vm997_vm4, %v978_v39 }
 0x268   : > { %v976_v26 = vpop.permute.xlu0 %975 }
 0x269   : > { %1011 = vst.msk [vmem:[#allocation2 + $0x7f] sm:$0xfe] %vm995_vm5, %v976_v26 }
 0x271   : > { %v1046_v49 = vpop.permute.xlu0 %1045  ;;  %v1054_v50 = vpop.permute.xlu1 %1053 }
 0x272   : > { %1051 = vst.msk [vmem:[#allocation2] sm:$0xff] %vm930_vm3, %v1046_v49 }
 0x273   : > { %1059 = vst.msk [vmem:[#allocation2 - $0x1] sm:$0xfe] %vm995_vm5, %v1054_v50 }
 0x27d   : > { %v1048_v52 = vpop.permute.xlu0 %1047  ;;  %v1056_v53 = vpop.permute.xlu1 %1055 }
 0x27e   : > { %1052 = vst.msk [vmem:[#allocation2 + $0x8] sm:$0xff] %vm930_vm3, %v1048_v52 }
 0x27f   : > { %1060 = vst.msk [vmem:[#allocation2 + $0x7] sm:$0xff] %vm997_vm4, %v1056_v53 }
 0x280 PF: > { %s4852_s9 = sld [smem:[#allocation37_spill]] }
 0x286   : > { %p2287_p3 = scmp.ge.s32.totalorder %s4852_s9, 1 }
 0x287   : > { %v1065_v54 = vld [vmem:[%s511_s16] sm:$0xff] (!%p2287_p3)  ;;  %v1066_v55 = vld [vmem:[%s511_s16 + $0x8] sm:$0xff] (!%p2287_p3)  ;;  %s3432_s18 = smov (!%p2287_p3), 32   ;;  %s3433_s10 = smov (!%p2287_p3), 64  }
 0x288   : > { %1064 = sbr.rel (%p2287_p3) target bundleno = 805 (0x325), region = 100  ;;  %v1067_v41 = vsub.f32 (!%p2287_p3), %v1065_v54, %v4108_v1  ;;  %v1068_v44 = vsub.f32 (!%p2287_p3), %v1066_v55, %v4108_v1 }
 0x28a   : > { %v1069_v56 = vmul.f32 (!%p2287_p3), %v4110_v2, %v1067_v41  ;;  %v1070_v57 = vmul.f32 (!%p2287_p3), %v4110_v2, %v1068_v44 }
 0x28c   : > { %v1071_v58 = vmul.f32 (!%p2287_p3), %v4112_v3, %v1069_v56  ;;  %v1072_v59 = vmul.f32 (!%p2287_p3), %v4112_v3, %v1070_v57 }
 0x28e   : > { %v1073_v60 = vadd.f32 (!%p2287_p3), %v4131_v21, %v1071_v58  ;;  %v1074_v61 = vadd.f32 (!%p2287_p3), %v4131_v21, %v1072_v59 }
 0x290   : > { %v2288_v62 = vmul.f32 -1.442695, %v1073_v60  ;;  %v2289_v63 = vmul.f32 -1.442695, %v1074_v61 }
 0x292   : > { %2954 = vpow2.f32 %v2288_v62 }
 0x293   : > { %2956 = vpow2.f32 %v2289_v63 }
 0x29c   : > { %v2955_v4 = vpop.eup %2954 }
 0x29d   : > { %v2957_v5 = vpop.eup %2956  ;;  %v1081_v6 = vadd.f32 1.0, %v2955_v4 }
 0x29e   : > { %v1082_v1 = vadd.f32 1.0, %v2957_v5 }
 0x29f   : > { %2958 = vrcp.f32 %v1081_v6 }
 0x2a0   : > { %2960 = vrcp.f32 %v1082_v1 }
 0x2a9   : > { %v2959_v7 = vpop.eup %2958 }
 0x2aa   : > { %v2961_v2 = vpop.eup %2960  ;;  %v1087_v8 = vmul.f32 %v2959_v7, %v1073_v60 }
 0x2ab   : > { %v1088_v9 = vmul.f32 %v2961_v2, %v1074_v61 }
 0x2ac   : > { %1094 = vrot.lane.b32.xlu0 %v1087_v8, %s3432_s18  ;;  %1090 = vst.msk [vmem:[#allocation2 + $0x91] sm:$0xff] %vm848_vm1, %v1087_v8  ;;  %1102 = vrot.lane.b32.xlu1 %v1087_v8, %s3433_s10 }
 0x2ad   : > { %1091 = vst.msk [vmem:[#allocation2 + $0x99] sm:$0x7f] %vm850_vm2, %v1088_v9 }
 0x2b0   : > { %1096 = vrot.lane.b32.xlu0 %v1088_v9, %s3432_s18  ;;  %1104 = vrot.lane.b32.xlu1 %v1088_v9, %s3433_s10 }
 0x31e   : > { %v1095_v3 = vpop.permute.xlu0 %1094  ;;  %v1103_v21 = vpop.permute.xlu1 %1102 }
 0x31f   : > { %1100 = vst.msk [vmem:[#allocation2 + $0x90] sm:$0xff] %vm930_vm3, %v1095_v3 }
 0x320   : > { %1108 = vst.msk [vmem:[#allocation2 + $0x8f] sm:$0xfe] %vm995_vm5, %v1103_v21 }
 0x322   : > { %v1097_v10 = vpop.permute.xlu0 %1096  ;;  %v1105_v11 = vpop.permute.xlu1 %1104 }
 0x323   : > { %1101 = vst.msk [vmem:[#allocation2 + $0x98] sm:$0xff] %vm930_vm3, %v1097_v10 }
 0x324   : > { %1109 = vst.msk [vmem:[#allocation2 + $0x97] sm:$0xff] %vm997_vm4, %v1105_v11 }
 0x325 PF: > { %v1159_v13 = vld [vmem:[#allocation16] sm:$0xff]  ;;  %v1160_v14 = vld [vmem:[#allocation16 + $0x8] sm:$0xff]  ;;  %vm1110_vm6 = vcmask 523264   ;;  %v1161_v20 = vld [vmem:[#allocation16 + $0x10] sm:$0xff]  ;;  %s4853_s4 = sld [smem:[#allocation37_spill]]  ;;  %s4854_s19 = sld [smem:[#allocation38_spill]] }
 0x326   : > { %v1429_v15 = vld [vmem:[#allocation16 + $0x60] sm:$0xff]  ;;  %v2576_v18 = vpack.c.bf16 %v1160_v14, %v1159_v13  ;;  %v1430_v19 = vld [vmem:[#allocation16 + $0x68] sm:$0xff]  ;;  %v1162_v22 = vld [vmem:[#allocation16 + $0x18] sm:$0xff]  ;;  %1112 = vst.msk [vmem:[#allocation3 + $0x8] sm:$0xff] %vm1110_vm6, %v3427_v0  ;;  %s2009_s20 = sshll.u32 %s4360_s5, 4  ;;  %s4856_s22 = sld [smem:[#allocation44_spill]]  ;;  %s4601_s20 = int_to_ptr.vmem [resolvable:$true] %s2009_s20 }
 0x327   : > { %1111 = vst.msk [vmem:[#allocation3] sm:$0xff] %vm1110_vm6, %v3427_v0  ;;  %1113 = vst.msk [vmem:[#allocation3 + $0x10] sm:$0xff] %vm1110_vm6, %v3427_v0  ;;  %v2600_v34 = vpack.c.bf16 %v1430_v19, %v1429_v15  ;;  %v2580_v35 = vpack.c.bf16 %v1162_v22, %v1161_v20  ;;  %v1431_v23 = vld [vmem:[#allocation16 + $0x70] sm:$0xff]  ;;  %v1432_v24 = vld [vmem:[#allocation16 + $0x78] sm:$0xff]  ;;  %s4857_s28 = sld [smem:[#allocation59_spill]]  ;;  %s4610_s26 = scalar_lea.sflag [#allocation6], %s500_s13 }
 0x328   : > { %1114 = vst.msk [vmem:[#allocation3 + $0x18] sm:$0xff] %vm1110_vm6, %v3427_v0  ;;  %1115 = vst.msk [vmem:[#allocation3 + $0x20] sm:$0xff] %vm1110_vm6, %v3427_v0  ;;  %v1163_v38 = vld [vmem:[#allocation16 + $0x20] sm:$0xff]  ;;  %2577 = vmatprep.subr.bf16.mxu0 %v2576_v18  ;;  %v2604_v25 = vpack.c.bf16 %v1432_v24, %v1431_v23  ;;  %v1164_v39 = vld [vmem:[#allocation16 + $0x28] sm:$0xff]  ;;  %s3224_s7 = scalar_lea.vmem %s4601_s20, 2048  ;;  %s3434_s8 = smov [#allocation19]  }
 0x329   : > { %1116 = vst.msk [vmem:[#allocation3 + $0x28] sm:$0xff] %vm1110_vm6, %v3427_v0  ;;  %1117 = vst.msk [vmem:[#allocation3 + $0x30] sm:$0xff] %vm1110_vm6, %v3427_v0  ;;  %v1433_v26 = vld [vmem:[#allocation16 + $0x80] sm:$0xff]  ;;  %v1434_v40 = vld [vmem:[#allocation16 + $0x88] sm:$0xff]  ;;  %2579 = vmatpush3.bf16.msra.mxu0 %v2576_v18  ;;  %2601 = vmatprep.subr.bf16.mxu1 %v2600_v34  ;;  %v2584_v45 = vpack.c.bf16 %v1164_v39, %v1163_v38  ;;  %p3225_p11 = scmp.ne.s32.totalorder %s4601_s20, %s3224_s7  ;;  %s3228_s30 = sshll.u32 %s3434_s8, 4  ;;  %s3229_s30 = int_to_ptr.vmem [resolvable:$false] %s3228_s30 }
 0x32a   : > { %1118 = vst.msk [vmem:[#allocation3 + $0x38] sm:$0xff] %vm1110_vm6, %v3427_v0  ;;  %1119 = vst.msk [vmem:[#allocation3 + $0x40] sm:$0xff] %vm1110_vm6, %v3427_v0  ;;  %2581 = vmatprep.subr.bf16.mxu0 %v2580_v35  ;;  %2603 = vmatpush3.bf16.msra.mxu1 %v2600_v34  ;;  %v2608_v27 = vpack.c.bf16 %v1434_v40, %v1433_v26  ;;  %v1165_v28 = vld [vmem:[#allocation16 + $0x30] sm:$0xff]  ;;  %v1166_v29 = vld [vmem:[#allocation16 + $0x38] sm:$0xff]  ;;  %s3230_s23 = scalar_lea.vmem %s3229_s30, 4096  ;;  %p3231_p5 = scmp.lt.s32.totalorder %s4601_s20, %s3229_s30 }
 0x32b   : > { %1120 = vst.msk [vmem:[#allocation3 + $0x48] sm:$0xff] %vm1110_vm6, %v3427_v0  ;;  %1121 = vst.msk [vmem:[#allocation3 + $0x50] sm:$0xff] %vm1110_vm6, %v3427_v0  ;;  %2605 = vmatprep.subr.bf16.mxu1 %v2604_v25  ;;  %v1436_v46 = vld [vmem:[#allocation16 + $0x98] sm:$0xff]  ;;  %v1396_v31 = vld [vmem:[#allocation2 + $0x10] sm:$0xff]  ;;  %v2588_v51 = vpack.c.bf16 %v1166_v29, %v1165_v28  ;;  %s2347_s12 = sshll.u32 %s4853_s4, 4  ;;  %s2342_s17 = sshll.u32 %s4854_s19, 5 }
 0x32c   : > { %1122 = vst.msk [vmem:[#allocation3 + $0x58] sm:$0xff] %vm1110_vm6, %v3427_v0  ;;  %1123 = vst.msk [vmem:[#allocation3 + $0x60] sm:$0xff] %vm1110_vm6, %v3427_v0  ;;  %v1127_v30 = vld [vmem:[#allocation2] sm:$0xff]  ;;  %v1167_v33 = vld [vmem:[#allocation16 + $0x40] sm:$0xff]  ;;  %2504 = vmatprep.mubr.msk.f32.mxu1 %vm610_vm0, %v1396_v31  ;;  %s2006_s29 = sadd.s32 %s2347_s12, %s2342_s17  ;;  %p4858_p0 = scmp.ne.s32.totalorder %s4856_s22, 0 }
 0x32d   : > { %1124 = vst.msk [vmem:[#allocation3 + $0x68] sm:$0xff] %vm1110_vm6, %v3427_v0  ;;  %1125 = vst.msk [vmem:[#allocation3 + $0x70] sm:$0xff] %vm1110_vm6, %v3427_v0  ;;  %2583 = vmatpush3.bf16.msra.mxu0 %v2580_v35  ;;  %2456 = vmatprep.mubr.msk.f32.mxu0 %vm610_vm0, %v1127_v30  ;;  %v1168_v36 = vld [vmem:[#allocation16 + $0x48] sm:$0xff]  ;;  %v1437_v37 = vld [vmem:[#allocation16 + $0xa0] sm:$0xff]  ;;  %s2343_s16 = sshll.u32 %s2006_s29, 7  ;;  %p3232_p6 = scmp.lt.s32.totalorder %s3230_s23, %s3224_s7 }
 0x32e   : > { %1126 = vst.msk [vmem:[#allocation3 + $0x78] sm:$0xff] %vm1110_vm6, %v3427_v0  ;;  %v1435_v0 = vld [vmem:[#allocation16 + $0x90] sm:$0xff]  ;;  %2585 = vmatprep.subr.bf16.mxu0 %v2584_v45  ;;  %2607 = vmatpush3.bf16.msra.mxu1 %v2604_v25  ;;  %v1438_v42 = vld [vmem:[#allocation16 + $0xa8] sm:$0xff]  ;;  %v2592_v43 = vpack.c.bf16 %v1168_v36, %v1167_v33  ;;  %v1170_v17 = vld [vmem:[#allocation16 + $0x58] sm:$0xff]  ;;  %s4599_s14 = scalar_lea.hbm %s4857_s28, %s2343_s16  ;;  %p3226_p13 = pnand %p3225_p11, %p4858_p0 }
 0x32f   : > { %2609 = vmatprep.subr.bf16.mxu1 %v2608_v27  ;;  %v2612_v32 = vpack.c.bf16 %v1436_v46, %v1435_v0  ;;  %v2616_v12 = vpack.c.bf16 %v1438_v42, %v1437_v37  ;;  %v1169_v16 = vld [vmem:[#allocation16 + $0x50] sm:$0xff]  ;;  %v1440_v48 = vld [vmem:[#allocation16 + $0xb8] sm:$0xff]  ;;  %v1700_v52 = vld [vmem:[#allocation16 + $0xc0] sm:$0xff]  ;;  %p3233_p9 = por %p3232_p6, %p3231_p5 }
 0x330   : > { %v1439_v47 = vld [vmem:[#allocation16 + $0xb0] sm:$0xff]  ;;  %v2596_v49 = vpack.c.bf16 %v1170_v17, %v1169_v16  ;;  %v1701_v53 = vld [vmem:[#allocation16 + $0xc8] sm:$0xff]  ;;  %v1703_v41 = vld [vmem:[#allocation16 + $0xd8] sm:$0xff]  ;;  %p3227_p2 = pneg %p3226_p13 }
 0x331   : > { %2587 = vmatpush3.bf16.msra.mxu0 %v2584_v45  ;;  %v2620_v50 = vpack.c.bf16 %v1440_v48, %v1439_v47  ;;  %v2624_v54 = vpack.c.bf16 %v1701_v53, %v1700_v52  ;;  %v1702_v55 = vld [vmem:[#allocation16 + $0xd0] sm:$0xff]  ;;  %v1128_v44 = vld [vmem:[#allocation2 + $0x8] sm:$0xff]  ;;  %v4435_v58 = vld [vmem:[#allocation2 + $0x20] sm:$0xff] }
 0x332   : > { %2589 = vmatprep.subr.bf16.mxu0 %v2588_v51  ;;  %2611 = vmatpush3.bf16.msra.mxu1 %v2608_v27  ;;  %v1397_v56 = vld [vmem:[#allocation2 + $0x18] sm:$0xff]  ;;  %v2628_v57 = vpack.c.bf16 %v1703_v41, %v1702_v55  ;;  %v1704_v59 = vld [vmem:[#allocation16 + $0xe0] sm:$0xff]  ;;  %v1705_v60 = vld [vmem:[#allocation16 + $0xe8] sm:$0xff]  ;;  %p3234_p12 = pnand %p3233_p9, %p3227_p2 }
 0x333   : > { %2613 = vmatprep.subr.bf16.mxu1 %v2612_v32  ;;  %v4439_v61 = vld [vmem:[#allocation2 + $0x28] sm:$0xff]  ;;  %v4443_v62 = vld [vmem:[#allocation2 + $0x30] sm:$0xff]  ;;  %v2632_v63 = vpack.c.bf16 %v1705_v60, %v1704_v59  ;;  %v1706_v4 = vld [vmem:[#allocation16 + $0xf0] sm:$0xff] }
 0x334   : > { %v1707_v5 = vld [vmem:[#allocation16 + $0xf8] sm:$0xff]  ;;  %v4452_v6 = vld [vmem:[#allocation2 + $0x38] sm:$0xff]  ;;  %v1708_v2 = vld [vmem:[#allocation16 + $0x100] sm:$0xff] }
 0x335   : > { %2591 = vmatpush3.bf16.msra.mxu0 %v2588_v51  ;;  %v1402_v1 = vld [vmem:[#allocation2 + $0x40] sm:$0xff]  ;;  %v2636_v7 = vpack.c.bf16 %v1707_v5, %v1706_v4  ;;  %v1709_v8 = vld [vmem:[#allocation16 + $0x108] sm:$0xff]  ;;  %v1403_v9 = vld [vmem:[#allocation2 + $0x48] sm:$0xff] }
 0x336   : > { %2593 = vmatprep.subr.bf16.mxu0 %v2592_v43  ;;  %2615 = vmatpush3.bf16.msra.mxu1 %v2612_v32  ;;  %v1404_v3 = vld [vmem:[#allocation2 + $0x50] sm:$0xff]  ;;  %v2640_v21 = vpack.c.bf16 %v1709_v8, %v1708_v2  ;;  %v1710_v10 = vld [vmem:[#allocation16 + $0x110] sm:$0xff]  ;;  %v1711_v11 = vld [vmem:[#allocation16 + $0x118] sm:$0xff] }
 0x337   : > { %2617 = vmatprep.subr.bf16.mxu1 %v2616_v12  ;;  %v1405_v13 = vld [vmem:[#allocation2 + $0x58] sm:$0xff]  ;;  %v1406_v14 = vld [vmem:[#allocation2 + $0x60] sm:$0xff]  ;;  %v2644_v15 = vpack.c.bf16 %v1711_v11, %v1710_v10  ;;  %v1407_v18 = vld [vmem:[#allocation2 + $0x68] sm:$0xff] }
 0x338   : > { %v1408_v19 = vld [vmem:[#allocation2 + $0x70] sm:$0xff]  ;;  %v1409_v20 = vld [vmem:[#allocation2 + $0x78] sm:$0xff]  ;;  %v1410_v22 = vld [vmem:[#allocation2 + $0x80] sm:$0xff] }
 0x339   : > { %2595 = vmatpush3.bf16.msra.mxu0 %v2592_v43  ;;  %v1411_v34 = vld [vmem:[#allocation2 + $0x88] sm:$0xff]  ;;  %v1681_v35 = vld [vmem:[#allocation2 + $0x90] sm:$0xff]  ;;  %v1682_v23 = vld [vmem:[#allocation2 + $0x98] sm:$0xff] }
 0x33a   : > { %2597 = vmatprep.subr.bf16.mxu0 %v2596_v49  ;;  %2619 = vmatpush3.bf16.msra.mxu1 %v2616_v12  ;;  %v1144_v24 = vld [vmem:[#allocation3 + $0x8] sm:$0xff]  ;;  %v1143_v38 = vld [vmem:[#allocation3] sm:$0xff]  ;;  %v1146_v27 = vld [vmem:[#allocation3 + $0x18] sm:$0xff] }
 0x33b   : > { %2621 = vmatprep.subr.bf16.mxu1 %v2620_v50  ;;  %v1145_v29 = vld [vmem:[#allocation3 + $0x10] sm:$0xff]  ;;  %v1148_v32 = vld [vmem:[#allocation3 + $0x28] sm:$0xff]  ;;  %v1147_v36 = vld [vmem:[#allocation3 + $0x20] sm:$0xff] }
 0x33c   : > { %v1150_v47 = vld [vmem:[#allocation3 + $0x38] sm:$0xff]  ;;  %v1149_v52 = vld [vmem:[#allocation3 + $0x30] sm:$0xff] }
 0x33d   : > { %2599 = vmatpush3.bf16.msra.mxu0 %v2596_v49  ;;  %v1154_v8 = vld [vmem:[#allocation3 + $0x58] sm:$0xff]  ;;  %v1153_v10 = vld [vmem:[#allocation3 + $0x50] sm:$0xff] }
 0x33e   : > { %2623 = vmatpush3.bf16.msra.mxu1 %v2620_v50  ;;  %2625 = vmatprep.subr.bf16.mxu0 %v2624_v54 }
 0x33f   : > { %2648 = vmatprep.subr.bf16.mxu1 %v2624_v54 }
 0x340   : > { %2457 = vmatmul.mubr.msk.f32.vlgmr.msra.gmra.mrb[0].mxu0 %vm610_vm0, %v1128_v44 }
 0x341   : > { %2459 = vmatprep.mubr.msk.f32.mxu0 %vm610_vm0, %v1396_v31  ;;  %2505 = vmatmul.mubr.msk.f32.vlgmr.msra.gmra.mrb[0].mxu1 %vm610_vm0, %v1397_v56 }
 0x342   : > { %2627 = vmatpush3.bf16.msra.mxu0 %v2624_v54  ;;  %2654 = vmatpush3.bf16.msra.mxu1 %v2624_v54 }
 0x343   : > { %2507 = vmatprep.mubr.msk.f32.mxu1 %vm610_vm0, %v4435_v58  ;;  %2629 = vmatprep.subr.bf16.mxu0 %v2628_v57 }
 0x344   : > { %2460 = vmatmul.mubr.msk.f32.gmra.mrb[2].mxu0 %vm610_vm0, %v1397_v56  ;;  %2649 = vmatprep.subr.bf16.mxu1 %v2628_v57 }
 0x345   : > { %2462 = vmatprep.mubr.msk.f32.mxu0 %vm610_vm0, %v4435_v58  ;;  %2508 = vmatmul.mubr.msk.f32.gmra.mrb[2].mxu1 %vm610_vm0, %v4439_v61 }
 0x346   : > { %2510 = vmatprep.mubr.msk.f32.mxu1 %vm610_vm0, %v4443_v62  ;;  %2631 = vmatpush3.bf16.msra.mxu0 %v2628_v57 }
 0x347   : > { %2655 = vmatpush3.bf16.msra.mxu1 %v2628_v57  ;;  %2633 = vmatprep.subr.bf16.mxu0 %v2632_v63 }
 0x348   : > { %2463 = vmatmul.mubr.msk.f32.gmra.mrb[4].mxu0 %vm610_vm0, %v4439_v61  ;;  %2650 = vmatprep.subr.bf16.mxu1 %v2632_v63 }
 0x349   : > { %2465 = vmatprep.mubr.msk.f32.mxu0 %vm610_vm0, %v4443_v62  ;;  %2511 = vmatmul.mubr.msk.f32.gmra.mrb[4].mxu1 %vm610_vm0, %v4452_v6 }
 0x34a   : > { %2513 = vmatprep.mubr.msk.f32.mxu1 %vm610_vm0, %v1402_v1  ;;  %2635 = vmatpush3.bf16.msra.mxu0 %v2632_v63 }
 0x34b   : > { %2656 = vmatpush3.bf16.msra.mxu1 %v2632_v63  ;;  %2637 = vmatprep.subr.bf16.mxu0 %v2636_v7 }
 0x34c   : > { %2466 = vmatmul.mubr.msk.f32.gmra.mrb[6].mxu0 %vm610_vm0, %v4452_v6  ;;  %2651 = vmatprep.subr.bf16.mxu1 %v2636_v7 }
 0x34d   : > { %2468 = vmatprep.mubr.msk.f32.mxu0 %vm610_vm0, %v1402_v1  ;;  %2514 = vmatmul.mubr.msk.f32.gmra.mrb[6].mxu1 %vm610_vm0, %v1403_v9 }
 0x34e   : > { %2516 = vmatprep.mubr.msk.f32.mxu1 %vm610_vm0, %v1404_v3  ;;  %2639 = vmatpush3.bf16.msra.mxu0 %v2636_v7 }
 0x34f   : > { %2657 = vmatpush3.bf16.msra.mxu1 %v2636_v7  ;;  %2641 = vmatprep.subr.bf16.mxu0 %v2640_v21 }
 0x350   : > { %2469 = vmatmul.mubr.msk.f32.gmra.mrb[8].mxu0 %vm610_vm0, %v1403_v9  ;;  %2652 = vmatprep.subr.bf16.mxu1 %v2640_v21 }
 0x351   : > { %2471 = vmatprep.mubr.msk.f32.mxu0 %vm610_vm0, %v1404_v3  ;;  %2517 = vmatmul.mubr.msk.f32.gmra.mrb[8].mxu1 %vm610_vm0, %v1405_v13 }
 0x352   : > { %2519 = vmatprep.mubr.msk.f32.mxu1 %vm610_vm0, %v1406_v14  ;;  %2643 = vmatpush3.bf16.msra.mxu0 %v2640_v21 }
 0x353   : > { %2658 = vmatpush3.bf16.msra.mxu1 %v2640_v21  ;;  %2645 = vmatprep.subr.bf16.mxu0 %v2644_v15 }
 0x354   : > { %2472 = vmatmul.mubr.msk.f32.gmra.mrb[10].mxu0 %vm610_vm0, %v1405_v13  ;;  %2653 = vmatprep.subr.bf16.mxu1 %v2644_v15 }
 0x355   : > { %2474 = vmatprep.mubr.msk.f32.mxu0 %vm610_vm0, %v1406_v14  ;;  %2520 = vmatmul.mubr.msk.f32.gmra.mrb[10].mxu1 %vm610_vm0, %v1407_v18 }
 0x356   : > { %2522 = vmatprep.mubr.msk.f32.mxu1 %vm610_vm0, %v1408_v19  ;;  %2647 = vmatpush3.bf16.msra.mxu0 %v2644_v15 }
 0x357   : > { %2659 = vmatpush3.bf16.msra.mxu1 %v2644_v15 }
 0x358   : > { %2475 = vmatmul.mubr.msk.f32.gmra.mrb[12].mxu0 %vm610_vm0, %v1407_v18 }
 0x359   : > { %2477 = vmatprep.mubr.msk.f32.mxu0 %vm610_vm0, %v1408_v19  ;;  %2523 = vmatmul.mubr.msk.f32.gmra.mrb[12].mxu1 %vm610_vm0, %v1409_v20 }
 0x35a   : > { %2525 = vmatprep.mubr.msk.f32.mxu1 %vm610_vm0, %v1410_v22 }
 0x35c   : > { %2478 = vmatmul.mubr.msk.f32.gmra.mrb[14].mxu0 %vm610_vm0, %v1409_v20 }
 0x35d   : > { %2526 = vmatmul.mubr.msk.f32.gmra.mrb[14].mxu1 %vm610_vm0, %v1411_v34  ;;  %2552 = vmatprep.mubr.msk.f32.mxu0 %vm610_vm0, %v4435_v58  ;;  %v1152_v58 = vld [vmem:[#allocation3 + $0x48] sm:$0xff] }
 0x35e   : > { %2564 = vmatprep.mubr.msk.f32.mxu1 %vm610_vm0, %v1406_v14 }
 0x360   : > { %2553 = vmatmul.mubr.msk.f32.vlgmr.msra.gmra.mrb[16].mxu0 %vm610_vm0, %v4439_v61 }
 0x361   : > { %2555 = vmatprep.mubr.msk.f32.mxu0 %vm610_vm0, %v4443_v62  ;;  %2565 = vmatmul.mubr.msk.f32.vlgmr.msra.gmra.mrb[16].mxu1 %vm610_vm0, %v1407_v18  ;;  %v1151_v62 = vld [vmem:[#allocation3 + $0x40] sm:$0xff] }
 0x362   : > { %2567 = vmatprep.mubr.msk.f32.mxu1 %vm610_vm0, %v1408_v19 }
 0x364   : > { %2556 = vmatmul.mubr.msk.f32.gmra.mrb[18].mxu0 %vm610_vm0, %v4452_v6 }
 0x365   : > { %2558 = vmatprep.mubr.msk.f32.mxu0 %vm610_vm0, %v1402_v1  ;;  %2568 = vmatmul.mubr.msk.f32.gmra.mrb[18].mxu1 %vm610_vm0, %v1409_v20 }
 0x366   : > { %2570 = vmatprep.mubr.msk.f32.mxu1 %vm610_vm0, %v1410_v22  ;;  %v1156_v22 = vld [vmem:[#allocation3 + $0x68] sm:$0xff] }
 0x368   : > { %2559 = vmatmul.mubr.msk.f32.gmra.mrb[20].mxu0 %vm610_vm0, %v1403_v9 }
 0x369   : > { %2561 = vmatprep.mubr.msk.f32.mxu0 %vm610_vm0, %v1404_v3  ;;  %2571 = vmatmul.mubr.msk.f32.gmra.mrb[20].mxu1 %vm610_vm0, %v1411_v34 }
 0x36a   : > { %2573 = vmatprep.mubr.msk.f32.mxu1 %vm610_vm0, %v1681_v35 }
 0x36c   : > { %2562 = vmatmul.mubr.msk.f32.gmra.mrb[22].mxu0 %vm610_vm0, %v1405_v13 }
 0x36d   : > { %2574 = vmatmul.mubr.msk.f32.gmra.mrb[22].mxu1 %vm610_vm0, %v1682_v23 }
 0x413   : > { %v2458_v25 = vpop.f32.mrb[0].mxu0 }
 0x414   : > { %v1365_v39 = vadd.f32 %v2458_v25, %v1144_v24  ;;  %v1285_v26 = vpop.f32.mrb[1].mxu0  ;;  %v2506_v40 = vpop.f32.mrb[0].mxu1  ;;  %v1155_v24 = vld [vmem:[#allocation3 + $0x60] sm:$0xff] }
 0x415   : > { %v1364_v45 = vadd.f32 %v1285_v26, %v1143_v38  ;;  %v1555_v28 = vpop.f32.mrb[1].mxu1 }
 0x416   : > { %1381 = vst.msk [vmem:[#allocation3 + $0x8] sm:$0xff] %vm1110_vm6, %v1365_v39 }
 0x417   : > { %1380 = vst.msk [vmem:[#allocation3] sm:$0xff] %vm1110_vm6, %v1364_v45  ;;  %v2461_v0 = vpop.f32.mrb[2].mxu0 }
 0x418   : > { %v1367_v46 = vadd.f32 %v2461_v0, %v1146_v27  ;;  %v1295_v30 = vpop.f32.mrb[3].mxu0  ;;  %v2509_v31 = vpop.f32.mrb[2].mxu1 }
 0x419   : > { %v1366_v51 = vadd.f32 %v1295_v30, %v1145_v29  ;;  %v1565_v33 = vpop.f32.mrb[3].mxu1  ;;  %v1157_v30 = vld [vmem:[#allocation3 + $0x70] sm:$0xff] }
 0x41a   : > { %1383 = vst.msk [vmem:[#allocation3 + $0x18] sm:$0xff] %vm1110_vm6, %v1367_v46 }
 0x41b   : > { %1382 = vst.msk [vmem:[#allocation3 + $0x10] sm:$0xff] %vm1110_vm6, %v1366_v51  ;;  %v2464_v37 = vpop.f32.mrb[4].mxu0 }
 0x41c   : > { %v1369_v42 = vadd.f32 %v2464_v37, %v1148_v32  ;;  %v1305_v43 = vpop.f32.mrb[5].mxu0  ;;  %v2512_v12 = vpop.f32.mrb[4].mxu1 }
 0x41d   : > { %v1413_v16 = vld [vmem:[#allocation3 + $0x8] sm:$0xff]  ;;  %v1368_v17 = vadd.f32 %v1305_v43, %v1147_v36  ;;  %v1575_v48 = vpop.f32.mrb[5].mxu1 }
 0x41e   : > { %v1635_v49 = vadd.f32 %v2506_v40, %v1413_v16  ;;  %v1412_v50 = vld [vmem:[#allocation3] sm:$0xff]  ;;  %1385 = vst.msk [vmem:[#allocation3 + $0x28] sm:$0xff] %vm1110_vm6, %v1369_v42 }
 0x41f   : > { %v1634_v53 = vadd.f32 %v1555_v28, %v1412_v50  ;;  %1384 = vst.msk [vmem:[#allocation3 + $0x20] sm:$0xff] %vm1110_vm6, %v1368_v17  ;;  %v2467_v54 = vpop.f32.mrb[6].mxu0  ;;  %v1158_v28 = vld [vmem:[#allocation3 + $0x78] sm:$0xff] }
 0x420   : > { %1651 = vst.msk [vmem:[#allocation3 + $0x8] sm:$0xff] %vm1110_vm6, %v1635_v49  ;;  %v1371_v55 = vadd.f32 %v2467_v54, %v1150_v47  ;;  %v1315_v41 = vpop.f32.mrb[7].mxu0  ;;  %v2515_v44 = vpop.f32.mrb[6].mxu1 }
 0x421   : > { %1650 = vst.msk [vmem:[#allocation3] sm:$0xff] %vm1110_vm6, %v1634_v53  ;;  %v1415_v56 = vld [vmem:[#allocation3 + $0x18] sm:$0xff]  ;;  %v1370_v57 = vadd.f32 %v1315_v41, %v1149_v52  ;;  %v1585_v59 = vpop.f32.mrb[7].mxu1 }
 0x422   : > { %v1637_v60 = vadd.f32 %v2509_v31, %v1415_v56  ;;  %v1414_v61 = vld [vmem:[#allocation3 + $0x10] sm:$0xff]  ;;  %1387 = vst.msk [vmem:[#allocation3 + $0x38] sm:$0xff] %vm1110_vm6, %v1371_v55 }
 0x423   : > { %v1636_v63 = vadd.f32 %v1565_v33, %v1414_v61  ;;  %1386 = vst.msk [vmem:[#allocation3 + $0x30] sm:$0xff] %vm1110_vm6, %v1370_v57  ;;  %v2470_v4 = vpop.f32.mrb[8].mxu0 }
 0x424   : > { %1653 = vst.msk [vmem:[#allocation3 + $0x18] sm:$0xff] %vm1110_vm6, %v1637_v60  ;;  %v1373_v5 = vadd.f32 %v2470_v4, %v1152_v58  ;;  %v1325_v6 = vpop.f32.mrb[9].mxu0  ;;  %v2518_v1 = vpop.f32.mrb[8].mxu1 }
 0x425   : > { %1652 = vst.msk [vmem:[#allocation3 + $0x10] sm:$0xff] %vm1110_vm6, %v1636_v63  ;;  %v1417_v7 = vld [vmem:[#allocation3 + $0x28] sm:$0xff]  ;;  %v1372_v2 = vadd.f32 %v1325_v6, %v1151_v62  ;;  %v1595_v9 = vpop.f32.mrb[9].mxu1 }
 0x426   : > { %v1639_v3 = vadd.f32 %v2512_v12, %v1417_v7  ;;  %v1416_v21 = vld [vmem:[#allocation3 + $0x20] sm:$0xff]  ;;  %1389 = vst.msk [vmem:[#allocation3 + $0x48] sm:$0xff] %vm1110_vm6, %v1373_v5 }
 0x427   : > { %v1638_v11 = vadd.f32 %v1575_v48, %v1416_v21  ;;  %1388 = vst.msk [vmem:[#allocation3 + $0x40] sm:$0xff] %vm1110_vm6, %v1372_v2  ;;  %v2473_v13 = vpop.f32.mrb[10].mxu0  ;;  %v1684_v47 = vld [vmem:[#allocation3 + $0x8] sm:$0xff] }
 0x428   : > { %1655 = vst.msk [vmem:[#allocation3 + $0x28] sm:$0xff] %vm1110_vm6, %v1639_v3  ;;  %v1375_v14 = vadd.f32 %v2473_v13, %v1154_v8  ;;  %v1335_v15 = vpop.f32.mrb[11].mxu0  ;;  %v2521_v18 = vpop.f32.mrb[10].mxu1  ;;  %v1683_v50 = vld [vmem:[#allocation3] sm:$0xff] }
 0x429   : > { %1654 = vst.msk [vmem:[#allocation3 + $0x20] sm:$0xff] %vm1110_vm6, %v1638_v11  ;;  %v1419_v19 = vld [vmem:[#allocation3 + $0x38] sm:$0xff]  ;;  %v1374_v20 = vadd.f32 %v1335_v15, %v1153_v10  ;;  %v1605_v34 = vpop.f32.mrb[11].mxu1  ;;  %v4534_v10 = vld [vmem:[#allocation18] ss:$0 sm:$0xff] }
 0x42a   : > { %v1641_v35 = vadd.f32 %v2515_v44, %v1419_v19  ;;  %v1418_v23 = vld [vmem:[#allocation3 + $0x30] sm:$0xff]  ;;  %1391 = vst.msk [vmem:[#allocation3 + $0x58] sm:$0xff] %vm1110_vm6, %v1375_v14 }
 0x42b   : > { %v1640_v38 = vadd.f32 %v1585_v59, %v1418_v23  ;;  %1390 = vst.msk [vmem:[#allocation3 + $0x50] sm:$0xff] %vm1110_vm6, %v1374_v20  ;;  %v2476_v25 = vpop.f32.mrb[12].mxu0  ;;  %v1686_v59 = vld [vmem:[#allocation3 + $0x18] sm:$0xff] }
 0x42c   : > { %1657 = vst.msk [vmem:[#allocation3 + $0x38] sm:$0xff] %vm1110_vm6, %v1641_v35  ;;  %v1377_v39 = vadd.f32 %v2476_v25, %v1156_v22  ;;  %v1345_v26 = vpop.f32.mrb[13].mxu0  ;;  %v2524_v40 = vpop.f32.mrb[12].mxu1  ;;  %v1685_v4 = vld [vmem:[#allocation3 + $0x10] sm:$0xff] }
 0x42d   : > { %1656 = vst.msk [vmem:[#allocation3 + $0x30] sm:$0xff] %vm1110_vm6, %v1640_v38  ;;  %v1421_v45 = vld [vmem:[#allocation3 + $0x48] sm:$0xff]  ;;  %v1376_v27 = vadd.f32 %v1345_v26, %v1155_v24  ;;  %v1615_v29 = vpop.f32.mrb[13].mxu1 }
 0x42e   : > { %v1643_v0 = vadd.f32 %v2518_v1, %v1421_v45  ;;  %v1420_v46 = vld [vmem:[#allocation3 + $0x40] sm:$0xff]  ;;  %1393 = vst.msk [vmem:[#allocation3 + $0x68] sm:$0xff] %vm1110_vm6, %v1377_v39 }
 0x42f   : > { %v1642_v31 = vadd.f32 %v1595_v9, %v1420_v46  ;;  %1392 = vst.msk [vmem:[#allocation3 + $0x60] sm:$0xff] %vm1110_vm6, %v1376_v27  ;;  %v2479_v51 = vpop.f32.mrb[14].mxu0  ;;  %v1688_v13 = vld [vmem:[#allocation3 + $0x28] sm:$0xff] }
 0x430   : > { %1659 = vst.msk [vmem:[#allocation3 + $0x48] sm:$0xff] %vm1110_vm6, %v1643_v0  ;;  %v1379_v32 = vadd.f32 %v2479_v51, %v1158_v28  ;;  %v1355_v33 = vpop.f32.mrb[15].mxu0  ;;  %v2527_v36 = vpop.f32.mrb[14].mxu1  ;;  %v1687_v20 = vld [vmem:[#allocation3 + $0x20] sm:$0xff] }
 0x431   : > { %1658 = vst.msk [vmem:[#allocation3 + $0x40] sm:$0xff] %vm1110_vm6, %v1642_v31  ;;  %v1423_v37 = vld [vmem:[#allocation3 + $0x58] sm:$0xff]  ;;  %v1378_v42 = vadd.f32 %v1355_v33, %v1157_v30  ;;  %v1625_v43 = vpop.f32.mrb[15].mxu1 }
 0x432   : > { %v1645_v12 = vadd.f32 %v2521_v18, %v1423_v37  ;;  %v1422_v16 = vld [vmem:[#allocation3 + $0x50] sm:$0xff]  ;;  %1395 = vst.msk [vmem:[#allocation3 + $0x78] sm:$0xff] %vm1110_vm6, %v1379_v32 }
 0x433   : > { %v1644_v17 = vadd.f32 %v1605_v34, %v1422_v16  ;;  %1394 = vst.msk [vmem:[#allocation3 + $0x70] sm:$0xff] %vm1110_vm6, %v1378_v42  ;;  %v2554_v48 = vpop.f32.mrb[16].mxu0  ;;  %v1690_v45 = vld [vmem:[#allocation3 + $0x38] sm:$0xff] }
 0x434   : > { %1661 = vst.msk [vmem:[#allocation3 + $0x58] sm:$0xff] %vm1110_vm6, %v1645_v12  ;;  %v1906_v49 = vadd.f32 %v2554_v48, %v1684_v47  ;;  %v1826_v52 = vpop.f32.mrb[17].mxu0  ;;  %v2566_v53 = vpop.f32.mrb[16].mxu1  ;;  %v1689_v46 = vld [vmem:[#allocation3 + $0x30] sm:$0xff] }
 0x435   : > { %1660 = vst.msk [vmem:[#allocation3 + $0x50] sm:$0xff] %vm1110_vm6, %v1644_v17  ;;  %v1425_v54 = vld [vmem:[#allocation3 + $0x68] sm:$0xff]  ;;  %v1905_v55 = vadd.f32 %v1826_v52, %v1683_v50  ;;  %v1866_v41 = vpop.f32.mrb[17].mxu1 }
 0x436   : > { %v1647_v44 = vadd.f32 %v2524_v40, %v1425_v54  ;;  %v1424_v56 = vld [vmem:[#allocation3 + $0x60] sm:$0xff]  ;;  %1922 = vst.msk [vmem:[#allocation3 + $0x8] sm:$0xff] %vm1110_vm6, %v1906_v49 }
 0x437   : > { %v1646_v57 = vadd.f32 %v1615_v29, %v1424_v56  ;;  %1921 = vst.msk [vmem:[#allocation3] sm:$0xff] %vm1110_vm6, %v1905_v55  ;;  %v1692_v58 = vld [vmem:[#allocation3 + $0x48] sm:$0xff]  ;;  %v2557_v60 = vpop.f32.mrb[18].mxu0 }
 0x438   : > { %1663 = vst.msk [vmem:[#allocation3 + $0x68] sm:$0xff] %vm1110_vm6, %v1647_v44  ;;  %v1914_v61 = vadd.f32 %v2566_v53, %v1692_v58  ;;  %v1908_v62 = vadd.f32 %v2557_v60, %v1686_v59  ;;  %v1691_v63 = vld [vmem:[#allocation3 + $0x40] sm:$0xff]  ;;  %v1836_v5 = vpop.f32.mrb[19].mxu0  ;;  %v2569_v6 = vpop.f32.mrb[18].mxu1 }
 0x439   : > { %1662 = vst.msk [vmem:[#allocation3 + $0x60] sm:$0xff] %vm1110_vm6, %v1646_v57  ;;  %v1427_v1 = vld [vmem:[#allocation3 + $0x78] sm:$0xff]  ;;  %v1913_v7 = vadd.f32 %v1866_v41, %v1691_v63  ;;  %v1907_v2 = vadd.f32 %v1836_v5, %v1685_v4  ;;  %v1876_v8 = vpop.f32.mrb[19].mxu1 }
 0x43a   : > { %v1649_v9 = vadd.f32 %v2527_v36, %v1427_v1  ;;  %v1426_v3 = vld [vmem:[#allocation3 + $0x70] sm:$0xff]  ;;  %1930 = vst.msk [vmem:[#allocation3 + $0x48] sm:$0xff] %vm1110_vm6, %v1914_v61  ;;  %1924 = vst.msk [vmem:[#allocation3 + $0x18] sm:$0xff] %vm1110_vm6, %v1908_v62 }
 0x43b   : > { %v1648_v21 = vadd.f32 %v1625_v43, %v1426_v3  ;;  %1929 = vst.msk [vmem:[#allocation3 + $0x40] sm:$0xff] %vm1110_vm6, %v1913_v7  ;;  %1923 = vst.msk [vmem:[#allocation3 + $0x10] sm:$0xff] %vm1110_vm6, %v1907_v2  ;;  %v1694_v11 = vld [vmem:[#allocation3 + $0x58] sm:$0xff]  ;;  %v2560_v14 = vpop.f32.mrb[20].mxu0 }
 0x43c   : > { %1665 = vst.msk [vmem:[#allocation3 + $0x78] sm:$0xff] %vm1110_vm6, %v1649_v9  ;;  %v1916_v15 = vadd.f32 %v2569_v6, %v1694_v11  ;;  %v1910_v18 = vadd.f32 %v2560_v14, %v1688_v13  ;;  %v1693_v19 = vld [vmem:[#allocation3 + $0x50] sm:$0xff]  ;;  %v1846_v22 = vpop.f32.mrb[21].mxu0  ;;  %v2572_v34 = vpop.f32.mrb[20].mxu1 }
 0x43d   : > { %1664 = vst.msk [vmem:[#allocation3 + $0x70] sm:$0xff] %vm1110_vm6, %v1648_v21  ;;  %v1938_v35 = vld [vmem:[#allocation3 + $0x8] sm:$0xff]  ;;  %v1915_v23 = vadd.f32 %v1876_v8, %v1693_v19  ;;  %v1909_v24 = vadd.f32 %v1846_v22, %v1687_v20  ;;  %v1886_v38 = vpop.f32.mrb[21].mxu1 }
 0x43e   : > { %v1961_v25 = vadd.f32 %v4534_v10, %v1938_v35  ;;  %v1937_v39 = vld [vmem:[#allocation3] sm:$0xff]  ;;  %1932 = vst.msk [vmem:[#allocation3 + $0x58] sm:$0xff] %vm1110_vm6, %v1916_v15  ;;  %1926 = vst.msk [vmem:[#allocation3 + $0x28] sm:$0xff] %vm1110_vm6, %v1910_v18 }
 0x43f   : > { %v1960_v26 = vadd.f32 %v4534_v10, %v1937_v39  ;;  %1931 = vst.msk [vmem:[#allocation3 + $0x50] sm:$0xff] %vm1110_vm6, %v1915_v23  ;;  %1925 = vst.msk [vmem:[#allocation3 + $0x20] sm:$0xff] %vm1110_vm6, %v1909_v24  ;;  %v1696_v40 = vld [vmem:[#allocation3 + $0x68] sm:$0xff]  ;;  %v2563_v27 = vpop.f32.mrb[22].mxu0 }
 0x440   : > { %1977 = vst.msk [vmem:[%s4360_s5 + $0x8] sm:$0xff] %vm1110_vm6, %v1961_v25  ;;  %v1918_v28 = vadd.f32 %v2572_v34, %v1696_v40  ;;  %v1912_v29 = vadd.f32 %v2563_v27, %v1690_v45  ;;  %v1695_v0 = vld [vmem:[#allocation3 + $0x60] sm:$0xff]  ;;  %v1856_v30 = vpop.f32.mrb[23].mxu0  ;;  %v2575_v31 = vpop.f32.mrb[22].mxu1 }
 0x441   : > { %1976 = vst.msk [vmem:[%s4360_s5] sm:$0xff] %vm1110_vm6, %v1960_v26  ;;  %v1946_v51 = vld [vmem:[#allocation3 + $0x48] sm:$0xff]  ;;  %v1940_v32 = vld [vmem:[#allocation3 + $0x18] sm:$0xff]  ;;  %v1917_v33 = vadd.f32 %v1886_v38, %v1695_v0  ;;  %v1911_v36 = vadd.f32 %v1856_v30, %v1689_v46  ;;  %v1896_v37 = vpop.f32.mrb[23].mxu1 }
 0x442   : > { %v1969_v42 = vadd.f32 %v4534_v10, %v1946_v51  ;;  %v1963_v43 = vadd.f32 %v4534_v10, %v1940_v32  ;;  %v1945_v12 = vld [vmem:[#allocation3 + $0x40] sm:$0xff]  ;;  %v1939_v16 = vld [vmem:[#allocation3 + $0x10] sm:$0xff]  ;;  %1934 = vst.msk [vmem:[#allocation3 + $0x68] sm:$0xff] %vm1110_vm6, %v1918_v28  ;;  %1928 = vst.msk [vmem:[#allocation3 + $0x38] sm:$0xff] %vm1110_vm6, %v1912_v29 }
 0x443   : > { %v1968_v17 = vadd.f32 %v4534_v10, %v1945_v12  ;;  %v1962_v47 = vadd.f32 %v4534_v10, %v1939_v16  ;;  %1933 = vst.msk [vmem:[#allocation3 + $0x60] sm:$0xff] %vm1110_vm6, %v1917_v33  ;;  %1927 = vst.msk [vmem:[#allocation3 + $0x30] sm:$0xff] %vm1110_vm6, %v1911_v36  ;;  %v1698_v48 = vld [vmem:[#allocation3 + $0x78] sm:$0xff] }
 0x444   : > { %1985 = vst.msk [vmem:[%s4360_s5 + $0x48] sm:$0xff] %vm1110_vm6, %v1969_v42  ;;  %1979 = vst.msk [vmem:[%s4360_s5 + $0x18] sm:$0xff] %vm1110_vm6, %v1963_v43  ;;  %v1920_v49 = vadd.f32 %v2575_v31, %v1698_v48  ;;  %v1697_v50 = vld [vmem:[#allocation3 + $0x70] sm:$0xff] }
 0x445   : > { %1984 = vst.msk [vmem:[%s4360_s5 + $0x40] sm:$0xff] %vm1110_vm6, %v1968_v17  ;;  %1978 = vst.msk [vmem:[%s4360_s5 + $0x10] sm:$0xff] %vm1110_vm6, %v1962_v47  ;;  %v1948_v52 = vld [vmem:[#allocation3 + $0x58] sm:$0xff]  ;;  %v1942_v53 = vld [vmem:[#allocation3 + $0x28] sm:$0xff]  ;;  %v1919_v54 = vadd.f32 %v1896_v37, %v1697_v50 }
 0x446   : > { %v1971_v55 = vadd.f32 %v4534_v10, %v1948_v52  ;;  %v1965_v41 = vadd.f32 %v4534_v10, %v1942_v53  ;;  %v1947_v44 = vld [vmem:[#allocation3 + $0x50] sm:$0xff]  ;;  %v1941_v56 = vld [vmem:[#allocation3 + $0x20] sm:$0xff]  ;;  %1936 = vst.msk [vmem:[#allocation3 + $0x78] sm:$0xff] %vm1110_vm6, %v1920_v49 }
 0x447   : > { %v1970_v57 = vadd.f32 %v4534_v10, %v1947_v44  ;;  %v1964_v58 = vadd.f32 %v4534_v10, %v1941_v56  ;;  %1935 = vst.msk [vmem:[#allocation3 + $0x70] sm:$0xff] %vm1110_vm6, %v1919_v54 }
 0x448   : > { %1987 = vst.msk [vmem:[%s4360_s5 + $0x58] sm:$0xff] %vm1110_vm6, %v1971_v55  ;;  %1981 = vst.msk [vmem:[%s4360_s5 + $0x28] sm:$0xff] %vm1110_vm6, %v1965_v41 }
 0x449   : > { %1986 = vst.msk [vmem:[%s4360_s5 + $0x50] sm:$0xff] %vm1110_vm6, %v1970_v57  ;;  %1980 = vst.msk [vmem:[%s4360_s5 + $0x20] sm:$0xff] %vm1110_vm6, %v1964_v58  ;;  %v1950_v59 = vld [vmem:[#allocation3 + $0x68] sm:$0xff]  ;;  %v1944_v60 = vld [vmem:[#allocation3 + $0x38] sm:$0xff] }
 0x44a   : > { %v1973_v61 = vadd.f32 %v4534_v10, %v1950_v59  ;;  %v1967_v62 = vadd.f32 %v4534_v10, %v1944_v60  ;;  %v1949_v63 = vld [vmem:[#allocation3 + $0x60] sm:$0xff]  ;;  %v1943_v4 = vld [vmem:[#allocation3 + $0x30] sm:$0xff] }
 0x44b   : > { %v1972_v5 = vadd.f32 %v4534_v10, %v1949_v63  ;;  %v1966_v6 = vadd.f32 %v4534_v10, %v1943_v4 }
 0x44c   : > { %1989 = vst.msk [vmem:[%s4360_s5 + $0x68] sm:$0xff] %vm1110_vm6, %v1973_v61  ;;  %1983 = vst.msk [vmem:[%s4360_s5 + $0x38] sm:$0xff] %vm1110_vm6, %v1967_v62 }
 0x44d   : > { %1988 = vst.msk [vmem:[%s4360_s5 + $0x60] sm:$0xff] %vm1110_vm6, %v1972_v5  ;;  %1982 = vst.msk [vmem:[%s4360_s5 + $0x30] sm:$0xff] %vm1110_vm6, %v1966_v6  ;;  %v1952_v1 = vld [vmem:[#allocation3 + $0x78] sm:$0xff] }
 0x44e   : > { %v1975_v7 = vadd.f32 %v4534_v10, %v1952_v1  ;;  %v1951_v2 = vld [vmem:[#allocation3 + $0x70] sm:$0xff] }
 0x44f   : > { %v1974_v8 = vadd.f32 %v4534_v10, %v1951_v2 }
 0x450   : > { %1991 = vst.msk [vmem:[%s4360_s5 + $0x78] sm:$0xff] %vm1110_vm6, %v1975_v7 }
 0x451   : > { %1990 = vst.msk [vmem:[%s4360_s5 + $0x70] sm:$0xff] %vm1110_vm6, %v1974_v8 }
 0x452   : > { %3237 = shalt.err (!%p3234_p12)
}
 0x453   : > { %s3238_s13 = scalar_lea.hbm %s4599_s14, 2048  ;;  %s3242_s18 = scalar_lea.hbm %s4857_s28, 8192 }
 0x454   : > { %p3239_p7 = scmp.ne.s32.totalorder %s4599_s14, %s3238_s13  ;;  %p3243_p10 = scmp.lt.u32.totalorder %s4599_s14, %s4857_s28 }
 0x455   : > { %p3244_p1 = scmp.lt.u32.totalorder %s3242_s18, %s3238_s13  ;;  %p3246_p11 = scmp.lt.u32.totalorder %s3238_s13, %s4599_s14 }
 0x456   : > { %p3240_p8 = pnand %p3239_p7, %p4858_p0 }
 0x457   : > { %p3245_p3 = por %p3244_p1, %p3243_p10 }
 0x458   : > { %p3241_p4 = pneg %p3240_p8 }
 0x459   : > { %p3247_p13 = por %p3246_p11, %p3245_p3 }
 0x45b   : > { %p3248_p2 = pnand %p3247_p13, %p3241_p4 }
 0x45d   : > { %3251 = shalt.err (!%p3248_p2)
}
 0x45e   : > { %s3435_s19 = smov 128   ;;  %s3436_s12 = smov 8  }
 0x45f   : > { %2686 = dma.vmem_to_hbm [thread:$0]  (%p4858_p0), %s4601_s20, 2048, %s4599_s14, %s4610_s26, %s3435_s19, %s3435_s19, %s3436_s12  }
 0x460 PF: > { %s4859_s17 = sld [smem:[#allocation31_spill]]  ;;  %s4860_s29 = sld [smem:[#allocation45_spill]] }
 0x461   : > { %p2730_p5 = scmp.ge.s32.totalorder %s3414_s25, 2 }
 0x466   : > { %s2024_s2 = sand.u32 1, %s4859_s17   ;;  %p4861_p6 = scmp.ne.s32.totalorder %s4860_s29, 0 }
 0x467   : > { %s2025_s16 = scalar_lea.sflag [#allocation6], %s2024_s2 }
 0x468   : > { %p2718_p9 = pnand %p2730_p5, %p4861_p6 }
 0x46a   : > { %3345 = dma.done.wait (!%p2718_p9), %s2025_s16, 2048  }
 0x46b   : > { %3347 = vsyncadd (!%p2718_p9), %s2025_s16, 4294965248  ;;  %s33_s25 = sadd.s32 1, %s3414_s25   ;;  %s4863_s30 = sld [smem:[#allocation27_spill]] }
 0x46c   : > { %p4639_p12 = scmp.ge.s32.totalorder %s33_s25, 6   ;;  %s4864_s20 = sld [smem:[#allocation47_spill]] }
 0x46d   : > { %s4865_s12 = sld [smem:[#allocation29_spill]]  ;;  %s4866_s13 = sld [smem:[#allocation30_spill]] }
 0x46e   : > { %s4867_s22 = sld [smem:[#allocation32_spill]]  ;;  %s4868_s16 = sld [smem:[#allocation33_spill]] }
 0x46f   : > { %s4869_s17 = sld [smem:[#allocation46_spill]]  ;;  %s4870_s18 = sld [smem:[#allocation35_spill]] }
 0x470   : > { %s4871_s19 = sld [smem:[#allocation36_spill]]  ;;  %s4872_s21 = smov %s3871_s15 }
 0x471   : > { %s4873_s26 = sld [smem:[#allocation39_spill]]  ;;  %s4874_s23 = sld [smem:[#allocation41_spill]] }
 0x472   : > { %s4875_s7 = sld [smem:[#allocation42_spill]]  ;;  %s4876_s10 = smov %s3358_s11 }
 0x473   : > { %s4877_s11 = smov %s4864_s20  ;;  %s4878_s14 = smov %s4899_s1 }
 0x474   : > { %s4879_s15 = smov %s4867_s22  ;;  %s4880_s20 = smov %s4872_s21 }
 0x475   : > { %s4882_s22 = smov %s3410_s24  ;;  %32 = sbr.rel (!%p4639_p12) target bundleno = 29 (0x1d), region = 178 }
 0x477   : > { %s4881_s21 = smov %s4873_s26 }
 0x478   : > { %s4883_s24 = smov %s4875_s7 }
 0x47c   :  { %2030 = vsyncpa [#allocation5], 1 }
 0x47d   :  { %2032 = vsyncpa [#allocation5 + $0x1], 1 }
 0x47e   :  { %2033 = vsyncpa [#allocation8], 1 }
 0x47f   :  { %2035 = vsyncpa [#allocation8 + $0x1], 1 }
 0x480   :  { %2036 = vsyncpa [#allocation11], 1 }
 0x481   :  { %2038 = vsyncpa [#allocation11 + $0x1], 1 }
 0x482   :  { %2039 = vsyncpa [#allocation14], 1 }
 0x483   :  { %2040 = vsyncpa [#allocation17], 1 }
 0x484   :  { %2041 = vsyncpa [#allocation6], 1 }
 0x485   :  { %2043 = vsyncpa [#allocation6 + $0x1], 1 }

// kernel: resnet_block_forward.7
= control target key start
LH: loop header
LB: loop body
LE: loop exit
PB: predicated region body
PF: predicated region fallthrough
CT: control target
= control target key end

     0   :  { %s5656_s0 = inlined_call_operand.hbm [shape: f32[2,16,16,64], index: 0, kind: input, shape index: {}, may-alias: {0,1,2}]   ;;  %s5657_s1 = inlined_call_operand.hbm [shape: f32[2,16,16,64], index: 1, kind: input, shape index: {}, may-alias: {0,1,2}]   ;;  %s5658_s2 = inlined_call_operand.hbm [shape: f32[2,16,16,64], index: 2, kind: input, shape index: {}, may-alias: {0,1,2}]   ;;  %s5659_s3 = inlined_call_operand.hbm [shape: f32[2,1,64], index: 3, kind: input, shape index: {}]   ;;  %s5660_s4 = inlined_call_operand.hbm [shape: f32[2,1,64], index: 4, kind: input, shape index: {}]   ;;  %s5661_s5 = inlined_call_operand.hbm [shape: f32[1,1,64], index: 5, kind: input, shape index: {}]   ;;  %s5662_s6 = inlined_call_operand.hbm [shape: f32[1,1,64], index: 6, kind: input, shape index: {}]   ;;  %s5663_s7 = inlined_call_operand.hbm [shape: f32[3,192,64], index: 7, kind: input, shape index: {}]   ;;  %s5664_s8 = inlined_call_operand.hbm [shape: f32[1,64], index: 8, kind: input, shape index: {}]   ;;  %s5665_s9 = inlined_call_operand.hbm [shape: f32[2,16,16,32], index: 9, kind: input, shape index: {}]   ;;  %s5666_s10 = inlined_call_operand.hbm [shape: f32[32,64], index: 10, kind: input, shape index: {}]   ;;  %s5667_s11 = inlined_call_operand.hbm [shape: f32[1,64], index: 11, kind: input, shape index: {}]   ;;  %s5668_s12 = inlined_call_operand.hbm [shape: f32[2,16,16,64], index: 12, kind: output, shape index: {}]  }
   0x1   :  { %5729 = sst [smem:[#allocation60_spill]] %s5656_s0 }
   0x2   :  { %5730 = sst [smem:[#allocation61_spill]] %s5657_s1 }
   0x3   :  { %5731 = sst [smem:[#allocation62_spill]] %s5658_s2 }
   0x4   :  { %5732 = sst [smem:[#allocation63_spill]] %s5659_s3 }
   0x5   :  { %5733 = sst [smem:[#allocation64_spill]] %s5660_s4 }
   0x6   :  { %5734 = sst [smem:[#allocation65_spill]] %s5661_s5 }
   0x7   :  { %5735 = sst [smem:[#allocation66_spill]] %s5662_s6 }
   0x8   :  { %5736 = sst [smem:[#allocation67_spill]] %s5663_s7 }
   0x9   :  { %5737 = sst [smem:[#allocation68_spill]] %s5664_s8 }
   0xa   :  { %5738 = sst [smem:[#allocation69_spill]] %s5665_s9 }
   0xb   :  { %5739 = sst [smem:[#allocation70_spill]] %s5666_s10 }
   0xc   :  { %5740 = sst [smem:[#allocation71_spill]] %s5667_s11 }
   0xd   :  { %5741 = sst [smem:[#allocation72_spill]] %s5668_s12 }
   0xe   :  { %17 = vsyncpa [#allocation5], 0 }
   0xf   :  { %19 = vsyncpa [#allocation5 + $0x1], 0 }
  0x10   :  { %20 = vsyncpa [#allocation8], 0 }
  0x11   :  { %22 = vsyncpa [#allocation8 + $0x1], 0 }
  0x12   :  { %23 = vsyncpa [#allocation11], 0 }
  0x13   :  { %25 = vsyncpa [#allocation11 + $0x1], 0 }
  0x14   :  { %26 = vsyncpa [#allocation14], 0 }
  0x15   :  { %27 = vsyncpa [#allocation17], 0 }
  0x16   :  { %28 = vsyncpa [#allocation20], 0 }
  0x17   :  { %30 = vsyncpa [#allocation20 + $0x1], 0 }
  0x18   :  { %31 = vsyncpa [#allocation23], 0 }
  0x19   :  { %32 = vsyncpa [#allocation6], 0 }
  0x1a   :  { %34 = vsyncpa [#allocation6 + $0x1], 0  ;;  %s4127_s21 = smov 0   ;;  %s4129_s22 = smov 0  }
  0x1b   :  { %s4131_s23 = smov 0   ;;  %s4133_s24 = smov 0  }
  0x1c   :  { %s4135_s25 = smov 0   ;;  %s4137_s26 = smov 0  }
  0x1d   :  { %s4139_s27 = smov 0   ;;  %s4141_s28 = smov 0  }
  0x1e   :  { %s4143_s29 = smov 0   ;;  %s4145_s30 = smov 0  }
  0x1f   :  { %s4147_s13 = smov 0   ;;  %s4149_s14 = smov 0  }
  0x20   :  { %s4151_s15 = smov 0   ;;  %s4153_s16 = smov 0  }
  0x21   :  { %s4155_s17 = smov 0   ;;  %s4157_s18 = smov 0  }
  0x22   :  { %s4159_s19 = smov 0  }
  0x23 LB: > { %5742 = sst [smem:[#allocation35_spill]] %s3978_s22  ;;  %s4213_s20 = sadd.s32 4294967295, %s4038_s19   ;;  %s4038_s19 = sphi %s4159_s19, %s40_s19   ;;  %s4034_s18 = sphi %s4157_s18, %s5889_s18   ;;  %s4030_s17 = sphi %s4155_s17, %s5877_s17   ;;  %s4026_s16 = sphi %s4153_s16, %s5888_s16   ;;  %s4022_s15 = sphi %s4151_s15, %s5887_s15   ;;  %s4018_s14 = sphi %s4149_s14, %s5886_s14   ;;  %s4014_s13 = sphi %s4147_s13, %s5874_s13   ;;  %s4010_s30 = sphi %s4145_s30, %s5885_s30   ;;  %s4006_s29 = sphi %s4143_s29, %s5872_s29   ;;  %s4002_s28 = sphi %s4141_s28, %s5871_s28   ;;  %s3998_s27 = sphi %s4139_s27, %s5870_s27   ;;  %s3994_s26 = sphi %s4137_s26, %s5884_s26   ;;  %s3990_s25 = sphi %s4135_s25, %s5883_s25   ;;  %s3986_s24 = sphi %s4133_s24, %s5882_s24   ;;  %s3982_s23 = sphi %s4131_s23, %s5881_s23   ;;  %s3978_s22 = sphi %s4129_s22, %s5879_s22   ;;  %s3974_s21 = sphi %s4127_s21, %s5866_s21  }
  0x24   : > { %5743 = sst [smem:[#allocation36_spill]] %s3986_s24  ;;  %p2826_p0 = scmp.ge.s32.totalorder %s4038_s19, 1 }
  0x25   : > { %5744 = sst [smem:[#allocation37_spill]] %s3990_s25  ;;  %p5678_p1 = scmp.eq.s32.totalorder %s4213_s20, 0 }
  0x26   : > { %5745 = sst [smem:[#allocation38_spill]] %s3994_s26  ;;  %p391_p2 = scmp.lt.s32.totalorder %s4038_s19, 5 }
  0x27   : > { %5746 = sst [smem:[#allocation39_spill]] %s3998_s27  ;;  %s4041_s4 = smov [#allocation16]  }
  0x28   : > { %5747 = sst [smem:[#allocation40_spill]] %s4002_s28  ;;  %p4218_p3 = pnand %p2826_p0, %p391_p2 }
  0x29   : > { %5748 = sst [smem:[#allocation41_spill]] %s4006_s29  ;;  %s425_s2 = sshll.u32 %s4041_s4, 4  ;;  %s4230_s2 = int_to_ptr.vmem [resolvable:$true] %s425_s2 }
  0x2a   : > { %5749 = sst [smem:[#allocation42_spill]] %s4010_s30  ;;  %p3201_p4 = pneg %p4218_p3 }
  0x2b   : > { %5750 = sst [smem:[#allocation43_spill]] %s4014_s13  ;;  %s4042_s25 = smov [#allocation21]  }
  0x2c   : > { %5751 = sst [smem:[#allocation44_spill]] %s4018_s14  ;;  %p4226_p5 = pnand %p3201_p4, %p5678_p1 }
  0x2d   : > { %5752 = sst [smem:[#allocation45_spill]] %s4022_s15  ;;  %s4232_s26 = sshll.u32 %s4042_s25, 4  ;;  %s450_s26 = int_to_ptr.vmem [resolvable:$true] %s4232_s26 }
  0x2e   : > { %5753 = sst [smem:[#allocation46_spill]] %s4026_s16  ;;  %s4040_s16 = smov [#allocation13]  }
  0x2f   : > { %5754 = sst [smem:[#allocation47_spill]] %s4030_s17  ;;  %s404_s15 = sshll.u32 %s4040_s16, 4  ;;  %s405_s15 = int_to_ptr.vmem [resolvable:$true] %s404_s15 }
  0x30   : > { %s5755_s12 = scalar_select %p4218_p3, 1, 0 }
  0x31   : > { %s5757_s24 = scalar_select %p4226_p5, 1, 0 }
  0x32   : > { %5756 = sst [smem:[#allocation48_spill]] %s5755_s12  ;;  %s5758_s5 = sld [smem:[#allocation65_spill]] }
  0x33   : > { %p4242_p7 = pneg %p4226_p5 }
  0x38   : > { %s3488_s16 = scalar_lea.hbm %s5758_s5, 16 }
  0x39   : > { %p3489_p6 = scmp.ne.s32.totalorder %s5758_s5, %s3488_s16  ;;  %p3495_p10 = scmp.lt.u32.totalorder %s3488_s16, %s5758_s5 }
  0x3b   : > { %p3491_p8 = pnand %p4242_p7, %p3489_p6 }
  0x3d   : > { %p3492_p9 = pneg %p3491_p8 }
  0x3f   : > { %p3497_p11 = pnand %p3495_p10, %p3492_p9 }
  0x41   : > { %3500 = shalt.err (!%p3497_p11)
}
  0x42   : > { %s3501_s0 = scalar_lea.vmem %s405_s15, 16  ;;  %s3508_s12 = scalar_lea.vmem %s405_s15, 32 }
  0x43   : > { %p3502_p12 = scmp.ne.s32.totalorder %s405_s15, %s3501_s0  ;;  %p3509_p2 = scmp.lt.s32.totalorder %s405_s15, %s405_s15 }
  0x44   : > { %p3510_p4 = scmp.lt.s32.totalorder %s3508_s12, %s3501_s0 }
  0x45   : > { %p3504_p13 = pnand %p3502_p12, %p4242_p7 }
  0x46   : > { %p3511_p1 = por %p3510_p4, %p3509_p2 }
  0x47   : > { %p3505_p0 = pneg %p3504_p13 }
  0x49   : > { %p3512_p3 = pnand %p3511_p1, %p3505_p0 }
  0x4b   : > { %3515 = shalt.err (!%p3512_p3)
}
  0x4c   : > { %3204 = dma.hbm_to_vmem [thread:$0]  (!%p4226_p5), %s5758_s5, 16, %s405_s15, [#allocation14]  }
  0x4d   : > { %s5760_s7 = sld [smem:[#allocation67_spill]] }
  0x53   : > { %s3516_s25 = scalar_lea.hbm %s5760_s7, 9216 }
  0x54   : > { %p3517_p6 = scmp.ne.s32.totalorder %s5760_s7, %s3516_s25  ;;  %p3523_p1 = scmp.lt.u32.totalorder %s3516_s25, %s5760_s7 }
  0x56   : > { %p3519_p8 = pnand %p3517_p6, %p4242_p7 }
  0x58   : > { %p3520_p9 = pneg %p3519_p8 }
  0x5a   : > { %p3525_p3 = pnand %p3523_p1, %p3520_p9 }
  0x5c   : > { %3528 = shalt.err (!%p3525_p3)
}
  0x5d   : > { %s3529_s15 = scalar_lea.vmem %s4230_s2, 9216  ;;  %p3537_p13 = scmp.lt.s32.totalorder %s4230_s2, %s4230_s2 }
  0x5e   : > { %p3530_p10 = scmp.ne.s32.totalorder %s4230_s2, %s3529_s15  ;;  %p3538_p0 = scmp.lt.s32.totalorder %s3529_s15, %s3529_s15 }
  0x60   : > { %p3532_p11 = pnand %p3530_p10, %p4242_p7  ;;  %p3539_p2 = por %p3538_p0, %p3537_p13 }
  0x62   : > { %p3533_p12 = pneg %p3532_p11 }
  0x64   : > { %p3540_p4 = pnand %p3539_p2, %p3533_p12 }
  0x66   : > { %3543 = shalt.err (!%p3540_p4)
}
  0x67   : > { %s5682_s8 = smov 128   ;;  %s5684_s11 = smov 8  }
  0x68   : > { %3210 = dma.hbm_to_vmem [thread:$0]  (!%p4226_p5), %s5760_s7, 9216, %s4230_s2, [#allocation17], %s5682_s8, %s5682_s8, %s5684_s11  }
  0x69   : > { %s5761_s10 = sld [smem:[#allocation70_spill]] }
  0x6f   : > { %s3544_s25 = scalar_lea.hbm %s5761_s10, 512 }
  0x70   : > { %p3545_p6 = scmp.ne.s32.totalorder %s5761_s10, %s3544_s25  ;;  %p3551_p1 = scmp.lt.u32.totalorder %s3544_s25, %s5761_s10 }
  0x72   : > { %p3547_p8 = pnand %p3545_p6, %p4242_p7 }
  0x74   : > { %p3548_p9 = pneg %p3547_p8 }
  0x76   : > { %p3553_p3 = pnand %p3551_p1, %p3548_p9 }
  0x78   : > { %3556 = shalt.err (!%p3553_p3)
}
  0x79   : > { %s3557_s30 = scalar_lea.vmem %s450_s26, 512  ;;  %p3565_p13 = scmp.lt.s32.totalorder %s450_s26, %s450_s26 }
  0x7a   : > { %p3558_p10 = scmp.ne.s32.totalorder %s450_s26, %s3557_s30  ;;  %p3566_p0 = scmp.lt.s32.totalorder %s3557_s30, %s3557_s30 }
  0x7c   : > { %p3560_p11 = pnand %p3558_p10, %p4242_p7  ;;  %p3567_p2 = por %p3566_p0, %p3565_p13 }
  0x7e   : > { %p3561_p12 = pneg %p3560_p11 }
  0x80   : > { %p3568_p4 = pnand %p3567_p2, %p3561_p12 }
  0x82   : > { %3571 = shalt.err (!%p3568_p4)
}
  0x83   : > { %3216 = dma.hbm_to_vmem [thread:$0]  (!%p4226_p5), %s5761_s10, 512, %s450_s26, [#allocation20], %s5682_s8, %s5682_s8, %s5684_s11  }
  0x84   : > { %s2819_s13 = sadd.s32 4294967294, %s4038_s19   ;;  %s49_s14 = sadd.s32 1, %s4030_s17 }
  0x85   : > { %s52_s16 = sadd.s32 1, %s4034_s18  ;;  %p50_p6 = scmp.ge.s32.totalorder %s49_s14, 2 }
  0x86   : > { %p5699_p8 = scmp.eq.s32.totalorder %s4038_s19, 0  ;;  %s97_s25 = sadd.s32 1, %s4006_s29 }
  0x87   : > { %p104_p9 = scmp.ne.s32.totalorder %s4006_s29, %s4002_s28  ;;  %s5891_s14 = smov (%p50_p6, %s49_s14), 0 }
  0x88   : > { %5762 = sst [smem:[#allocation49_spill]] %s5891_s14  ;;  %s5893_s16 = smov (!%p50_p6, %s52_s16), %s4034_s18 }
  0x89   : > { %s93_s0 = ssub.s32 %s4030_s17, %s5891_s14  ;;  %p4320_p1 = por %p104_p9, %p5699_p8 }
  0x8a   : > { %p54_p3 = scmp.ge.s32.totalorder %s5893_s16, 2  ;;  %p110_p10 = scmp.ne.s32.totalorder %s4002_s28, %s3998_s27 }
  0x8b   : > { %p378_p11 = scmp.eq.s32.totalorder %s4213_s20, 3  ;;  %p384_p12 = scmp.eq.s32.totalorder %s2819_s13, 3 }
  0x8c   : > { %s5895_s16 = smov (%p54_p3, %s5893_s16), 0  ;;  %p5765_p13 = scmp.eq.s32.totalorder %s4213_s20, 0 }
  0x8d   : > { %5764 = sst [smem:[#allocation50_spill]] %s5895_s16  ;;  %p4335_p2 = por %p378_p11, %p104_p9 }
  0x8e   : > { %p4331_p0 = por %p110_p10, %p5765_p13  ;;  %s4341_s30 = ssub.s32 %s4034_s18, %s5895_s16 }
  0x8f   : > { %s5768_s15 = scalar_select %p4335_p2, 1, 0 }
  0x90   : > { %s5766_s12 = scalar_select %p4331_p0, 1, 0 }
  0x91   : > { %5769 = sst [smem:[#allocation52_spill]] %s5768_s15  ;;  %p4343_p4 = por %p384_p12, %p110_p10 }
  0x92   : > { %5767 = sst [smem:[#allocation51_spill]] %s5766_s12  ;;  %s94_s5 = sor.u32 %s93_s0, %s4341_s30 }
  0x93   : > { %s5770_s2 = scalar_select %p4343_p4, 1, 0 }
  0x94   : > { %p5698_p6 = scmp.lt.s32.totalorder %s4038_s19, 4  ;;  %p95_p3 = scmp.eq.s32.totalorder %s94_s5, 0 }
  0x95   : > { %5771 = sst [smem:[#allocation53_spill]] %s5770_s2  ;;  %s4350_s13 = sshll.u32 %s4034_s18, 5 }
  0x96   : > { %5772 = sst [smem:[#allocation54_spill]] %s4350_s13  ;;  %s4353_s8 = sand.u32 1, %s4038_s19  }
  0x97   : > { %s503_s11 = sand.u32 1, %s4006_s29   ;;  %s2968_s16 = sshll.u32 %s4030_s17, 4 }
  0x98   : > { %s4357_s7 = scalar_select %p95_p3, %s4006_s29, %s97_s25  }
  0x99   : > { %s4359_s10 = sshll.u32 %s503_s11, 7  ;;  %s512_s27 = sadd.s32 %s2968_s16, %s4350_s13 }
  0x9a   : > { %5773 = sst [smem:[#allocation55_spill]] %s4357_s7  ;;  %s505_s2 = scalar_lea.vmem [#allocation7], %s4359_s10 }
  0x9b   : > { %s515_s15 = sshll.u32 %s505_s2, 4  ;;  %s2844_s12 = sshll.u32 %s512_s27, 7  ;;  %s4364_s15 = int_to_ptr.vmem [resolvable:$true] %s515_s15 }
  0x9c   : > { %s5774_s1 = sld [smem:[#allocation61_spill]]  ;;  %p4375_p9 = pnand %p5698_p6, %p4320_p1 }
  0x9d   : > { %s5777_s9 = sld [smem:[#allocation69_spill]]  ;;  %s5704_s2 = scalar_lea.sflag [#allocation8], %s4353_s8 }
  0x9e   : > { %s5775_s11 = scalar_select %p4375_p9, 1, 0 }
  0x9f   : > { %p5709_p11 = pneg %p4375_p9 }
  0xa0   : > { %5776 = sst [smem:[#allocation56_spill]] %s5775_s11 }
  0xa2   : > { %s4369_s28 = scalar_lea.hbm %s5774_s1, %s2844_s12  ;;  %s3577_s7 = scalar_lea.hbm %s5774_s1, 8192 }
  0xa3   : > { %s4382_s27 = scalar_lea.hbm %s5777_s9, %s2844_s12  ;;  %s3572_s0 = scalar_lea.hbm %s4369_s28, 2048 }
  0xa4   : > { %p3573_p10 = scmp.ne.s32.totalorder %s4369_s28, %s3572_s0  ;;  %p3578_p1 = scmp.lt.u32.totalorder %s4369_s28, %s5774_s1 }
  0xa5   : > { %p3579_p3 = scmp.lt.u32.totalorder %s3577_s7, %s3572_s0  ;;  %p3581_p8 = scmp.lt.u32.totalorder %s3572_s0, %s4369_s28 }
  0xa6   : > { %p3575_p12 = pnand %p5709_p11, %p3573_p10 }
  0xa7   : > { %p3580_p6 = por %p3579_p3, %p3578_p1 }
  0xa8   : > { %p3576_p13 = pneg %p3575_p12 }
  0xa9   : > { %p3582_p4 = por %p3581_p8, %p3580_p6 }
  0xab   : > { %p3583_p2 = pnand %p3582_p4, %p3576_p13 }
  0xad   : > { %3586 = shalt.err (!%p3583_p2)
}
  0xae   : > { %s3587_s12 = scalar_lea.vmem %s4364_s15, 2048  ;;  %s4045_s16 = smov [#allocation7]  }
  0xaf   : > { %p3588_p10 = scmp.ne.s32.totalorder %s4364_s15, %s3587_s12  ;;  %s3592_s25 = sshll.u32 %s4045_s16, 4  ;;  %s3593_s25 = int_to_ptr.vmem [resolvable:$false] %s3592_s25 }
  0xb0   : > { %s3594_s29 = scalar_lea.vmem %s3593_s25, 4096  ;;  %p3595_p5 = scmp.lt.s32.totalorder %s4364_s15, %s3593_s25 }
  0xb1   : > { %p3590_p12 = pnand %p3588_p10, %p5709_p11  ;;  %p3596_p1 = scmp.lt.s32.totalorder %s3594_s29, %s3587_s12 }
  0xb3   : > { %p3591_p0 = pneg %p3590_p12  ;;  %p3597_p3 = por %p3596_p1, %p3595_p5 }
  0xb5   : > { %p3598_p8 = pnand %p3597_p3, %p3591_p0 }
  0xb7   : > { %3601 = shalt.err (!%p3598_p8)
}
  0xb8   : > { %s5778_s7 = smov 8   ;;  %s5779_s13 = smov 128  }
  0xb9   : > { %3226 = dma.hbm_to_vmem [thread:$0]  (!%p4375_p9), %s4369_s28, 2048, %s4364_s15, %s5704_s2, %s5779_s13, %s5779_s13, %s5778_s7  }
  0xba   : > { %s590_s0 = scalar_lea.vmem [#allocation19], %s4359_s10  ;;  %p157_p5 = scmp.eq.s32.totalorder %s4341_s30, 0 }
  0xbb   : > { %s600_s26 = sshll.u32 %s590_s0, 4  ;;  %s159_s5 = sadd.s32 1, %s3982_s23  ;;  %s4423_s26 = int_to_ptr.vmem [resolvable:$true] %s600_s26 }
  0xbc   : > { %p166_p0 = scmp.ne.s32.totalorder %s3982_s23, %s3978_s22  ;;  %5781 = sst [smem:[#allocation58_spill]] %s4423_s26 }
  0xbd   : > { %s4421_s12 = scalar_select %p157_p5, %s3982_s23, %s159_s5  }
  0xbe   : > { %p172_p2 = scmp.ne.s32.totalorder %s3978_s22, %s3974_s21  ;;  %p5782_p4 = scmp.eq.s32.totalorder %s4038_s19, 0 }
  0xbf   : > { %5780 = sst [smem:[#allocation57_spill]] %s4421_s12  ;;  %s5705_s16 = sand.u32 1, %s3982_s23  }
  0xc0   : > { %p168_p6 = por %p166_p0, %p5782_p4  ;;  %p5783_p13 = scmp.eq.s32.totalorder %s4213_s20, 0 }
  0xc1   : > { %s5706_s10 = sshll.u32 %s4034_s18, 4  ;;  %s555_s28 = scalar_lea.vmem [#allocation10], %s5705_s16 }
  0xc2   : > { %p4432_p10 = por %p172_p2, %p5783_p13  ;;  %s562_s15 = sshll.u32 %s555_s28, 4  ;;  %s4446_s15 = int_to_ptr.vmem [resolvable:$true] %s562_s15 }
  0xc3   : > { %s5786_s3 = sld [smem:[#allocation63_spill]]  ;;  %p5787_p12 = scmp.lt.s32.totalorder %s4038_s19, 4 }
  0xc4   : > { %s5784_s25 = scalar_select %p4432_p10, 1, 0 }
  0xc5   : > { %p4450_p1 = pnand %p5787_p12, %p168_p6  ;;  %s4046_s28 = smov [#allocation15]  }
  0xc6   : > { %5785 = sst [smem:[#allocation59_spill]] %s5784_s25  ;;  %s4454_s2 = sshll.u32 %s4046_s28, 4  ;;  %s416_s2 = int_to_ptr.vmem [resolvable:$true] %s4454_s2 }
  0xc7   : > { %s5788_s21 = scalar_select %p4450_p1, 1, 0 }
  0xc8   : > { %s5714_s16 = scalar_lea.sflag [#allocation11], %s4353_s8  ;;  %p5713_p8 = pneg %p4450_p1 }
  0xc9   : > { %s4444_s5 = scalar_lea.hbm %s5786_s3, %s5706_s10  ;;  %s3607_s1 = scalar_lea.hbm %s5786_s3, 32 }
  0xca   : > { %s3602_s29 = scalar_lea.hbm %s4444_s5, 16  ;;  %p3608_p2 = scmp.lt.u32.totalorder %s4444_s5, %s5786_s3 }
  0xcb   : > { %p3603_p3 = scmp.ne.s32.totalorder %s4444_s5, %s3602_s29  ;;  %p3609_p4 = scmp.lt.u32.totalorder %s3607_s1, %s3602_s29 }
  0xcc   : > { %p3611_p13 = scmp.lt.u32.totalorder %s3602_s29, %s4444_s5 }
  0xcd   : > { %p3605_p5 = pnand %p5713_p8, %p3603_p3  ;;  %p3610_p6 = por %p3609_p4, %p3608_p2 }
  0xcf   : > { %p3606_p0 = pneg %p3605_p5  ;;  %p3612_p12 = por %p3611_p13, %p3610_p6 }
  0xd1   : > { %p3613_p11 = pnand %p3612_p12, %p3606_p0 }
  0xd3   : > { %3616 = shalt.err (!%p3613_p11)
}
  0xd4   : > { %s3617_s28 = scalar_lea.vmem %s4446_s15, 16  ;;  %s4047_s10 = smov [#allocation10]  }
  0xd5   : > { %p3618_p3 = scmp.ne.s32.totalorder %s4446_s15, %s3617_s28  ;;  %s3622_s0 = sshll.u32 %s4047_s10, 4  ;;  %s3623_s0 = int_to_ptr.vmem [resolvable:$false] %s3622_s0 }
  0xd6   : > { %s3624_s12 = scalar_lea.vmem %s3623_s0, 32  ;;  %p3625_p9 = scmp.lt.s32.totalorder %s4446_s15, %s3623_s0 }
  0xd7   : > { %p3620_p5 = pnand %p3618_p3, %p5713_p8  ;;  %p3626_p2 = scmp.lt.s32.totalorder %s3624_s12, %s3617_s28 }
  0xd9   : > { %p3621_p10 = pneg %p3620_p5  ;;  %p3627_p4 = por %p3626_p2, %p3625_p9 }
  0xdb   : > { %p3628_p6 = pnand %p3627_p4, %p3621_p10 }
  0xdd   : > { %3631 = shalt.err (!%p3628_p6)
}
  0xde   : > { %3232 = dma.hbm_to_vmem [thread:$0]  (!%p4450_p1), %s4444_s5, 16, %s4446_s15, %s5714_s16  }
  0xdf   : > { %s5789_s6 = sld [smem:[#allocation66_spill]] }
  0xe5   : > { %s3632_s29 = scalar_lea.hbm %s5789_s6, 16 }
  0xe6   : > { %p3633_p9 = scmp.ne.s32.totalorder %s5789_s6, %s3632_s29  ;;  %p3639_p0 = scmp.lt.u32.totalorder %s3632_s29, %s5789_s6 }
  0xe8   : > { %p3635_p11 = pnand %p3633_p9, %p4242_p7 }
  0xea   : > { %p3636_p10 = pneg %p3635_p11 }
  0xec   : > { %p3641_p13 = pnand %p3639_p0, %p3636_p10 }
  0xee   : > { %3644 = shalt.err (!%p3641_p13)
}
  0xef   : > { %s3645_s3 = scalar_lea.vmem %s416_s2, 16  ;;  %s3652_s15 = scalar_lea.vmem %s416_s2, 32 }
  0xf0   : > { %p3646_p12 = scmp.ne.s32.totalorder %s416_s2, %s3645_s3  ;;  %p3653_p2 = scmp.lt.s32.totalorder %s416_s2, %s416_s2 }
  0xf1   : > { %p3654_p4 = scmp.lt.s32.totalorder %s3652_s15, %s3645_s3 }
  0xf2   : > { %p3648_p3 = pnand %p3646_p12, %p4242_p7 }
  0xf3   : > { %p3655_p6 = por %p3654_p4, %p3653_p2 }
  0xf4   : > { %p3649_p5 = pneg %p3648_p3 }
  0xf6   : > { %p3656_p8 = pnand %p3655_p6, %p3649_p5 }
  0xf8   : > { %3659 = shalt.err (!%p3656_p8)
}
  0xf9   : > { %p5790_p9 = scmp.ne.s32.totalorder %s5757_s24, 0  ;;  %s4048_s25 = smov [#allocation18]  }
  0xfa   : > { %s439_s29 = sshll.u32 %s4048_s25, 4  ;;  %s4049_s10 = smov [#allocation22]   ;;  %s440_s29 = int_to_ptr.vmem [resolvable:$true] %s439_s29 }
  0xfb   : > { %3207 = dma.hbm_to_vmem [thread:$0]  (!%p5790_p9), %s5789_s6, 16, %s416_s2, [#allocation14]  }
  0xfc   : > { %s463_s0 = sshll.u32 %s4049_s10, 4  ;;  %s5791_s16 = sld [smem:[#allocation68_spill]]  ;;  %s464_s0 = int_to_ptr.vmem [resolvable:$true] %s463_s0 }
 0x102   : > { %s5792_s9 = smov %s5791_s16  ;;  %s3660_s22 = scalar_lea.hbm %s5791_s16, 16 }
 0x103   : > { %p3661_p8 = scmp.ne.s32.totalorder %s5792_s9, %s3660_s22  ;;  %p3667_p0 = scmp.lt.u32.totalorder %s3660_s22, %s5792_s9 }
 0x105   : > { %p3663_p11 = pnand %p3661_p8, %p4242_p7 }
 0x107   : > { %p3664_p10 = pneg %p3663_p11 }
 0x109   : > { %p3669_p13 = pnand %p3667_p0, %p3664_p10 }
 0x10b   : > { %3672 = shalt.err (!%p3669_p13)
}
 0x10c   : > { %s3673_s2 = scalar_lea.vmem %s440_s29, 16  ;;  %s3680_s16 = scalar_lea.vmem %s440_s29, 32 }
 0x10d   : > { %p3674_p12 = scmp.ne.s32.totalorder %s440_s29, %s3673_s2  ;;  %p3681_p2 = scmp.lt.s32.totalorder %s440_s29, %s440_s29 }
 0x10e   : > { %p3682_p4 = scmp.lt.s32.totalorder %s3680_s16, %s3673_s2 }
 0x10f   : > { %p3676_p3 = pnand %p3674_p12, %p4242_p7 }
 0x110   : > { %p3683_p6 = por %p3682_p4, %p3681_p2 }
 0x111   : > { %p3677_p5 = pneg %p3676_p3 }
 0x113   : > { %p3684_p1 = pnand %p3683_p6, %p3677_p5 }
 0x115   : > { %3687 = shalt.err (!%p3684_p1)
}
 0x116   : > { %3213 = dma.hbm_to_vmem [thread:$0]  (!%p5790_p9), %s5792_s9, 16, %s440_s29, [#allocation17]  }
 0x117   : > { %s5793_s10 = sld [smem:[#allocation71_spill]] }
 0x11d   : > { %s3688_s28 = scalar_lea.hbm %s5793_s10, 16 }
 0x11e   : > { %p3689_p8 = scmp.ne.s32.totalorder %s5793_s10, %s3688_s28  ;;  %p3695_p1 = scmp.lt.u32.totalorder %s3688_s28, %s5793_s10 }
 0x120   : > { %p3691_p11 = pnand %p3689_p8, %p4242_p7 }
 0x122   : > { %p3692_p10 = pneg %p3691_p11 }
 0x124   : > { %p3697_p0 = pnand %p3695_p1, %p3692_p10 }
 0x126   : > { %3700 = shalt.err (!%p3697_p0)
}
 0x127   : > { %s3701_s2 = scalar_lea.vmem %s464_s0, 16  ;;  %s3708_s29 = scalar_lea.vmem %s464_s0, 32 }
 0x128   : > { %p3702_p13 = scmp.ne.s32.totalorder %s464_s0, %s3701_s2  ;;  %p3709_p5 = scmp.lt.s32.totalorder %s464_s0, %s464_s0 }
 0x129   : > { %p3710_p2 = scmp.lt.s32.totalorder %s3708_s29, %s3701_s2 }
 0x12a   : > { %p3704_p12 = pnand %p3702_p13, %p4242_p7 }
 0x12b   : > { %p3711_p4 = por %p3710_p2, %p3709_p5 }
 0x12c   : > { %p3705_p3 = pneg %p3704_p12 }
 0x12e   : > { %p3712_p6 = pnand %p3711_p4, %p3705_p3 }
 0x130   : > { %3715 = shalt.err (!%p3712_p6)
}
 0x131   : > { %s5794_s25 = sld [smem:[#allocation44_spill]]  ;;  %s5795_s22 = sld [smem:[#allocation43_spill]] }
 0x132   : > { %s5796_s26 = sld [smem:[#allocation42_spill]]  ;;  %s2820_s4 = sshll.u32 %s4030_s17, 3 }
 0x133   : > { %3219 = dma.hbm_to_vmem [thread:$0]  (!%p5790_p9), %s5793_s10, 16, %s464_s0, [#allocation23]  }
 0x134   : > { %s2821_s28 = sadd.s32 4294967295, %s2820_s4  ;;  %s2822_s12 = sshll.u32 %s5891_s14, 3 }
 0x135   : > { %p58_p7 = scmp.gt.s32.totalorder %s2821_s28, 0  ;;  %s2823_s24 = sadd.s32 4294967295, %s2822_s12 }
 0x136   : > { %p62_p8 = scmp.gt.s32.totalorder %s2823_s24, 0  ;;  %s5797_s15 = sld [smem:[#allocation54_spill]] }
 0x137   : > { %s69_s3 = sadd.s32 1, %s5794_s25  ;;  %s5897_s28 = smov (!%p58_p7, %s2821_s28), 0 }
 0x138   : > { %s5899_s24 = smov (!%p62_p8, %s2823_s24), 0  ;;  %p76_p11 = scmp.ne.s32.totalorder %s5794_s25, %s5795_s22 }
 0x139   : > { %p82_p10 = scmp.ne.s32.totalorder %s5795_s22, %s5796_s26  ;;  %s65_s5 = ssub.s32 %s5897_s28, %s5899_s24 }
 0x13a   : > { %s4546_s2 = sadd.s32 8, %s2820_s4  ;;  %s66_s0 = sor.u32 %s65_s5, %s4341_s30 }
 0x13b   : > { %p5798_p9 = scmp.eq.s32.totalorder %s4038_s19, 0  ;;  %p67_p0 = scmp.eq.s32.totalorder %s66_s0, 0 }
 0x13c   : > { %p5800_p13 = scmp.eq.s32.totalorder %s4213_s20, 0  ;;  %s4562_s1 = sadd.s32 8, %s2822_s12 }
 0x13d   : > { %p4551_p1 = por %p5798_p9, %p76_p11  ;;  %s474_s26 = sand.u32 1, %s5794_s25  }
 0x13e   : > { %p4557_p12 = por %p5800_p13, %p82_p10  ;;  %s2834_s4 = sshll.u32 %s474_s26, 4 }
 0x13f   : > { %s4565_s22 = scalar_select %p67_p0, %s5794_s25, %s69_s3  }
 0x140   : > { %s5801_s16 = scalar_select %p4557_p12, 1, 0 }
 0x141   : > { %s2837_s24 = sshll.u32 %s5897_s28, 1  ;;  %s478_s6 = scalar_lea.vmem [#allocation4], %s2834_s4 }
 0x142   : > { %5802 = sst [smem:[#allocation42_spill]] %s5801_s16  ;;  %s488_s5 = sadd.s32 %s5797_s15, %s2837_s24 }
 0x143   : > { %s491_s9 = sshll.u32 %s478_s6, 4  ;;  %s2839_s10 = sshll.u32 %s488_s5, 7  ;;  %s4570_s9 = int_to_ptr.vmem [resolvable:$true] %s491_s9 }
 0x144   : > { %s5803_s17 = sld [smem:[#allocation60_spill]]  ;;  %p5805_p2 = scmp.lt.s32.totalorder %s4038_s19, 4 }
 0x145   : > { %s4585_s6 = scalar_lea.sflag [#allocation5], %s474_s26 }
 0x146   : > { %p4581_p4 = pnand %p5805_p2, %p4551_p1 }
 0x148   : > { %p3718_p7 = pneg %p4581_p4 }
 0x14a   : > { %s5804_s11 = smov %s5803_s17  ;;  %s4575_s16 = scalar_lea.hbm %s5803_s17, %s2839_s10 }
 0x14b   : > { %s3716_s28 = scalar_lea.hbm %s4575_s16, 256  ;;  %s3721_s10 = scalar_lea.hbm %s5804_s11, 8192 }
 0x14c   : > { %p3717_p6 = scmp.ne.s32.totalorder %s4575_s16, %s3716_s28  ;;  %p3722_p10 = scmp.lt.u32.totalorder %s4575_s16, %s5804_s11 }
 0x14d   : > { %p3723_p9 = scmp.lt.u32.totalorder %s3721_s10, %s3716_s28  ;;  %p3725_p0 = scmp.lt.u32.totalorder %s3716_s28, %s4575_s16 }
 0x14e   : > { %p3719_p8 = pnand %p3718_p7, %p3717_p6 }
 0x14f   : > { %p3724_p1 = por %p3723_p9, %p3722_p10 }
 0x150   : > { %p3720_p11 = pneg %p3719_p8 }
 0x151   : > { %p3726_p13 = por %p3725_p0, %p3724_p1 }
 0x153   : > { %p3727_p2 = pnand %p3726_p13, %p3720_p11 }
 0x155   : > { %3730 = shalt.err (!%p3727_p2)
}
 0x156   : > { %s3731_s29 = scalar_lea.vmem %s4570_s9, 256  ;;  %s4050_s26 = smov [#allocation4]  }
 0x157   : > { %p3732_p6 = scmp.ne.s32.totalorder %s4570_s9, %s3731_s29  ;;  %s3736_s4 = sshll.u32 %s4050_s26, 4  ;;  %s3737_s4 = int_to_ptr.vmem [resolvable:$false] %s3736_s4 }
 0x158   : > { %s3738_s24 = scalar_lea.vmem %s3737_s4, 512  ;;  %p3739_p3 = scmp.lt.s32.totalorder %s4570_s9, %s3737_s4 }
 0x159   : > { %p3734_p8 = pnand %p3732_p6, %p3718_p7  ;;  %p3740_p10 = scmp.lt.s32.totalorder %s3738_s24, %s3731_s29 }
 0x15b   : > { %p3735_p5 = pneg %p3734_p8  ;;  %p3741_p9 = por %p3740_p10, %p3739_p3 }
 0x15d   : > { %p3742_p1 = pnand %p3741_p9, %p3735_p5 }
 0x15f   : > { %3745 = shalt.err (!%p3742_p1)
}
 0x160   : > { %s5807_s5 = sld [smem:[#allocation38_spill]]  ;;  %s5808_s0 = sld [smem:[#allocation37_spill]] }
 0x161   : > { %s5809_s28 = sld [smem:[#allocation36_spill]]  ;;  %p5810_p3 = scmp.lt.s32.totalorder %s4546_s2, 15 }
 0x162   : > { %3223 = dma.hbm_to_vmem [thread:$0]  (!%p4581_p4), %s4575_s16, 256, %s4570_s9, %s4585_s6, %s5779_s13, %s5779_s13, %s5778_s7  }
 0x163   : > { %s5901_s2 = smov (!%p5810_p3, %s4546_s2), 15  ;;  %p5811_p5 = scmp.lt.s32.totalorder %s4562_s1, 15 }
 0x164   : > { %p5812_p0 = scmp.eq.s32.totalorder %s4038_s19, 0  ;;  %p5813_p6 = scmp.eq.s32.totalorder %s4213_s20, 0 }
 0x165   : > { %s5903_s1 = smov (!%p5811_p5, %s4562_s1), 15  ;;  %s2847_s16 = sshll.u32 %s5901_s2, 1 }
 0x166   : > { %s133_s25 = sadd.s32 1, %s5807_s5  ;;  %p140_p7 = scmp.ne.s32.totalorder %s5807_s5, %s5808_s0 }
 0x167   : > { %p146_p11 = scmp.ne.s32.totalorder %s5808_s0, %s5809_s28  ;;  %s129_s17 = ssub.s32 %s5901_s2, %s5903_s1 }
 0x168   : > { %s527_s14 = sand.u32 1, %s5807_s5   ;;  %s130_s10 = sor.u32 %s129_s17, %s4341_s30 }
 0x169   : > { %p142_p13 = por %p140_p7, %p5812_p0  ;;  %p131_p2 = scmp.eq.s32.totalorder %s130_s10, 0 }
 0x16a   : > { %p4633_p8 = por %p146_p11, %p5813_p6  ;;  %s2845_s9 = sshll.u32 %s527_s14, 4 }
 0x16b   : > { %s5905_s5 = smov (!%p131_p2, %s5807_s5), %s133_s25  ;;  %s539_s6 = sadd.s32 %s2847_s16, %s5797_s15 }
 0x16c   : > { %s5814_s12 = scalar_select %p4633_p8, 1, 0 }
 0x16d   : > { %s2849_s3 = sshll.u32 %s539_s6, 7  ;;  %s529_s29 = scalar_lea.vmem [#allocation9], %s2845_s9 }
 0x16e   : > { %s542_s1 = sshll.u32 %s529_s29, 4  ;;  %s5815_s30 = sld [smem:[#allocation62_spill]]  ;;  %s4646_s1 = int_to_ptr.vmem [resolvable:$true] %s542_s1 }
 0x16f   : > { %p5817_p4 = scmp.lt.s32.totalorder %s4038_s19, 4  ;;  %s5819_s15 = sand.u32 1, %s3982_s23  }
 0x170   : > { %s572_s28 = scalar_lea.vmem [#allocation12], %s5819_s15  ;;  %s5820_s17 = sshll.u32 %s4034_s18, 4 }
 0x171   : > { %p4650_p10 = pnand %p5817_p4, %p142_p13  ;;  %s579_s25 = sshll.u32 %s572_s28, 4  ;;  %s4663_s25 = int_to_ptr.vmem [resolvable:$true] %s579_s25 }
 0x172   : > { %s5821_s9 = sld [smem:[#allocation64_spill]] }
 0x173   : > { %p3748_p1 = pneg %p4650_p10 }
 0x174   : > { %s5816_s0 = smov %s5815_s30  ;;  %s4644_s24 = scalar_lea.hbm %s5815_s30, %s2849_s3 }
 0x175   : > { %s3746_s6 = scalar_lea.hbm %s4644_s24, 256  ;;  %s3751_s26 = scalar_lea.hbm %s5816_s0, 8192 }
 0x176   : > { %p3747_p9 = scmp.ne.s32.totalorder %s4644_s24, %s3746_s6  ;;  %p3752_p7 = scmp.lt.u32.totalorder %s4644_s24, %s5816_s0 }
 0x177   : > { %p3753_p11 = scmp.lt.u32.totalorder %s3751_s26, %s3746_s6  ;;  %p3755_p13 = scmp.lt.u32.totalorder %s3746_s6, %s4644_s24 }
 0x178   : > { %s4661_s16 = scalar_lea.hbm %s5821_s9, %s5820_s17  ;;  %p3749_p3 = pnand %p3748_p1, %p3747_p9 }
 0x179   : > { %p3754_p0 = por %p3753_p11, %p3752_p7 }
 0x17a   : > { %p3750_p5 = pneg %p3749_p3 }
 0x17b   : > { %p3756_p2 = por %p3755_p13, %p3754_p0 }
 0x17d   : > { %p3757_p6 = pnand %p3756_p2, %p3750_p5 }
 0x17f   : > { %3760 = shalt.err (!%p3757_p6)
}
 0x180   : > { %s3761_s15 = scalar_lea.vmem %s4646_s1, 256  ;;  %s4051_s28 = smov [#allocation9]  }
 0x181   : > { %p3762_p4 = scmp.ne.s32.totalorder %s4646_s1, %s3761_s15  ;;  %s3766_s17 = sshll.u32 %s4051_s28, 4  ;;  %s3767_s17 = int_to_ptr.vmem [resolvable:$false] %s3766_s17 }
 0x182   : > { %s3768_s14 = scalar_lea.vmem %s3767_s17, 512  ;;  %p3769_p8 = scmp.lt.s32.totalorder %s4646_s1, %s3767_s17 }
 0x183   : > { %p3764_p9 = pnand %p3762_p4, %p3748_p1  ;;  %p3770_p7 = scmp.lt.s32.totalorder %s3768_s14, %s3761_s15 }
 0x185   : > { %p3765_p3 = pneg %p3764_p9  ;;  %p3771_p11 = por %p3770_p7, %p3769_p8 }
 0x187   : > { %p3772_p0 = pnand %p3771_p11, %p3765_p3 }
 0x189   : > { %3775 = shalt.err (!%p3772_p0)
}
 0x18a   : > { %s5822_s10 = scalar_lea.sflag [#allocation8], %s4353_s8  ;;  %s3776_s6 = scalar_lea.hbm %s4661_s16, 16 }
 0x18b   : > { %3229 = dma.hbm_to_vmem [thread:$0]  (!%p4650_p10), %s4644_s24, 256, %s4646_s1, %s5822_s10, %s5779_s13, %s5779_s13, %s5778_s7  }
 0x18c   : > { %p3777_p1 = scmp.ne.s32.totalorder %s4661_s16, %s3776_s6  ;;  %p5823_p8 = scmp.ne.s32.totalorder %s5788_s21, 0 }
 0x18d   : > { %s3781_s29 = scalar_lea.hbm %s5821_s9, 32  ;;  %p3782_p6 = scmp.lt.u32.totalorder %s4661_s16, %s5821_s9 }
 0x18e   : > { %p5824_p5 = pneg %p5823_p8  ;;  %p3783_p4 = scmp.lt.u32.totalorder %s3781_s29, %s3776_s6 }
 0x18f   : > { %p3785_p3 = scmp.lt.u32.totalorder %s3776_s6, %s4661_s16 }
 0x190   : > { %p3779_p13 = pnand %p3777_p1, %p5824_p5  ;;  %p3784_p9 = por %p3783_p4, %p3782_p6 }
 0x192   : > { %p3780_p2 = pneg %p3779_p13  ;;  %p3786_p7 = por %p3785_p3, %p3784_p9 }
 0x194   : > { %p3787_p11 = pnand %p3786_p7, %p3780_p2 }
 0x196   : > { %3790 = shalt.err (!%p3787_p11)
}
 0x197   : > { %s3791_s1 = scalar_lea.vmem %s4663_s25, 16  ;;  %p5825_p0 = pmov %p5824_p5 }
 0x198   : > { %p3792_p10 = scmp.ne.s32.totalorder %s4663_s25, %s3791_s1  ;;  %s4052_s24 = smov [#allocation12]  }
 0x199   : > { %s3796_s30 = sshll.u32 %s4052_s24, 4  ;;  %s3797_s30 = int_to_ptr.vmem [resolvable:$false] %s3796_s30 }
 0x19a   : > { %p3794_p1 = pnand %p3792_p10, %p5825_p0  ;;  %s3798_s15 = scalar_lea.vmem %s3797_s30, 32 }
 0x19b   : > { %p3799_p13 = scmp.lt.s32.totalorder %s4663_s25, %s3797_s30  ;;  %p3800_p6 = scmp.lt.s32.totalorder %s3798_s15, %s3791_s1 }
 0x19c   : > { %p3795_p5 = pneg %p3794_p1 }
 0x19d   : > { %p3801_p4 = por %p3800_p6, %p3799_p13 }
 0x19f   : > { %p3802_p9 = pnand %p3801_p4, %p3795_p5 }
 0x1a1   : > { %3805 = shalt.err (!%p3802_p9)
}
 0x1a2   : > { %s5826_s28 = scalar_lea.sflag [#allocation11], %s4353_s8  ;;  %s5827_s17 = sld [smem:[#allocation56_spill]] }
 0x1a3   : > { %3235 = dma.hbm_to_vmem [thread:$0]  (!%p5823_p8), %s4661_s16, 16, %s4663_s25, %s5826_s28  }
 0x1a4   : > { %s587_s14 = scalar_lea.sflag [#allocation20], %s4353_s8  ;;  %s3806_s10 = scalar_lea.hbm %s4382_s27, 2048 }
 0x1a5   : > { %p3807_p2 = scmp.ne.s32.totalorder %s4382_s27, %s3806_s10  ;;  %s5830_s2 = sld [smem:[#allocation69_spill]] }
 0x1a6   : > { %p3815_p13 = scmp.lt.u32.totalorder %s3806_s10, %s4382_s27 }
 0x1a8   : > { %p5828_p3 = scmp.ne.s32.totalorder %s5827_s17, 0 }
 0x1aa   : > { %p5829_p7 = pneg %p5828_p3 }
 0x1ab   : > { %s3811_s3 = scalar_lea.hbm %s5830_s2, 8192  ;;  %p3812_p0 = scmp.lt.u32.totalorder %s4382_s27, %s5830_s2 }
 0x1ac   : > { %p3809_p11 = pnand %p3807_p2, %p5829_p7  ;;  %p3813_p1 = scmp.lt.u32.totalorder %s3811_s3, %s3806_s10 }
 0x1ae   : > { %p3810_p10 = pneg %p3809_p11  ;;  %p3814_p5 = por %p3813_p1, %p3812_p0 }
 0x1b0   : > { %p3816_p6 = por %p3815_p13, %p3814_p5 }
 0x1b2   : > { %p3817_p8 = pnand %p3816_p6, %p3810_p10 }
 0x1b4   : > { %3820 = shalt.err (!%p3817_p8)
}
 0x1b5   : > { %s5831_s25 = sld [smem:[#allocation58_spill]]  ;;  %p5832_p9 = pmov %p5829_p7 }
 0x1b6   : > { %s4053_s4 = smov [#allocation19]  }
 0x1b7   : > { %s3826_s1 = sshll.u32 %s4053_s4, 4  ;;  %s3827_s1 = int_to_ptr.vmem [resolvable:$false] %s3826_s1 }
 0x1b8   : > { %s3828_s24 = scalar_lea.vmem %s3827_s1, 4096 }
 0x1bb   : > { %s3821_s16 = scalar_lea.vmem %s5831_s25, 2048  ;;  %p3829_p11 = scmp.lt.s32.totalorder %s5831_s25, %s3827_s1 }
 0x1bc   : > { %p3822_p4 = scmp.ne.s32.totalorder %s5831_s25, %s3821_s16  ;;  %p3830_p0 = scmp.lt.s32.totalorder %s3828_s24, %s3821_s16 }
 0x1be   : > { %p3824_p2 = pnand %p3822_p4, %p5832_p9  ;;  %p3831_p1 = por %p3830_p0, %p3829_p11 }
 0x1c0   : > { %p3825_p7 = pneg %p3824_p2 }
 0x1c2   : > { %p3832_p5 = pnand %p3831_p1, %p3825_p7 }
 0x1c4   : > { %3835 = shalt.err (!%p3832_p5)
}
 0x1c5   : > { %3238 = dma.hbm_to_vmem [thread:$0]  (!%p5828_p3), %s4382_s27, 2048, %s5831_s25, %s587_s14, %s5779_s13, %s5779_s13, %s5778_s7  }
 0x1c6   : > { %s5833_s30 = sld [smem:[#allocation48_spill]] }
 0x1cc   : > { %p5834_p10 = scmp.ne.s32.totalorder %s5833_s30, 0 }
 0x1cd   : > { %s5835_s15 = sld [smem:[#allocation43_spill]] (!%p5834_p10) }
 0x1ce   : > { %612 = sbr.rel (%p5834_p10) target bundleno = 1296 (0x510), region = 68 }
 0x1d3   : > { %s614_s10 = sand.u32 (!%p5834_p10), 1, %s5835_s15  }
 0x1d4   : > { %s4752_s6 = sshll.u32 (!%p5834_p10), %s614_s10, 4  ;;  %s615_s21 = scalar_lea.sflag (!%p5834_p10), [#allocation5], %s614_s10 }
 0x1d5   : > { %s618_s2 = scalar_lea.vmem [#allocation4], %s4752_s6 }
 0x1d6   : > { %3933 = dma.done.wait (%p4557_p12), %s615_s21, 256  }
 0x1d7   : > { %3935 = vsyncadd (%p4557_p12), %s615_s21, 4294967040  ;;  %s5837_s8 = sld [smem:[#allocation40_spill]]  ;;  %s5838_s27 = sld [smem:[#allocation51_spill]] }
 0x1d8   : > { %s623_s7 = sand.u32 1, %s4213_s20  }
 0x1d9   : > { %s624_s14 = scalar_lea.sflag [#allocation8], %s623_s7 }
 0x1dd   : > { %s625_s13 = sand.u32 1, %s5837_s8   ;;  %p5839_p3 = scmp.ne.s32.totalorder %s5838_s27, 0 }
 0x1de   : > { %s4763_s17 = sshll.u32 %s625_s13, 7 }
 0x1df   : > { %s4766_s3 = scalar_lea.vmem [#allocation7], %s4763_s17 }
 0x1e0   : > { %3937 = dma.done.wait (%p5839_p3), %s624_s14, 2048  }
 0x1e1   : > { %3939 = vsyncadd (%p5839_p3), %s624_s14, 4294965248  ;;  %s5840_s29 = sld [smem:[#allocation37_spill]]  ;;  %p5841_p12 = scmp.ne.s32.totalorder %s5814_s12, 0 }
 0x1e7   : > { %s634_s26 = sand.u32 1, %s5840_s29  }
 0x1e8   : > { %s4773_s25 = sshll.u32 %s634_s26, 4 }
 0x1e9   : > { %s636_s16 = scalar_lea.vmem [#allocation9], %s4773_s25 }
 0x1ea   : > { %3941 = dma.done.wait (%p5841_p12), %s624_s14, 256  }
 0x1eb   : > { %3943 = vsyncadd (%p5841_p12), %s624_s14, 4294967040  ;;  %s5842_s4 = sld [smem:[#allocation35_spill]]  ;;  %s642_s30 = scalar_lea.sflag [#allocation11], %s623_s7 }
 0x1ec   : > { %s5843_s1 = sld [smem:[#allocation59_spill]] }
 0x1f1   : > { %s643_s24 = sand.u32 1, %s5842_s4  }
 0x1f2   : > { %s4781_s15 = scalar_lea.vmem [#allocation10], %s643_s24  ;;  %p5844_p13 = scmp.ne.s32.totalorder %s5843_s1, 0 }
 0x1f4   : > { %3945 = dma.done.wait (%p5844_p13), %s642_s30, 32  }
 0x1f5   : > { %3947 = vsyncadd (%p5844_p13), %s642_s30, 4294967264  ;;  %s4787_s28 = scalar_lea.vmem [#allocation12], %s643_s24  ;;  %p5845_p6 = scmp.eq.s32.totalorder %s4213_s20, 0 }
 0x1f7   : > { %3949 = dma.done.wait (%p5845_p6), [#allocation14], 32   ;;  %p5846_p8 = pmov %p5845_p6 }
 0x1f8   : > { %p5847_p4 = pmov %p5845_p6 }
 0x1f9   : > { %3951 = vsyncadd (%p5846_p8), [#allocation14], 4294967264 }
 0x1fa   : > { %3953 = dma.done.wait (%p5847_p4), [#allocation17], 9232   ;;  %p5848_p9 = pmov %p5847_p4 }
 0x1fb   : > { %s674_s12 = scalar_lea.sflag [#allocation20], %s623_s7  ;;  %s4798_s10 = scalar_lea.vmem [#allocation19], %s4763_s17 }
 0x1fc   : > { %3955 = vsyncadd (%p5848_p9), [#allocation17], 4294958064 }
 0x1fd   : > { %3957 = dma.done.wait (%p5839_p3), %s674_s12, 2048  }
 0x1fe   : > { %3959 = vsyncadd (%p5839_p3), %s674_s12, 4294965248  ;;  %p5849_p2 = pmov %p5847_p4 }
 0x200   : > { %3961 = dma.done.wait (%p5849_p2), [#allocation20], 512   ;;  %p5850_p7 = pmov %p5849_p2 }
 0x201   : > { %p5851_p11 = pmov %p5849_p2 }
 0x202   : > { %3963 = vsyncadd (%p5850_p7), [#allocation20], 4294966784 }
 0x203   : > { %3965 = dma.done.wait (%p5851_p11), [#allocation23], 16   ;;  %p5852_p0 = pmov %p5849_p2 }
 0x204   : > { %vm765_vm0 = vcmask 523264   ;;  %v4054_v0 = vmov 0.0   ;;  %v4873_v1 = vld [vmem:[%s4781_s15] ss:$0 sm:$0xff]  ;;  %v4878_v3 = vld [vmem:[#allocation13] ss:$0 sm:$0xff] }
 0x205   : > { %3967 = vsyncadd (%p5852_p0), [#allocation23], 4294967280  ;;  %764 = vst [vmem:[#allocation2] sm:$0xff] %v4054_v0  ;;  %v4876_v2 = vld [vmem:[%s4787_s28] ss:$0 sm:$0xff]  ;;  %v807_v4 = vld [vmem:[%s4766_s3 + $0x10] sm:$0xff] }
 0x206   : > { %766 = vst.msk [vmem:[#allocation2 + $0x8] sm:$0xff] %vm765_vm0, %v4054_v0  ;;  %767 = vst [vmem:[#allocation2 + $0x10] sm:$0xff] %v4054_v0  ;;  %v805_v5 = vld [vmem:[%s4766_s3] sm:$0xff]  ;;  %v829_v6 = vsub.f32 %v807_v4, %v4873_v1  ;;  %v808_v8 = vld [vmem:[%s4766_s3 + $0x18] sm:$0xff]  ;;  %vm1161_vm1 = vcmask 1046528   ;;  %vm1203_vm2 = vcmask 522240  }
 0x207   : > { %768 = vst.msk [vmem:[#allocation2 + $0x18] sm:$0xff] %vm765_vm0, %v4054_v0  ;;  %801 = vst [vmem:[#allocation2 + $0x120] sm:$0xff] %v4054_v0  ;;  %v827_v7 = vsub.f32 %v805_v5, %v4873_v1  ;;  %v806_v9 = vld [vmem:[%s4766_s3 + $0x8] sm:$0xff]  ;;  %v830_v11 = vsub.f32 %v808_v8, %v4873_v1  ;;  %v809_v14 = vld [vmem:[%s4766_s3 + $0x20] sm:$0xff]  ;;  %vm1079_vm3 = vcmask 523265   ;;  %s4055_s20 = smov 64  }
 0x208   : > { %802 = vst.msk [vmem:[#allocation2 + $0x128] sm:$0xff] %vm765_vm0, %v4054_v0  ;;  %803 = vst [vmem:[#allocation2 + $0x130] sm:$0xff] %v4054_v0  ;;  %v810_v10 = vld [vmem:[%s4766_s3 + $0x28] sm:$0xff]  ;;  %v828_v12 = vsub.f32 %v806_v9, %v4873_v1  ;;  %v812_v15 = vld [vmem:[%s4766_s3 + $0x38] sm:$0xff]  ;;  %v851_v17 = vmul.f32 %v4876_v2, %v829_v6  ;;  %v831_v19 = vsub.f32 %v809_v14, %v4873_v1  ;;  %vm1037_vm4 = vcmask 1040384   ;;  %s5112_s21 = scalar_lea.vmem [#allocation24], %s4763_s17 }
 0x209   : > { %804 = vst.msk [vmem:[#allocation2 + $0x138] sm:$0xff] %vm765_vm0, %v4054_v0  ;;  %769 = vst [vmem:[#allocation2 + $0x20] sm:$0xff] %v4054_v0  ;;  %v832_v13 = vsub.f32 %v810_v10, %v4873_v1  ;;  %v811_v16 = vld [vmem:[%s4766_s3 + $0x30] sm:$0xff]  ;;  %v849_v18 = vmul.f32 %v4876_v2, %v827_v7  ;;  %v834_v20 = vsub.f32 %v812_v15, %v4873_v1  ;;  %v4897_v21 = vld [vmem:[#allocation15] ss:$0 sm:$0xff]  ;;  %vm1144_vm5 = vcmask 1048064  }
 0x20a   : > { %770 = vst.msk [vmem:[#allocation2 + $0x28] sm:$0xff] %vm765_vm0, %v4054_v0  ;;  %771 = vst [vmem:[#allocation2 + $0x30] sm:$0xff] %v4054_v0  ;;  %v852_v22 = vmul.f32 %v4876_v2, %v830_v11  ;;  %v850_v23 = vmul.f32 %v4876_v2, %v828_v12  ;;  %v833_v25 = vsub.f32 %v811_v16, %v4873_v1  ;;  %v814_v42 = vld [vmem:[%s4766_s3 + $0x48] sm:$0xff]  ;;  %v813_v47 = vld [vmem:[%s4766_s3 + $0x40] sm:$0xff]  ;;  %s5853_s8 = sld [smem:[#allocation45_spill]] }
 0x20b   : > { %772 = vst.msk [vmem:[#allocation2 + $0x38] sm:$0xff] %vm765_vm0, %v4054_v0  ;;  %773 = vst [vmem:[#allocation2 + $0x40] sm:$0xff] %v4054_v0  ;;  %v854_v24 = vmul.f32 %v4876_v2, %v832_v13  ;;  %v873_v26 = vmul.f32 %v4878_v3, %v851_v17  ;;  %v871_v27 = vmul.f32 %v4878_v3, %v849_v18  ;;  %v816_v48 = vld [vmem:[%s4766_s3 + $0x58] sm:$0xff]  ;;  %v815_v52 = vld [vmem:[%s4766_s3 + $0x50] sm:$0xff] }
 0x20c   : > { %774 = vst.msk [vmem:[#allocation2 + $0x48] sm:$0xff] %vm765_vm0, %v4054_v0  ;;  %775 = vst [vmem:[#allocation2 + $0x50] sm:$0xff] %v4054_v0  ;;  %v853_v28 = vmul.f32 %v4876_v2, %v831_v19  ;;  %v856_v29 = vmul.f32 %v4876_v2, %v834_v20  ;;  %v874_v30 = vmul.f32 %v4878_v3, %v852_v22  ;;  %v818_v53 = vld [vmem:[%s4766_s3 + $0x68] sm:$0xff]  ;;  %v817_v6 = vld [vmem:[%s4766_s3 + $0x60] sm:$0xff] }
 0x20d   : > { %776 = vst.msk [vmem:[#allocation2 + $0x58] sm:$0xff] %vm765_vm0, %v4054_v0  ;;  %777 = vst [vmem:[#allocation2 + $0x60] sm:$0xff] %v4054_v0  ;;  %v872_v31 = vmul.f32 %v4878_v3, %v850_v23  ;;  %v876_v32 = vmul.f32 %v4878_v3, %v854_v24  ;;  %v855_v33 = vmul.f32 %v4876_v2, %v833_v25  ;;  %v820_v11 = vld [vmem:[%s4766_s3 + $0x78] sm:$0xff]  ;;  %v819_v15 = vld [vmem:[%s4766_s3 + $0x70] sm:$0xff] }
 0x20e   : > { %778 = vst.msk [vmem:[#allocation2 + $0x68] sm:$0xff] %vm765_vm0, %v4054_v0  ;;  %779 = vst [vmem:[#allocation2 + $0x70] sm:$0xff] %v4054_v0  ;;  %v4912_v34 = vadd.f32 %v4897_v21, %v873_v26  ;;  %v4915_v35 = vadd.f32 %v4897_v21, %v871_v27  ;;  %v875_v36 = vmul.f32 %v4878_v3, %v853_v28 }
 0x20f   : > { %780 = vst.msk [vmem:[#allocation2 + $0x78] sm:$0xff] %vm765_vm0, %v4054_v0  ;;  %781 = vst [vmem:[#allocation2 + $0x80] sm:$0xff] %v4054_v0  ;;  %v878_v37 = vmul.f32 %v4878_v3, %v856_v29  ;;  %v4920_v38 = vadd.f32 %v4897_v21, %v874_v30  ;;  %v4923_v39 = vadd.f32 %v4897_v21, %v872_v31 }
 0x210   : > { %782 = vst.msk [vmem:[#allocation2 + $0x88] sm:$0xff] %vm765_vm0, %v4054_v0  ;;  %783 = vst [vmem:[#allocation2 + $0x90] sm:$0xff] %v4054_v0  ;;  %v4926_v40 = vadd.f32 %v4897_v21, %v876_v32  ;;  %v877_v41 = vmul.f32 %v4878_v3, %v855_v33  ;;  %v2875_v43 = vmul.f32 -1.442695, %v4912_v34  ;;  %v2873_v44 = vmul.f32 -1.442695, %v4915_v35 }
 0x211   : > { %784 = vst.msk [vmem:[#allocation2 + $0x98] sm:$0xff] %vm765_vm0, %v4054_v0  ;;  %785 = vst [vmem:[#allocation2 + $0xa0] sm:$0xff] %v4054_v0  ;;  %v4933_v45 = vadd.f32 %v4897_v21, %v875_v36  ;;  %v4936_v46 = vadd.f32 %v4897_v21, %v878_v37  ;;  %v2876_v49 = vmul.f32 -1.442695, %v4920_v38  ;;  %v2874_v50 = vmul.f32 -1.442695, %v4923_v39 }
 0x212   : > { %786 = vst.msk [vmem:[#allocation2 + $0xa8] sm:$0xff] %vm765_vm0, %v4054_v0  ;;  %787 = vst [vmem:[#allocation2 + $0xb0] sm:$0xff] %v4054_v0  ;;  %v4943_v51 = vadd.f32 %v4897_v21, %v877_v41  ;;  %3408 = vpow2.f32 %v2875_v43  ;;  %v2878_v54 = vmul.f32 -1.442695, %v4926_v40  ;;  %v836_v56 = vsub.f32 %v814_v42, %v4873_v1  ;;  %p2889_p1 = scmp.le.s32.totalorder %s5853_s8, 0 }
 0x213   : > { %788 = vst.msk [vmem:[#allocation2 + $0xb8] sm:$0xff] %vm765_vm0, %v4054_v0  ;;  %789 = vst [vmem:[#allocation2 + $0xc0] sm:$0xff] %v4054_v0  ;;  %v2877_v55 = vmul.f32 -1.442695, %v4933_v45  ;;  %3410 = vpow2.f32 %v2873_v44  ;;  %v2880_v57 = vmul.f32 -1.442695, %v4936_v46  ;;  %v835_v58 = vsub.f32 %v813_v47, %v4873_v1 }
 0x214   : > { %790 = vst.msk [vmem:[#allocation2 + $0xc8] sm:$0xff] %vm765_vm0, %v4054_v0  ;;  %791 = vst [vmem:[#allocation2 + $0xd0] sm:$0xff] %v4054_v0  ;;  %v838_v59 = vsub.f32 %v816_v48, %v4873_v1  ;;  %3412 = vpow2.f32 %v2876_v49  ;;  %v858_v60 = vmul.f32 %v4876_v2, %v836_v56  ;;  %v837_v61 = vsub.f32 %v815_v52, %v4873_v1  ;;  %s4056_s6 = smov (!%p2889_p1), 64  }
 0x215   : > { %792 = vst.msk [vmem:[#allocation2 + $0xd8] sm:$0xff] %vm765_vm0, %v4054_v0  ;;  %793 = vst [vmem:[#allocation2 + $0xe0] sm:$0xff] %v4054_v0  ;;  %v840_v62 = vsub.f32 %v818_v53, %v4873_v1  ;;  %3414 = vpow2.f32 %v2874_v50  ;;  %v2879_v63 = vmul.f32 -1.442695, %v4943_v51  ;;  %v857_v4 = vmul.f32 %v4876_v2, %v835_v58 }
 0x216   : > { %794 = vst.msk [vmem:[#allocation2 + $0xe8] sm:$0xff] %vm765_vm0, %v4054_v0  ;;  %795 = vst [vmem:[#allocation2 + $0xf0] sm:$0xff] %v4054_v0  ;;  %v860_v5 = vmul.f32 %v4876_v2, %v838_v59  ;;  %3416 = vpow2.f32 %v2878_v54  ;;  %v880_v7 = vmul.f32 %v4878_v3, %v858_v60  ;;  %v859_v10 = vmul.f32 %v4876_v2, %v837_v61 }
 0x217   : > { %796 = vst.msk [vmem:[#allocation2 + $0xf8] sm:$0xff] %vm765_vm0, %v4054_v0  ;;  %797 = vst [vmem:[#allocation2 + $0x100] sm:$0xff] %v4054_v0  ;;  %3418 = vpow2.f32 %v2877_v55  ;;  %v879_v8 = vmul.f32 %v4878_v3, %v857_v4  ;;  %v862_v13 = vmul.f32 %v4876_v2, %v840_v62  ;;  %v839_v14 = vsub.f32 %v817_v6, %v4873_v1 }
 0x218   : > { %798 = vst.msk [vmem:[#allocation2 + $0x108] sm:$0xff] %vm765_vm0, %v4054_v0  ;;  %799 = vst [vmem:[#allocation2 + $0x110] sm:$0xff] %v4054_v0  ;;  %v882_v9 = vmul.f32 %v4878_v3, %v860_v5  ;;  %3420 = vpow2.f32 %v2880_v57  ;;  %v4966_v12 = vadd.f32 %v4897_v21, %v880_v7  ;;  %v842_v19 = vsub.f32 %v820_v11, %v4873_v1 }
 0x219   : > { %800 = vst.msk [vmem:[#allocation2 + $0x118] sm:$0xff] %vm765_vm0, %v4054_v0  ;;  %3422 = vpow2.f32 %v2879_v63  ;;  %v4972_v16 = vadd.f32 %v4897_v21, %v879_v8  ;;  %v881_v23 = vmul.f32 %v4878_v3, %v859_v10  ;;  %v841_v24 = vsub.f32 %v819_v15, %v4873_v1 }
 0x21a   : > { %v4975_v17 = vadd.f32 %v4897_v21, %v882_v9  ;;  %v2882_v18 = vmul.f32 -1.442695, %v4966_v12  ;;  %v884_v26 = vmul.f32 %v4878_v3, %v862_v13  ;;  %v861_v27 = vmul.f32 %v4876_v2, %v839_v14 }
 0x21b   : > { %v2881_v20 = vmul.f32 -1.442695, %v4972_v16  ;;  %v864_v30 = vmul.f32 %v4876_v2, %v842_v19  ;;  %v863_v33 = vmul.f32 %v4876_v2, %v841_v24  ;;  %v4988_v41 = vadd.f32 %v4897_v21, %v881_v23 }
 0x21c   : > { %v2884_v22 = vmul.f32 -1.442695, %v4975_v17  ;;  %v3409_v25 = vpop.eup %3408  ;;  %3424 = vpow2.f32 %v2882_v18  ;;  %v4991_v44 = vadd.f32 %v4897_v21, %v884_v26  ;;  %v883_v47 = vmul.f32 %v4878_v3, %v861_v27 }
 0x21d   : > { %v3411_v28 = vpop.eup %3410  ;;  %v959_v29 = vadd.f32 1.0, %v3409_v25  ;;  %3426 = vpow2.f32 %v2881_v20  ;;  %v886_v50 = vmul.f32 %v4878_v3, %v864_v30  ;;  %v885_v54 = vmul.f32 %v4878_v3, %v863_v33 }
 0x21e   : > { %v3413_v31 = vpop.eup %3412  ;;  %v957_v32 = vadd.f32 1.0, %v3411_v28  ;;  %3428 = vpow2.f32 %v2884_v22  ;;  %v2883_v57 = vmul.f32 -1.442695, %v4988_v41  ;;  %v2886_v59 = vmul.f32 -1.442695, %v4991_v44 }
 0x21f   : > { %v3415_v36 = vpop.eup %3414  ;;  %3430 = vrcp.f32 %v959_v29  ;;  %v960_v37 = vadd.f32 1.0, %v3413_v31  ;;  %v4999_v60 = vadd.f32 %v4897_v21, %v883_v47  ;;  %v5002_v61 = vadd.f32 %v4897_v21, %v886_v50 }
 0x220   : > { %v3417_v42 = vpop.eup %3416  ;;  %3432 = vrcp.f32 %v957_v32  ;;  %v958_v43 = vadd.f32 1.0, %v3415_v36  ;;  %v5005_v63 = vadd.f32 %v4897_v21, %v885_v54 }
 0x221   : > { %v3419_v48 = vpop.eup %3418  ;;  %3434 = vrcp.f32 %v960_v37  ;;  %v962_v49 = vadd.f32 1.0, %v3417_v42  ;;  %v2885_v8 = vmul.f32 -1.442695, %v4999_v60  ;;  %v2888_v11 = vmul.f32 -1.442695, %v5002_v61 }
 0x222   : > { %v3421_v52 = vpop.eup %3420  ;;  %3436 = vrcp.f32 %v958_v43  ;;  %v961_v53 = vadd.f32 1.0, %v3419_v48  ;;  %v2887_v15 = vmul.f32 -1.442695, %v5005_v63 }
 0x223   : > { %v3423_v55 = vpop.eup %3422  ;;  %3438 = vrcp.f32 %v962_v49  ;;  %v964_v56 = vadd.f32 1.0, %v3421_v52 }
 0x224   : > { %3440 = vrcp.f32 %v961_v53  ;;  %v963_v58 = vadd.f32 1.0, %v3423_v55 }
 0x225   : > { %3442 = vrcp.f32 %v964_v56 }
 0x226   : > { %v3425_v62 = vpop.eup %3424  ;;  %3444 = vrcp.f32 %v963_v58 }
 0x227   : > { %v3427_v4 = vpop.eup %3426  ;;  %v966_v5 = vadd.f32 1.0, %v3425_v62  ;;  %3446 = vpow2.f32 %v2883_v57 }
 0x228   : > { %v3429_v6 = vpop.eup %3428  ;;  %v965_v7 = vadd.f32 1.0, %v3427_v4  ;;  %3448 = vpow2.f32 %v2886_v59 }
 0x229   : > { %v3431_v9 = vpop.eup %3430  ;;  %3450 = vrcp.f32 %v966_v5  ;;  %v968_v10 = vadd.f32 1.0, %v3429_v6 }
 0x22a   : > { %v3433_v13 = vpop.eup %3432  ;;  %v1007_v14 = vmul.f32 %v3431_v9, %v4912_v34  ;;  %3452 = vrcp.f32 %v965_v7 }
 0x22b   : > { %v3435_v18 = vpop.eup %3434  ;;  %v5012_v19 = vmul.f32 %v3433_v13, %v4915_v35  ;;  %3454 = vrcp.f32 %v968_v10 }
 0x22c   : > { %v3437_v20 = vpop.eup %3436  ;;  %1100 = vrot.lane.b32.xlu1 %v1007_v14, %s4055_s20  ;;  %v1041_v22 = vrot.slane %v1007_v14, 7  ;;  %v1165_v23 = vrot.slane %v1007_v14, 1  ;;  %v1008_v24 = vmul.f32 %v3435_v18, %v4920_v38  ;;  %3456 = vpow2.f32 %v2885_v8 }
 0x22d   : > { %v3439_v34 = vpop.eup %3438  ;;  %1096 = vrot.lane.b32.xlu0 %v5012_v19, %s4055_s20  ;;  %v1038_v25 = vrot.slane %v5012_v19, 7  ;;  %v1162_v35 = vrot.slane %v5012_v19, 1  ;;  %v1006_v26 = vmul.f32 %v3437_v20, %v4923_v39  ;;  %3458 = vpow2.f32 %v2888_v11 }
 0x22e   : > { %v3441_v27 = vpop.eup %3440  ;;  %v1042_v28 = vrot.slane %v1008_v24, 7  ;;  %v1166_v29 = vrot.slane %v1008_v24, 1  ;;  %v1010_v30 = vmul.f32 %v3439_v34, %v4926_v40  ;;  %3460 = vpow2.f32 %v2887_v15  ;;  %1082 = vst.msk [vmem:[#allocation2 + $0x40] sm:$0xfe] %vm1079_vm3, %v1041_v22 }
 0x22f   : > { %v3443_v38 = vpop.eup %3442  ;;  %v1039_v31 = vrot.slane %v1006_v26, 7  ;;  %v1163_v32 = vrot.slane %v1006_v26, 1  ;;  %v1009_v33 = vmul.f32 %v3441_v27, %v4933_v45  ;;  %1080 = vst.msk [vmem:[#allocation2 + $0x20] sm:$0xfe] %vm1079_vm3, %v1038_v25 }
 0x230   : > { %v3445_v36 = vpop.eup %3444  ;;  %1206 = vst.msk [vmem:[#allocation2 + $0x58] sm:$0x7f] %vm1203_vm2, %v1166_v29  ;;  %1102 = vrot.lane.b32.xlu1 %v1008_v24, %s4055_s20  ;;  %v1167_v39 = vsel %vm1161_vm1, %v1165_v23, %v1166_v29  ;;  %v1045_v37 = vrot.slane %v1010_v30, 7  ;;  %v1169_v40 = vrot.slane %v1010_v30, 1  ;;  %v1012_v42 = vmul.f32 %v3443_v38, %v4936_v46 }
 0x231   : > { %v3447_v43 = vpop.eup %3446  ;;  %1205 = vst.msk [vmem:[#allocation2 + $0x48] sm:$0xff] %vm765_vm0, %v1167_v39  ;;  %1098 = vrot.lane.b32.xlu0 %v1006_v26, %s4055_s20  ;;  %v1164_v45 = vsel %vm1161_vm1, %v1162_v35, %v1163_v32  ;;  %v1044_v47 = vrot.slane %v1009_v33, 7  ;;  %v1168_v48 = vrot.slane %v1009_v33, 1  ;;  %v1011_v49 = vmul.f32 %v3445_v36, %v4943_v51 }
 0x232   : > { %1204 = vst.msk [vmem:[#allocation2 + $0x38] sm:$0x7f] %vm1203_vm2, %v1163_v32  ;;  %v3449_v50 = vpop.eup %3448  ;;  %1208 = vst.msk [vmem:[#allocation2 + $0x78] sm:$0x7f] %vm1203_vm2, %v1169_v40  ;;  %v1048_v52 = vrot.slane %v1012_v42, 7  ;;  %v1172_v46 = vrot.slane %v1012_v42, 1  ;;  %v1043_v54 = vsel %vm1037_vm4, %v1041_v22, %v1042_v28  ;;  %v1040_v4 = vsel %vm1037_vm4, %v1038_v25, %v1039_v31 }
 0x233   : > { %1202 = vst.msk [vmem:[#allocation2 + $0x28] sm:$0xff] %vm765_vm0, %v1164_v45  ;;  %v967_v53 = vadd.f32 1.0, %v3447_v43  ;;  %v3451_v55 = vpop.eup %3450  ;;  %v1170_v56 = vsel %vm1161_vm1, %v1168_v48, %v1169_v40  ;;  %v1047_v57 = vrot.slane %v1011_v49, 7  ;;  %v1171_v58 = vrot.slane %v1011_v49, 1  ;;  %1083 = vst.msk [vmem:[#allocation2 + $0x50] sm:$0xff] %vm765_vm0, %v1043_v54 }
 0x234   : > { %v970_v59 = vadd.f32 1.0, %v3449_v50  ;;  %1084 = vst.msk [vmem:[#allocation2 + $0x60] sm:$0xfe] %vm1079_vm3, %v1044_v47  ;;  %v3453_v51 = vpop.eup %3452  ;;  %1106 = vrot.lane.b32.xlu1 %v1010_v30, %s4055_s20  ;;  %v1014_v62 = vmul.f32 %v3451_v55, %v4966_v12  ;;  %v1046_v5 = vsel %vm1037_vm4, %v1044_v47, %v1045_v37 }
 0x235   : > { %1207 = vst.msk [vmem:[#allocation2 + $0x68] sm:$0xff] %vm765_vm0, %v1170_v56  ;;  %3462 = vrcp.f32 %v967_v53  ;;  %v3455_v6 = vpop.eup %3454  ;;  %1104 = vrot.lane.b32.xlu0 %v1009_v33, %s4055_s20  ;;  %v1173_v7 = vsel %vm1161_vm1, %v1171_v58, %v1172_v46  ;;  %v1013_v8 = vmul.f32 %v3453_v51, %v4972_v16  ;;  %1081 = vst.msk [vmem:[#allocation2 + $0x30] sm:$0xff] %vm765_vm0, %v1040_v4 }
 0x236   : > { %1210 = vst.msk [vmem:[#allocation2 + $0x98] sm:$0x7f] %vm1203_vm2, %v1172_v46  ;;  %3464 = vrcp.f32 %v970_v59  ;;  %v1049_v12 = vsel %vm1037_vm4, %v1047_v57, %v1048_v52  ;;  %v3457_v9 = vpop.eup %3456  ;;  %v1051_v10 = vrot.slane %v1014_v62, 7  ;;  %v1175_v11 = vrot.slane %v1014_v62, 1 }
 0x237   : > { %1086 = vst.msk [vmem:[#allocation2 + $0x80] sm:$0xfe] %vm1079_vm3, %v1047_v57  ;;  %v1016_v13 = vmul.f32 %v3455_v6, %v4975_v17  ;;  %v3459_v14 = vpop.eup %3458  ;;  %v1050_v16 = vrot.slane %v1013_v8, 7  ;;  %v1174_v15 = vrot.slane %v1013_v8, 1  ;;  %v969_v18 = vadd.f32 1.0, %v3457_v9 }
 0x238   : > { %1085 = vst.msk [vmem:[#allocation2 + $0x70] sm:$0xff] %vm765_vm0, %v1046_v5  ;;  %1209 = vst.msk [vmem:[#allocation2 + $0x88] sm:$0xff] %vm765_vm0, %v1173_v7  ;;  %v3461_v19 = vpop.eup %3460  ;;  %1110 = vrot.lane.b32.xlu1 %v1012_v42, %s4055_s20  ;;  %v972_v22 = vadd.f32 1.0, %v3459_v14 }
 0x239   : > { %1087 = vst.msk [vmem:[#allocation2 + $0x90] sm:$0xff] %vm765_vm0, %v1049_v12  ;;  %v1178_v20 = vrot.slane %v1016_v13, 1  ;;  %1108 = vrot.lane.b32.xlu0 %v1011_v49, %s4055_s20  ;;  %v1176_v23 = vsel %vm1161_vm1, %v1174_v15, %v1175_v11  ;;  %3466 = vrcp.f32 %v969_v18  ;;  %v971_v24 = vadd.f32 1.0, %v3461_v19  ;;  %v1224_v12 = vld [vmem:[%s618_s2 + $0x8] sm:$0xff] (!%p2889_p1) }
 0x23a   : > { %1212 = vst.msk [vmem:[#allocation2 + $0xb8] sm:$0x7f] %vm1203_vm2, %v1175_v11  ;;  %v1052_v17 = vsel %vm1037_vm4, %v1050_v16, %v1051_v10  ;;  %3468 = vrcp.f32 %v972_v22  ;;  %v1054_v35 = vrot.slane %v1016_v13, 7  ;;  %v1226_v10 = vsub.f32 (!%p2889_p1), %v1224_v12, %v4873_v1 }
 0x23b   : > { %1088 = vst.msk [vmem:[#allocation2 + $0xa0] sm:$0xfe] %vm1079_vm3, %v1050_v16  ;;  %3470 = vrcp.f32 %v971_v24 }
 0x23c   : > { %1211 = vst.msk [vmem:[#allocation2 + $0xa8] sm:$0xff] %vm765_vm0, %v1176_v23  ;;  %1089 = vst.msk [vmem:[#allocation2 + $0xb0] sm:$0xff] %vm765_vm0, %v1052_v17  ;;  %1114 = vrot.lane.b32.xlu1 %v1014_v62, %s4055_s20 }
 0x23d   : > { %1214 = vst.msk [vmem:[#allocation2 + $0xd8] sm:$0x7f] %vm1203_vm2, %v1178_v20  ;;  %1112 = vrot.lane.b32.xlu0 %v1013_v8, %s4055_s20  ;;  %v1223_v8 = vld [vmem:[%s618_s2] sm:$0xff] (!%p2889_p1) }
 0x23e   : > { %v1225_v9 = vsub.f32 (!%p2889_p1), %v1223_v8, %v4873_v1 }
 0x23f   : > { %v3463_v34 = vpop.eup %3462 }
 0x240   : > { %v3465_v25 = vpop.eup %3464  ;;  %v1015_v26 = vmul.f32 %v3463_v34, %v4988_v41  ;;  %1118 = vrot.lane.b32.xlu1 %v1016_v13, %s4055_s20  ;;  %v1227_v11 = vmul.f32 (!%p2889_p1), %v4876_v2, %v1225_v9  ;;  %v1228_v13 = vmul.f32 (!%p2889_p1), %v4876_v2, %v1226_v10 }
 0x241   : > { %v1018_v27 = vmul.f32 %v3465_v25, %v4991_v44 }
 0x242   : > { %v1053_v28 = vrot.slane %v1015_v26, 7  ;;  %v1177_v29 = vrot.slane %v1015_v26, 1  ;;  %1116 = vrot.lane.b32.xlu0 %v1015_v26, %s4055_s20  ;;  %v1229_v14 = vmul.f32 (!%p2889_p1), %v4878_v3, %v1227_v11  ;;  %v1230_v16 = vmul.f32 (!%p2889_p1), %v4878_v3, %v1228_v13 }
 0x243   : > { %v1181_v30 = vrot.slane %v1018_v27, 1  ;;  %v3467_v38 = vpop.eup %3466  ;;  %v1057_v41 = vrot.slane %v1018_v27, 7 }
 0x244   : > { %v1179_v31 = vsel %vm1161_vm1, %v1177_v29, %v1178_v20  ;;  %1090 = vst.msk [vmem:[#allocation2 + $0xc0] sm:$0xfe] %vm1079_vm3, %v1053_v28  ;;  %v1055_v32 = vsel %vm1037_vm4, %v1053_v28, %v1054_v35  ;;  %v3469_v33 = vpop.eup %3468  ;;  %1122 = vrot.lane.b32.xlu1 %v1018_v27, %s4055_s20  ;;  %v1017_v44 = vmul.f32 %v3467_v38, %v4999_v60 }
 0x245   : > { %1213 = vst.msk [vmem:[#allocation2 + $0xc8] sm:$0xff] %vm765_vm0, %v1179_v31  ;;  %1091 = vst.msk [vmem:[#allocation2 + $0xd0] sm:$0xff] %vm765_vm0, %v1055_v32  ;;  %v3471_v36 = vpop.eup %3470  ;;  %v1020_v39 = vmul.f32 %v3469_v33, %v5002_v61  ;;  %v1231_v15 = vadd.f32 (!%p2889_p1), %v4897_v21, %v1229_v14  ;;  %v1232_v18 = vadd.f32 (!%p2889_p1), %v4897_v21, %v1230_v16 }
 0x246   : > { %1216 = vst.msk [vmem:[#allocation2 + $0xf8] sm:$0x7f] %vm1203_vm2, %v1181_v30  ;;  %v1056_v37 = vrot.slane %v1017_v44, 7  ;;  %v1180_v40 = vrot.slane %v1017_v44, 1  ;;  %1120 = vrot.lane.b32.xlu0 %v1017_v44, %s4055_s20  ;;  %v1019_v42 = vmul.f32 %v3471_v36, %v5005_v63 }
 0x247   : > { %v1060_v43 = vrot.slane %v1020_v39, 7  ;;  %v1184_v45 = vrot.slane %v1020_v39, 1  ;;  %v2890_v19 = vmul.f32 (!%p2889_p1), -1.442695, %v1231_v15  ;;  %v2891_v20 = vmul.f32 (!%p2889_p1), -1.442695, %v1232_v18 }
 0x248   : > { %v1182_v47 = vsel %vm1161_vm1, %v1180_v40, %v1181_v30  ;;  %1126 = vrot.lane.b32.xlu1 %v1020_v39, %s4055_s20  ;;  %v1059_v48 = vrot.slane %v1019_v42, 7  ;;  %v1183_v49 = vrot.slane %v1019_v42, 1  ;;  %1092 = vst.msk [vmem:[#allocation2 + $0xe0] sm:$0xfe] %vm1079_vm3, %v1056_v37  ;;  %v1058_v60 = vsel %vm1037_vm4, %v1056_v37, %v1057_v41 }
 0x249   : > { %1215 = vst.msk [vmem:[#allocation2 + $0xe8] sm:$0xff] %vm765_vm0, %v1182_v47  ;;  %1093 = vst.msk [vmem:[#allocation2 + $0xf0] sm:$0xff] %vm765_vm0, %v1058_v60  ;;  %3472 = vpow2.f32 (!%p2889_p1), %v2890_v19 }
 0x24a   : > { %1218 = vst.msk [vmem:[#allocation2 + $0x118] sm:$0x7f] %vm1203_vm2, %v1184_v45  ;;  %v1185_v61 = vsel %vm1161_vm1, %v1183_v49, %v1184_v45  ;;  %1124 = vrot.lane.b32.xlu0 %v1019_v42, %s4055_s20  ;;  %v1061_v63 = vsel %vm1037_vm4, %v1059_v48, %v1060_v43  ;;  %3474 = vpow2.f32 (!%p2889_p1), %v2891_v20 }
 0x24b   : > { %1094 = vst.msk [vmem:[#allocation2 + $0x100] sm:$0xfe] %vm1079_vm3, %v1059_v48 }
 0x24c   : > { %1217 = vst.msk [vmem:[#allocation2 + $0x108] sm:$0xff] %vm765_vm0, %v1185_v61  ;;  %1095 = vst.msk [vmem:[#allocation2 + $0x110] sm:$0xff] %vm765_vm0, %v1061_v63 }
 0x253   : > { %v3473_v22 = vpop.eup (!%p2889_p1), %3472 }
 0x254   : > { %v3475_v23 = vpop.eup (!%p2889_p1), %3474  ;;  %v1239_v24 = vadd.f32 (!%p2889_p1), 1.0, %v3473_v22 }
 0x255   : > { %v1240_v17 = vadd.f32 (!%p2889_p1), 1.0, %v3475_v23 }
 0x256   : > { %3476 = vrcp.f32 (!%p2889_p1), %v1239_v24 }
 0x257   : > { %3478 = vrcp.f32 (!%p2889_p1), %v1240_v17 }
 0x260   : > { %v3477_v34 = vpop.eup (!%p2889_p1), %3476 }
 0x261   : > { %v3479_v25 = vpop.eup (!%p2889_p1), %3478  ;;  %v1245_v35 = vmul.f32 (!%p2889_p1), %v3477_v34, %v1231_v15 }
 0x262   : > { %v1246_v26 = vmul.f32 (!%p2889_p1), %v3479_v25, %v1232_v18 }
 0x263   : > { %1256 = vrot.lane.b32.xlu0 (!%p2889_p1), %v1245_v35, %s4056_s6  ;;  %v1264_v27 = vrot.slane (!%p2889_p1), %v1245_v35, 1  ;;  %v1249_v28 = vrot.slane (!%p2889_p1), %v1245_v35, 7 }
 0x264   : > { %v1265_v29 = vrot.slane (!%p2889_p1), %v1246_v26, 1  ;;  %v1250_v30 = vrot.slane (!%p2889_p1), %v1246_v26, 7 }
 0x265   : > { %1254 = vst.msk [vmem:[#allocation2] sm:$0xfe] (!%p2889_p1), %vm1079_vm3, %v1249_v28 }
 0x266   : > { %1270 = vst.msk [vmem:[#allocation2 + $0x18] sm:$0x7f] (!%p2889_p1), %vm1203_vm2, %v1265_v29  ;;  %v1266_v38 = vsel (!%p2889_p1), %vm1161_vm1, %v1264_v27, %v1265_v29  ;;  %v1251_v31 = vsel (!%p2889_p1), %vm1037_vm4, %v1249_v28, %v1250_v30 }
 0x267   : > { %1258 = vrot.lane.b32.xlu0 (!%p2889_p1), %v1246_v26, %s4056_s6  ;;  %1269 = vst.msk [vmem:[#allocation2 + $0x8] sm:$0xff] (!%p2889_p1), %vm765_vm0, %v1266_v38  ;;  %1255 = vst.msk [vmem:[#allocation2 + $0x10] sm:$0xff] (!%p2889_p1), %vm765_vm0, %v1251_v31 }
 0x29e   : > { %v1101_v50 = vpop.permute.xlu1 %1100 }
 0x29f   : > { %1147 = vst.msk [vmem:[#allocation2 + $0x40] sm:$0xff] %vm1144_vm5, %v1101_v50  ;;  %v1097_v52 = vpop.permute.xlu0 %1096 }
 0x2a0   : > { %1145 = vst.msk [vmem:[#allocation2 + $0x20] sm:$0xff] %vm1144_vm5, %v1097_v52 }
 0x2a2   : > { %v1103_v46 = vpop.permute.xlu1 %1102 }
 0x2a3   : > { %1148 = vst.msk [vmem:[#allocation2 + $0x50] sm:$0xff] %vm1144_vm5, %v1103_v46  ;;  %v1099_v53 = vpop.permute.xlu0 %1098 }
 0x2a4   : > { %1146 = vst.msk [vmem:[#allocation2 + $0x30] sm:$0xff] %vm1144_vm5, %v1099_v53 }
 0x2a6   : > { %v1107_v54 = vpop.permute.xlu1 %1106 }
 0x2a7   : > { %1150 = vst.msk [vmem:[#allocation2 + $0x70] sm:$0xff] %vm1144_vm5, %v1107_v54  ;;  %v1105_v55 = vpop.permute.xlu0 %1104 }
 0x2a8   : > { %1149 = vst.msk [vmem:[#allocation2 + $0x60] sm:$0xff] %vm1144_vm5, %v1105_v55 }
 0x2aa   : > { %v1111_v56 = vpop.permute.xlu1 %1110 }
 0x2ab   : > { %1152 = vst.msk [vmem:[#allocation2 + $0x90] sm:$0xff] %vm1144_vm5, %v1111_v56  ;;  %v1109_v57 = vpop.permute.xlu0 %1108 }
 0x2ac   : > { %1151 = vst.msk [vmem:[#allocation2 + $0x80] sm:$0xff] %vm1144_vm5, %v1109_v57 }
 0x2ae   : > { %v1115_v58 = vpop.permute.xlu1 %1114 }
 0x2af   : > { %1154 = vst.msk [vmem:[#allocation2 + $0xb0] sm:$0xff] %vm1144_vm5, %v1115_v58  ;;  %v1113_v59 = vpop.permute.xlu0 %1112 }
 0x2b0   : > { %1153 = vst.msk [vmem:[#allocation2 + $0xa0] sm:$0xff] %vm1144_vm5, %v1113_v59 }
 0x2b2   : > { %v1119_v51 = vpop.permute.xlu1 %1118 }
 0x2b3   : > { %1156 = vst.msk [vmem:[#allocation2 + $0xd0] sm:$0xff] %vm1144_vm5, %v1119_v51 }
 0x2b4   : > { %v1117_v62 = vpop.permute.xlu0 %1116 }
 0x2b5   : > { %1155 = vst.msk [vmem:[#allocation2 + $0xc0] sm:$0xff] %vm1144_vm5, %v1117_v62 }
 0x2b6   : > { %v1123_v4 = vpop.permute.xlu1 %1122 }
 0x2b7   : > { %1158 = vst.msk [vmem:[#allocation2 + $0xf0] sm:$0xff] %vm1144_vm5, %v1123_v4  ;;  %1222 = sbr.rel (%p2889_p1) target bundleno = 731 (0x2db), region = 120 }
 0x2b8   : > { %v1121_v5 = vpop.permute.xlu0 %1120 }
 0x2b9   : > { %1157 = vst.msk [vmem:[#allocation2 + $0xe0] sm:$0xff] %vm1144_vm5, %v1121_v5 }
 0x2ba   : > { %v1127_v6 = vpop.permute.xlu1 %1126 }
 0x2bb   : > { %1160 = vst.msk [vmem:[#allocation2 + $0x110] sm:$0xff] %vm1144_vm5, %v1127_v6 }
 0x2bc   : > { %v1125_v7 = vpop.permute.xlu0 %1124 }
 0x2bd   : > { %1159 = vst.msk [vmem:[#allocation2 + $0x100] sm:$0xff] %vm1144_vm5, %v1125_v7 }
 0x2d5   : > { %v1257_v32 = vpop.permute.xlu0 %1256 }
 0x2d6   : > { %1262 = vst.msk [vmem:[#allocation2] sm:$0xff] %vm1144_vm5, %v1257_v32 }
 0x2d9   : > { %v1259_v33 = vpop.permute.xlu0 %1258 }
 0x2da   : > { %1263 = vst.msk [vmem:[#allocation2 + $0x10] sm:$0xff] %vm1144_vm5, %v1259_v33 }
 0x2db PF: > { %s5854_s2 = sld [smem:[#allocation45_spill]] }
 0x2e1   : > { %p2892_p5 = scmp.ge.s32.totalorder %s5854_s2, 1 }
 0x2e2   : > { %v1275_v41 = vld [vmem:[%s636_s16] sm:$0xff] (!%p2892_p5)  ;;  %v1276_v44 = vld [vmem:[%s636_s16 + $0x8] sm:$0xff] (!%p2892_p5)  ;;  %s4057_s27 = smov (!%p2892_p5), 64  }
 0x2e3   : > { %1274 = sbr.rel (%p2892_p5) target bundleno = 895 (0x37f), region = 124  ;;  %v1277_v36 = vsub.f32 (!%p2892_p5), %v1275_v41, %v4873_v1  ;;  %v1278_v39 = vsub.f32 (!%p2892_p5), %v1276_v44, %v4873_v1 }
 0x2e5   : > { %v1279_v37 = vmul.f32 (!%p2892_p5), %v4876_v2, %v1277_v36  ;;  %v1280_v40 = vmul.f32 (!%p2892_p5), %v4876_v2, %v1278_v39 }
 0x2e7   : > { %v1281_v42 = vmul.f32 (!%p2892_p5), %v4878_v3, %v1279_v37  ;;  %v1282_v43 = vmul.f32 (!%p2892_p5), %v4878_v3, %v1280_v40 }
 0x2e9   : > { %v1283_v45 = vadd.f32 (!%p2892_p5), %v4897_v21, %v1281_v42  ;;  %v1284_v47 = vadd.f32 (!%p2892_p5), %v4897_v21, %v1282_v43 }
 0x2eb   : > { %v2893_v48 = vmul.f32 -1.442695, %v1283_v45  ;;  %v2894_v49 = vmul.f32 -1.442695, %v1284_v47 }
 0x2ed   : > { %3480 = vpow2.f32 %v2893_v48 }
 0x2ee   : > { %3482 = vpow2.f32 %v2894_v49 }
 0x2f7   : > { %v3481_v60 = vpop.eup %3480 }
 0x2f8   : > { %v3483_v61 = vpop.eup %3482  ;;  %v1291_v63 = vadd.f32 1.0, %v3481_v60 }
 0x2f9   : > { %v1292_v1 = vadd.f32 1.0, %v3483_v61 }
 0x2fa   : > { %3484 = vrcp.f32 %v1291_v63 }
 0x2fb   : > { %3486 = vrcp.f32 %v1292_v1 }
 0x304   : > { %v3485_v50 = vpop.eup %3484 }
 0x305   : > { %v3487_v2 = vpop.eup %3486  ;;  %v1297_v52 = vmul.f32 %v3485_v50, %v1283_v45 }
 0x306   : > { %v1298_v46 = vmul.f32 %v3487_v2, %v1284_v47 }
 0x307   : > { %1309 = vrot.lane.b32.xlu0 %v1297_v52, %s4057_s27  ;;  %v1317_v3 = vrot.slane %v1297_v52, 1  ;;  %v1301_v53 = vrot.slane %v1297_v52, 7 }
 0x308   : > { %v1318_v54 = vrot.slane %v1298_v46, 1  ;;  %v1302_v21 = vrot.slane %v1298_v46, 7 }
 0x309   : > { %1307 = vst.msk [vmem:[#allocation2 + $0x120] sm:$0xfe] %vm1079_vm3, %v1301_v53 }
 0x30a   : > { %1323 = vst.msk [vmem:[#allocation2 + $0x138] sm:$0x7f] %vm1203_vm2, %v1318_v54  ;;  %v1319_v55 = vsel %vm1161_vm1, %v1317_v3, %v1318_v54  ;;  %v1303_v56 = vsel %vm1037_vm4, %v1301_v53, %v1302_v21 }
 0x30b   : > { %1311 = vrot.lane.b32.xlu0 %v1298_v46, %s4057_s27  ;;  %1322 = vst.msk [vmem:[#allocation2 + $0x128] sm:$0xff] %vm765_vm0, %v1319_v55  ;;  %1308 = vst.msk [vmem:[#allocation2 + $0x130] sm:$0xff] %vm765_vm0, %v1303_v56 }
 0x379   : > { %v1310_v57 = vpop.permute.xlu0 %1309 }
 0x37a   : > { %1315 = vst.msk [vmem:[#allocation2 + $0x120] sm:$0xff] %vm1144_vm5, %v1310_v57 }
 0x37d   : > { %v1312_v58 = vpop.permute.xlu0 %1311 }
 0x37e   : > { %1316 = vst.msk [vmem:[#allocation2 + $0x130] sm:$0xff] %vm1144_vm5, %v1312_v58 }
 0x37f PF: > { %v1388_v59 = vld [vmem:[#allocation16] sm:$0xff]  ;;  %v1389_v51 = vld [vmem:[#allocation16 + $0x8] sm:$0xff]  ;;  %1324 = vst.msk [vmem:[#allocation3] sm:$0xff] %vm765_vm0, %v4054_v0  ;;  %1325 = vst.msk [vmem:[#allocation3 + $0x8] sm:$0xff] %vm765_vm0, %v4054_v0  ;;  %v4058_v4 = vmov 0.0|0.0   ;;  %vm2254_vm6 = vcmask 261120  }
 0x380   : > { %v1686_v62 = vld [vmem:[#allocation16 + $0xc0] sm:$0xff]  ;;  %1326 = vst.msk [vmem:[#allocation3 + $0x10] sm:$0xff] %vm765_vm0, %v4054_v0  ;;  %1327 = vst.msk [vmem:[#allocation3 + $0x18] sm:$0xff] %vm765_vm0, %v4054_v0  ;;  %3023 = vmatprep.subr.bf16.mxu0 %v4058_v4  ;;  %3059 = vmatprep.subr.bf16.mxu1 %v4058_v4  ;;  %v3024_v5 = vpack.c.bf16 %v1389_v51, %v1388_v59  ;;  %v1687_v6 = vld [vmem:[#allocation16 + $0xc8] sm:$0xff]  ;;  %s5855_s7 = sld [smem:[#allocation45_spill]]  ;;  %s5856_s17 = sld [smem:[#allocation46_spill]] }
 0x381   : > { %1328 = vst.msk [vmem:[#allocation3 + $0x20] sm:$0xff] %vm765_vm0, %v4054_v0  ;;  %1329 = vst.msk [vmem:[#allocation3 + $0x28] sm:$0xff] %vm765_vm0, %v4054_v0  ;;  %v1390_v7 = vld [vmem:[#allocation16 + $0x10] sm:$0xff]  ;;  %v1391_v8 = vld [vmem:[#allocation16 + $0x18] sm:$0xff]  ;;  %v3060_v12 = vpack.c.bf16 %v1687_v6, %v1686_v62  ;;  %s5858_s25 = sld [smem:[#allocation52_spill]]  ;;  %s2559_s4 = sshll.u32 %s5112_s21, 4  ;;  %s5564_s4 = int_to_ptr.vmem [resolvable:$true] %s2559_s4 }
 0x382   : > { %1330 = vst.msk [vmem:[#allocation3 + $0x30] sm:$0xff] %vm765_vm0, %v4054_v0  ;;  %1331 = vst.msk [vmem:[#allocation3 + $0x38] sm:$0xff] %vm765_vm0, %v4054_v0  ;;  %v1688_v9 = vld [vmem:[#allocation16 + $0xd0] sm:$0xff]  ;;  %v1689_v10 = vld [vmem:[#allocation16 + $0xd8] sm:$0xff]  ;;  %3025 = vmatpush1.bf16.msra.mxu0 %v3024_v5  ;;  %v3027_v11 = vpack.c.bf16 %v1391_v8, %v1390_v7  ;;  %s5859_s30 = sld [smem:[#allocation72_spill]]  ;;  %s5571_s28 = scalar_lea.sflag [#allocation6], %s625_s13 }
 0x383   : > { %1332 = vst.msk [vmem:[#allocation3 + $0x40] sm:$0xff] %vm765_vm0, %v4054_v0  ;;  %1333 = vst.msk [vmem:[#allocation3 + $0x48] sm:$0xff] %vm765_vm0, %v4054_v0  ;;  %3061 = vmatpush1.bf16.msra.mxu1 %v3060_v12  ;;  %3026 = vmatprep.subr.bf16.mxu0 %v4058_v4  ;;  %v3063_v13 = vpack.c.bf16 %v1689_v10, %v1688_v9  ;;  %v1392_v14 = vld [vmem:[#allocation16 + $0x20] sm:$0xff]  ;;  %v1691_v15 = vld [vmem:[#allocation16 + $0xe8] sm:$0xff]  ;;  %s4059_s20 = smov [#allocation24]  }
 0x384   : > { %1334 = vst.msk [vmem:[#allocation3 + $0x50] sm:$0xff] %vm765_vm0, %v4054_v0  ;;  %1335 = vst.msk [vmem:[#allocation3 + $0x58] sm:$0xff] %vm765_vm0, %v4054_v0  ;;  %3062 = vmatprep.subr.bf16.mxu1 %v4058_v4  ;;  %v1690_v16 = vld [vmem:[#allocation16 + $0xe0] sm:$0xff]  ;;  %v1394_v20 = vld [vmem:[#allocation16 + $0x30] sm:$0xff]  ;;  %s3840_s8 = sshll.u32 %s4059_s20, 4  ;;  %s3841_s8 = int_to_ptr.vmem [resolvable:$false] %s3840_s8 }
 0x385   : > { %1336 = vst.msk [vmem:[#allocation3 + $0x60] sm:$0xff] %vm765_vm0, %v4054_v0  ;;  %1337 = vst.msk [vmem:[#allocation3 + $0x68] sm:$0xff] %vm765_vm0, %v4054_v0  ;;  %v3066_v19 = vpack.c.bf16 %v1691_v15, %v1690_v16  ;;  %v1395_v22 = vld [vmem:[#allocation16 + $0x38] sm:$0xff]  ;;  %v1692_v23 = vld [vmem:[#allocation16 + $0xf0] sm:$0xff]  ;;  %s3842_s6 = scalar_lea.vmem %s3841_s8, 4096  ;;  %p3843_p6 = scmp.lt.s32.totalorder %s5564_s4, %s3841_s8 }
 0x386   : > { %1338 = vst.msk [vmem:[#allocation3 + $0x70] sm:$0xff] %vm765_vm0, %v4054_v0  ;;  %1339 = vst.msk [vmem:[#allocation3 + $0x78] sm:$0xff] %vm765_vm0, %v4054_v0  ;;  %v1393_v0 = vld [vmem:[#allocation16 + $0x28] sm:$0xff]  ;;  %3028 = vmatpush1.bf16.msra.mxu0 %v3027_v11  ;;  %v1693_v24 = vld [vmem:[#allocation16 + $0xf8] sm:$0xff]  ;;  %v3033_v17 = vpack.c.bf16 %v1395_v22, %v1394_v20  ;;  %s2970_s14 = sshll.u32 %s5855_s7, 4  ;;  %s2964_s3 = sshll.u32 %s5856_s17, 5 }
 0x387   : > { %v3030_v18 = vpack.c.bf16 %v1393_v0, %v1392_v14  ;;  %3064 = vmatpush1.bf16.msra.mxu1 %v3063_v13  ;;  %3029 = vmatprep.subr.bf16.mxu0 %v4058_v4  ;;  %v3069_v34 = vpack.c.bf16 %v1693_v24, %v1692_v23  ;;  %v1396_v25 = vld [vmem:[#allocation16 + $0x40] sm:$0xff]  ;;  %v1397_v35 = vld [vmem:[#allocation16 + $0x48] sm:$0xff]  ;;  %v1398_v29 = vld [vmem:[#allocation16 + $0x50] sm:$0xff]  ;;  %s2556_s26 = sadd.s32 %s2970_s14, %s2964_s3  ;;  %p5861_p3 = scmp.ne.s32.totalorder %s5858_s25, 0 }
 0x388   : > { %3065 = vmatprep.subr.bf16.mxu1 %v4058_v4  ;;  %v1694_v26 = vld [vmem:[#allocation16 + $0x100] sm:$0xff]  ;;  %v1695_v27 = vld [vmem:[#allocation16 + $0x108] sm:$0xff]  ;;  %v3036_v28 = vpack.c.bf16 %v1397_v35, %v1396_v25  ;;  %v1399_v38 = vld [vmem:[#allocation16 + $0x58] sm:$0xff]  ;;  %s2965_s16 = sshll.u32 %s2556_s26, 7  ;;  %s5860_s12 = smov %s5859_s30 }
 0x389   : > { %v3072_v30 = vpack.c.bf16 %v1695_v27, %v1694_v26  ;;  %v1341_v31 = vld [vmem:[#allocation2 + $0x8] sm:$0xff]  ;;  %v1696_v33 = vld [vmem:[#allocation16 + $0x110] sm:$0xff]  ;;  %v1697_v41 = vld [vmem:[#allocation16 + $0x118] sm:$0xff]  ;;  %v3039_v44 = vpack.c.bf16 %v1399_v38, %v1398_v29  ;;  %s5562_s15 = scalar_lea.hbm %s5859_s30, %s2965_s16 }
 0x38a   : > { %3031 = vmatpush1.bf16.msra.mxu0 %v3030_v18  ;;  %v5197_v32 = vld [vmem:[#allocation2 + $0x28] sm:$0xff]  ;;  %2895 = vmatprep.mubr.msk.f32.mxu0 %vm765_vm0, %v1341_v31  ;;  %v3075_v36 = vpack.c.bf16 %v1697_v41, %v1696_v33  ;;  %v1401_v37 = vld [vmem:[#allocation16 + $0x68] sm:$0xff]  ;;  %v1402_v47 = vld [vmem:[#allocation16 + $0x70] sm:$0xff] }
 0x38b   : > { %3067 = vmatpush1.bf16.msra.mxu1 %v3066_v19  ;;  %3032 = vmatprep.subr.bf16.mxu0 %v4058_v4  ;;  %v1400_v39 = vld [vmem:[#allocation16 + $0x60] sm:$0xff]  ;;  %v1699_v42 = vld [vmem:[#allocation16 + $0x128] sm:$0xff]  ;;  %v1403_v48 = vld [vmem:[#allocation16 + $0x78] sm:$0xff] }
 0x38c   : > { %3068 = vmatprep.subr.bf16.mxu1 %v4058_v4  ;;  %2911 = vmatprep.mubr.msk.f32.mxu1 %vm765_vm0, %v5197_v32  ;;  %v1698_v40 = vld [vmem:[#allocation16 + $0x120] sm:$0xff]  ;;  %v3042_v43 = vpack.c.bf16 %v1401_v37, %v1400_v39  ;;  %v1700_v49 = vld [vmem:[#allocation16 + $0x130] sm:$0xff]  ;;  %v1701_v60 = vld [vmem:[#allocation16 + $0x138] sm:$0xff]  ;;  %v3045_v61 = vpack.c.bf16 %v1403_v48, %v1402_v47 }
 0x38d   : > { %v3078_v45 = vpack.c.bf16 %v1699_v42, %v1698_v40  ;;  %v3081_v63 = vpack.c.bf16 %v1701_v60, %v1700_v49  ;;  %v1404_v1 = vld [vmem:[#allocation16 + $0x80] sm:$0xff]  ;;  %v1405_v50 = vld [vmem:[#allocation16 + $0x88] sm:$0xff]  ;;  %v1406_v53 = vld [vmem:[#allocation16 + $0x90] sm:$0xff] }
 0x38e   : > { %3034 = vmatpush1.bf16.msra.mxu0 %v3033_v17  ;;  %v1702_v2 = vld [vmem:[#allocation16 + $0x140] sm:$0xff]  ;;  %v1703_v52 = vld [vmem:[#allocation16 + $0x148] sm:$0xff]  ;;  %v3048_v46 = vpack.c.bf16 %v1405_v50, %v1404_v1  ;;  %v1407_v54 = vld [vmem:[#allocation16 + $0x98] sm:$0xff] }
 0x38f   : > { %3070 = vmatpush1.bf16.msra.mxu1 %v3069_v34  ;;  %3035 = vmatprep.subr.bf16.mxu0 %v4058_v4  ;;  %v3084_v3 = vpack.c.bf16 %v1703_v52, %v1702_v2  ;;  %v1704_v21 = vld [vmem:[#allocation16 + $0x150] sm:$0xff]  ;;  %v1705_v55 = vld [vmem:[#allocation16 + $0x158] sm:$0xff]  ;;  %v3051_v56 = vpack.c.bf16 %v1407_v54, %v1406_v53  ;;  %v1408_v58 = vld [vmem:[#allocation16 + $0xa0] sm:$0xff] }
 0x390   : > { %3071 = vmatprep.subr.bf16.mxu1 %v4058_v4  ;;  %v3087_v57 = vpack.c.bf16 %v1705_v55, %v1704_v21  ;;  %v1409_v59 = vld [vmem:[#allocation16 + $0xa8] sm:$0xff]  ;;  %v1706_v51 = vld [vmem:[#allocation16 + $0x160] sm:$0xff]  ;;  %v1410_v7 = vld [vmem:[#allocation16 + $0xb0] sm:$0xff] }
 0x391   : > { %v1707_v62 = vld [vmem:[#allocation16 + $0x168] sm:$0xff]  ;;  %v3054_v5 = vpack.c.bf16 %v1409_v59, %v1408_v58  ;;  %v1411_v8 = vld [vmem:[#allocation16 + $0xb8] sm:$0xff]  ;;  %v1708_v12 = vld [vmem:[#allocation16 + $0x170] sm:$0xff] }
 0x392   : > { %3037 = vmatpush1.bf16.msra.mxu0 %v3036_v28  ;;  %v3090_v6 = vpack.c.bf16 %v1707_v62, %v1706_v51  ;;  %v1709_v9 = vld [vmem:[#allocation16 + $0x178] sm:$0xff]  ;;  %v3057_v10 = vpack.c.bf16 %v1411_v8, %v1410_v7  ;;  %v1985_v13 = vld [vmem:[#allocation16 + $0x180] sm:$0xff]  ;;  %v1986_v14 = vld [vmem:[#allocation16 + $0x188] sm:$0xff] }
 0x393   : > { %3073 = vmatpush1.bf16.msra.mxu1 %v3072_v30  ;;  %3038 = vmatprep.subr.bf16.mxu0 %v4058_v4  ;;  %v3093_v11 = vpack.c.bf16 %v1709_v9, %v1708_v12  ;;  %v1340_v0 = vld [vmem:[#allocation2] sm:$0xff]  ;;  %v3096_v16 = vpack.c.bf16 %v1986_v14, %v1985_v13  ;;  %v1343_v18 = vld [vmem:[#allocation2 + $0x18] sm:$0xff]  ;;  %v1342_v23 = vld [vmem:[#allocation2 + $0x10] sm:$0xff] }
 0x394   : > { %3074 = vmatprep.subr.bf16.mxu1 %v4058_v4  ;;  %v1637_v15 = vld [vmem:[#allocation2 + $0x20] sm:$0xff]  ;;  %v1640_v19 = vld [vmem:[#allocation2 + $0x38] sm:$0xff]  ;;  %v1639_v24 = vld [vmem:[#allocation2 + $0x30] sm:$0xff] }
 0x395   : > { %v1987_v20 = vld [vmem:[#allocation16 + $0x190] sm:$0xff]  ;;  %v1988_v22 = vld [vmem:[#allocation16 + $0x198] sm:$0xff]  ;;  %v5222_v34 = vld [vmem:[#allocation2 + $0x48] sm:$0xff] }
 0x396   : > { %3040 = vmatpush1.bf16.msra.mxu0 %v3039_v44  ;;  %v3099_v17 = vpack.c.bf16 %v1988_v22, %v1987_v20  ;;  %v1989_v25 = vld [vmem:[#allocation16 + $0x1a0] sm:$0xff]  ;;  %v1990_v35 = vld [vmem:[#allocation16 + $0x1a8] sm:$0xff]  ;;  %v5229_v26 = vld [vmem:[#allocation2 + $0x40] sm:$0xff] }
 0x397   : > { %3076 = vmatpush1.bf16.msra.mxu1 %v3075_v36  ;;  %3041 = vmatprep.subr.bf16.mxu0 %v4058_v4  ;;  %v3102_v27 = vpack.c.bf16 %v1990_v35, %v1989_v25  ;;  %v5231_v28 = vld [vmem:[#allocation2 + $0x58] sm:$0xff]  ;;  %v1992_v30 = vld [vmem:[#allocation16 + $0x1b8] sm:$0xff]  ;;  %v5239_v38 = vld [vmem:[#allocation2 + $0x50] sm:$0xff] }
 0x398   : > { %3077 = vmatprep.subr.bf16.mxu1 %v4058_v4  ;;  %v1991_v29 = vld [vmem:[#allocation16 + $0x1b0] sm:$0xff]  ;;  %v1993_v33 = vld [vmem:[#allocation16 + $0x1c0] sm:$0xff]  ;;  %v1994_v41 = vld [vmem:[#allocation16 + $0x1c8] sm:$0xff] }
 0x399   : > { %v3105_v31 = vpack.c.bf16 %v1992_v30, %v1991_v29  ;;  %v5250_v44 = vld [vmem:[#allocation2 + $0x60] sm:$0xff]  ;;  %v3108_v36 = vpack.c.bf16 %v1994_v41, %v1993_v33  ;;  %v5252_v39 = vld [vmem:[#allocation2 + $0x78] sm:$0xff]  ;;  %v5262_v42 = vld [vmem:[#allocation2 + $0x70] sm:$0xff] }
 0x39a   : > { %3043 = vmatpush1.bf16.msra.mxu0 %v3042_v43  ;;  %v1995_v37 = vld [vmem:[#allocation16 + $0x1d0] sm:$0xff]  ;;  %v1996_v40 = vld [vmem:[#allocation16 + $0x1d8] sm:$0xff]  ;;  %v1997_v47 = vld [vmem:[#allocation16 + $0x1e0] sm:$0xff] }
 0x39b   : > { %3079 = vmatpush1.bf16.msra.mxu1 %v3078_v45  ;;  %3044 = vmatprep.subr.bf16.mxu0 %v4058_v4  ;;  %v3111_v43 = vpack.c.bf16 %v1996_v40, %v1995_v37  ;;  %v5264_v45 = vld [vmem:[#allocation2 + $0x88] sm:$0xff]  ;;  %v1998_v48 = vld [vmem:[#allocation16 + $0x1e8] sm:$0xff]  ;;  %v5274_v49 = vld [vmem:[#allocation2 + $0x80] sm:$0xff] }
 0x39c   : > { %3080 = vmatprep.subr.bf16.mxu1 %v4058_v4  ;;  %v3114_v60 = vpack.c.bf16 %v1998_v48, %v1997_v47  ;;  %v2000_v1 = vld [vmem:[#allocation16 + $0x1f8] sm:$0xff]  ;;  %v5286_v50 = vld [vmem:[#allocation2 + $0x90] sm:$0xff]  ;;  %v5288_v52 = vld [vmem:[#allocation2 + $0xa8] sm:$0xff] }
 0x39d   : > { %v5298_v53 = vld [vmem:[#allocation2 + $0xa0] sm:$0xff]  ;;  %v5300_v21 = vld [vmem:[#allocation2 + $0xb8] sm:$0xff]  ;;  %v5312_v59 = vld [vmem:[#allocation2 + $0xc8] sm:$0xff] }
 0x39e   : > { %3046 = vmatpush1.bf16.msra.mxu0 %v3045_v61  ;;  %v5276_v61 = vld [vmem:[#allocation2 + $0x98] sm:$0xff]  ;;  %v2005_v51 = vld [vmem:[#allocation16 + $0x220] sm:$0xff]  ;;  %v2006_v62 = vld [vmem:[#allocation16 + $0x228] sm:$0xff] }
 0x39f   : > { %3082 = vmatpush1.bf16.msra.mxu1 %v3081_v63  ;;  %3047 = vmatprep.subr.bf16.mxu0 %v4058_v4  ;;  %v1999_v63 = vld [vmem:[#allocation16 + $0x1f0] sm:$0xff]  ;;  %v2008_v12 = vld [vmem:[#allocation16 + $0x238] sm:$0xff]  ;;  %v2250_v9 = vld [vmem:[#allocation21] sm:$0xff] }
 0x3a0   : > { %3083 = vmatprep.subr.bf16.mxu1 %v4058_v4  ;;  %v3117_v2 = vpack.c.bf16 %v2000_v1, %v1999_v63  ;;  %v2003_v55 = vld [vmem:[#allocation16 + $0x210] sm:$0xff]  ;;  %v5336_v14 = vld [vmem:[#allocation2 + $0xe8] sm:$0xff]  ;;  %v1667_v22 = vld [vmem:[#allocation2 + $0x110] sm:$0xff] }
 0x3a1   : > { %v5324_v7 = vld [vmem:[#allocation2 + $0xd8] sm:$0xff]  ;;  %v1965_v25 = vld [vmem:[#allocation2 + $0x128] sm:$0xff] }
 0x3a2   : > { %3049 = vmatpush1.bf16.msra.mxu0 %v3048_v46  ;;  %v2001_v46 = vld [vmem:[#allocation16 + $0x200] sm:$0xff]  ;;  %v2007_v8 = vld [vmem:[#allocation16 + $0x230] sm:$0xff] }
 0x3a3   : > { %3085 = vmatpush1.bf16.msra.mxu1 %v3084_v3  ;;  %3050 = vmatprep.subr.bf16.mxu0 %v4058_v4  ;;  %v2002_v3 = vld [vmem:[#allocation16 + $0x208] sm:$0xff]  ;;  %v3129_v13 = vpack.c.bf16 %v2008_v12, %v2007_v8  ;;  %v1668_v20 = vld [vmem:[#allocation2 + $0x118] sm:$0xff]  ;;  %v2237_v30 = vld [vmem:[%s4798_s10 + $0x18] sm:$0xff] }
 0x3a4   : > { %3086 = vmatprep.subr.bf16.mxu1 %v4058_v4  ;;  %v3120_v54 = vpack.c.bf16 %v2002_v3, %v2001_v46  ;;  %v1967_v35 = vld [vmem:[#allocation2 + $0x138] sm:$0xff]  ;;  %v2241_v33 = vld [vmem:[%s4798_s10 + $0x38] sm:$0xff]  ;;  %v2242_v41 = vld [vmem:[%s4798_s10 + $0x40] sm:$0xff] }
 0x3a5   : > { %v2236_v29 = vld [vmem:[%s4798_s10 + $0x10] sm:$0xff]  ;;  %v2246_v37 = vld [vmem:[%s4798_s10 + $0x60] sm:$0xff]  ;;  %v2247_v40 = vld [vmem:[%s4798_s10 + $0x68] sm:$0xff] }
 0x3a6   : > { %3052 = vmatpush1.bf16.msra.mxu0 %v3051_v56  ;;  %v2004_v56 = vld [vmem:[#allocation16 + $0x218] sm:$0xff]  ;;  %v1374_v46 = vld [vmem:[#allocation3 + $0x10] sm:$0xff] }
 0x3a7   : > { %3088 = vmatpush1.bf16.msra.mxu1 %v3087_v57  ;;  %3053 = vmatprep.subr.bf16.mxu0 %v4058_v4  ;;  %v5310_v57 = vld [vmem:[#allocation2 + $0xb0] sm:$0xff]  ;;  %v3123_v58 = vpack.c.bf16 %v2004_v56, %v2003_v55  ;;  %v1376_v8 = vld [vmem:[#allocation3 + $0x20] sm:$0xff] }
 0x3a8   : > { %3089 = vmatprep.subr.bf16.mxu1 %v4058_v4 }
 0x3aa   : > { %3055 = vmatpush1.bf16.msra.mxu0 %v3054_v5  ;;  %v5322_v5 = vld [vmem:[#allocation2 + $0xc0] sm:$0xff] }
 0x3ab   : > { %3091 = vmatpush1.bf16.msra.mxu1 %v3090_v6  ;;  %3056 = vmatprep.subr.bf16.mxu0 %v4058_v4  ;;  %v3126_v6 = vpack.c.bf16 %v2006_v62, %v2005_v51 }
 0x3ac   : > { %3092 = vmatprep.subr.bf16.mxu1 %v4058_v4 }
 0x3ae   : > { %3058 = vmatpush1.bf16.msra.mxu0 %v3057_v10  ;;  %v2251_v10 = vld [vmem:[#allocation21 + $0x8] sm:$0xff] }
 0x3af   : > { %3094 = vmatpush1.bf16.msra.mxu1 %v3093_v11  ;;  %3095 = vmatprep.subr.bf16.mxu0 %v4058_v4  ;;  %v5334_v11 = vld [vmem:[#allocation2 + $0xd0] sm:$0xff] }
 0x3b0   : > { %3139 = vmatprep.subr.bf16.mxu1 %v4058_v4 }
 0x3b1   : > { %1525 = vmatmul.mubr.f32.vlgmr.msra.gmra.mrb[0].mxu0 %v1340_v0  ;;  %v3131_v0 = vpack.c.bf16 %v2251_v10, %v2250_v9 }
 0x3b2   : > { %1823 = vmatmul.mubr.f32.vlgmr.msra.gmra.mrb[0].mxu1 %v1637_v15  ;;  %3097 = vmatpush1.bf16.msra.mxu0 %v3096_v16 }
 0x3b3   : > { %2896 = vmatprep.mubr.msk.f32.mxu0 %vm765_vm0, %v1343_v18  ;;  %2912 = vmatprep.mubr.msk.f32.mxu1 %vm765_vm0, %v1640_v19  ;;  %v1666_v18 = vld [vmem:[#allocation2 + $0x108] sm:$0xff] }
 0x3b4   : > { %3098 = vmatprep.subr.bf16.mxu0 %v4058_v4  ;;  %3151 = vmatpush1.bf16.msra.mxu1 %v3096_v16  ;;  %v5346_v16 = vld [vmem:[#allocation2 + $0xe0] sm:$0xff] }
 0x3b5   : > { %1530 = vmatmul.mubr.f32.gmra.mrb[2].mxu0 %v1342_v23  ;;  %3140 = vmatprep.subr.bf16.mxu1 %v4058_v4  ;;  %v2252_v23 = vld [vmem:[#allocation21 + $0x10] sm:$0xff] }
 0x3b6   : > { %1828 = vmatmul.mubr.f32.gmra.mrb[2].mxu1 %v1639_v24  ;;  %2897 = vmatprep.mubr.msk.f32.mxu0 %vm765_vm0, %v5197_v32  ;;  %v5241_v32 = vld [vmem:[#allocation2 + $0x68] sm:$0xff] }
 0x3b7   : > { %2913 = vmatprep.mubr.msk.f32.mxu1 %vm765_vm0, %v5222_v34  ;;  %3100 = vmatpush1.bf16.msra.mxu0 %v3099_v17 }
 0x3b8   : > { %3101 = vmatprep.subr.bf16.mxu0 %v4058_v4  ;;  %3152 = vmatpush1.bf16.msra.mxu1 %v3099_v17 }
 0x3b9   : > { %1535 = vmatmul.mubr.f32.gmra.mrb[4].mxu0 %v1637_v15  ;;  %3141 = vmatprep.subr.bf16.mxu1 %v4058_v4  ;;  %v5348_v15 = vld [vmem:[#allocation2 + $0xf8] sm:$0xff] }
 0x3ba   : > { %1833 = vmatmul.mubr.f32.gmra.mrb[4].mxu1 %v5229_v26  ;;  %2898 = vmatprep.mubr.msk.f32.mxu0 %vm765_vm0, %v1640_v19  ;;  %v1665_v19 = vld [vmem:[#allocation2 + $0x100] sm:$0xff] }
 0x3bb   : > { %2914 = vmatprep.mubr.msk.f32.mxu1 %vm765_vm0, %v5231_v28  ;;  %3103 = vmatpush1.bf16.msra.mxu0 %v3102_v27 }
 0x3bc   : > { %3104 = vmatprep.subr.bf16.mxu0 %v4058_v4  ;;  %3153 = vmatpush1.bf16.msra.mxu1 %v3102_v27  ;;  %v2234_v27 = vld [vmem:[%s4798_s10] sm:$0xff] }
 0x3bd   : > { %1540 = vmatmul.mubr.f32.gmra.mrb[6].mxu0 %v1639_v24  ;;  %3142 = vmatprep.subr.bf16.mxu1 %v4058_v4  ;;  %v2253_v24 = vld [vmem:[#allocation21 + $0x18] sm:$0xff] }
 0x3be   : > { %1838 = vmatmul.mubr.f32.gmra.mrb[6].mxu1 %v5239_v38  ;;  %2899 = vmatprep.mubr.msk.f32.mxu0 %vm765_vm0, %v5222_v34  ;;  %v3135_v17 = vpack.c.bf16 %v2253_v24, %v2252_v23  ;;  %v1378_v24 = vld [vmem:[#allocation3 + $0x30] sm:$0xff] }
 0x3bf   : > { %2915 = vmatprep.mubr.msk.f32.mxu1 %vm765_vm0, %v5241_v32  ;;  %3106 = vmatpush1.bf16.msra.mxu0 %v3105_v31 }
 0x3c0   : > { %3107 = vmatprep.subr.bf16.mxu0 %v4058_v4  ;;  %3154 = vmatpush1.bf16.msra.mxu1 %v3105_v31  ;;  %v2239_v31 = vld [vmem:[%s4798_s10 + $0x28] sm:$0xff] }
 0x3c1   : > { %1545 = vmatmul.mubr.f32.gmra.mrb[8].mxu0 %v5229_v26  ;;  %3143 = vmatprep.subr.bf16.mxu1 %v4058_v4 }
 0x3c2   : > { %1843 = vmatmul.mubr.f32.gmra.mrb[8].mxu1 %v5250_v44  ;;  %2900 = vmatprep.mubr.msk.f32.mxu0 %vm765_vm0, %v5231_v28 }
 0x3c3   : > { %2916 = vmatprep.mubr.msk.f32.mxu1 %vm765_vm0, %v5252_v39  ;;  %3109 = vmatpush1.bf16.msra.mxu0 %v3108_v36 }
 0x3c4   : > { %3110 = vmatprep.subr.bf16.mxu0 %v4058_v4  ;;  %3155 = vmatpush1.bf16.msra.mxu1 %v3108_v36  ;;  %v2244_v36 = vld [vmem:[%s4798_s10 + $0x50] sm:$0xff] }
 0x3c5   : > { %1550 = vmatmul.mubr.f32.gmra.mrb[10].mxu0 %v5239_v38  ;;  %3144 = vmatprep.subr.bf16.mxu1 %v4058_v4 }
 0x3c6   : > { %1848 = vmatmul.mubr.f32.gmra.mrb[10].mxu1 %v5262_v42  ;;  %2901 = vmatprep.mubr.msk.f32.mxu0 %vm765_vm0, %v5241_v32 }
 0x3c7   : > { %2917 = vmatprep.mubr.msk.f32.mxu1 %vm765_vm0, %v5264_v45  ;;  %3112 = vmatpush1.bf16.msra.mxu0 %v3111_v43 }
 0x3c8   : > { %3113 = vmatprep.subr.bf16.mxu0 %v4058_v4  ;;  %3156 = vmatpush1.bf16.msra.mxu1 %v3111_v43  ;;  %v2249_v43 = vld [vmem:[%s4798_s10 + $0x78] sm:$0xff] }
 0x3c9   : > { %1555 = vmatmul.mubr.f32.gmra.mrb[12].mxu0 %v5250_v44  ;;  %3145 = vmatprep.subr.bf16.mxu1 %v4058_v4 }
 0x3ca   : > { %1853 = vmatmul.mubr.f32.gmra.mrb[12].mxu1 %v5274_v49  ;;  %2902 = vmatprep.mubr.msk.f32.mxu0 %vm765_vm0, %v5252_v39 }
 0x3cb   : > { %2918 = vmatprep.mubr.msk.f32.mxu1 %vm765_vm0, %v5276_v61  ;;  %3115 = vmatpush1.bf16.msra.mxu0 %v3114_v60 }
 0x3cc   : > { %3116 = vmatprep.subr.bf16.mxu0 %v4058_v4  ;;  %3157 = vmatpush1.bf16.msra.mxu1 %v3114_v60 }
 0x3cd   : > { %1560 = vmatmul.mubr.f32.gmra.mrb[14].mxu0 %v5262_v42  ;;  %3146 = vmatprep.subr.bf16.mxu1 %v4058_v4 }
 0x3ce   : > { %1858 = vmatmul.mubr.f32.gmra.mrb[14].mxu1 %v5286_v50  ;;  %2903 = vmatprep.mubr.msk.f32.mxu0 %vm765_vm0, %v5264_v45 }
 0x3cf   : > { %2919 = vmatprep.mubr.msk.f32.mxu1 %vm765_vm0, %v5288_v52  ;;  %3118 = vmatpush1.bf16.msra.mxu0 %v3117_v2 }
 0x3d0   : > { %3119 = vmatprep.subr.bf16.mxu0 %v4058_v4  ;;  %3158 = vmatpush1.bf16.msra.mxu1 %v3117_v2 }
 0x3d1   : > { %1565 = vmatmul.mubr.f32.gmra.mrb[16].mxu0 %v5274_v49  ;;  %3147 = vmatprep.subr.bf16.mxu1 %v4058_v4 }
 0x3d2   : > { %1863 = vmatmul.mubr.f32.gmra.mrb[16].mxu1 %v5298_v53  ;;  %2904 = vmatprep.mubr.msk.f32.mxu0 %vm765_vm0, %v5276_v61 }
 0x3d3   : > { %2920 = vmatprep.mubr.msk.f32.mxu1 %vm765_vm0, %v5300_v21  ;;  %3121 = vmatpush1.bf16.msra.mxu0 %v3120_v54 }
 0x3d4   : > { %3122 = vmatprep.subr.bf16.mxu0 %v4058_v4  ;;  %3159 = vmatpush1.bf16.msra.mxu1 %v3120_v54 }
 0x3d5   : > { %1570 = vmatmul.mubr.f32.gmra.mrb[18].mxu0 %v5286_v50  ;;  %3148 = vmatprep.subr.bf16.mxu1 %v4058_v4 }
 0x3d6   : > { %1868 = vmatmul.mubr.f32.gmra.mrb[18].mxu1 %v5310_v57  ;;  %2905 = vmatprep.mubr.msk.f32.mxu0 %vm765_vm0, %v5288_v52 }
 0x3d7   : > { %2921 = vmatprep.mubr.msk.f32.mxu1 %vm765_vm0, %v5312_v59  ;;  %3124 = vmatpush1.bf16.msra.mxu0 %v3123_v58 }
 0x3d8   : > { %3160 = vmatpush1.bf16.msra.mxu1 %v3123_v58  ;;  %3125 = vmatprep.subr.bf16.mxu0 %v4058_v4 }
 0x3d9   : > { %1575 = vmatmul.mubr.f32.gmra.mrb[20].mxu0 %v5298_v53  ;;  %3149 = vmatprep.subr.bf16.mxu1 %v4058_v4 }
 0x3da   : > { %1873 = vmatmul.mubr.f32.gmra.mrb[20].mxu1 %v5322_v5  ;;  %2906 = vmatprep.mubr.msk.f32.mxu0 %vm765_vm0, %v5300_v21 }
 0x3db   : > { %2922 = vmatprep.mubr.msk.f32.mxu1 %vm765_vm0, %v5324_v7  ;;  %3127 = vmatpush1.bf16.msra.mxu0 %v3126_v6 }
 0x3dc   : > { %3161 = vmatpush1.bf16.msra.mxu1 %v3126_v6  ;;  %3128 = vmatprep.subr.bf16.mxu0 %v4058_v4 }
 0x3dd   : > { %1580 = vmatmul.mubr.f32.gmra.mrb[22].mxu0 %v5310_v57  ;;  %3150 = vmatprep.subr.bf16.mxu1 %v4058_v4  ;;  %v5356_v4 = vld [vmem:[#allocation2 + $0xf0] sm:$0xff] }
 0x3de   : > { %1878 = vmatmul.mubr.f32.gmra.mrb[22].mxu1 %v5334_v11  ;;  %2907 = vmatprep.mubr.msk.f32.mxu0 %vm765_vm0, %v5312_v59 }
 0x3df   : > { %2923 = vmatprep.mubr.msk.f32.mxu1 %vm765_vm0, %v5336_v14  ;;  %3130 = vmatpush1.bf16.msra.mxu0 %v3129_v13 }
 0x3e0   : > { %3162 = vmatpush1.bf16.msra.mxu1 %v3129_v13 }
 0x3e1   : > { %1585 = vmatmul.mubr.f32.gmra.mrb[24].mxu0 %v5322_v5  ;;  %3132 = vmatprep.subr.bf16.mxu1 %v3131_v0 }
 0x3e2   : > { %1883 = vmatmul.mubr.f32.gmra.mrb[24].mxu1 %v5346_v16  ;;  %2908 = vmatprep.mubr.msk.f32.mxu0 %vm765_vm0, %v5324_v7 }
 0x3e3   : > { %2924 = vmatprep.mubr.msk.f32.mxu1 %vm765_vm0, %v5348_v15 }
 0x3e5   : > { %1590 = vmatmul.mubr.f32.gmra.mrb[26].mxu0 %v5334_v11 }
 0x3e6   : > { %1888 = vmatmul.mubr.f32.gmra.mrb[26].mxu1 %v5356_v4  ;;  %2909 = vmatprep.mubr.msk.f32.mxu0 %vm765_vm0, %v5336_v14 }
 0x3e7   : > { %2925 = vmatprep.mubr.msk.f32.mxu1 %vm765_vm0, %v1666_v18 }
 0x3e9   : > { %1595 = vmatmul.mubr.f32.gmra.mrb[28].mxu0 %v5346_v16 }
 0x3ea   : > { %1893 = vmatmul.mubr.f32.gmra.mrb[28].mxu1 %v1665_v19  ;;  %2910 = vmatprep.mubr.msk.f32.mxu0 %vm765_vm0, %v5348_v15 }
 0x3eb   : > { %2926 = vmatprep.mubr.msk.f32.mxu1 %vm765_vm0, %v1668_v20 }
 0x3ed   : > { %1600 = vmatmul.mubr.f32.gmra.mrb[30].mxu0 %v5356_v4 }
 0x3ee   : > { %1898 = vmatmul.mubr.f32.gmra.mrb[30].mxu1 %v1667_v22  ;;  %2927 = vmatprep.mubr.msk.f32.mxu0 %vm765_vm0, %v5222_v34  ;;  %v1964_v34 = vld [vmem:[#allocation2 + $0x120] sm:$0xff] }
 0x3ef   : > { %2939 = vmatprep.mubr.msk.f32.mxu1 %vm765_vm0, %v1666_v18 }
 0x3f1   : > { %2122 = vmatmul.mubr.f32.vlgmr.msra.gmra.mrb[32].mxu0 %v5229_v26  ;;  %v1966_v26 = vld [vmem:[#allocation2 + $0x130] sm:$0xff] }
 0x3f2   : > { %2182 = vmatmul.mubr.f32.vlgmr.msra.gmra.mrb[32].mxu1 %v1665_v19  ;;  %2928 = vmatprep.mubr.msk.f32.mxu0 %vm765_vm0, %v5231_v28  ;;  %v2235_v28 = vld [vmem:[%s4798_s10 + $0x8] sm:$0xff] }
 0x3f3   : > { %2940 = vmatprep.mubr.msk.f32.mxu1 %vm765_vm0, %v1668_v20  ;;  %3134 = vmatpush3.bf16.msra.mxu1 %v3131_v0 }
 0x3f4   : > { %3136 = vmatprep.subr.bf16.mxu1 %v3135_v17 }
 0x3f5   : > { %2127 = vmatmul.mubr.f32.gmra.mrb[34].mxu0 %v5239_v38  ;;  %v2238_v38 = vld [vmem:[%s4798_s10 + $0x20] sm:$0xff] }
 0x3f6   : > { %2187 = vmatmul.mubr.f32.gmra.mrb[34].mxu1 %v1667_v22  ;;  %2929 = vmatprep.mubr.msk.f32.mxu0 %vm765_vm0, %v5241_v32  ;;  %v2240_v32 = vld [vmem:[%s4798_s10 + $0x30] sm:$0xff] }
 0x3f7   : > { %2941 = vmatprep.mubr.msk.f32.mxu1 %vm765_vm0, %v1965_v25  ;;  %3138 = vmatpush3.bf16.msra.mxu1 %v3135_v17 }
 0x3f9   : > { %2132 = vmatmul.mubr.f32.gmra.mrb[36].mxu0 %v5250_v44  ;;  %v2243_v44 = vld [vmem:[%s4798_s10 + $0x48] sm:$0xff] }
 0x3fa   : > { %2192 = vmatmul.mubr.f32.gmra.mrb[36].mxu1 %v1964_v34  ;;  %2930 = vmatprep.mubr.msk.f32.mxu0 %vm765_vm0, %v5252_v39  ;;  %v2245_v39 = vld [vmem:[%s4798_s10 + $0x58] sm:$0xff] }
 0x3fb   : > { %2942 = vmatprep.mubr.msk.f32.mxu1 %vm765_vm0, %v1967_v35 }
 0x3fd   : > { %2137 = vmatmul.mubr.f32.gmra.mrb[38].mxu0 %v5262_v42  ;;  %v2248_v42 = vld [vmem:[%s4798_s10 + $0x70] sm:$0xff]  ;;  %s3836_s10 = scalar_lea.vmem %s5564_s4, 2048 }
 0x3fe   : > { %2197 = vmatmul.mubr.f32.gmra.mrb[38].mxu1 %v1966_v26  ;;  %2931 = vmatprep.mubr.msk.f32.mxu0 %vm765_vm0, %v5264_v45  ;;  %v1372_v45 = vld [vmem:[#allocation3] sm:$0xff]  ;;  %p3837_p10 = scmp.ne.s32.totalorder %s5564_s4, %s3836_s10  ;;  %p3844_p8 = scmp.lt.s32.totalorder %s3842_s6, %s3836_s10 }
 0x3ff   : > { %2999 = vmatprep.mubr.msk.f32.mxu1 %vm2254_vm6, %v2234_v27 }
 0x400   : > { %p3838_p12 = pnand %p3837_p10, %p5861_p3  ;;  %p3845_p4 = por %p3844_p8, %p3843_p6 }
 0x401   : > { %2142 = vmatmul.mubr.f32.gmra.mrb[40].mxu0 %v5274_v49 }
 0x402   : > { %3000 = vmatmul.mubr.msk.f32.vlgmr.msra.gmra.mrb[40].mxu1 %vm2254_vm6, %v2235_v28  ;;  %2932 = vmatprep.mubr.msk.f32.mxu0 %vm765_vm0, %v5276_v61  ;;  %v1373_v61 = vld [vmem:[#allocation3 + $0x8] sm:$0xff]  ;;  %p3839_p13 = pneg %p3838_p12 }
 0x403   : > { %3002 = vmatprep.mubr.msk.f32.mxu1 %vm2254_vm6, %v2236_v29  ;;  %v1379_v29 = vld [vmem:[#allocation3 + $0x38] sm:$0xff] }
 0x404   : > { %p3846_p9 = pnand %p3845_p4, %p3839_p13 }
 0x405   : > { %2147 = vmatmul.mubr.f32.gmra.mrb[42].mxu0 %v5286_v50 }
 0x406   : > { %3003 = vmatmul.mubr.msk.f32.gmra.mrb[42].mxu1 %vm2254_vm6, %v2237_v30  ;;  %2933 = vmatprep.mubr.msk.f32.mxu0 %vm765_vm0, %v5288_v52 }
 0x407   : > { %3005 = vmatprep.mubr.msk.f32.mxu1 %vm2254_vm6, %v2238_v38 }
 0x409   : > { %2152 = vmatmul.mubr.f32.gmra.mrb[44].mxu0 %v5298_v53 }
 0x40a   : > { %3006 = vmatmul.mubr.msk.f32.gmra.mrb[44].mxu1 %vm2254_vm6, %v2239_v31  ;;  %2934 = vmatprep.mubr.msk.f32.mxu0 %vm765_vm0, %v5300_v21 }
 0x40b   : > { %3008 = vmatprep.mubr.msk.f32.mxu1 %vm2254_vm6, %v2240_v32 }
 0x40d   : > { %2157 = vmatmul.mubr.f32.gmra.mrb[46].mxu0 %v5310_v57  ;;  %v1375_v57 = vld [vmem:[#allocation3 + $0x18] sm:$0xff] }
 0x40e   : > { %3009 = vmatmul.mubr.msk.f32.gmra.mrb[46].mxu1 %vm2254_vm6, %v2241_v33  ;;  %2935 = vmatprep.mubr.msk.f32.mxu0 %vm765_vm0, %v5312_v59 }
 0x40f   : > { %3011 = vmatprep.mubr.msk.f32.mxu1 %vm2254_vm6, %v2242_v41 }
 0x411   : > { %2162 = vmatmul.mubr.f32.gmra.mrb[48].mxu0 %v5322_v5 }
 0x412   : > { %3012 = vmatmul.mubr.msk.f32.gmra.mrb[48].mxu1 %vm2254_vm6, %v2243_v44  ;;  %2936 = vmatprep.mubr.msk.f32.mxu0 %vm765_vm0, %v5324_v7 }
 0x413   : > { %3014 = vmatprep.mubr.msk.f32.mxu1 %vm2254_vm6, %v2244_v36  ;;  %v1380_v36 = vld [vmem:[#allocation3 + $0x40] sm:$0xff] }
 0x415   : > { %2167 = vmatmul.mubr.f32.gmra.mrb[50].mxu0 %v5334_v11 }
 0x416   : > { %3015 = vmatmul.mubr.msk.f32.gmra.mrb[50].mxu1 %vm2254_vm6, %v2245_v39  ;;  %2937 = vmatprep.mubr.msk.f32.mxu0 %vm765_vm0, %v5336_v14 }
 0x417   : > { %3017 = vmatprep.mubr.msk.f32.mxu1 %vm2254_vm6, %v2246_v37 }
 0x419   : > { %2172 = vmatmul.mubr.f32.gmra.mrb[52].mxu0 %v5346_v16  ;;  %v1377_v16 = vld [vmem:[#allocation3 + $0x28] sm:$0xff] }
 0x41a   : > { %3018 = vmatmul.mubr.msk.f32.gmra.mrb[52].mxu1 %vm2254_vm6, %v2247_v40  ;;  %2938 = vmatprep.mubr.msk.f32.mxu0 %vm765_vm0, %v5348_v15 }
 0x41b   : > { %3020 = vmatprep.mubr.msk.f32.mxu1 %vm2254_vm6, %v2248_v42 }
 0x41d   : > { %2177 = vmatmul.mubr.f32.gmra.mrb[54].mxu0 %v5356_v4 }
 0x41e   : > { %3021 = vmatmul.mubr.msk.f32.gmra.mrb[54].mxu1 %vm2254_vm6, %v2249_v43 }
 0x484   : > { %v1526_v47 = vpop.f32.mrb[0].mxu0 }
 0x485   : > { %v1605_v48 = vadd.f32 %v1526_v47, %v1372_v45  ;;  %v1528_v49 = vpop.f32.mrb[1].mxu0  ;;  %v1824_v60 = vpop.f32.mrb[0].mxu1 }
 0x486   : > { %v1826_v63 = vpop.f32.mrb[1].mxu1 }
 0x487   : > { %1621 = vst.msk [vmem:[#allocation3] sm:$0xff] %vm765_vm0, %v1605_v48  ;;  %v1381_v48 = vld [vmem:[#allocation3 + $0x48] sm:$0xff] }
 0x488   : > { %v1531_v1 = vpop.f32.mrb[2].mxu0 }
 0x489   : > { %v1606_v50 = vadd.f32 %v1531_v1, %v1373_v61  ;;  %v1533_v2 = vpop.f32.mrb[3].mxu0  ;;  %v1829_v52 = vpop.f32.mrb[2].mxu1 }
 0x48a   : > { %v1831_v3 = vpop.f32.mrb[3].mxu1 }
 0x48b   : > { %1622 = vst.msk [vmem:[#allocation3 + $0x8] sm:$0xff] %vm765_vm0, %v1606_v50 }
 0x48c   : > { %v1536_v53 = vpop.f32.mrb[4].mxu0 }
 0x48d   : > { %v1607_v54 = vadd.f32 %v1536_v53, %v1374_v46  ;;  %v1538_v21 = vpop.f32.mrb[5].mxu0  ;;  %v1834_v55 = vpop.f32.mrb[4].mxu1 }
 0x48e   : > { %v1669_v56 = vld [vmem:[#allocation3] sm:$0xff]  ;;  %v1836_v58 = vpop.f32.mrb[5].mxu1 }
 0x48f   : > { %1623 = vst.msk [vmem:[#allocation3 + $0x10] sm:$0xff] %vm765_vm0, %v1607_v54  ;;  %v1903_v59 = vadd.f32 %v1824_v60, %v1669_v56 }
 0x490   : > { %v1541_v51 = vpop.f32.mrb[6].mxu0 }
 0x491   : > { %1919 = vst.msk [vmem:[#allocation3] sm:$0xff] %vm765_vm0, %v1903_v59  ;;  %v1608_v62 = vadd.f32 %v1541_v51, %v1375_v57  ;;  %v1543_v5 = vpop.f32.mrb[7].mxu0  ;;  %v1839_v6 = vpop.f32.mrb[6].mxu1  ;;  %v1383_v57 = vld [vmem:[#allocation3 + $0x58] sm:$0xff] }
 0x492   : > { %v1670_v7 = vld [vmem:[#allocation3 + $0x8] sm:$0xff]  ;;  %v1841_v12 = vpop.f32.mrb[7].mxu1 }
 0x493   : > { %1624 = vst.msk [vmem:[#allocation3 + $0x18] sm:$0xff] %vm765_vm0, %v1608_v62  ;;  %v1904_v9 = vadd.f32 %v1829_v52, %v1670_v7  ;;  %v1382_v52 = vld [vmem:[#allocation3 + $0x50] sm:$0xff] }
 0x494   : > { %v1546_v10 = vpop.f32.mrb[8].mxu0 }
 0x495   : > { %1920 = vst.msk [vmem:[#allocation3 + $0x8] sm:$0xff] %vm765_vm0, %v1904_v9  ;;  %v1609_v11 = vadd.f32 %v1546_v10, %v1376_v8  ;;  %v1548_v13 = vpop.f32.mrb[9].mxu0  ;;  %v1844_v14 = vpop.f32.mrb[8].mxu1  ;;  %v1384_v8 = vld [vmem:[#allocation3 + $0x60] sm:$0xff] }
 0x496   : > { %v1671_v0 = vld [vmem:[#allocation3 + $0x10] sm:$0xff]  ;;  %v1846_v15 = vpop.f32.mrb[9].mxu1 }
 0x497   : > { %1625 = vst.msk [vmem:[#allocation3 + $0x20] sm:$0xff] %vm765_vm0, %v1609_v11  ;;  %v1905_v4 = vadd.f32 %v1834_v55, %v1671_v0 }
 0x498   : > { %v1551_v18 = vpop.f32.mrb[10].mxu0 }
 0x499   : > { %1921 = vst.msk [vmem:[#allocation3 + $0x10] sm:$0xff] %vm765_vm0, %v1905_v4  ;;  %v1610_v19 = vadd.f32 %v1551_v18, %v1377_v16  ;;  %v1553_v20 = vpop.f32.mrb[11].mxu0  ;;  %v1849_v22 = vpop.f32.mrb[10].mxu1  ;;  %v1385_v16 = vld [vmem:[#allocation3 + $0x68] sm:$0xff] }
 0x49a   : > { %v1672_v23 = vld [vmem:[#allocation3 + $0x18] sm:$0xff]  ;;  %v1851_v17 = vpop.f32.mrb[11].mxu1 }
 0x49b   : > { %1626 = vst.msk [vmem:[#allocation3 + $0x28] sm:$0xff] %vm765_vm0, %v1610_v19  ;;  %v1906_v25 = vadd.f32 %v1839_v6, %v1672_v23 }
 0x49c   : > { %v1556_v34 = vpop.f32.mrb[12].mxu0 }
 0x49d   : > { %1922 = vst.msk [vmem:[#allocation3 + $0x18] sm:$0xff] %vm765_vm0, %v1906_v25  ;;  %v1611_v35 = vadd.f32 %v1556_v34, %v1378_v24  ;;  %v1558_v26 = vpop.f32.mrb[13].mxu0  ;;  %v1854_v27 = vpop.f32.mrb[12].mxu1  ;;  %v1386_v24 = vld [vmem:[#allocation3 + $0x70] sm:$0xff] }
 0x49e   : > { %v1673_v28 = vld [vmem:[#allocation3 + $0x20] sm:$0xff]  ;;  %v1856_v30 = vpop.f32.mrb[13].mxu1 }
 0x49f   : > { %1627 = vst.msk [vmem:[#allocation3 + $0x30] sm:$0xff] %vm765_vm0, %v1611_v35  ;;  %v1907_v38 = vadd.f32 %v1844_v14, %v1673_v28 }
 0x4a0   : > { %v1561_v31 = vpop.f32.mrb[14].mxu0 }
 0x4a1   : > { %1923 = vst.msk [vmem:[#allocation3 + $0x20] sm:$0xff] %vm765_vm0, %v1907_v38  ;;  %v1612_v32 = vadd.f32 %v1561_v31, %v1379_v29  ;;  %v1563_v33 = vpop.f32.mrb[15].mxu0  ;;  %v1859_v41 = vpop.f32.mrb[14].mxu1  ;;  %v1387_v29 = vld [vmem:[#allocation3 + $0x78] sm:$0xff] }
 0x4a2   : > { %v1674_v44 = vld [vmem:[#allocation3 + $0x28] sm:$0xff]  ;;  %v1861_v39 = vpop.f32.mrb[15].mxu1 }
 0x4a3   : > { %1628 = vst.msk [vmem:[#allocation3 + $0x38] sm:$0xff] %vm765_vm0, %v1612_v32  ;;  %v1908_v37 = vadd.f32 %v1849_v22, %v1674_v44 }
 0x4a4   : > { %v1566_v40 = vpop.f32.mrb[16].mxu0 }
 0x4a5   : > { %1924 = vst.msk [vmem:[#allocation3 + $0x28] sm:$0xff] %vm765_vm0, %v1908_v37  ;;  %v1613_v42 = vadd.f32 %v1566_v40, %v1380_v36  ;;  %v1568_v43 = vpop.f32.mrb[17].mxu0  ;;  %v1864_v45 = vpop.f32.mrb[16].mxu1  ;;  %v1968_v37 = vld [vmem:[#allocation3] sm:$0xff] }
 0x4a6   : > { %v1675_v47 = vld [vmem:[#allocation3 + $0x30] sm:$0xff]  ;;  %v1866_v49 = vpop.f32.mrb[17].mxu1 }
 0x4a7   : > { %1629 = vst.msk [vmem:[#allocation3 + $0x40] sm:$0xff] %vm765_vm0, %v1613_v42  ;;  %v1909_v60 = vadd.f32 %v1854_v27, %v1675_v47 }
 0x4a8   : > { %v1571_v61 = vpop.f32.mrb[18].mxu0 }
 0x4a9   : > { %1925 = vst.msk [vmem:[#allocation3 + $0x30] sm:$0xff] %vm765_vm0, %v1909_v60  ;;  %v1614_v63 = vadd.f32 %v1571_v61, %v1381_v48  ;;  %v1573_v1 = vpop.f32.mrb[19].mxu0  ;;  %v1869_v50 = vpop.f32.mrb[18].mxu1  ;;  %v1969_v60 = vld [vmem:[#allocation3 + $0x8] sm:$0xff] }
 0x4aa   : > { %v1676_v2 = vld [vmem:[#allocation3 + $0x38] sm:$0xff]  ;;  %v1871_v46 = vpop.f32.mrb[19].mxu1 }
 0x4ab   : > { %1630 = vst.msk [vmem:[#allocation3 + $0x48] sm:$0xff] %vm765_vm0, %v1614_v63  ;;  %v1910_v3 = vadd.f32 %v1859_v41, %v1676_v2 }
 0x4ac   : > { %v1576_v53 = vpop.f32.mrb[20].mxu0 }
 0x4ad   : > { %1926 = vst.msk [vmem:[#allocation3 + $0x38] sm:$0xff] %vm765_vm0, %v1910_v3  ;;  %v1615_v54 = vadd.f32 %v1576_v53, %v1382_v52  ;;  %v1578_v21 = vpop.f32.mrb[21].mxu0  ;;  %v1874_v55 = vpop.f32.mrb[20].mxu1 }
 0x4ae   : > { %v1677_v56 = vld [vmem:[#allocation3 + $0x40] sm:$0xff]  ;;  %v1876_v58 = vpop.f32.mrb[21].mxu1 }
 0x4af   : > { %1631 = vst.msk [vmem:[#allocation3 + $0x50] sm:$0xff] %vm765_vm0, %v1615_v54  ;;  %v1911_v59 = vadd.f32 %v1864_v45, %v1677_v56  ;;  %v1970_v54 = vld [vmem:[#allocation3 + $0x10] sm:$0xff] }
 0x4b0   : > { %v1581_v51 = vpop.f32.mrb[22].mxu0 }
 0x4b1   : > { %1927 = vst.msk [vmem:[#allocation3 + $0x40] sm:$0xff] %vm765_vm0, %v1911_v59  ;;  %v1616_v62 = vadd.f32 %v1581_v51, %v1383_v57  ;;  %v1583_v5 = vpop.f32.mrb[23].mxu0  ;;  %v1879_v6 = vpop.f32.mrb[22].mxu1 }
 0x4b2   : > { %v1678_v7 = vld [vmem:[#allocation3 + $0x48] sm:$0xff]  ;;  %v1881_v12 = vpop.f32.mrb[23].mxu1 }
 0x4b3   : > { %1632 = vst.msk [vmem:[#allocation3 + $0x58] sm:$0xff] %vm765_vm0, %v1616_v62  ;;  %v1912_v9 = vadd.f32 %v1869_v50, %v1678_v7  ;;  %v1971_v62 = vld [vmem:[#allocation3 + $0x18] sm:$0xff] }
 0x4b4   : > { %v1586_v10 = vpop.f32.mrb[24].mxu0 }
 0x4b5   : > { %1928 = vst.msk [vmem:[#allocation3 + $0x48] sm:$0xff] %vm765_vm0, %v1912_v9  ;;  %v1617_v11 = vadd.f32 %v1586_v10, %v1384_v8  ;;  %v1588_v13 = vpop.f32.mrb[25].mxu0  ;;  %v1884_v14 = vpop.f32.mrb[24].mxu1 }
 0x4b6   : > { %v1679_v0 = vld [vmem:[#allocation3 + $0x50] sm:$0xff]  ;;  %v1886_v15 = vpop.f32.mrb[25].mxu1  ;;  %v5477_v13 = vld [vmem:[#allocation18] ss:$0 sm:$0xff] }
 0x4b7   : > { %1633 = vst.msk [vmem:[#allocation3 + $0x60] sm:$0xff] %vm765_vm0, %v1617_v11  ;;  %v1913_v4 = vadd.f32 %v1874_v55, %v1679_v0  ;;  %v1972_v15 = vld [vmem:[#allocation3 + $0x20] sm:$0xff] }
 0x4b8   : > { %v1591_v18 = vpop.f32.mrb[26].mxu0 }
 0x4b9   : > { %1929 = vst.msk [vmem:[#allocation3 + $0x50] sm:$0xff] %vm765_vm0, %v1913_v4  ;;  %v1618_v19 = vadd.f32 %v1591_v18, %v1385_v16  ;;  %v1593_v20 = vpop.f32.mrb[27].mxu0  ;;  %v1889_v22 = vpop.f32.mrb[26].mxu1 }
 0x4ba   : > { %v1680_v23 = vld [vmem:[#allocation3 + $0x58] sm:$0xff]  ;;  %v1891_v17 = vpop.f32.mrb[27].mxu1 }
 0x4bb   : > { %1634 = vst.msk [vmem:[#allocation3 + $0x68] sm:$0xff] %vm765_vm0, %v1618_v19  ;;  %v1914_v25 = vadd.f32 %v1879_v6, %v1680_v23 }
 0x4bc   : > { %v1596_v34 = vpop.f32.mrb[28].mxu0 }
 0x4bd   : > { %1930 = vst.msk [vmem:[#allocation3 + $0x58] sm:$0xff] %vm765_vm0, %v1914_v25  ;;  %v1619_v35 = vadd.f32 %v1596_v34, %v1386_v24  ;;  %v1598_v26 = vpop.f32.mrb[29].mxu0  ;;  %v1894_v27 = vpop.f32.mrb[28].mxu1 }
 0x4be   : > { %v1681_v28 = vld [vmem:[#allocation3 + $0x60] sm:$0xff]  ;;  %v1896_v30 = vpop.f32.mrb[29].mxu1 }
 0x4bf   : > { %1635 = vst.msk [vmem:[#allocation3 + $0x70] sm:$0xff] %vm765_vm0, %v1619_v35  ;;  %v1915_v38 = vadd.f32 %v1884_v14, %v1681_v28  ;;  %v1973_v28 = vld [vmem:[#allocation3 + $0x28] sm:$0xff] }
 0x4c0   : > { %v1601_v31 = vpop.f32.mrb[30].mxu0 }
 0x4c1   : > { %1931 = vst.msk [vmem:[#allocation3 + $0x60] sm:$0xff] %vm765_vm0, %v1915_v38  ;;  %v1620_v32 = vadd.f32 %v1601_v31, %v1387_v29  ;;  %v1603_v33 = vpop.f32.mrb[31].mxu0  ;;  %v1899_v41 = vpop.f32.mrb[30].mxu1 }
 0x4c2   : > { %v1682_v44 = vld [vmem:[#allocation3 + $0x68] sm:$0xff]  ;;  %v1901_v36 = vpop.f32.mrb[31].mxu1 }
 0x4c3   : > { %1636 = vst.msk [vmem:[#allocation3 + $0x78] sm:$0xff] %vm765_vm0, %v1620_v32  ;;  %v1916_v39 = vadd.f32 %v1889_v22, %v1682_v44  ;;  %v5482_v22 = vld [vmem:[#allocation22] ss:$0 sm:$0xff] }
 0x4c4   : > { %v2123_v40 = vpop.f32.mrb[32].mxu0 }
 0x4c5   : > { %1932 = vst.msk [vmem:[#allocation3 + $0x68] sm:$0xff] %vm765_vm0, %v1916_v39  ;;  %v2202_v42 = vadd.f32 %v2123_v40, %v1968_v37  ;;  %v2125_v43 = vpop.f32.mrb[33].mxu0  ;;  %v2183_v45 = vpop.f32.mrb[32].mxu1  ;;  %v1974_v39 = vld [vmem:[#allocation3 + $0x30] sm:$0xff] }
 0x4c6   : > { %v1683_v47 = vld [vmem:[#allocation3 + $0x70] sm:$0xff]  ;;  %v2185_v48 = vpop.f32.mrb[33].mxu1 }
 0x4c7   : > { %2218 = vst.msk [vmem:[#allocation3] sm:$0xff] %vm765_vm0, %v2202_v42  ;;  %v1917_v49 = vadd.f32 %v1894_v27, %v1683_v47 }
 0x4c8   : > { %v2128_v61 = vpop.f32.mrb[34].mxu0  ;;  %v1980_v63 = vld [vmem:[#allocation3 + $0x60] sm:$0xff] }
 0x4c9   : > { %1933 = vst.msk [vmem:[#allocation3 + $0x70] sm:$0xff] %vm765_vm0, %v1917_v49  ;;  %v2203_v1 = vadd.f32 %v2128_v61, %v1969_v60  ;;  %v2130_v50 = vpop.f32.mrb[35].mxu0  ;;  %v2214_v2 = vadd.f32 %v2183_v45, %v1980_v63  ;;  %v2188_v52 = vpop.f32.mrb[34].mxu1  ;;  %v1975_v63 = vld [vmem:[#allocation3 + $0x38] sm:$0xff] }
 0x4ca   : > { %v1684_v46 = vld [vmem:[#allocation3 + $0x78] sm:$0xff]  ;;  %v2190_v3 = vpop.f32.mrb[35].mxu1 }
 0x4cb   : > { %v1918_v53 = vadd.f32 %v1899_v41, %v1684_v46  ;;  %2219 = vst.msk [vmem:[#allocation3 + $0x8] sm:$0xff] %vm765_vm0, %v2203_v1  ;;  %2230 = vst.msk [vmem:[#allocation3 + $0x60] sm:$0xff] %vm765_vm0, %v2214_v2 }
 0x4cc   : > { %v2133_v21 = vpop.f32.mrb[36].mxu0  ;;  %v1981_v55 = vld [vmem:[#allocation3 + $0x68] sm:$0xff] }
 0x4cd   : > { %1934 = vst.msk [vmem:[#allocation3 + $0x78] sm:$0xff] %vm765_vm0, %v1918_v53  ;;  %v2204_v56 = vadd.f32 %v2133_v21, %v1970_v54  ;;  %v2135_v57 = vpop.f32.mrb[37].mxu0  ;;  %v2215_v58 = vadd.f32 %v2188_v52, %v1981_v55  ;;  %v2193_v59 = vpop.f32.mrb[36].mxu1  ;;  %v1976_v55 = vld [vmem:[#allocation3 + $0x40] sm:$0xff] }
 0x4ce   : > { %v2195_v51 = vpop.f32.mrb[37].mxu1  ;;  %v2448_v14 = vld [vmem:[#allocation3] sm:$0xff] }
 0x4cf   : > { %2220 = vst.msk [vmem:[#allocation3 + $0x10] sm:$0xff] %vm765_vm0, %v2204_v56  ;;  %2231 = vst.msk [vmem:[#allocation3 + $0x68] sm:$0xff] %vm765_vm0, %v2215_v58  ;;  %v2471_v24 = vadd.f32 %v5477_v13, %v2448_v14 }
 0x4d0   : > { %v2138_v5 = vpop.f32.mrb[38].mxu0  ;;  %v1982_v6 = vld [vmem:[#allocation3 + $0x70] sm:$0xff] }
 0x4d1   : > { %v2205_v7 = vadd.f32 %v2138_v5, %v1971_v62  ;;  %v2216_v8 = vadd.f32 %v2193_v59, %v1982_v6  ;;  %v2140_v12 = vpop.f32.mrb[39].mxu0  ;;  %v2198_v9 = vpop.f32.mrb[38].mxu1 }
 0x4d2   : > { %v2200_v10 = vpop.f32.mrb[39].mxu1  ;;  %v2449_v11 = vld [vmem:[#allocation3 + $0x8] sm:$0xff] }
 0x4d3   : > { %2221 = vst.msk [vmem:[#allocation3 + $0x18] sm:$0xff] %vm765_vm0, %v2205_v7  ;;  %2232 = vst.msk [vmem:[#allocation3 + $0x70] sm:$0xff] %vm765_vm0, %v2216_v8  ;;  %v2472_v0 = vadd.f32 %v5477_v13, %v2449_v11  ;;  %v1977_v8 = vld [vmem:[#allocation3 + $0x48] sm:$0xff] }
 0x4d4   : > { %v1983_v16 = vld [vmem:[#allocation3 + $0x78] sm:$0xff]  ;;  %v2143_v4 = vpop.f32.mrb[40].mxu0 }
 0x4d5   : > { %v2217_v18 = vadd.f32 %v2198_v9, %v1983_v16  ;;  %v2206_v19 = vadd.f32 %v2143_v4, %v1972_v15  ;;  %v3001_v20 = vpop.f32.mrb[40].mxu1  ;;  %v2145_v23 = vpop.f32.mrb[41].mxu0  ;;  %v2460_v4 = vld [vmem:[#allocation3 + $0x60] sm:$0xff] }
 0x4d6   : > { %v2488_v17 = vadd.f32 %v3001_v20, %v2472_v0  ;;  %v2369_v25 = vpop.f32.mrb[41].mxu1  ;;  %v2450_v34 = vld [vmem:[#allocation3 + $0x10] sm:$0xff]  ;;  %v2461_v0 = vld [vmem:[#allocation3 + $0x68] sm:$0xff] }
 0x4d7   : > { %2233 = vst.msk [vmem:[#allocation3 + $0x78] sm:$0xff] %vm765_vm0, %v2217_v18  ;;  %2222 = vst.msk [vmem:[#allocation3 + $0x20] sm:$0xff] %vm765_vm0, %v2206_v19  ;;  %v2487_v35 = vadd.f32 %v2471_v24, %v2369_v25  ;;  %v2473_v26 = vadd.f32 %v5477_v13, %v2450_v34  ;;  %v1978_v20 = vld [vmem:[#allocation3 + $0x50] sm:$0xff]  ;;  %v2484_v24 = vadd.f32 %v5477_v13, %v2461_v0 }
 0x4d8   : > { %v2511_v27 = vadd.f32 %v5482_v22, %v2488_v17  ;;  %v2148_v29 = vpop.f32.mrb[42].mxu0 }
 0x4d9   : > { %v2510_v30 = vadd.f32 %v5482_v22, %v2487_v35  ;;  %v2207_v38 = vadd.f32 %v2148_v29, %v1973_v28  ;;  %v3004_v31 = vpop.f32.mrb[42].mxu1  ;;  %v2150_v32 = vpop.f32.mrb[43].mxu0 }
 0x4da   : > { %2527 = vst.msk [vmem:[%s5112_s21 + $0x8] sm:$0xff] %vm765_vm0, %v2511_v27  ;;  %v2451_v33 = vld [vmem:[#allocation3 + $0x18] sm:$0xff]  ;;  %v2379_v41 = vpop.f32.mrb[43].mxu1 }
 0x4db   : > { %2526 = vst.msk [vmem:[%s5112_s21] sm:$0xff] %vm765_vm0, %v2510_v30  ;;  %2223 = vst.msk [vmem:[#allocation3 + $0x28] sm:$0xff] %vm765_vm0, %v2207_v38  ;;  %v2474_v44 = vadd.f32 %v5477_v13, %v2451_v33  ;;  %v2489_v36 = vadd.f32 %v2473_v26, %v2379_v41  ;;  %v2483_v26 = vadd.f32 %v5477_v13, %v2460_v4  ;;  %v2462_v38 = vld [vmem:[#allocation3 + $0x70] sm:$0xff] }
 0x4dc   : > { %v2153_v37 = vpop.f32.mrb[44].mxu0 }
 0x4dd   : > { %v2490_v40 = vadd.f32 %v3004_v31, %v2474_v44  ;;  %v2512_v42 = vadd.f32 %v5482_v22, %v2489_v36  ;;  %v2208_v43 = vadd.f32 %v2153_v37, %v1974_v39  ;;  %v2155_v45 = vpop.f32.mrb[45].mxu0  ;;  %v3007_v47 = vpop.f32.mrb[44].mxu1  ;;  %v1979_v44 = vld [vmem:[#allocation3 + $0x58] sm:$0xff] }
 0x4de   : > { %v2389_v48 = vpop.f32.mrb[45].mxu1  ;;  %v2452_v49 = vld [vmem:[#allocation3 + $0x20] sm:$0xff]  ;;  %v2463_v27 = vld [vmem:[#allocation3 + $0x78] sm:$0xff] }
 0x4df   : > { %v2513_v60 = vadd.f32 %v5482_v22, %v2490_v40  ;;  %2528 = vst.msk [vmem:[%s5112_s21 + $0x10] sm:$0xff] %vm765_vm0, %v2512_v42  ;;  %2224 = vst.msk [vmem:[#allocation3 + $0x30] sm:$0xff] %vm765_vm0, %v2208_v43  ;;  %v2475_v61 = vadd.f32 %v5477_v13, %v2452_v49  ;;  %v2486_v39 = vadd.f32 %v5477_v13, %v2463_v27 }
 0x4e0   : > { %v2158_v1 = vpop.f32.mrb[46].mxu0 }
 0x4e1   : > { %2529 = vst.msk [vmem:[%s5112_s21 + $0x18] sm:$0xff] %vm765_vm0, %v2513_v60  ;;  %v2209_v50 = vadd.f32 %v2158_v1, %v1975_v63  ;;  %v2491_v2 = vadd.f32 %v2475_v61, %v2389_v48  ;;  %v2160_v52 = vpop.f32.mrb[47].mxu0  ;;  %v3010_v46 = vpop.f32.mrb[46].mxu1 }
 0x4e2   : > { %v2453_v3 = vld [vmem:[#allocation3 + $0x28] sm:$0xff]  ;;  %v2399_v53 = vpop.f32.mrb[47].mxu1 }
 0x4e3   : > { %v2476_v54 = vadd.f32 %v5477_v13, %v2453_v3  ;;  %2225 = vst.msk [vmem:[#allocation3 + $0x38] sm:$0xff] %vm765_vm0, %v2209_v50  ;;  %v2514_v21 = vadd.f32 %v5482_v22, %v2491_v2 }
 0x4e4   : > { %v2163_v56 = vpop.f32.mrb[48].mxu0 }
 0x4e5   : > { %v2492_v57 = vadd.f32 %v3007_v47, %v2476_v54  ;;  %2530 = vst.msk [vmem:[%s5112_s21 + $0x20] sm:$0xff] %vm765_vm0, %v2514_v21  ;;  %v2210_v58 = vadd.f32 %v2163_v56, %v1976_v55  ;;  %v2165_v59 = vpop.f32.mrb[49].mxu0  ;;  %v3013_v51 = vpop.f32.mrb[48].mxu1  ;;  %v2485_v47 = vadd.f32 %v5477_v13, %v2462_v38 }
 0x4e6   : > { %v2454_v62 = vld [vmem:[#allocation3 + $0x30] sm:$0xff]  ;;  %v2409_v5 = vpop.f32.mrb[49].mxu1 }
 0x4e7   : > { %v2515_v6 = vadd.f32 %v5482_v22, %v2492_v57  ;;  %2226 = vst.msk [vmem:[#allocation3 + $0x40] sm:$0xff] %vm765_vm0, %v2210_v58  ;;  %v2477_v7 = vadd.f32 %v5477_v13, %v2454_v62 }
 0x4e8   : > { %v2168_v12 = vpop.f32.mrb[50].mxu0 }
 0x4e9   : > { %2531 = vst.msk [vmem:[%s5112_s21 + $0x28] sm:$0xff] %vm765_vm0, %v2515_v6  ;;  %v2493_v9 = vadd.f32 %v2477_v7, %v2399_v53  ;;  %v2211_v10 = vadd.f32 %v2168_v12, %v1977_v8  ;;  %v2170_v11 = vpop.f32.mrb[51].mxu0  ;;  %v5514_v14 = vpop.f32.mrb[50].mxu1 }
 0x4ea   : > { %v2455_v16 = vld [vmem:[#allocation3 + $0x38] sm:$0xff]  ;;  %v2419_v15 = vpop.f32.mrb[51].mxu1 }
 0x4eb   : > { %v2478_v18 = vadd.f32 %v5477_v13, %v2455_v16  ;;  %v2516_v19 = vadd.f32 %v5482_v22, %v2493_v9  ;;  %2227 = vst.msk [vmem:[#allocation3 + $0x48] sm:$0xff] %vm765_vm0, %v2211_v10 }
 0x4ec   : > { %v2173_v23 = vpop.f32.mrb[52].mxu0 }
 0x4ed   : > { %v2494_v17 = vadd.f32 %v3010_v46, %v2478_v18  ;;  %2532 = vst.msk [vmem:[%s5112_s21 + $0x30] sm:$0xff] %vm765_vm0, %v2516_v19  ;;  %v2212_v25 = vadd.f32 %v2173_v23, %v1978_v20  ;;  %v3019_v34 = vpop.f32.mrb[52].mxu1  ;;  %v2175_v35 = vpop.f32.mrb[53].mxu0 }
 0x4ee   : > { %v2456_v28 = vld [vmem:[#allocation3 + $0x40] sm:$0xff]  ;;  %v2500_v29 = vadd.f32 %v3019_v34, %v2484_v24  ;;  %v2429_v30 = vpop.f32.mrb[53].mxu1 }
 0x4ef   : > { %v2517_v31 = vadd.f32 %v5482_v22, %v2494_v17  ;;  %v2479_v32 = vadd.f32 %v5477_v13, %v2456_v28  ;;  %2228 = vst.msk [vmem:[#allocation3 + $0x50] sm:$0xff] %vm765_vm0, %v2212_v25  ;;  %v2499_v33 = vadd.f32 %v2483_v26, %v2429_v30 }
 0x4f0   : > { %v2523_v41 = vadd.f32 %v5482_v22, %v2500_v29  ;;  %v2178_v36 = vpop.f32.mrb[54].mxu0 }
 0x4f1   : > { %2533 = vst.msk [vmem:[%s5112_s21 + $0x38] sm:$0xff] %vm765_vm0, %v2517_v31  ;;  %v2495_v37 = vadd.f32 %v2479_v32, %v2409_v5  ;;  %v2522_v40 = vadd.f32 %v5482_v22, %v2499_v33  ;;  %v2213_v42 = vadd.f32 %v2178_v36, %v1979_v44  ;;  %v3022_v43 = vpop.f32.mrb[54].mxu1  ;;  %v2180_v45 = vpop.f32.mrb[55].mxu0 }
 0x4f2   : > { %v2457_v48 = vld [vmem:[#allocation3 + $0x48] sm:$0xff]  ;;  %2539 = vst.msk [vmem:[%s5112_s21 + $0x68] sm:$0xff] %vm765_vm0, %v2523_v41  ;;  %v2502_v49 = vadd.f32 %v3022_v43, %v2486_v39  ;;  %v2439_v60 = vpop.f32.mrb[55].mxu1 }
 0x4f3   : > { %v2480_v61 = vadd.f32 %v5477_v13, %v2457_v48  ;;  %v2518_v63 = vadd.f32 %v5482_v22, %v2495_v37  ;;  %2538 = vst.msk [vmem:[%s5112_s21 + $0x60] sm:$0xff] %vm765_vm0, %v2522_v40  ;;  %2229 = vst.msk [vmem:[#allocation3 + $0x58] sm:$0xff] %vm765_vm0, %v2213_v42  ;;  %v2501_v1 = vadd.f32 %v2485_v47, %v2439_v60 }
 0x4f4   : > { %v2525_v50 = vadd.f32 %v5482_v22, %v2502_v49 }
 0x4f5   : > { %v2496_v2 = vadd.f32 %v3013_v51, %v2480_v61  ;;  %2534 = vst.msk [vmem:[%s5112_s21 + $0x40] sm:$0xff] %vm765_vm0, %v2518_v63  ;;  %v2524_v52 = vadd.f32 %v5482_v22, %v2501_v1 }
 0x4f6   : > { %v2458_v46 = vld [vmem:[#allocation3 + $0x50] sm:$0xff]  ;;  %2541 = vst.msk [vmem:[%s5112_s21 + $0x78] sm:$0xff] %vm765_vm0, %v2525_v50 }
 0x4f7   : > { %v2519_v3 = vadd.f32 %v5482_v22, %v2496_v2  ;;  %v2481_v53 = vadd.f32 %v5477_v13, %v2458_v46  ;;  %2540 = vst.msk [vmem:[%s5112_s21 + $0x70] sm:$0xff] %vm765_vm0, %v2524_v52 }
 0x4f9   : > { %2535 = vst.msk [vmem:[%s5112_s21 + $0x48] sm:$0xff] %vm765_vm0, %v2519_v3  ;;  %v2497_v54 = vadd.f32 %v2481_v53, %v2419_v15 }
 0x4fa   : > { %v2459_v21 = vld [vmem:[#allocation3 + $0x58] sm:$0xff] }
 0x4fb   : > { %v2520_v55 = vadd.f32 %v5482_v22, %v2497_v54  ;;  %v2482_v56 = vadd.f32 %v5477_v13, %v2459_v21 }
 0x4fd   : > { %2536 = vst.msk [vmem:[%s5112_s21 + $0x50] sm:$0xff] %vm765_vm0, %v2520_v55  ;;  %v2498_v57 = vadd.f32 %v5514_v14, %v2482_v56 }
 0x4ff   : > { %v2521_v58 = vadd.f32 %v5482_v22, %v2498_v57 }
 0x501   : > { %2537 = vst.msk [vmem:[%s5112_s21 + $0x58] sm:$0xff] %vm765_vm0, %v2521_v58 }
 0x502   : > { %3849 = shalt.err (!%p3846_p9)
}
 0x503   : > { %s3850_s13 = scalar_lea.hbm %s5562_s15, 2048  ;;  %s3854_s27 = scalar_lea.hbm %s5860_s12, 8192 }
 0x504   : > { %p3851_p2 = scmp.ne.s32.totalorder %s5562_s15, %s3850_s13  ;;  %p3855_p0 = scmp.lt.u32.totalorder %s5562_s15, %s5860_s12 }
 0x505   : > { %p3856_p1 = scmp.lt.u32.totalorder %s3854_s27, %s3850_s13  ;;  %p3858_p10 = scmp.lt.u32.totalorder %s3850_s13, %s5562_s15 }
 0x506   : > { %p3852_p7 = pnand %p3851_p2, %p5861_p3 }
 0x507   : > { %p3857_p5 = por %p3856_p1, %p3855_p0 }
 0x508   : > { %p3853_p11 = pneg %p3852_p7 }
 0x509   : > { %p3859_p12 = por %p3858_p10, %p3857_p5 }
 0x50b   : > { %p3860_p13 = pnand %p3859_p12, %p3853_p11 }
 0x50d   : > { %3863 = shalt.err (!%p3860_p13)
}
 0x50e   : > { %s4060_s14 = smov 128   ;;  %s4061_s3 = smov 8  }
 0x50f   : > { %3199 = dma.vmem_to_hbm [thread:$0]  (%p5861_p3), %s5564_s4, 2048, %s5562_s15, %s5571_s28, %s4060_s14, %s4060_s14, %s4061_s3  }
 0x510 PF: > { %s5862_s29 = sld [smem:[#allocation39_spill]]  ;;  %s5863_s26 = sld [smem:[#allocation53_spill]] }
 0x511   : > { %p3256_p6 = scmp.ge.s32.totalorder %s4038_s19, 2 }
 0x516   : > { %s2574_s16 = sand.u32 1, %s5862_s29   ;;  %p5864_p8 = scmp.ne.s32.totalorder %s5863_s26, 0 }
 0x517   : > { %s2575_s1 = scalar_lea.sflag [#allocation6], %s2574_s16 }
 0x518   : > { %p3240_p4 = pnand %p3256_p6, %p5864_p8 }
 0x51a   : > { %3969 = dma.done.wait (!%p3240_p4), %s2575_s1, 2048  }
 0x51b   : > { %3971 = vsyncadd (!%p3240_p4), %s2575_s1, 4294965248  ;;  %s40_s19 = sadd.s32 1, %s4038_s19   ;;  %s5866_s21 = sld [smem:[#allocation35_spill]] }
 0x51c   : > { %p5600_p9 = scmp.ge.s32.totalorder %s40_s19, 6   ;;  %s5867_s25 = sld [smem:[#allocation57_spill]] }
 0x51d   : > { %s5868_s4 = sld [smem:[#allocation37_spill]]  ;;  %s5869_s30 = sld [smem:[#allocation38_spill]] }
 0x51e   : > { %s5870_s27 = sld [smem:[#allocation40_spill]]  ;;  %s5871_s28 = sld [smem:[#allocation41_spill]] }
 0x51f   : > { %s5872_s29 = sld [smem:[#allocation55_spill]]  ;;  %s5873_s15 = sld [smem:[#allocation43_spill]] }
 0x520   : > { %s5874_s13 = sld [smem:[#allocation44_spill]]  ;;  %s5875_s10 = smov %s4565_s22 }
 0x521   : > { %s5876_s20 = sld [smem:[#allocation47_spill]]  ;;  %s5877_s17 = sld [smem:[#allocation49_spill]] }
 0x522   : > { %s5878_s8 = sld [smem:[#allocation50_spill]]  ;;  %s5879_s22 = smov %s3982_s23 }
 0x523   : > { %s5881_s23 = smov %s5867_s25  ;;  %s5882_s24 = smov %s5868_s4 }
 0x524   : > { %s5883_s25 = smov %s5869_s30  ;;  %s5884_s26 = smov %s5905_s5 }
 0x525   : > { %s5885_s30 = smov %s5873_s15  ;;  %s5886_s14 = smov %s5875_s10 }
 0x526   : > { %s5888_s16 = smov %s4034_s18  ;;  %39 = sbr.rel (!%p5600_p9) target bundleno = 35 (0x23), region = 211 }
 0x527   : > { %s5887_s15 = smov %s5876_s20 }
 0x528   : > { %s5889_s18 = smov %s5878_s8 }
 0x52d   :  { %2580 = vsyncpa [#allocation5], 1 }
 0x52e   :  { %2582 = vsyncpa [#allocation5 + $0x1], 1 }
 0x52f   :  { %2583 = vsyncpa [#allocation8], 1 }
 0x530   :  { %2585 = vsyncpa [#allocation8 + $0x1], 1 }
 0x531   :  { %2586 = vsyncpa [#allocation11], 1 }
 0x532   :  { %2588 = vsyncpa [#allocation11 + $0x1], 1 }
 0x533   :  { %2589 = vsyncpa [#allocation14], 1 }
 0x534   :  { %2590 = vsyncpa [#allocation17], 1 }
 0x535   :  { %2591 = vsyncpa [#allocation20], 1 }
 0x536   :  { %2593 = vsyncpa [#allocation20 + $0x1], 1 }
 0x537   :  { %2594 = vsyncpa [#allocation23], 1 }
 0x538   :  { %2595 = vsyncpa [#allocation6], 1 }
 0x539   :  { %2597 = vsyncpa [#allocation6 + $0x1], 1 }

</bundles_post_ra>
